<compile_context>
chip_gen: v6e
topology: v6e:2x2x1
jax: 0.10.0
libtpu: 0.0.40
codegen_flags: <defaults>
</compile_context>

<pallas_src>
import numpy as np
import jax
import jax.numpy as jnp
from jax.experimental import pallas as pl
from jax.experimental.pallas import tpu as pltpu

_BB = 8  # batch tile (multiple of 8 -> sublane-aligned (BB, 10) output block)


# ------------------------------ Pallas kernel -------------------------------

def _net_kernel(x_ref, w1_ref, b1_ref, w2_ref, b2_ref, wfc_ref, bfc_ref,
                o_ref, c1s_ref):
    BB = x_ref.shape[0]
    x = x_ref[...]                                          # (BB, 28, 28)

    # ---- conv1 (1 -> 10, k=5) as ONE lane-dense matmul ----
    # im2col slabs come from static slices of the VMEM-resident input block.
    slabs = [x[:, ky:ky + 24, kx:kx + 24]                   # (BB, 24, 24)
             for ky in range(5) for kx in range(5)]
    p1 = jnp.concatenate(slabs, axis=-1)                    # (BB, 24, 600) lane=(j, ox)
    p1 = p1.reshape(BB * 24, 600)
    # w1_ref is pre-expanded to (600, 240); output lanes = (dx, px, ci).
    c1 = jnp.dot(p1, w1_ref[...], preferred_element_type=jnp.float32)
    c1 = c1 + b1_ref[...]                                   # (BB*24, 240)

    # 2x2 max-pool over ox == max of the two 120-lane halves (dx = 0 / 1).
    m1 = jnp.maximum(c1[:, :120], c1[:, 120:])              # (BB*24, 120) lane=(px, ci)
    c1s_ref[...] = m1.reshape(BB, 24, 120)
    # pool over oy via strided sublane reads (rows 0,2,.. vs 1,3,..), then ReLU
    # (relu(pool(x)) == pool(relu(x)) since relu is monotonic).
    h1 = jnp.maximum(c1s_ref[:, pl.ds(0, 12, stride=2), :],
                     c1s_ref[:, pl.ds(1, 12, stride=2), :])
    h1 = jnp.maximum(h1, 0.0)                               # (BB, 12, 120)

    # ---- conv2 (10 -> 20, k=5) as ONE lane-dense matmul ----
    slabs2 = [h1[:, ky:ky + 8, kx * 10: kx * 10 + 80]       # (BB, 8, 80)
              for ky in range(5) for kx in range(5)]
    p2 = jnp.concatenate(slabs2, axis=-1)                   # (BB, 8, 2000)
    p2 = p2.reshape(BB * 8, 2000)
    c2 = jnp.dot(p2, w2_ref[...], preferred_element_type=jnp.float32)
    c2 = c2 + b2_ref[...]                                   # (BB*8, 160) lane=(dx2, px2, co)

    # pool over ox2 (lane halves), then pool over oy2 fused with the flatten.
    m2 = jnp.maximum(c2[:, :80], c2[:, 80:])                # (BB*8, 80) lane=(px2, co)
    m2 = m2.reshape(BB, 8, 80)
    rows = []
    for q in range(4):                                      # oy2 pairs (2q, 2q+1)
        r = jnp.maximum(m2[:, 2 * q, :], m2[:, 2 * q + 1, :])     # (BB, 80)
        rows.append(jnp.maximum(r, 0.0))
    flat = jnp.concatenate(rows, axis=-1)                   # (BB, 320) lane=(qy, px2, co)

    # ---- fc (Linear(320, 10)) fused into the same kernel ----
    out = jnp.dot(flat, wfc_ref[...], preferred_element_type=jnp.float32)
    o_ref[...] = out + bfc_ref[...]                         # (BB, 10)


# -------------------- trace-time weight re-layout (plain JAX) ---------------

def _prepare_params(params):
    """Expand conv weights to block-diagonal lane-dense matrices and permute
    the fc rows so the in-kernel flatten matches PyTorch's NCHW view(B, -1)."""
    w1, b1, w2, b2, wfc, bfc = params

    # conv1: W1[j*24 + ox, dx*120 + px*10 + co] = w1[co,0,ky,kx] iff ox == 2*px+dx
    w1f = w1.reshape(10, 25).T                                       # (25, 10) [j, co]
    r1 = (np.arange(24)[:, None, None] ==
          (2 * np.arange(12)[None, None, :] + np.arange(2)[None, :, None])
          ).astype(np.float32)                                       # (24, 2, 12)
    w1_big = (w1f[:, None, None, None, :] *
              jnp.asarray(r1)[None, :, :, :, None]).reshape(600, 240)
    b1_big = jnp.tile(b1, 24).reshape(1, 240)

    # conv2: W2[j*80 + ox*10 + ci, dx*80 + px*20 + co] = w2[co,ci,ky,kx] iff ox == 2*px+dx
    w2f = jnp.transpose(w2.reshape(20, 10, 25), (2, 1, 0))           # (25, 10, 20) [j, ci, co]
    r2 = (np.arange(8)[:, None, None] ==
          (2 * np.arange(4)[None, None, :] + np.arange(2)[None, :, None])
          ).astype(np.float32)                                       # (8, 2, 4)
    w2_big = (w2f[:, None, :, None, None, :] *
              jnp.asarray(r2)[None, :, None, :, :, None]).reshape(2000, 160)
    b2_big = jnp.tile(b2, 8).reshape(1, 160)

    # fc: kernel flatten order is (qy, px, co); PyTorch flatten is (co, qy, px).
    perm = np.array([co * 16 + qy * 4 + px
                     for qy in range(4) for px in range(4) for co in range(20)])
    wfc_perm = wfc[perm, :]                                          # (320, 10)
    return w1_big, b1_big, w2_big, b2_big, wfc_perm, bfc.reshape(1, 10)


# ------------------------------- forward pass -------------------------------

@jax.jit
def net_forward(x, params):
    """Forward pass identical to the PyTorch Net. x: (B, 1, 28, 28) float32."""
    B = x.shape[0]
    assert x.shape[1:] == (1, 28, 28), x.shape
    w1_big, b1_big, w2_big, b2_big, wfc_perm, bfc2 = _prepare_params(params)
    x3 = x.reshape(B, 28, 28)

    # batch tile: sublane-aligned multiple of 8 dividing B, else one full block
    bb = _BB if (B % _BB == 0) else B
    grid = (B // bb,)

    return pl.pallas_call(
        _net_kernel,
        out_shape=jax.ShapeDtypeStruct((B, 10), jnp.float32),
        grid=grid,
        in_specs=[
            pl.BlockSpec((bb, 28, 28), lambda i: (i, 0, 0)),   # input batch tile
            pl.BlockSpec((600, 240), lambda i: (0, 0)),        # conv1 weights (expanded)
            pl.BlockSpec((1, 240), lambda i: (0, 0)),
            pl.BlockSpec((2000, 160), lambda i: (0, 0)),       # conv2 weights (expanded)
            pl.BlockSpec((1, 160), lambda i: (0, 0)),
            pl.BlockSpec((320, 10), lambda i: (0, 0)),         # fc weights (row-permuted)
            pl.BlockSpec((1, 10), lambda i: (0, 0)),
        ],
        out_specs=pl.BlockSpec((bb, 10), lambda i: (i, 0)),
        scratch_shapes=[pltpu.VMEM((bb, 24, 120), jnp.float32)],
        compiler_params=pltpu.CompilerParams(
            dimension_semantics=("parallel",),
            vmem_limit_bytes=32 * 1024 * 1024,
        ),
    )(x3, w1_big, b1_big, w2_big, b2_big, wfc_perm, bfc2)


# ---------------------------- reference & params ----------------------------

def net_reference(x, params):
    """Plain-JAX reference identical to the PyTorch module (validation only)."""
    w1, b1, w2, b2, wfc, bfc = params
    hp = jax.lax.Precision.HIGHEST
    dn = ("NCHW", "OIHW", "NCHW")
    y = jax.lax.conv_general_dilated(x, w1, (1, 1), "VALID",
                                     dimension_numbers=dn, precision=hp)
    y = y + b1[None, :, None, None]
    y = jax.lax.reduce_window(y, -jnp.inf, jax.lax.max,
                              (1, 1, 2, 2), (1, 1, 2, 2), "VALID")
    y = jnp.maximum(y, 0.0)
    y = jax.lax.conv_general_dilated(y, w2, (1, 1), "VALID",
                                     dimension_numbers=dn, precision=hp)
    y = y + b2[None, :, None, None]
    y = jax.lax.reduce_window(y, -jnp.inf, jax.lax.max,
                              (1, 1, 2, 2), (1, 1, 2, 2), "VALID")
    y = jnp.maximum(y, 0.0)
    y = y.reshape(x.shape[0], -1)
    return jnp.dot(y, wfc, precision=hp) + bfc[None, :]


def init_params(key):
    k1, k2, k3, k4, k5, k6 = jax.random.split(key, 6)
    w1 = jax.random.normal(k1, (10, 1, 5, 5), jnp.float32) * 0.1
    b1 = jax.random.normal(k2, (10,), jnp.float32) * 0.1
    w2 = jax.random.normal(k3, (20, 10, 5, 5), jnp.float32) * 0.1
    b2 = jax.random.normal(k4, (20,), jnp.float32) * 0.1
    wfc = jax.random.normal(k5, (320, 10), jnp.float32) * 0.05   # (in, out)
    bfc = jax.random.normal(k6, (10,), jnp.float32) * 0.05
    return (w1, b1, w2, b2, wfc, bfc)


if __name__ == "__main__":
    key = jax.random.PRNGKey(0)
    pkey, xkey = jax.random.split(key)
    params = init_params(pkey)

    # 28x28 inputs are required so the flattened feature size is 320 (= 20*4*4)
    # as hard-coded by Linear(320, 10).  Batch 16 -> grid of 2 batch tiles.
    x = jax.random.normal(xkey, (16, 1, 28, 28), jnp.float32)

    out = jax.block_until_ready(net_forward(x, params))
    assert out.shape == (16, 10) and out.dtype == jnp.float32

    ref = jax.block_until_ready(net_reference(x, params))
    max_err = float(jnp.max(jnp.abs(out - ref)))
    assert max_err < 2e-3, f"mismatch vs reference: max abs err = {max_err}"

    print("KERNEL_OK")
</pallas_src>

<mosaic_0001>
module attributes {stable_mosaic.version = 11 : i64} {
  func.func @_net_kernel(%arg0: i32, %arg1: memref<8x28x28xf32, #tpu.memory_space<vmem>>, %arg2: memref<600x240xf32, #tpu.memory_space<vmem>>, %arg3: memref<1x240xf32, #tpu.memory_space<vmem>>, %arg4: memref<2000x160xf32, #tpu.memory_space<vmem>>, %arg5: memref<1x160xf32, #tpu.memory_space<vmem>>, %arg6: memref<320x10xf32, #tpu.memory_space<vmem>>, %arg7: memref<1x10xf32, #tpu.memory_space<vmem>>, %arg8: memref<8x10xf32, #tpu.memory_space<vmem>>, %arg9: memref<8x24x120xf32, #tpu.memory_space<vmem>>) attributes {dimension_semantics = [#tpu.dimension_semantics<parallel>], iteration_bounds = array<i64: 2>, scalar_prefetch = 0 : i64, scratch_operands = 1 : i64, tpu.core_type = #tpu.core_type<tc>, window_params = [{transform_indices = @transform_0, window_bounds = array<i64: 8, 28, 28>}, {pipeline_mode = #tpu.pipeline_mode<synchronous>, transform_indices = @transform_1, window_bounds = array<i64: 600, 240>}, {pipeline_mode = #tpu.pipeline_mode<synchronous>, transform_indices = @transform_2, window_bounds = array<i64: 1, 240>}, {pipeline_mode = #tpu.pipeline_mode<synchronous>, transform_indices = @transform_3, window_bounds = array<i64: 2000, 160>}, {pipeline_mode = #tpu.pipeline_mode<synchronous>, transform_indices = @transform_4, window_bounds = array<i64: 1, 160>}, {pipeline_mode = #tpu.pipeline_mode<synchronous>, transform_indices = @transform_5, window_bounds = array<i64: 320, 10>}, {pipeline_mode = #tpu.pipeline_mode<synchronous>, transform_indices = @transform_6, window_bounds = array<i64: 1, 10>}, {transform_indices = @transform_7, window_bounds = array<i64: 8, 10>}]} {
    %c0 = arith.constant 0 : index
    %c0_0 = arith.constant 0 : index
    %c0_1 = arith.constant 0 : index
    %0 = vector.load %arg1[%c0, %c0_0, %c0_1] : memref<8x28x28xf32, #tpu.memory_space<vmem>>, vector<8x28x28xf32>
    %1 = vector.extract_strided_slice %0 {offsets = [0, 0, 0], sizes = [8, 24, 24], strides = [1, 1, 1]} : vector<8x28x28xf32> to vector<8x24x24xf32>
    %2 = vector.extract_strided_slice %0 {offsets = [0, 0, 1], sizes = [8, 24, 24], strides = [1, 1, 1]} : vector<8x28x28xf32> to vector<8x24x24xf32>
    %3 = vector.extract_strided_slice %0 {offsets = [0, 0, 2], sizes = [8, 24, 24], strides = [1, 1, 1]} : vector<8x28x28xf32> to vector<8x24x24xf32>
    %4 = vector.extract_strided_slice %0 {offsets = [0, 0, 3], sizes = [8, 24, 24], strides = [1, 1, 1]} : vector<8x28x28xf32> to vector<8x24x24xf32>
    %5 = vector.extract_strided_slice %0 {offsets = [0, 0, 4], sizes = [8, 24, 24], strides = [1, 1, 1]} : vector<8x28x28xf32> to vector<8x24x24xf32>
    %6 = vector.extract_strided_slice %0 {offsets = [0, 1, 0], sizes = [8, 24, 24], strides = [1, 1, 1]} : vector<8x28x28xf32> to vector<8x24x24xf32>
    %7 = vector.extract_strided_slice %0 {offsets = [0, 1, 1], sizes = [8, 24, 24], strides = [1, 1, 1]} : vector<8x28x28xf32> to vector<8x24x24xf32>
    %8 = vector.extract_strided_slice %0 {offsets = [0, 1, 2], sizes = [8, 24, 24], strides = [1, 1, 1]} : vector<8x28x28xf32> to vector<8x24x24xf32>
    %9 = vector.extract_strided_slice %0 {offsets = [0, 1, 3], sizes = [8, 24, 24], strides = [1, 1, 1]} : vector<8x28x28xf32> to vector<8x24x24xf32>
    %10 = vector.extract_strided_slice %0 {offsets = [0, 1, 4], sizes = [8, 24, 24], strides = [1, 1, 1]} : vector<8x28x28xf32> to vector<8x24x24xf32>
    %11 = vector.extract_strided_slice %0 {offsets = [0, 2, 0], sizes = [8, 24, 24], strides = [1, 1, 1]} : vector<8x28x28xf32> to vector<8x24x24xf32>
    %12 = vector.extract_strided_slice %0 {offsets = [0, 2, 1], sizes = [8, 24, 24], strides = [1, 1, 1]} : vector<8x28x28xf32> to vector<8x24x24xf32>
    %13 = vector.extract_strided_slice %0 {offsets = [0, 2, 2], sizes = [8, 24, 24], strides = [1, 1, 1]} : vector<8x28x28xf32> to vector<8x24x24xf32>
    %14 = vector.extract_strided_slice %0 {offsets = [0, 2, 3], sizes = [8, 24, 24], strides = [1, 1, 1]} : vector<8x28x28xf32> to vector<8x24x24xf32>
    %15 = vector.extract_strided_slice %0 {offsets = [0, 2, 4], sizes = [8, 24, 24], strides = [1, 1, 1]} : vector<8x28x28xf32> to vector<8x24x24xf32>
    %16 = vector.extract_strided_slice %0 {offsets = [0, 3, 0], sizes = [8, 24, 24], strides = [1, 1, 1]} : vector<8x28x28xf32> to vector<8x24x24xf32>
    %17 = vector.extract_strided_slice %0 {offsets = [0, 3, 1], sizes = [8, 24, 24], strides = [1, 1, 1]} : vector<8x28x28xf32> to vector<8x24x24xf32>
    %18 = vector.extract_strided_slice %0 {offsets = [0, 3, 2], sizes = [8, 24, 24], strides = [1, 1, 1]} : vector<8x28x28xf32> to vector<8x24x24xf32>
    %19 = vector.extract_strided_slice %0 {offsets = [0, 3, 3], sizes = [8, 24, 24], strides = [1, 1, 1]} : vector<8x28x28xf32> to vector<8x24x24xf32>
    %20 = vector.extract_strided_slice %0 {offsets = [0, 3, 4], sizes = [8, 24, 24], strides = [1, 1, 1]} : vector<8x28x28xf32> to vector<8x24x24xf32>
    %21 = vector.extract_strided_slice %0 {offsets = [0, 4, 0], sizes = [8, 24, 24], strides = [1, 1, 1]} : vector<8x28x28xf32> to vector<8x24x24xf32>
    %22 = vector.extract_strided_slice %0 {offsets = [0, 4, 1], sizes = [8, 24, 24], strides = [1, 1, 1]} : vector<8x28x28xf32> to vector<8x24x24xf32>
    %23 = vector.extract_strided_slice %0 {offsets = [0, 4, 2], sizes = [8, 24, 24], strides = [1, 1, 1]} : vector<8x28x28xf32> to vector<8x24x24xf32>
    %24 = vector.extract_strided_slice %0 {offsets = [0, 4, 3], sizes = [8, 24, 24], strides = [1, 1, 1]} : vector<8x28x28xf32> to vector<8x24x24xf32>
    %25 = vector.extract_strided_slice %0 {offsets = [0, 4, 4], sizes = [8, 24, 24], strides = [1, 1, 1]} : vector<8x28x28xf32> to vector<8x24x24xf32>
    %26 = tpu.concatenate %1, %2, %3, %4, %5, %6, %7, %8, %9, %10, %11, %12, %13, %14, %15, %16 in 2 : vector<8x24x24xf32>, vector<8x24x24xf32>, vector<8x24x24xf32>, vector<8x24x24xf32>, vector<8x24x24xf32>, vector<8x24x24xf32>, vector<8x24x24xf32>, vector<8x24x24xf32>, vector<8x24x24xf32>, vector<8x24x24xf32>, vector<8x24x24xf32>, vector<8x24x24xf32>, vector<8x24x24xf32>, vector<8x24x24xf32>, vector<8x24x24xf32>, vector<8x24x24xf32> -> vector<8x24x384xf32>
    %27 = tpu.concatenate %17, %18, %19, %20, %21, %22, %23, %24, %25 in 2 : vector<8x24x24xf32>, vector<8x24x24xf32>, vector<8x24x24xf32>, vector<8x24x24xf32>, vector<8x24x24xf32>, vector<8x24x24xf32>, vector<8x24x24xf32>, vector<8x24x24xf32>, vector<8x24x24xf32> -> vector<8x24x216xf32>
    %28 = tpu.concatenate %26, %27 in 2 : vector<8x24x384xf32>, vector<8x24x216xf32> -> vector<8x24x600xf32>
    %29 = vector.shape_cast %28 : vector<8x24x600xf32> to vector<192x600xf32>
    %c0_2 = arith.constant 0 : index
    %c0_3 = arith.constant 0 : index
    %30 = vector.load %arg2[%c0_2, %c0_3] : memref<600x240xf32, #tpu.memory_space<vmem>>, vector<600x240xf32>
    %cst = arith.constant dense<0.000000e+00> : vector<192x240xf32>
    %31 = tpu.matmul %29, %30, %cst {dimension_numbers = #tpu.dot_dimension_numbers<[1], [0], [0], [1], [0, 0, 1, 1], [], []>} : vector<192x600xf32>, vector<600x240xf32>, vector<192x240xf32> -> vector<192x240xf32>
    %c0_4 = arith.constant 0 : index
    %c0_5 = arith.constant 0 : index
    %32 = vector.load %arg3[%c0_4, %c0_5] : memref<1x240xf32, #tpu.memory_space<vmem>>, vector<1x240xf32>
    %33 = vector.broadcast %32 : vector<1x240xf32> to vector<192x240xf32>
    %34 = arith.addf %31, %33 : vector<192x240xf32>
    %35 = vector.extract_strided_slice %34 {offsets = [0, 0], sizes = [192, 120], strides = [1, 1]} : vector<192x240xf32> to vector<192x120xf32>
    %36 = vector.extract_strided_slice %34 {offsets = [0, 120], sizes = [192, 120], strides = [1, 1]} : vector<192x240xf32> to vector<192x120xf32>
    %37 = arith.maximumf %35, %36 : vector<192x120xf32>
    %38 = vector.shape_cast %37 : vector<192x120xf32> to vector<8x24x120xf32>
    %c0_6 = arith.constant 0 : index
    %c0_7 = arith.constant 0 : index
    %c0_8 = arith.constant 0 : index
    %39 = vector.load %arg9[%c0_6, %c0_7, %c0_8] : memref<8x24x120xf32, #tpu.memory_space<vmem>>, vector<8x24x120xf32>
    tpu.vector_store %arg9[%c0_6, %c0_7, %c0_8], %38 {strides = array<i32>} : memref<8x24x120xf32, #tpu.memory_space<vmem>>, vector<8x24x120xf32>,
    %c0_9 = arith.constant 0 : index
    %c0_10 = arith.constant 0 : index
    %c0_11 = arith.constant 0 : index
    %40 = tpu.strided_load %arg9[%c0_9, %c0_10, %c0_11] {strides = array<i32: 1, 2, 1>} : memref<8x24x120xf32, #tpu.memory_space<vmem>>, vector<8x12x120xf32>
    %c0_12 = arith.constant 0 : index
    %c1 = arith.constant 1 : index
    %c0_13 = arith.constant 0 : index
    %41 = tpu.strided_load %arg9[%c0_12, %c1, %c0_13] {strides = array<i32: 1, 2, 1>} : memref<8x24x120xf32, #tpu.memory_space<vmem>>, vector<8x12x120xf32>
    %42 = arith.maximumf %40, %41 : vector<8x12x120xf32>
    %cst_14 = arith.constant 0.000000e+00 : f32
    %43 = vector.broadcast %cst_14 : f32 to vector<8x12x120xf32>
    %44 = arith.maximumf %42, %43 : vector<8x12x120xf32>
    %45 = vector.extract_strided_slice %44 {offsets = [0, 0, 0], sizes = [8, 8, 80], strides = [1, 1, 1]} : vector<8x12x120xf32> to vector<8x8x80xf32>
    %46 = vector.extract_strided_slice %44 {offsets = [0, 0, 10], sizes = [8, 8, 80], strides = [1, 1, 1]} : vector<8x12x120xf32> to vector<8x8x80xf32>
    %47 = vector.extract_strided_slice %44 {offsets = [0, 0, 20], sizes = [8, 8, 80], strides = [1, 1, 1]} : vector<8x12x120xf32> to vector<8x8x80xf32>
    %48 = vector.extract_strided_slice %44 {offsets = [0, 0, 30], sizes = [8, 8, 80], strides = [1, 1, 1]} : vector<8x12x120xf32> to vector<8x8x80xf32>
    %49 = vector.extract_strided_slice %44 {offsets = [0, 0, 40], sizes = [8, 8, 80], strides = [1, 1, 1]} : vector<8x12x120xf32> to vector<8x8x80xf32>
    %50 = vector.extract_strided_slice %44 {offsets = [0, 1, 0], sizes = [8, 8, 80], strides = [1, 1, 1]} : vector<8x12x120xf32> to vector<8x8x80xf32>
    %51 = vector.extract_strided_slice %44 {offsets = [0, 1, 10], sizes = [8, 8, 80], strides = [1, 1, 1]} : vector<8x12x120xf32> to vector<8x8x80xf32>
    %52 = vector.extract_strided_slice %44 {offsets = [0, 1, 20], sizes = [8, 8, 80], strides = [1, 1, 1]} : vector<8x12x120xf32> to vector<8x8x80xf32>
    %53 = vector.extract_strided_slice %44 {offsets = [0, 1, 30], sizes = [8, 8, 80], strides = [1, 1, 1]} : vector<8x12x120xf32> to vector<8x8x80xf32>
    %54 = vector.extract_strided_slice %44 {offsets = [0, 1, 40], sizes = [8, 8, 80], strides = [1, 1, 1]} : vector<8x12x120xf32> to vector<8x8x80xf32>
    %55 = vector.extract_strided_slice %44 {offsets = [0, 2, 0], sizes = [8, 8, 80], strides = [1, 1, 1]} : vector<8x12x120xf32> to vector<8x8x80xf32>
    %56 = vector.extract_strided_slice %44 {offsets = [0, 2, 10], sizes = [8, 8, 80], strides = [1, 1, 1]} : vector<8x12x120xf32> to vector<8x8x80xf32>
    %57 = vector.extract_strided_slice %44 {offsets = [0, 2, 20], sizes = [8, 8, 80], strides = [1, 1, 1]} : vector<8x12x120xf32> to vector<8x8x80xf32>
    %58 = vector.extract_strided_slice %44 {offsets = [0, 2, 30], sizes = [8, 8, 80], strides = [1, 1, 1]} : vector<8x12x120xf32> to vector<8x8x80xf32>
    %59 = vector.extract_strided_slice %44 {offsets = [0, 2, 40], sizes = [8, 8, 80], strides = [1, 1, 1]} : vector<8x12x120xf32> to vector<8x8x80xf32>
    %60 = vector.extract_strided_slice %44 {offsets = [0, 3, 0], sizes = [8, 8, 80], strides = [1, 1, 1]} : vector<8x12x120xf32> to vector<8x8x80xf32>
    %61 = vector.extract_strided_slice %44 {offsets = [0, 3, 10], sizes = [8, 8, 80], strides = [1, 1, 1]} : vector<8x12x120xf32> to vector<8x8x80xf32>
    %62 = vector.extract_strided_slice %44 {offsets = [0, 3, 20], sizes = [8, 8, 80], strides = [1, 1, 1]} : vector<8x12x120xf32> to vector<8x8x80xf32>
    %63 = vector.extract_strided_slice %44 {offsets = [0, 3, 30], sizes = [8, 8, 80], strides = [1, 1, 1]} : vector<8x12x120xf32> to vector<8x8x80xf32>
    %64 = vector.extract_strided_slice %44 {offsets = [0, 3, 40], sizes = [8, 8, 80], strides = [1, 1, 1]} : vector<8x12x120xf32> to vector<8x8x80xf32>
    %65 = vector.extract_strided_slice %44 {offsets = [0, 4, 0], sizes = [8, 8, 80], strides = [1, 1, 1]} : vector<8x12x120xf32> to vector<8x8x80xf32>
    %66 = vector.extract_strided_slice %44 {offsets = [0, 4, 10], sizes = [8, 8, 80], strides = [1, 1, 1]} : vector<8x12x120xf32> to vector<8x8x80xf32>
    %67 = vector.extract_strided_slice %44 {offsets = [0, 4, 20], sizes = [8, 8, 80], strides = [1, 1, 1]} : vector<8x12x120xf32> to vector<8x8x80xf32>
    %68 = vector.extract_strided_slice %44 {offsets = [0, 4, 30], sizes = [8, 8, 80], strides = [1, 1, 1]} : vector<8x12x120xf32> to vector<8x8x80xf32>
    %69 = vector.extract_strided_slice %44 {offsets = [0, 4, 40], sizes = [8, 8, 80], strides = [1, 1, 1]} : vector<8x12x120xf32> to vector<8x8x80xf32>
    %70 = tpu.concatenate %45, %46, %47, %48, %49, %50, %51, %52, %53, %54, %55, %56, %57, %58, %59, %60 in 2 : vector<8x8x80xf32>, vector<8x8x80xf32>, vector<8x8x80xf32>, vector<8x8x80xf32>, vector<8x8x80xf32>, vector<8x8x80xf32>, vector<8x8x80xf32>, vector<8x8x80xf32>, vector<8x8x80xf32>, vector<8x8x80xf32>, vector<8x8x80xf32>, vector<8x8x80xf32>, vector<8x8x80xf32>, vector<8x8x80xf32>, vector<8x8x80xf32>, vector<8x8x80xf32> -> vector<8x8x1280xf32>
    %71 = tpu.concatenate %61, %62, %63, %64, %65, %66, %67, %68, %69 in 2 : vector<8x8x80xf32>, vector<8x8x80xf32>, vector<8x8x80xf32>, vector<8x8x80xf32>, vector<8x8x80xf32>, vector<8x8x80xf32>, vector<8x8x80xf32>, vector<8x8x80xf32>, vector<8x8x80xf32> -> vector<8x8x720xf32>
    %72 = tpu.concatenate %70, %71 in 2 : vector<8x8x1280xf32>, vector<8x8x720xf32> -> vector<8x8x2000xf32>
    %73 = vector.shape_cast %72 : vector<8x8x2000xf32> to vector<64x2000xf32>
    %c0_15 = arith.constant 0 : index
    %c0_16 = arith.constant 0 : index
    %74 = vector.load %arg4[%c0_15, %c0_16] : memref<2000x160xf32, #tpu.memory_space<vmem>>, vector<2000x160xf32>
    %cst_17 = arith.constant dense<0.000000e+00> : vector<64x160xf32>
    %75 = tpu.matmul %73, %74, %cst_17 {dimension_numbers = #tpu.dot_dimension_numbers<[1], [0], [0], [1], [0, 0, 1, 1], [], []>} : vector<64x2000xf32>, vector<2000x160xf32>, vector<64x160xf32> -> vector<64x160xf32>
    %c0_18 = arith.constant 0 : index
    %c0_19 = arith.constant 0 : index
    %76 = vector.load %arg5[%c0_18, %c0_19] : memref<1x160xf32, #tpu.memory_space<vmem>>, vector<1x160xf32>
    %77 = vector.broadcast %76 : vector<1x160xf32> to vector<64x160xf32>
    %78 = arith.addf %75, %77 : vector<64x160xf32>
    %79 = vector.extract_strided_slice %78 {offsets = [0, 0], sizes = [64, 80], strides = [1, 1]} : vector<64x160xf32> to vector<64x80xf32>
    %80 = vector.extract_strided_slice %78 {offsets = [0, 80], sizes = [64, 80], strides = [1, 1]} : vector<64x160xf32> to vector<64x80xf32>
    %81 = arith.maximumf %79, %80 : vector<64x80xf32>
    %82 = vector.shape_cast %81 : vector<64x80xf32> to vector<8x8x80xf32>
    %83 = vector.extract_strided_slice %82 {offsets = [0, 0, 0], sizes = [8, 1, 80], strides = [1, 1, 1]} : vector<8x8x80xf32> to vector<8x1x80xf32>
    %84 = vector.shape_cast %83 : vector<8x1x80xf32> to vector<8x80xf32>
    %85 = vector.extract_strided_slice %82 {offsets = [0, 1, 0], sizes = [8, 1, 80], strides = [1, 1, 1]} : vector<8x8x80xf32> to vector<8x1x80xf32>
    %86 = vector.shape_cast %85 : vector<8x1x80xf32> to vector<8x80xf32>
    %87 = arith.maximumf %84, %86 : vector<8x80xf32>
    %cst_20 = arith.constant 0.000000e+00 : f32
    %88 = vector.broadcast %cst_20 : f32 to vector<8x80xf32>
    %89 = arith.maximumf %87, %88 : vector<8x80xf32>
    %90 = vector.extract_strided_slice %82 {offsets = [0, 2, 0], sizes = [8, 1, 80], strides = [1, 1, 1]} : vector<8x8x80xf32> to vector<8x1x80xf32>
    %91 = vector.shape_cast %90 : vector<8x1x80xf32> to vector<8x80xf32>
    %92 = vector.extract_strided_slice %82 {offsets = [0, 3, 0], sizes = [8, 1, 80], strides = [1, 1, 1]} : vector<8x8x80xf32> to vector<8x1x80xf32>
    %93 = vector.shape_cast %92 : vector<8x1x80xf32> to vector<8x80xf32>
    %94 = arith.maximumf %91, %93 : vector<8x80xf32>
    %cst_21 = arith.constant 0.000000e+00 : f32
    %95 = vector.broadcast %cst_21 : f32 to vector<8x80xf32>
    %96 = arith.maximumf %94, %95 : vector<8x80xf32>
    %97 = vector.extract_strided_slice %82 {offsets = [0, 4, 0], sizes = [8, 1, 80], strides = [1, 1, 1]} : vector<8x8x80xf32> to vector<8x1x80xf32>
    %98 = vector.shape_cast %97 : vector<8x1x80xf32> to vector<8x80xf32>
    %99 = vector.extract_strided_slice %82 {offsets = [0, 5, 0], sizes = [8, 1, 80], strides = [1, 1, 1]} : vector<8x8x80xf32> to vector<8x1x80xf32>
    %100 = vector.shape_cast %99 : vector<8x1x80xf32> to vector<8x80xf32>
    %101 = arith.maximumf %98, %100 : vector<8x80xf32>
    %cst_22 = arith.constant 0.000000e+00 : f32
    %102 = vector.broadcast %cst_22 : f32 to vector<8x80xf32>
    %103 = arith.maximumf %101, %102 : vector<8x80xf32>
    %104 = vector.extract_strided_slice %82 {offsets = [0, 6, 0], sizes = [8, 1, 80], strides = [1, 1, 1]} : vector<8x8x80xf32> to vector<8x1x80xf32>
    %105 = vector.shape_cast %104 : vector<8x1x80xf32> to vector<8x80xf32>
    %106 = vector.extract_strided_slice %82 {offsets = [0, 7, 0], sizes = [8, 1, 80], strides = [1, 1, 1]} : vector<8x8x80xf32> to vector<8x1x80xf32>
    %107 = vector.shape_cast %106 : vector<8x1x80xf32> to vector<8x80xf32>
    %108 = arith.maximumf %105, %107 : vector<8x80xf32>
    %cst_23 = arith.constant 0.000000e+00 : f32
    %109 = vector.broadcast %cst_23 : f32 to vector<8x80xf32>
    %110 = arith.maximumf %108, %109 : vector<8x80xf32>
    %111 = tpu.concatenate %89, %96, %103, %110 in 1 : vector<8x80xf32>, vector<8x80xf32>, vector<8x80xf32>, vector<8x80xf32> -> vector<8x320xf32>
    %c0_24 = arith.constant 0 : index
    %c0_25 = arith.constant 0 : index
    %112 = vector.load %arg6[%c0_24, %c0_25] : memref<320x10xf32, #tpu.memory_space<vmem>>, vector<320x10xf32>
    %cst_26 = arith.constant dense<0.000000e+00> : vector<8x10xf32>
    %113 = tpu.matmul %111, %112, %cst_26 {dimension_numbers = #tpu.dot_dimension_numbers<[1], [0], [0], [1], [0, 0, 1, 1], [], []>} : vector<8x320xf32>, vector<320x10xf32>, vector<8x10xf32> -> vector<8x10xf32>
    %c0_27 = arith.constant 0 : index
    %c0_28 = arith.constant 0 : index
    %114 = vector.load %arg7[%c0_27, %c0_28] : memref<1x10xf32, #tpu.memory_space<vmem>>, vector<1x10xf32>
    %115 = vector.broadcast %114 : vector<1x10xf32> to vector<8x10xf32>
    %116 = arith.addf %113, %115 : vector<8x10xf32>
    %c0_29 = arith.constant 0 : index
    %c0_30 = arith.constant 0 : index
    %117 = vector.load %arg8[%c0_29, %c0_30] : memref<8x10xf32, #tpu.memory_space<vmem>>, vector<8x10xf32>
    tpu.vector_store %arg8[%c0_29, %c0_30], %116 {strides = array<i32>} : memref<8x10xf32, #tpu.memory_space<vmem>>, vector<8x10xf32>,
    return
  }
  func.func @transform_0(%arg0: i32) -> (i32, i32, i32) {
    %c0_i32 = arith.constant 0 : i32
    %c0_i32_0 = arith.constant 0 : i32
    %c0_i32_1 = arith.constant 0 : i32
    return %arg0, %c0_i32, %c0_i32_0 : i32, i32, i32
  }
  func.func @transform_1(%arg0: i32) -> (i32, i32) {
    %c0_i32 = arith.constant 0 : i32
    %c0_i32_0 = arith.constant 0 : i32
    %c0_i32_1 = arith.constant 0 : i32
    return %c0_i32, %c0_i32_0 : i32, i32
  }
  func.func @transform_2(%arg0: i32) -> (i32, i32) {
    %c0_i32 = arith.constant 0 : i32
    %c0_i32_0 = arith.constant 0 : i32
    %c0_i32_1 = arith.constant 0 : i32
    return %c0_i32, %c0_i32_0 : i32, i32
  }
  func.func @transform_3(%arg0: i32) -> (i32, i32) {
    %c0_i32 = arith.constant 0 : i32
    %c0_i32_0 = arith.constant 0 : i32
    %c0_i32_1 = arith.constant 0 : i32
    return %c0_i32, %c0_i32_0 : i32, i32
  }
  func.func @transform_4(%arg0: i32) -> (i32, i32) {
    %c0_i32 = arith.constant 0 : i32
    %c0_i32_0 = arith.constant 0 : i32
    %c0_i32_1 = arith.constant 0 : i32
    return %c0_i32, %c0_i32_0 : i32, i32
  }
  func.func @transform_5(%arg0: i32) -> (i32, i32) {
    %c0_i32 = arith.constant 0 : i32
    %c0_i32_0 = arith.constant 0 : i32
    %c0_i32_1 = arith.constant 0 : i32
    return %c0_i32, %c0_i32_0 : i32, i32
  }
  func.func @transform_6(%arg0: i32) -> (i32, i32) {
    %c0_i32 = arith.constant 0 : i32
    %c0_i32_0 = arith.constant 0 : i32
    %c0_i32_1 = arith.constant 0 : i32
    return %c0_i32, %c0_i32_0 : i32, i32
  }
  func.func @transform_7(%arg0: i32) -> (i32, i32) {
    %c0_i32 = arith.constant 0 : i32
    %c0_i32_0 = arith.constant 0 : i32
    return %arg0, %c0_i32 : i32, i32
  }
}

</mosaic_0001>

<bundles_post_ra>
// kernel: tile.13
= control target key start
LH: loop header
LB: loop body
LE: loop exit
PB: predicated region body
PF: predicated region fallthrough
CT: control target
= control target key end

     0   :  { %s34_s0 = inlined_call_operand.vmem [shape: f32[10], index: 0, kind: input, shape index: {}]   ;;  %s35_s1 = inlined_call_operand.vmem [shape: f32[24,10], index: 1, kind: output, shape index: {}]  }
   0x1   :  { %v4_v0 = vld [vmem:[%s34_s0] ss:$0 sm:$0xff] }
   0x2   :  { %5 = vst [vmem:[%s35_s1] sm:$0xff] %v4_v0  ;;  %10 = vst [vmem:[%s35_s1 + $0x8] sm:$0xff] %v4_v0 }
   0x3   :  { %11 = vst [vmem:[%s35_s1 + $0x10] sm:$0xff] %v4_v0 }

// kernel: tile.14
= control target key start
LH: loop header
LB: loop body
LE: loop exit
PB: predicated region body
PF: predicated region fallthrough
CT: control target
= control target key end

     0   :  { %vm9_vm0 = vcmask 64512   ;;  %s223_s12 = smov 120   ;;  %s224_s13 = smov 102   ;;  %vm3_vm1 = vcmask 80896   ;;  %vm13_vm2 = vcmask 15360   ;;  %vm16_vm3 = vcmask 1048512   ;;  %s337_s0 = inlined_call_operand.vmem [shape: f32[24,10], index: 0, kind: input, shape index: {}]   ;;  %s338_s1 = inlined_call_operand.vmem [shape: f32[1,240], index: 1, kind: output, shape index: {}]  }
   0x1   :  { %v175_v0 = vld [vmem:[%s337_s0 + $0xc] sm:$0x1]   ;;  %v178_v3 = vld [vmem:[%s337_s0 + $0x17] sm:$0x1]   ;;  %v177_v4 = vld [vmem:[%s337_s0 + $0xb] sm:$0x1]  }
   0x2   :  { %v176_v1 = vld [vmem:[%s337_s0 + $0xc] sm:$0x1]   ;;  %26 = vrot.lane.b32.xlu1 %v178_v3, %s224_s13  ;;  %v179_v5 = vld [vmem:[%s337_s0 + $0xa] sm:$0x1]   ;;  %s225_s18 = smov 110   ;;  %s226_s19 = smov 100  }
   0x3   :  { %v10_v2 = vsel %vm9_vm0, %v176_v1, %v175_v0  ;;  %v180_v6 = vld [vmem:[%s337_s0 + $0x16] sm:$0x1]   ;;  %v181_v7 = vld [vmem:[%s337_s0 + $0x9] sm:$0x1]   ;;  %s227_s24 = smov 92   ;;  %s228_s25 = smov 90  }
   0x4   :  { %11 = vrot.lane.b32.xlu0 %v10_v2, %s223_s12  ;;  %v182_v8 = vld [vmem:[%s337_s0 + $0x15] sm:$0x1]   ;;  %v183_v9 = vld [vmem:[%s337_s0 + $0x8] sm:$0x1]   ;;  %v2_v10 = vld [vmem:[%s337_s0] sm:$0x1]  }
   0x5   :  { %4 = vst.msk [vmem:[#allocation0] sm:$0x1] %vm3_vm1, %v2_v10   ;;  %s229_s3 = smov 82   ;;  %s230_s4 = smov 80   ;;  %v184_v11 = vld [vmem:[%s337_s0 + $0x14] sm:$0x1]  }
   0x6   :  { %33 = vrot.lane.b32.xlu1 %v179_v5, %s226_s19  ;;  %v185_v12 = vld [vmem:[%s337_s0 + $0x7] sm:$0x1]   ;;  %s231_s9 = smov 72   ;;  %s232_s10 = smov 70   ;;  %v186_v13 = vld [vmem:[%s337_s0 + $0x13] sm:$0x1]  }
   0x7   :  { %v187_v14 = vld [vmem:[%s337_s0 + $0x6] sm:$0x1]   ;;  %s233_s15 = smov 62   ;;  %s234_s16 = smov 60   ;;  %v188_v15 = vld [vmem:[%s337_s0 + $0x12] sm:$0x1]  }
   0x8   :  { %20 = vrot.lane.b32.xlu0 %v177_v4, %s225_s18  ;;  %v189_v16 = vld [vmem:[%s337_s0 + $0x5] sm:$0x1]   ;;  %s235_s21 = smov 52   ;;  %s236_s22 = smov 50   ;;  %v190_v17 = vld [vmem:[%s337_s0 + $0x11] sm:$0x1]  }
   0x9   :  { %v191_v18 = vld [vmem:[%s337_s0 + $0x4] sm:$0x1]   ;;  %s237_s27 = smov 42   ;;  %s238_s28 = smov 40   ;;  %v192_v19 = vld [vmem:[%s337_s0 + $0x10] sm:$0x1]  }
   0xa   :  { %46 = vrot.lane.b32.xlu1 %v181_v7, %s228_s25  ;;  %v193_v20 = vld [vmem:[%s337_s0 + $0x3] sm:$0x1]   ;;  %s240_s5 = smov 30   ;;  %v194_v21 = vld [vmem:[%s337_s0 + $0xf] sm:$0x1]   ;;  %s242_s11 = smov 20  }
   0xb   :  { %v195_v22 = vld [vmem:[%s337_s0 + $0x2] sm:$0x1]   ;;  %v196_v23 = vld [vmem:[%s337_s0 + $0xe] sm:$0x1]   ;;  %v197_v24 = vld [vmem:[%s337_s0 + $0x1] sm:$0x1]  }
   0xc   :  { %39 = vrot.lane.b32.xlu0 %v180_v6, %s227_s24  ;;  %s244_s17 = smov 10   ;;  %v198_v25 = vld [vmem:[%s337_s0 + $0xd] sm:$0x1]   ;;  %s245_s0 = smov 2   ;;  %vm28_vm4 = vcmask 917296   ;;  %vm22_vm5 = vcmask 982896  }
   0xd   :  { %vm35_vm6 = vcmask 900896   ;;  %vm41_vm7 = vcmask 835296   ;;  %vm48_vm8 = vcmask 818896   ;;  %vm54_vm9 = vcmask 753296  }
   0xe   :  { %59 = vrot.lane.b32.xlu1 %v183_v9, %s230_s4  ;;  %s239_s4 = smov 32   ;;  %vm61_vm10 = vcmask 736896   ;;  %vm67_vm11 = vcmask 671296   ;;  %vm74_vm12 = vcmask 654896   ;;  %vm80_vm13 = vcmask 589296  }
   0xf   :  { %vm87_vm14 = vcmask 572896   ;;  %vm93_vm15 = vcmask 507296   ;;  %vm100_vm0 = vcmask 490896   ;;  %vm106_vm1 = vcmask 425296  }
  0x10   :  { %52 = vrot.lane.b32.xlu0 %v182_v8, %s229_s3 }
  0x12   :  { %72 = vrot.lane.b32.xlu1 %v185_v12, %s232_s10  ;;  %s241_s10 = smov 22  }
  0x14   :  { %65 = vrot.lane.b32.xlu0 %v184_v11, %s231_s9 }
  0x16   :  { %85 = vrot.lane.b32.xlu1 %v187_v14, %s234_s16  ;;  %s243_s16 = smov 12  }
  0x18   :  { %78 = vrot.lane.b32.xlu0 %v186_v13, %s233_s15 }
  0x1a   :  { %98 = vrot.lane.b32.xlu1 %v189_v16, %s236_s22 }
  0x1c   :  { %91 = vrot.lane.b32.xlu0 %v188_v15, %s235_s21 }
  0x1e   :  { %111 = vrot.lane.b32.xlu1 %v191_v18, %s238_s28 }
  0x20   :  { %104 = vrot.lane.b32.xlu0 %v190_v17, %s237_s27 }
  0x22   :  { %124 = vrot.lane.b32.xlu1 %v193_v20, %s240_s5 }
  0x24   :  { %117 = vrot.lane.b32.xlu0 %v192_v19, %s239_s4 }
  0x26   :  { %137 = vrot.lane.b32.xlu1 %v195_v22, %s242_s11 }
  0x28   :  { %130 = vrot.lane.b32.xlu0 %v194_v21, %s241_s10 }
  0x2a   :  { %150 = vrot.lane.b32.xlu1 %v197_v24, %s244_s17 }
  0x2c   :  { %143 = vrot.lane.b32.xlu0 %v196_v23, %s243_s16 }
  0x30   :  { %156 = vrot.lane.b32.xlu0 %v198_v25, %s245_s0 }
  0x74   :  { %v27_v27 = vpop.permute.xlu1 %26  }
  0x76   :  { %v12_v26 = vpop.permute.xlu0 %11  }
  0x77   :  { %15 = vst.msk [vmem:[#allocation0 + $0x8] sm:$0x1] %vm13_vm2, %v12_v26   ;;  %vm113_vm2 = vcmask 408896  }
  0x78   :  { %17 = vst.msk [vmem:[#allocation0] sm:$0x1] %vm16_vm3, %v12_v26   ;;  %v34_v29 = vpop.permute.xlu1 %33   ;;  %vm119_vm3 = vcmask 343296  }
  0x79   :  { %30 = vst.msk [vmem:[#allocation0 + $0x8] sm:$0x1] %vm28_vm4, %v27_v27   ;;  %vm126_vm4 = vcmask 326896  }
  0x7a   :  { %v21_v28 = vpop.permute.xlu0 %20  }
  0x7b   :  { %23 = vst.msk [vmem:[#allocation0] sm:$0x1] %vm22_vm5, %v21_v28   ;;  %vm132_vm5 = vcmask 261296  }
  0x7c   :  { %36 = vst.msk [vmem:[#allocation0] sm:$0x1] %vm35_vm6, %v34_v29   ;;  %v47_v31 = vpop.permute.xlu1 %46   ;;  %vm139_vm6 = vcmask 244896  }
  0x7d   :  { %49 = vst.msk [vmem:[#allocation0] sm:$0x1] %vm48_vm8, %v47_v31   ;;  %vm152_vm8 = vcmask 162896  }
  0x7e   :  { %v40_v30 = vpop.permute.xlu0 %39  }
  0x7f   :  { %43 = vst.msk [vmem:[#allocation0 + $0x8] sm:$0x1] %vm41_vm7, %v40_v30   ;;  %vm145_vm7 = vcmask 179296  }
  0x80   :  { %v60_v33 = vpop.permute.xlu1 %59  }
  0x81   :  { %62 = vst.msk [vmem:[#allocation0] sm:$0x1] %vm61_vm10, %v60_v33  }
  0x82   :  { %v53_v32 = vpop.permute.xlu0 %52  }
  0x83   :  { %56 = vst.msk [vmem:[#allocation0 + $0x8] sm:$0x1] %vm54_vm9, %v53_v32   ;;  %vm158_vm9 = vcmask 97296  }
  0x84   :  { %v73_v35 = vpop.permute.xlu1 %72  }
  0x85   :  { %75 = vst.msk [vmem:[#allocation0] sm:$0x1] %vm74_vm12, %v73_v35  }
  0x86   :  { %v66_v34 = vpop.permute.xlu0 %65  }
  0x87   :  { %69 = vst.msk [vmem:[#allocation0 + $0x8] sm:$0x1] %vm67_vm11, %v66_v34  }
  0x88   :  { %v86_v37 = vpop.permute.xlu1 %85  }
  0x89   :  { %88 = vst.msk [vmem:[#allocation0] sm:$0x1] %vm87_vm14, %v86_v37  }
  0x8a   :  { %v79_v36 = vpop.permute.xlu0 %78  }
  0x8b   :  { %82 = vst.msk [vmem:[#allocation0 + $0x8] sm:$0x1] %vm80_vm13, %v79_v36  }
  0x8c   :  { %v99_v39 = vpop.permute.xlu1 %98  }
  0x8d   :  { %101 = vst.msk [vmem:[#allocation0] sm:$0x1] %vm100_vm0, %v99_v39  }
  0x8e   :  { %v92_v38 = vpop.permute.xlu0 %91  }
  0x8f   :  { %95 = vst.msk [vmem:[#allocation0 + $0x8] sm:$0x1] %vm93_vm15, %v92_v38  }
  0x90   :  { %v112_v41 = vpop.permute.xlu1 %111  }
  0x91   :  { %114 = vst.msk [vmem:[#allocation0] sm:$0x1] %vm113_vm2, %v112_v41  }
  0x92   :  { %v105_v40 = vpop.permute.xlu0 %104  }
  0x93   :  { %108 = vst.msk [vmem:[#allocation0 + $0x8] sm:$0x1] %vm106_vm1, %v105_v40  }
  0x94   :  { %v125_v43 = vpop.permute.xlu1 %124  }
  0x95   :  { %127 = vst.msk [vmem:[#allocation0] sm:$0x1] %vm126_vm4, %v125_v43  }
  0x96   :  { %v118_v42 = vpop.permute.xlu0 %117  }
  0x97   :  { %121 = vst.msk [vmem:[#allocation0 + $0x8] sm:$0x1] %vm119_vm3, %v118_v42  }
  0x98   :  { %v138_v45 = vpop.permute.xlu1 %137  }
  0x99   :  { %140 = vst.msk [vmem:[#allocation0] sm:$0x1] %vm139_vm6, %v138_v45  }
  0x9a   :  { %v131_v44 = vpop.permute.xlu0 %130  }
  0x9b   :  { %134 = vst.msk [vmem:[#allocation0 + $0x8] sm:$0x1] %vm132_vm5, %v131_v44  }
  0x9c   :  { %v151_v47 = vpop.permute.xlu1 %150  }
  0x9d   :  { %153 = vst.msk [vmem:[#allocation0] sm:$0x1] %vm152_vm8, %v151_v47  }
  0x9e   :  { %v144_v46 = vpop.permute.xlu0 %143  }
  0x9f   :  { %147 = vst.msk [vmem:[#allocation0 + $0x8] sm:$0x1] %vm145_vm7, %v144_v46  }
  0xa2   :  { %v157_v48 = vpop.permute.xlu0 %156  }
  0xa3   :  { %160 = vst.msk [vmem:[#allocation0 + $0x8] sm:$0x1] %vm158_vm9, %v157_v48  }
  0xa4   :  { %v165_v49 = vld [vmem:[#allocation0] sm:$0x1] }
  0xa5   :  { %168 = vst [vmem:[%s338_s1] sm:$0x1] %v165_v49 }
  0xaa   :  { %v170_v50 = vld [vmem:[#allocation0 + $0x8] sm:$0x1] }
  0xab   :  { %199 = vst [vmem:[%s338_s1 + $0x1] sm:$0x1] %v170_v50 }

// kernel: tile.18
= control target key start
LH: loop header
LB: loop body
LE: loop exit
PB: predicated region body
PF: predicated region fallthrough
CT: control target
= control target key end

     0   :  { %s22_s0 = inlined_call_operand.vmem [shape: f32[20], index: 0, kind: input, shape index: {}]   ;;  %s23_s1 = inlined_call_operand.vmem [shape: f32[8,20], index: 1, kind: output, shape index: {}]  }
   0x1   :  { %v4_v0 = vld [vmem:[%s22_s0] ss:$0 sm:$0xff] }
   0x2   :  { %5 = vst [vmem:[%s23_s1] sm:$0xff] %v4_v0 }

// kernel: tile.19
= control target key start
LH: loop header
LB: loop body
LE: loop exit
PB: predicated region body
PF: predicated region fallthrough
CT: control target
= control target key end

     0   :  { %vm9_vm0 = vcmask 64512   ;;  %s85_s12 = smov 120   ;;  %s86_s13 = smov 80   ;;  %vm3_vm1 = vcmask 162816   ;;  %vm13_vm2 = vcmask 97280   ;;  %vm16_vm3 = vcmask 1048512   ;;  %s135_s0 = inlined_call_operand.vmem [shape: f32[8,20], index: 0, kind: input, shape index: {}]   ;;  %s136_s1 = inlined_call_operand.vmem [shape: f32[1,160], index: 1, kind: output, shape index: {}]  }
   0x1   :  { %v69_v0 = vld [vmem:[%s135_s0 + $0x6] sm:$0x1]   ;;  %v72_v3 = vld [vmem:[%s135_s0 + $0x4] sm:$0x1]   ;;  %v71_v4 = vld [vmem:[%s135_s0 + $0x5] sm:$0x1]  }
   0x2   :  { %v70_v1 = vld [vmem:[%s135_s0 + $0x6] sm:$0x1]   ;;  %26 = vrot.lane.b32.xlu1 %v72_v3, %s86_s13  ;;  %v73_v5 = vld [vmem:[%s135_s0 + $0x3] sm:$0x1]   ;;  %v2_v6 = vld [vmem:[%s135_s0] sm:$0x1]  }
   0x3   :  { %v10_v2 = vsel %vm9_vm0, %v70_v1, %v69_v0  ;;  %4 = vst.msk [vmem:[#allocation0] sm:$0x1] %vm3_vm1, %v2_v6   ;;  %s87_s20 = smov 100   ;;  %s88_s21 = smov 60   ;;  %v74_v7 = vld [vmem:[%s135_s0 + $0x2] sm:$0x1]  }
   0x4   :  { %11 = vrot.lane.b32.xlu0 %v10_v2, %s85_s12  ;;  %v75_v8 = vld [vmem:[%s135_s0 + $0x1] sm:$0x1]   ;;  %s89_s26 = smov 40   ;;  %s90_s27 = smov 20   ;;  %v76_v9 = vld [vmem:[%s135_s0 + $0x7] sm:$0x1]  }
   0x5   :  { %s91_s0 = smov 12   ;;  %vm22_vm4 = vcmask 982816   ;;  %vm28_vm5 = vcmask 818816   ;;  %vm34_vm6 = vcmask 654816   ;;  %vm40_vm7 = vcmask 490816  }
   0x6   :  { %32 = vrot.lane.b32.xlu1 %v73_v5, %s88_s21  ;;  %vm46_vm8 = vcmask 326816   ;;  %vm52_vm9 = vcmask 261216  }
   0x8   :  { %20 = vrot.lane.b32.xlu0 %v71_v4, %s87_s20 }
   0xa   :  { %44 = vrot.lane.b32.xlu1 %v75_v8, %s90_s27 }
   0xc   :  { %38 = vrot.lane.b32.xlu0 %v74_v7, %s89_s26 }
  0x10   :  { %50 = vrot.lane.b32.xlu0 %v76_v9, %s91_s0 }
  0x74   :  { %v27_v11 = vpop.permute.xlu1 %26  }
  0x76   :  { %v12_v10 = vpop.permute.xlu0 %11  }
  0x77   :  { %15 = vst.msk [vmem:[#allocation0 + $0x8] sm:$0x1] %vm13_vm2, %v12_v10  }
  0x78   :  { %17 = vst.msk [vmem:[#allocation0] sm:$0x1] %vm16_vm3, %v12_v10   ;;  %v33_v13 = vpop.permute.xlu1 %32  }
  0x7a   :  { %v21_v12 = vpop.permute.xlu0 %20  }
  0x7b   :  { %23 = vst.msk [vmem:[#allocation0] sm:$0x1] %vm22_vm4, %v21_v12  }
  0x7c   :  { %29 = vst.msk [vmem:[#allocation0] sm:$0x1] %vm28_vm5, %v27_v11   ;;  %v45_v15 = vpop.permute.xlu1 %44  }
  0x7d   :  { %35 = vst.msk [vmem:[#allocation0] sm:$0x1] %vm34_vm6, %v33_v13  }
  0x7e   :  { %v39_v14 = vpop.permute.xlu0 %38  }
  0x7f   :  { %41 = vst.msk [vmem:[#allocation0] sm:$0x1] %vm40_vm7, %v39_v14  }
  0x80   :  { %47 = vst.msk [vmem:[#allocation0] sm:$0x1] %vm46_vm8, %v45_v15  }
  0x82   :  { %v51_v16 = vpop.permute.xlu0 %50  }
  0x83   :  { %54 = vst.msk [vmem:[#allocation0 + $0x8] sm:$0x1] %vm52_vm9, %v51_v16  }
  0x87   :  { %v59_v17 = vld [vmem:[#allocation0] sm:$0x1] }
  0x88   :  { %62 = vst [vmem:[%s136_s1] sm:$0x1] %v59_v17 }
  0x8a   :  { %v64_v18 = vld [vmem:[#allocation0 + $0x8] sm:$0x1] }
  0x8b   :  { %77 = vst [vmem:[%s136_s1 + $0x1] sm:$0x1] %v64_v18 }

// kernel: net_forward.1
= control target key start
LH: loop header
LB: loop body
LE: loop exit
PB: predicated region body
PF: predicated region fallthrough
CT: control target
= control target key end

     0   :  { %12 = vsyncpa [#allocation4], 0  ;;  %s18435_s0 = inlined_call_operand.vmem [shape: f32[16,28,28], index: 0, kind: input, shape index: {}]   ;;  %s18436_s1 = inlined_call_operand.vmem [shape: f32[600,240], index: 1, kind: input, shape index: {}]   ;;  %s18437_s2 = inlined_call_operand.vmem [shape: f32[1,240], index: 2, kind: input, shape index: {}]   ;;  %s18438_s3 = inlined_call_operand.vmem [shape: f32[2000,160], index: 3, kind: input, shape index: {}]   ;;  %s18439_s4 = inlined_call_operand.vmem [shape: f32[1,160], index: 4, kind: input, shape index: {}]   ;;  %s18440_s5 = inlined_call_operand.vmem [shape: f32[320,10], index: 5, kind: input, shape index: {}]   ;;  %s18441_s6 = inlined_call_operand.vmem [shape: f32[1,10], index: 6, kind: input, shape index: {}]   ;;  %s18442_s7 = inlined_call_operand.hbm [shape: f32[16,10], index: 7, kind: output, shape index: {}]  }
   0x1   :  { %14 = vsyncpa [#allocation4 + $0x1], 0  ;;  %s10043_s24 = smov 0   ;;  %s10045_s25 = smov 0  }
   0x2   :  { %s10047_s26 = smov 0   ;;  %s10049_s27 = smov 0  }
   0x3 LB: > { %s10064_s28 = sadd.s32 4294967295, %s9950_s27   ;;  %s7708_s29 = sadd.s32 4294967294, %s9950_s27   ;;  %s9950_s27 = sphi %s10049_s27, %s19331_s27   ;;  %s9946_s26 = sphi %s10047_s26, %s19330_s26   ;;  %s9942_s25 = sphi %s10045_s25, %s19329_s25   ;;  %s9938_s24 = sphi %s10043_s24, %s19328_s24  }
   0x4   : > { %s10068_s30 = sadd.s32 1, %s9950_s27   ;;  %s179_s8 = sadd.s32 1, %s9946_s26 }
   0x5   : > { %s176_s9 = ssub.s32 %s9950_s27, %s10068_s30  ;;  %p189_p0 = scmp.ne.s32.totalorder %s9946_s26, %s9942_s25 }
   0x6   : > { %p177_p1 = scmp.eq.s32.totalorder %s176_s9, 0  ;;  %p190_p2 = scmp.eq.s32.totalorder %s10064_s28, 1 }
   0x7   : > { %p195_p3 = scmp.ne.s32.totalorder %s9942_s25, %s9938_s24  ;;  %p196_p4 = scmp.eq.s32.totalorder %s7708_s29, 1 }
   0x8   : > { %s10079_s10 = scalar_select %p177_p1, %s9946_s26, %s179_s8  }
   0x9   : > { %p10081_p5 = por %p190_p2, %p189_p0  ;;  %p10085_p6 = por %p196_p4, %p195_p3 }
   0xa   : > { %p7711_p7 = scmp.ge.s32.totalorder %s9950_s27, 1  ;;  %p242_p8 = scmp.lt.s32.totalorder %s9950_s27, 3 }
   0xc   : > { %p243_p9 = pnand %p7711_p7, %p242_p8 }
   0xe   : > { %246 = sbr.rel (%p243_p9) target bundleno = 2369 (0x941), region = 48 }
  0x13   : > { %s7713_s13 = sshll.u32 %s10064_s28, 3  ;;  %s9952_s18 = smov 23   ;;  %vm18649_vm0 = vcmask 1046528   ;;  %vm18648_vm1 = vcmask 1045504   ;;  %vm1597_vm2 = vcmask 195584   ;;  %vm1622_vm3 = vcmask 392192  }
  0x14   : > { %p276_p10 = scmp.lt.s32.totalorder %s7713_s13, 15  ;;  %s9953_s19 = smov 46   ;;  %vm1647_vm4 = vcmask 588800   ;;  %vm1672_vm5 = vcmask 785408   ;;  %vm1468_vm6 = vcmask 1044480   ;;  %vm1697_vm7 = vcmask 982016  }
  0x15   : > { %s9954_s20 = smov 69   ;;  %s9955_s21 = smov 92   ;;  %vm1722_vm8 = vcmask 130048   ;;  %vm1747_vm9 = vcmask 326656   ;;  %vm1772_vm10 = vcmask 523264   ;;  %vm1797_vm11 = vcmask 719872  }
  0x16   : > { %s19333_s13 = smov (!%p276_p10, %s7713_s13), 15  ;;  %s9956_s22 = smov 120   ;;  %vm1822_vm12 = vcmask 916480   ;;  %vm1847_vm13 = vcmask 64512   ;;  %vm1872_vm14 = vcmask 261120   ;;  %vm1897_vm15 = vcmask 457728  }
  0x17   : > { %s7754_s14 = sshll.u32 %s19333_s13, 5  ;;  %s9957_s23 = smov 15  }
  0x18   : > { %s10095_s17 = scalar_lea.vmem %s18435_s0, %s7754_s14  ;;  %s9958_s9 = smov 38  }
  0x19   : > { %v10098_v0 = vld [vmem:[%s10095_s17 + $0x28] sm:$0xff]  ;;  %v10101_v1 = vld [vmem:[%s10095_s17 + $0x30] sm:$0xff]  ;;  %v10104_v2 = vld [vmem:[%s10095_s17] sm:$0xff]  ;;  %s9968_s13 = smov 127   ;;  %s9970_s29 = smov 45  }
  0x1a   : > { %v10108_v3 = vpack.i.bf16 %v10101_v1, %v10098_v0  ;;  %v10111_v4 = vld [vmem:[%s10095_s17 + $0x8] sm:$0xff]  ;;  %v10114_v5 = vld [vmem:[%s10095_s17 + $0x40] sm:$0xff]  ;;  %v10124_v8 = vld [vmem:[%s10095_s17 + $0x10] sm:$0xff]  ;;  %v643_v40 = vrot.slane %v10098_v0, 1  ;;  %v635_v41 = vrot.slane %v10104_v2, 1  ;;  %v645_v51 = vrot.slane %v10101_v1, 1 }
  0x1b   : > { %v10117_v6 = vld [vmem:[%s10095_s17 + $0x48] sm:$0xff]  ;;  %v10121_v7 = vpack.i.bf16 %v10111_v4, %v10104_v2  ;;  %v10127_v9 = vld [vmem:[%s10095_s17 + $0x20] sm:$0xff]  ;;  %v10143_v13 = vld [vmem:[%s10095_s17 + $0x70] sm:$0xff]  ;;  %v638_v37 = vrot.slane %v10124_v8, 1  ;;  %v636_v42 = vrot.slane %v10111_v4, 1  ;;  %v649_v44 = vrot.slane %v10114_v5, 1 }
  0x1c   : > { %7918 = vrot.lane.b32.xlu1 %v10108_v3, %s9952_s18  ;;  %v10133_v10 = vpack.i.bf16 %v10117_v6, %v10114_v5  ;;  %v7912_v11 = vpack.i.bf16 %v10127_v9, %v10124_v8  ;;  %v10140_v12 = vld [vmem:[%s10095_s17 + $0x68] sm:$0xff]  ;;  %v10146_v14 = vld [vmem:[%s10095_s17 + $0x50] sm:$0xff]  ;;  %v10149_v15 = vld [vmem:[%s10095_s17 + $0x60] sm:$0xff]  ;;  %v642_v39 = vrot.slane %v10127_v9, 1  ;;  %v650_v47 = vrot.slane %v10117_v6, 1  ;;  %s9971_s16 = smov 96  }
  0x1d   : > { %7908 = vrot.lane.b32.xlu0 %v10121_v7, %s9952_s18  ;;  %v7932_v16 = vpack.i.bf16 %v10143_v13, %v10140_v12  ;;  %v7927_v17 = vpack.i.bf16 %v10149_v15, %v10146_v14  ;;  %v10159_v18 = vld [vmem:[%s10095_s17 + $0x90] sm:$0xff]  ;;  %v10162_v19 = vld [vmem:[%s10095_s17 + $0xa0] sm:$0xff]  ;;  %v10168_v21 = vld [vmem:[%s10095_s17 + $0x88] sm:$0xff]  ;;  %v652_v48 = vrot.slane %v10146_v14, 1  ;;  %v10263_v49 = vsel %vm18649_vm0, %v635_v41, %v636_v42  ;;  %s9972_s14 = smov 119   ;;  %s9978_s8 = smov 70  }
  0x1e   : > { %v10165_v20 = vld [vmem:[%s10095_s17 + $0x80] sm:$0xff]  ;;  %v7942_v22 = vpack.i.bf16 %v10162_v19, %v10159_v18  ;;  %v10180_v25 = vld [vmem:[%s10095_s17 + $0xc8] sm:$0xff]  ;;  %v10186_v27 = vld [vmem:[%s10095_s17 + $0xb0] sm:$0xff]  ;;  %v10257_v46 = vsel %vm18649_vm0, %v642_v39, %v643_v40  ;;  %18705 = vst [vmem:[#allocation9_spill] sm:$0xff] %v10263_v49  ;;  %v10266_v50 = vsel %vm18649_vm0, %v636_v42, %v638_v37  ;;  %v10288_v57 = vsel %vm18649_vm0, %v649_v44, %v650_v47  ;;  %s9999_s15 = smov 18  }
  0x1f   : > { %v7937_v23 = vpack.i.bf16 %v10168_v21, %v10165_v20  ;;  %v10177_v24 = vld [vmem:[%s10095_s17 + $0xc0] sm:$0xff]  ;;  %v10183_v26 = vld [vmem:[%s10095_s17 + $0xa8] sm:$0xff]  ;;  %v10198_v31 = vld [vmem:[%s10095_s17 + $0xf0] sm:$0xff]  ;;  %18704 = vst [vmem:[#allocation8_spill] sm:$0xff] %v10257_v46  ;;  %v10285_v56 = vpack.i.bf16 %v10266_v50, %v10263_v49  ;;  %v657_v58 = vrot.slane %v10140_v12, 1  ;;  %v659_v59 = vrot.slane %v10143_v13, 1 }
  0x20   : > { %7923 = vrot.lane.b32.xlu1 %v10133_v10, %s9952_s18  ;;  %v7952_v28 = vpack.i.bf16 %v10180_v25, %v10177_v24  ;;  %v7947_v29 = vpack.i.bf16 %v10186_v27, %v10183_v26  ;;  %v10195_v30 = vld [vmem:[%s10095_s17 + $0xe8] sm:$0xff]  ;;  %v10201_v32 = vld [vmem:[%s10095_s17 + $0xd0] sm:$0xff]  ;;  %v10204_v33 = vld [vmem:[%s10095_s17 + $0xe0] sm:$0xff]  ;;  %18706 = vst [vmem:[#allocation10_spill] sm:$0xff] %v10266_v50  ;;  %v10295_v60 = vsel %vm18649_vm0, %v650_v47, %v652_v48  ;;  %v663_v39 = vrot.slane %v10165_v20, 1 }
  0x21   : > { %7913 = vrot.lane.b32.xlu0 %v7912_v11, %s9952_s18  ;;  %v7962_v34 = vpack.i.bf16 %v10198_v31, %v10195_v30  ;;  %v10212_v35 = vpack.i.bf16 %v10204_v33, %v10201_v32  ;;  %v10235_v36 = vld [vmem:[%s10095_s17 + $0x18] sm:$0xf]  ;;  %18708 = vst [vmem:[#allocation12_spill] sm:$0xff] %v10285_v56  ;;  %18709 = vst [vmem:[#allocation13_spill] sm:$0xff] %v10288_v57  ;;  %v10298_v61 = vsel %vm18649_vm0, %v643_v40, %v645_v51  ;;  %v3320_v50 = vld [vmem:[%s18436_s1 + $0xe0] sm:$0xff] }
  0x22   : > { %v10240_v38 = vrot.slane %v10235_v36, 1  ;;  %v10248_v43 = vld [vmem:[%s10095_s17 + $0x38] sm:$0xf]  ;;  %18710 = vst [vmem:[#allocation14_spill] sm:$0xff] %v10295_v60  ;;  %18711 = vst [vmem:[#allocation15_spill] sm:$0xff] %v10298_v61  ;;  %v664_v40 = vrot.slane %v10168_v21, 1 }
  0x23   : > { %v10270_v52 = vrot.slane %v10248_v43, 1  ;;  %v10273_v53 = vld [vmem:[%s10095_s17 + $0x78] sm:$0xf]  ;;  %v677_v44 = vrot.slane %v10177_v24, 1  ;;  %v678_v47 = vrot.slane %v10180_v25, 1 }
  0x24   : > { %7933 = vrot.lane.b32.xlu1 %v7932_v16, %s9952_s18  ;;  %18702 = vst [vmem:[#allocation6_spill] sm:$0xff] %v10240_v38  ;;  %v10254_v45 = vsel %vm18649_vm0, %v638_v37, %v10240_v38  ;;  %v10280_v55 = vld [vmem:[%s10095_s17 + $0x58] sm:$0xf]  ;;  %v10305_v63 = vrot.slane %v10273_v53, 1  ;;  %v3316_v38 = vld [vmem:[%s18436_s1 + $0xc0] sm:$0xff] }
  0x25   : > { %7928 = vrot.lane.b32.xlu0 %v7927_v17, %s9952_s18  ;;  %18703 = vst [vmem:[#allocation7_spill] sm:$0xff] %v10254_v45  ;;  %18707 = vst [vmem:[#allocation11_spill] sm:$0xff] %v10270_v52  ;;  %v10277_v54 = vpack.i.bf16 %v10257_v46, %v10254_v45  ;;  %v10302_v62 = vsel %vm18649_vm0, %v645_v51, %v10270_v52  ;;  %v10349_v41 = vld [vmem:[%s10095_s17 + $0xb8] sm:$0xf] }
  0x26   : > { %18712 = vst [vmem:[#allocation16_spill] sm:$0xff] %v10302_v62  ;;  %18713 = vst [vmem:[#allocation17_spill] sm:$0xff] %v10305_v63  ;;  %v3323_v52 = vld [vmem:[%s18436_s1 + $0xf8] sm:$0xff] }
  0x27   : > { %3502 = vmatprep.subr.mxu0 %v3323_v52  ;;  %v3319_v49 = vld [vmem:[%s18436_s1 + $0xd8] sm:$0xff] }
  0x28   : > { %7943 = vrot.lane.b32.xlu1 %v7942_v22, %s9952_s18  ;;  %v3315_v45 = vld [vmem:[%s18436_s1 + $0xb8] sm:$0xff] }
  0x29   : > { %7938 = vrot.lane.b32.xlu0 %v7937_v23, %s9952_s18 }
  0x2c   : > { %7953 = vrot.lane.b32.xlu1 %v7952_v28, %s9952_s18 }
  0x2d   : > { %7948 = vrot.lane.b32.xlu0 %v7947_v29, %s9952_s18 }
  0x30   : > { %7963 = vrot.lane.b32.xlu1 %v7962_v34, %s9952_s18 }
  0x31   : > { %7958 = vrot.lane.b32.xlu0 %v10212_v35, %s9952_s18  ;;  %s9966_s18 = smov 104  }
  0x34   : > { %7973 = vrot.lane.b32.xlu1 %v7912_v11, %s9953_s19 }
  0x35   : > { %7968 = vrot.lane.b32.xlu0 %v10121_v7, %s9953_s19 }
  0x38   : > { %7983 = vrot.lane.b32.xlu1 %v10133_v10, %s9953_s19 }
  0x39   : > { %7978 = vrot.lane.b32.xlu0 %v10108_v3, %s9953_s19 }
  0x3c   : > { %7993 = vrot.lane.b32.xlu1 %v7932_v16, %s9953_s19 }
  0x3d   : > { %7988 = vrot.lane.b32.xlu0 %v7927_v17, %s9953_s19 }
  0x40   : > { %8003 = vrot.lane.b32.xlu1 %v7942_v22, %s9953_s19 }
  0x41   : > { %7998 = vrot.lane.b32.xlu0 %v7937_v23, %s9953_s19 }
  0x44   : > { %8013 = vrot.lane.b32.xlu1 %v7952_v28, %s9953_s19 }
  0x45   : > { %8008 = vrot.lane.b32.xlu0 %v7947_v29, %s9953_s19 }
  0x48   : > { %8023 = vrot.lane.b32.xlu1 %v7962_v34, %s9953_s19 }
  0x49   : > { %8018 = vrot.lane.b32.xlu0 %v10212_v35, %s9953_s19  ;;  %s9973_s19 = smov 14  }
  0x4c   : > { %8033 = vrot.lane.b32.xlu1 %v7912_v11, %s9954_s20 }
  0x4d   : > { %8028 = vrot.lane.b32.xlu0 %v10121_v7, %s9954_s20 }
  0x50   : > { %8043 = vrot.lane.b32.xlu1 %v10133_v10, %s9954_s20 }
  0x51   : > { %8038 = vrot.lane.b32.xlu0 %v10108_v3, %s9954_s20 }
  0x54   : > { %8053 = vrot.lane.b32.xlu1 %v7932_v16, %s9954_s20 }
  0x55   : > { %8048 = vrot.lane.b32.xlu0 %v7927_v17, %s9954_s20 }
  0x58   : > { %8063 = vrot.lane.b32.xlu1 %v7942_v22, %s9954_s20 }
  0x59   : > { %8058 = vrot.lane.b32.xlu0 %v7937_v23, %s9954_s20 }
  0x5c   : > { %8073 = vrot.lane.b32.xlu1 %v7952_v28, %s9954_s20 }
  0x5d   : > { %8068 = vrot.lane.b32.xlu0 %v7947_v29, %s9954_s20 }
  0x60   : > { %8083 = vrot.lane.b32.xlu1 %v7962_v34, %s9954_s20 }
  0x61   : > { %8078 = vrot.lane.b32.xlu0 %v10212_v35, %s9954_s20  ;;  %s18640_s20 = smov 112  }
  0x64   : > { %8093 = vrot.lane.b32.xlu1 %v7912_v11, %s9955_s21  ;;  %v10318_v11 = vpack.i.bf16 %v10295_v60, %v10288_v57 }
  0x65   : > { %8088 = vrot.lane.b32.xlu0 %v10121_v7, %s9955_s21  ;;  %v656_v7 = vrot.slane %v10149_v15, 1 }
  0x66   : > { %18715 = vst [vmem:[#allocation19_spill] sm:$0xff] %v10318_v11 }
  0x67   : > { %v10344_v37 = vsel %vm18649_vm0, %v656_v7, %v657_v58  ;;  %v10374_v7 = vsel %vm18649_vm0, %v663_v39, %v664_v40  ;;  %v10396_v39 = vsel %vm18649_vm0, %v677_v44, %v678_v47 }
  0x68   : > { %8103 = vrot.lane.b32.xlu1 %v10133_v10, %s9955_s21  ;;  %v10312_v10 = vld [vmem:[%s10095_s17 + $0x98] sm:$0xf]  ;;  %18720 = vst [vmem:[#allocation24_spill] sm:$0xff] %v10344_v37  ;;  %18723 = vst [vmem:[#allocation27_spill] sm:$0xff] %v10374_v7 }
  0x69   : > { %8098 = vrot.lane.b32.xlu0 %v10108_v3, %s9955_s21  ;;  %v10308_v3 = vrot.slane %v10280_v55, 1  ;;  %18726 = vst [vmem:[#allocation30_spill] sm:$0xff] %v10396_v39 }
  0x6b   : > { %18714 = vst [vmem:[#allocation18_spill] sm:$0xff] %v10308_v3 }
  0x6c   : > { %8113 = vrot.lane.b32.xlu1 %v7932_v16, %s9955_s21  ;;  %v10322_v16 = vpack.i.bf16 %v10302_v62, %v10298_v61  ;;  %v3322_v62 = vld [vmem:[%s18436_s1 + $0xf0] sm:$0xff]  ;;  %v3321_v61 = vld [vmem:[%s18436_s1 + $0xe8] sm:$0xff] }
  0x6d   : > { %8108 = vrot.lane.b32.xlu0 %v7927_v17, %s9955_s21  ;;  %v10325_v17 = vsel %vm18649_vm0, %v657_v58, %v659_v59  ;;  %3503 = vmatpush1.msra.mxu0 %v3322_v62  ;;  %v3318_v62 = vld [vmem:[%s18436_s1 + $0xd0] sm:$0xff] }
  0x6e   : > { %18716 = vst [vmem:[#allocation20_spill] sm:$0xff] %v10325_v17  ;;  %3504 = vmatprep.subr.mxu0 %v3321_v61 }
  0x6f   : > { %3505 = vmatpush1.msra.mxu0 %v3320_v50  ;;  %v3317_v50 = vld [vmem:[%s18436_s1 + $0xc8] sm:$0xff] }
  0x70   : > { %8123 = vrot.lane.b32.xlu1 %v7942_v22, %s9955_s21  ;;  %v666_v22 = vrot.slane %v10159_v18, 1  ;;  %3506 = vmatprep.subr.mxu0 %v3319_v49 }
  0x71   : > { %8118 = vrot.lane.b32.xlu0 %v7937_v23, %s9955_s21  ;;  %v10332_v23 = vsel %vm18649_vm0, %v659_v59, %v10305_v63  ;;  %v680_v59 = vrot.slane %v10201_v32, 1  ;;  %3507 = vmatpush1.msra.mxu0 %v3318_v62  ;;  %v3314_v62 = vld [vmem:[%s18436_s1 + $0xb0] sm:$0xff] }
  0x72   : > { %18717 = vst [vmem:[#allocation21_spill] sm:$0xff] %v10332_v23  ;;  %v10355_v42 = vpack.i.bf16 %v10332_v23, %v10325_v17  ;;  %v10377_v63 = vsel %vm18649_vm0, %v664_v40, %v666_v22  ;;  %v673_v23 = vrot.slane %v10186_v27, 1  ;;  %v10381_v17 = vrot.slane %v10349_v41, 1  ;;  %3508 = vmatprep.subr.mxu0 %v3317_v50 }
  0x73   : > { %18724 = vst [vmem:[#allocation28_spill] sm:$0xff] %v10377_v63  ;;  %v10403_v27 = vpack.i.bf16 %v10377_v63, %v10374_v7  ;;  %v10406_v40 = vsel %vm18649_vm0, %v678_v47, %v680_v59  ;;  %v684_v63 = vrot.slane %v10204_v33, 1  ;;  %3509 = vmatpush1.msra.mxu0 %v3316_v38  ;;  %v3313_v38 = vld [vmem:[%s18436_s1 + $0xa8] sm:$0xff] }
  0x74   : > { %8133 = vrot.lane.b32.xlu1 %v7952_v28, %s9955_s21  ;;  %v10335_v28 = vrot.slane %v10312_v10, 1  ;;  %18725 = vst [vmem:[#allocation29_spill] sm:$0xff] %v10381_v17  ;;  %18728 = vst [vmem:[#allocation32_spill] sm:$0xff] %v10406_v40  ;;  %3510 = vmatprep.subr.mxu0 %v3315_v45 }
  0x75   : > { %8128 = vrot.lane.b32.xlu0 %v7947_v29, %s9955_s21  ;;  %v670_v29 = vrot.slane %v10162_v19, 1  ;;  %18727 = vst [vmem:[#allocation31_spill] sm:$0xff] %v10403_v27  ;;  %3511 = vmatpush1.msra.mxu0 %v3314_v62  ;;  %v3310_v62 = vld [vmem:[%s18436_s1 + $0x90] sm:$0xff] }
  0x76   : > { %18718 = vst [vmem:[#allocation22_spill] sm:$0xff] %v10335_v28  ;;  %v10367_v51 = vsel %vm18649_vm0, %v666_v22, %v10335_v28  ;;  %v10387_v28 = vld [vmem:[%s10095_s17 + $0xd8] sm:$0xf]  ;;  %v685_v22 = vrot.slane %v10195_v30, 1  ;;  %v10417_v30 = vsel %vm18649_vm0, %v673_v23, %v10381_v17  ;;  %3512 = vmatprep.subr.mxu0 %v3313_v38  ;;  %v3308_v38 = vld [vmem:[%s18436_s1 + $0x80] sm:$0xff] }
  0x77   : > { %18721 = vst [vmem:[#allocation25_spill] sm:$0xff] %v10367_v51  ;;  %18731 = vst [vmem:[#allocation35_spill] sm:$0xff] %v10417_v30 }
  0x78   : > { %8143 = vrot.lane.b32.xlu1 %v7962_v34, %s9955_s21  ;;  %v671_v34 = vrot.slane %v10183_v26, 1 }
  0x79   : > { %8138 = vrot.lane.b32.xlu0 %v10212_v35, %s9955_s21  ;;  %v10341_v35 = vsel %vm18649_vm0, %v652_v48, %v10308_v3  ;;  %v687_v3 = vrot.slane %v10198_v31, 1  ;;  %v10427_v31 = vpack.i.bf16 %v10406_v40, %v10396_v39  ;;  %v10447_v40 = vsel %vm18649_vm0, %v684_v63, %v685_v22  ;;  %s9963_s21 = smov 30  }
  0x7a   : > { %18719 = vst [vmem:[#allocation23_spill] sm:$0xff] %v10341_v35  ;;  %v10363_v48 = vpack.i.bf16 %v10344_v37, %v10341_v35  ;;  %v10370_v58 = vsel %vm18649_vm0, %v670_v29, %v671_v34  ;;  %v10384_v37 = vld [vmem:[%s10095_s17 + $0xf8] sm:$0xf]  ;;  %v10413_v44 = vsel %vm18649_vm0, %v671_v34, %v673_v23  ;;  %18737 = vst [vmem:[#allocation41_spill] sm:$0xff] %v10447_v40 }
  0x7b   : > { %18722 = vst [vmem:[#allocation26_spill] sm:$0xff] %v10370_v58  ;;  %v10393_v29 = vpack.i.bf16 %v10370_v58, %v10367_v51  ;;  %v10410_v58 = vrot.slane %v10384_v37, 1  ;;  %18730 = vst [vmem:[#allocation34_spill] sm:$0xff] %v10413_v44  ;;  %v10420_v51 = vrot.slane %v10387_v28, 1  ;;  %v10433_v34 = vpack.i.bf16 %v10417_v30, %v10413_v44 }
  0x7c   : > { %8153 = vrot.lane.b32.xlu1 %v10277_v54, %s9956_s22  ;;  %18733 = vst [vmem:[#allocation37_spill] sm:$0xff] %v10427_v31  ;;  %v10436_v23 = vsel %vm18649_vm0, %v685_v22, %v687_v3 }
  0x7d   : > { %8148 = vrot.lane.b32.xlu0 %v10285_v56, %s9956_s22  ;;  %18729 = vst [vmem:[#allocation33_spill] sm:$0xff] %v10410_v58  ;;  %18732 = vst [vmem:[#allocation36_spill] sm:$0xff] %v10420_v51  ;;  %v10440_v33 = vsel %vm18649_vm0, %v687_v3, %v10410_v58  ;;  %v10444_v47 = vsel %vm18649_vm0, %v680_v59, %v10420_v51  ;;  %vm1947_vm0 = vcmask 850944  }
  0x7e   : > { %18734 = vst [vmem:[#allocation38_spill] sm:$0xff] %v10436_v23  ;;  %18735 = vst [vmem:[#allocation39_spill] sm:$0xff] %v10440_v33  ;;  %v10453_v39 = vpack.i.bf16 %v10440_v33, %v10436_v23  ;;  %v10459_v3 = vpack.i.bf16 %v10447_v40, %v10444_v47 }
  0x7f   : > { %18736 = vst [vmem:[#allocation40_spill] sm:$0xff] %v10444_v47 }
  0x80   : > { %8163 = vrot.lane.b32.xlu1 %v10318_v11, %s9956_s22 }
  0x81   : > { %8158 = vrot.lane.b32.xlu0 %v10322_v16, %s9956_s22 }
  0x84   : > { %8173 = vrot.lane.b32.xlu1 %v10355_v42, %s9956_s22 }
  0x85   : > { %8168 = vrot.lane.b32.xlu0 %v10363_v48, %s9956_s22 }
  0x88   : > { %8183 = vrot.lane.b32.xlu1 %v10393_v29, %s9956_s22 }
  0x89   : > { %8178 = vrot.lane.b32.xlu0 %v10403_v27, %s9956_s22 }
  0x8c   : > { %8193 = vrot.lane.b32.xlu1 %v10427_v31, %s9956_s22 }
  0x8d   : > { %8188 = vrot.lane.b32.xlu0 %v10433_v34, %s9956_s22 }
  0x8e   : > { %v10461_v58 = vpop.permute.xlu1 %7918 }
  0x8f   : > { %v10463_v59 = vpop.permute.xlu0 %7908 }
  0x90   : > { %8203 = vrot.lane.b32.xlu1 %v10453_v39, %s9956_s22 }
  0x91   : > { %8198 = vrot.lane.b32.xlu0 %v10459_v3, %s9956_s22  ;;  %s9964_s22 = smov 53  }
  0x92   : > { %v10469_v63 = vpop.permute.xlu1 %7923 }
  0x93   : > { %v10471_v22 = vpop.permute.xlu0 %7913 }
  0x94   : > { %8213 = vrot.lane.b32.xlu1 %v10277_v54, %s9957_s23 }
  0x95   : > { %8208 = vrot.lane.b32.xlu0 %v10285_v56, %s9957_s23 }
  0x96   : > { %v10475_v33 = vpop.permute.xlu1 %7933 }
  0x97   : > { %v10477_v23 = vpop.permute.xlu0 %7928 }
  0x98   : > { %8223 = vrot.lane.b32.xlu1 %v10318_v11, %s9957_s23 }
  0x99   : > { %8218 = vrot.lane.b32.xlu0 %v10322_v16, %s9957_s23 }
  0x9a   : > { %v10481_v40 = vpop.permute.xlu1 %7943 }
  0x9b   : > { %v10483_v51 = vpop.permute.xlu0 %7938 }
  0x9c   : > { %8233 = vrot.lane.b32.xlu1 %v10355_v42, %s9957_s23 }
  0x9d   : > { %8228 = vrot.lane.b32.xlu0 %v10363_v48, %s9957_s23 }
  0x9e   : > { %v10487_v47 = vpop.permute.xlu1 %7953 }
  0x9f   : > { %v10489_v17 = vpop.permute.xlu0 %7948 }
  0xa0   : > { %8243 = vrot.lane.b32.xlu1 %v10393_v29, %s9957_s23 }
  0xa1   : > { %8238 = vrot.lane.b32.xlu0 %v10403_v27, %s9957_s23 }
  0xa2   : > { %v10493_v30 = vpop.permute.xlu1 %7963 }
  0xa3   : > { %v10495_v44 = vpop.permute.xlu0 %7958 }
  0xa4   : > { %8253 = vrot.lane.b32.xlu1 %v10427_v31, %s9957_s23 }
  0xa5   : > { %8248 = vrot.lane.b32.xlu0 %v10433_v34, %s9957_s23 }
  0xa6   : > { %v10499_v7 = vpop.permute.xlu1 %7973 }
  0xa7   : > { %v10501_v35 = vpop.permute.xlu0 %7968 }
  0xa8   : > { %8263 = vrot.lane.b32.xlu1 %v10453_v39, %s9957_s23 }
  0xa9   : > { %8258 = vrot.lane.b32.xlu0 %v10459_v3, %s9957_s23  ;;  %s9967_s23 = smov 22  }
  0xaa   : > { %v10505_v60 = vpop.permute.xlu1 %7983 }
  0xab   : > { %v10507_v57 = vpop.permute.xlu0 %7978 }
  0xac   : > { %8273 = vrot.lane.b32.xlu1 %v10277_v54, %s9958_s9 }
  0xad   : > { %8268 = vrot.lane.b32.xlu0 %v10285_v56, %s9958_s9 }
  0xae   : > { %v10522_v46 = vpop.permute.xlu1 %7993 }
  0xaf   : > { %v10527_v52 = vpop.permute.xlu0 %7988 }
  0xb0   : > { %8283 = vrot.lane.b32.xlu1 %v10318_v11, %s9958_s9 }
  0xb1   : > { %8278 = vrot.lane.b32.xlu0 %v10322_v16, %s9958_s9 }
  0xb2   : > { %v10542_v61 = vpop.permute.xlu1 %8003 }
  0xb3   : > { %18738 = vst [vmem:[#allocation42_spill] sm:$0xff] %v10542_v61  ;;  %v10547_v49 = vpop.permute.xlu0 %7998  ;;  %v3311_v61 = vld [vmem:[%s18436_s1 + $0x98] sm:$0xff] }
  0xb4   : > { %18739 = vst [vmem:[#allocation43_spill] sm:$0xff] %v10547_v49  ;;  %8293 = vrot.lane.b32.xlu1 %v10355_v42, %s9958_s9  ;;  %v3312_v49 = vld [vmem:[%s18436_s1 + $0xa0] sm:$0xff] }
  0xb5   : > { %8288 = vrot.lane.b32.xlu0 %v10363_v48, %s9958_s9  ;;  %3513 = vmatpush1.msra.mxu0 %v3312_v49  ;;  %v3309_v49 = vld [vmem:[%s18436_s1 + $0x88] sm:$0xff] }
  0xb6   : > { %v10562_v50 = vpop.permute.xlu1 %8013  ;;  %3514 = vmatprep.subr.mxu0 %v3311_v61 }
  0xb7   : > { %18740 = vst [vmem:[#allocation44_spill] sm:$0xff] %v10562_v50  ;;  %v10567_v45 = vpop.permute.xlu0 %8008  ;;  %3515 = vmatpush1.msra.mxu0 %v3310_v62  ;;  %v3307_v50 = vld [vmem:[%s18436_s1 + $0x78] sm:$0xff]  ;;  %v3306_v62 = vld [vmem:[%s18436_s1 + $0x70] sm:$0xff] }
  0xb8   : > { %18741 = vst [vmem:[#allocation45_spill] sm:$0xff] %v10567_v45  ;;  %8303 = vrot.lane.b32.xlu1 %v10393_v29, %s9958_s9  ;;  %3516 = vmatprep.subr.mxu0 %v3309_v49  ;;  %v3305_v49 = vld [vmem:[%s18436_s1 + $0x68] sm:$0xff] }
  0xb9   : > { %8298 = vrot.lane.b32.xlu0 %v10403_v27, %s9958_s9  ;;  %3517 = vmatpush1.msra.mxu0 %v3308_v38  ;;  %v3304_v38 = vld [vmem:[%s18436_s1 + $0x60] sm:$0xff] }
  0xba   : > { %v10585_v45 = vpop.permute.xlu1 %8023  ;;  %3518 = vmatprep.subr.mxu0 %v3307_v50 }
  0xbb   : > { %18742 = vst [vmem:[#allocation46_spill] sm:$0xff] %v10585_v45  ;;  %v10587_v61 = vpop.permute.xlu0 %8018  ;;  %3519 = vmatpush1.msra.mxu0 %v3306_v62  ;;  %v3303_v45 = vld [vmem:[%s18436_s1 + $0x58] sm:$0xff]  ;;  %v3302_v62 = vld [vmem:[%s18436_s1 + $0x50] sm:$0xff] }
  0xbc   : > { %18743 = vst [vmem:[#allocation47_spill] sm:$0xff] %v10587_v61  ;;  %8313 = vrot.lane.b32.xlu1 %v10427_v31, %s9958_s9  ;;  %3520 = vmatprep.subr.mxu0 %v3305_v49  ;;  %v3301_v49 = vld [vmem:[%s18436_s1 + $0x48] sm:$0xff] }
  0xbd   : > { %8308 = vrot.lane.b32.xlu0 %v10433_v34, %s9958_s9  ;;  %3521 = vmatpush1.msra.mxu0 %v3304_v38  ;;  %v3300_v38 = vld [vmem:[%s18436_s1 + $0x40] sm:$0xff] }
  0xbe   : > { %v10605_v61 = vpop.permute.xlu1 %8033  ;;  %3522 = vmatprep.subr.mxu0 %v3303_v45 }
  0xbf   : > { %18744 = vst [vmem:[#allocation48_spill] sm:$0xff] %v10605_v61  ;;  %v10607_v50 = vpop.permute.xlu0 %8028  ;;  %3523 = vmatpush1.msra.mxu0 %v3302_v62  ;;  %v3299_v61 = vld [vmem:[%s18436_s1 + $0x38] sm:$0xff]  ;;  %v3298_v62 = vld [vmem:[%s18436_s1 + $0x30] sm:$0xff] }
  0xc0   : > { %18745 = vst [vmem:[#allocation49_spill] sm:$0xff] %v10607_v50  ;;  %8323 = vrot.lane.b32.xlu1 %v10453_v39, %s9958_s9  ;;  %3524 = vmatprep.subr.mxu0 %v3301_v49  ;;  %v3297_v49 = vld [vmem:[%s18436_s1 + $0x28] sm:$0xff] }
  0xc1   : > { %8318 = vrot.lane.b32.xlu0 %v10459_v3, %s9958_s9  ;;  %3525 = vmatpush1.msra.mxu0 %v3300_v38  ;;  %s9959_s9 = smov 61   ;;  %v3296_v38 = vld [vmem:[%s18436_s1 + $0x20] sm:$0xff] }
  0xc2   : > { %v10625_v50 = vpop.permute.xlu1 %8043  ;;  %3526 = vmatprep.subr.mxu0 %v3299_v61 }
  0xc3   : > { %18746 = vst [vmem:[#allocation50_spill] sm:$0xff] %v10625_v50  ;;  %v10627_v45 = vpop.permute.xlu0 %8038  ;;  %3527 = vmatpush1.msra.mxu0 %v3298_v62  ;;  %v3295_v50 = vld [vmem:[%s18436_s1 + $0x18] sm:$0xff]  ;;  %v3294_v62 = vld [vmem:[%s18436_s1 + $0x10] sm:$0xff] }
  0xc4   : > { %18747 = vst [vmem:[#allocation51_spill] sm:$0xff] %v10627_v45  ;;  %8333 = vrot.lane.b32.xlu1 %v10277_v54, %s9959_s9  ;;  %3528 = vmatprep.subr.mxu0 %v3297_v49  ;;  %v3293_v49 = vld [vmem:[%s18436_s1 + $0x8] sm:$0xff] }
  0xc5   : > { %8328 = vrot.lane.b32.xlu0 %v10285_v56, %s9959_s9  ;;  %3529 = vmatpush1.msra.mxu0 %v3296_v38  ;;  %v3292_v38 = vld [vmem:[%s18436_s1] sm:$0xff] }
  0xc6   : > { %v10645_v45 = vpop.permute.xlu1 %8053  ;;  %3530 = vmatprep.subr.mxu0 %v3295_v50 }
  0xc7   : > { %18748 = vst [vmem:[#allocation52_spill] sm:$0xff] %v10645_v45  ;;  %v10647_v61 = vpop.permute.xlu0 %8048  ;;  %3531 = vmatpush1.msra.mxu0 %v3294_v62  ;;  %v3355_v45 = vld [vmem:[%s18436_s1 + $0x1f8] sm:$0xff]  ;;  %v3354_v62 = vld [vmem:[%s18436_s1 + $0x1f0] sm:$0xff] }
  0xc8   : > { %18749 = vst [vmem:[#allocation53_spill] sm:$0xff] %v10647_v61  ;;  %8343 = vrot.lane.b32.xlu1 %v10318_v11, %s9959_s9  ;;  %3532 = vmatprep.subr.mxu0 %v3293_v49  ;;  %v3353_v49 = vld [vmem:[%s18436_s1 + $0x1e8] sm:$0xff] }
  0xc9   : > { %8338 = vrot.lane.b32.xlu0 %v10322_v16, %s9959_s9  ;;  %3533 = vmatpush1.msra.mxu0 %v3292_v38  ;;  %v3352_v38 = vld [vmem:[%s18436_s1 + $0x1e0] sm:$0xff] }
  0xca   : > { %v10665_v61 = vpop.permute.xlu1 %8063  ;;  %3534 = vmatprep.subr.mxu0 %v3355_v45 }
  0xcb   : > { %18750 = vst [vmem:[#allocation54_spill] sm:$0xff] %v10665_v61  ;;  %v10667_v50 = vpop.permute.xlu0 %8058  ;;  %3535 = vmatpush2.msra.mxu0 %v3354_v62  ;;  %v3351_v61 = vld [vmem:[%s18436_s1 + $0x1d8] sm:$0xff]  ;;  %v3350_v62 = vld [vmem:[%s18436_s1 + $0x1d0] sm:$0xff] }
  0xcc   : > { %18751 = vst [vmem:[#allocation55_spill] sm:$0xff] %v10667_v50  ;;  %8353 = vrot.lane.b32.xlu1 %v10355_v42, %s9959_s9  ;;  %3536 = vmatprep.subr.mxu0 %v3353_v49  ;;  %v3349_v49 = vld [vmem:[%s18436_s1 + $0x1c8] sm:$0xff] }
  0xcd   : > { %8348 = vrot.lane.b32.xlu0 %v10363_v48, %s9959_s9  ;;  %3537 = vmatpush2.msra.mxu0 %v3352_v38  ;;  %v3348_v38 = vld [vmem:[%s18436_s1 + $0x1c0] sm:$0xff] }
  0xce   : > { %v10685_v50 = vpop.permute.xlu1 %8073  ;;  %3538 = vmatprep.subr.mxu0 %v3351_v61 }
  0xcf   : > { %18752 = vst [vmem:[#allocation56_spill] sm:$0xff] %v10685_v50  ;;  %v10687_v45 = vpop.permute.xlu0 %8068  ;;  %3539 = vmatpush2.msra.mxu0 %v3350_v62  ;;  %v3347_v50 = vld [vmem:[%s18436_s1 + $0x1b8] sm:$0xff]  ;;  %v3346_v62 = vld [vmem:[%s18436_s1 + $0x1b0] sm:$0xff] }
  0xd0   : > { %18753 = vst [vmem:[#allocation57_spill] sm:$0xff] %v10687_v45  ;;  %8363 = vrot.lane.b32.xlu1 %v10393_v29, %s9959_s9  ;;  %3540 = vmatprep.subr.mxu0 %v3349_v49  ;;  %v3345_v49 = vld [vmem:[%s18436_s1 + $0x1a8] sm:$0xff] }
  0xd1   : > { %8358 = vrot.lane.b32.xlu0 %v10403_v27, %s9959_s9  ;;  %3541 = vmatpush2.msra.mxu0 %v3348_v38  ;;  %v3344_v38 = vld [vmem:[%s18436_s1 + $0x1a0] sm:$0xff] }
  0xd2   : > { %v10705_v45 = vpop.permute.xlu1 %8083  ;;  %3542 = vmatprep.subr.mxu0 %v3347_v50 }
  0xd3   : > { %18754 = vst [vmem:[#allocation58_spill] sm:$0xff] %v10705_v45  ;;  %v10707_v61 = vpop.permute.xlu0 %8078  ;;  %3543 = vmatpush2.msra.mxu0 %v3346_v62  ;;  %v3343_v45 = vld [vmem:[%s18436_s1 + $0x198] sm:$0xff]  ;;  %v3342_v62 = vld [vmem:[%s18436_s1 + $0x190] sm:$0xff] }
  0xd4   : > { %18755 = vst [vmem:[#allocation59_spill] sm:$0xff] %v10707_v61  ;;  %8373 = vrot.lane.b32.xlu1 %v10427_v31, %s9959_s9  ;;  %3544 = vmatprep.subr.mxu0 %v3345_v49  ;;  %v3341_v49 = vld [vmem:[%s18436_s1 + $0x188] sm:$0xff] }
  0xd5   : > { %8368 = vrot.lane.b32.xlu0 %v10433_v34, %s9959_s9  ;;  %3545 = vmatpush2.msra.mxu0 %v3344_v38  ;;  %v3340_v38 = vld [vmem:[%s18436_s1 + $0x180] sm:$0xff] }
  0xd6   : > { %v10725_v61 = vpop.permute.xlu1 %8093  ;;  %3546 = vmatprep.subr.mxu0 %v3343_v45 }
  0xd7   : > { %18756 = vst [vmem:[#allocation60_spill] sm:$0xff] %v10725_v61  ;;  %v10727_v50 = vpop.permute.xlu0 %8088  ;;  %3547 = vmatpush2.msra.mxu0 %v3342_v62  ;;  %v3339_v61 = vld [vmem:[%s18436_s1 + $0x178] sm:$0xff]  ;;  %v3338_v62 = vld [vmem:[%s18436_s1 + $0x170] sm:$0xff] }
  0xd8   : > { %18757 = vst [vmem:[#allocation61_spill] sm:$0xff] %v10727_v50  ;;  %8383 = vrot.lane.b32.xlu1 %v10453_v39, %s9959_s9  ;;  %3548 = vmatprep.subr.mxu0 %v3341_v49  ;;  %v3337_v49 = vld [vmem:[%s18436_s1 + $0x168] sm:$0xff] }
  0xd9   : > { %8378 = vrot.lane.b32.xlu0 %v10459_v3, %s9959_s9  ;;  %3549 = vmatpush2.msra.mxu0 %v3340_v38  ;;  %s9960_s9 = smov 84   ;;  %v3336_v38 = vld [vmem:[%s18436_s1 + $0x160] sm:$0xff] }
  0xda   : > { %v10745_v50 = vpop.permute.xlu1 %8103  ;;  %3550 = vmatprep.subr.mxu0 %v3339_v61  ;;  %v3335_v61 = vld [vmem:[%s18436_s1 + $0x158] sm:$0xff] }
  0xdb   : > { %v10747_v45 = vpop.permute.xlu0 %8098  ;;  %3551 = vmatpush2.msra.mxu0 %v3338_v62  ;;  %v3334_v62 = vld [vmem:[%s18436_s1 + $0x150] sm:$0xff] }
  0xdc   : > { %18758 = vst [vmem:[#allocation62_spill] sm:$0xff] %v10747_v45  ;;  %8393 = vrot.lane.b32.xlu1 %v10277_v54, %s9960_s9  ;;  %3552 = vmatprep.subr.mxu0 %v3337_v49  ;;  %v3333_v49 = vld [vmem:[%s18436_s1 + $0x148] sm:$0xff] }
  0xdd   : > { %8388 = vrot.lane.b32.xlu0 %v10285_v56, %s9960_s9  ;;  %3553 = vmatpush2.msra.mxu0 %v3336_v38  ;;  %v3332_v38 = vld [vmem:[%s18436_s1 + $0x140] sm:$0xff] }
  0xde   : > { %v10765_v45 = vpop.permute.xlu1 %8113  ;;  %3554 = vmatprep.subr.mxu0 %v3335_v61 }
  0xdf   : > { %v10767_v54 = vpop.permute.xlu0 %8108  ;;  %3555 = vmatpush2.msra.mxu0 %v3334_v62  ;;  %v3329_v62 = vld [vmem:[%s18436_s1 + $0x128] sm:$0xff] }
  0xe0   : > { %8403 = vrot.lane.b32.xlu1 %v10318_v11, %s9960_s9  ;;  %3556 = vmatprep.subr.mxu0 %v3333_v49  ;;  %v3331_v11 = vld [vmem:[%s18436_s1 + $0x138] sm:$0xff]  ;;  %v3328_v49 = vld [vmem:[%s18436_s1 + $0x120] sm:$0xff] }
  0xe1   : > { %8398 = vrot.lane.b32.xlu0 %v10322_v16, %s9960_s9  ;;  %3557 = vmatpush2.msra.mxu0 %v3332_v38  ;;  %v3330_v16 = vld [vmem:[%s18436_s1 + $0x130] sm:$0xff] }
  0xe2   : > { %v10785_v56 = vpop.permute.xlu1 %8123  ;;  %3558 = vmatprep.subr.mxu0 %v3331_v11 }
  0xe3   : > { %18759 = vst [vmem:[#allocation63_spill] sm:$0xff] %v10785_v56  ;;  %v10787_v61 = vpop.permute.xlu0 %8118  ;;  %3559 = vmatpush2.msra.mxu0 %v3330_v16  ;;  %v1060_v16 = vrot.slane %v10098_v0, 2  ;;  %v3327_v56 = vld [vmem:[%s18436_s1 + $0x118] sm:$0xff]  ;;  %v3325_v0 = vld [vmem:[%s18436_s1 + $0x108] sm:$0xff] }
  0xe4   : > { %18760 = vst [vmem:[#allocation64_spill] sm:$0xff] %v10787_v61  ;;  %8413 = vrot.lane.b32.xlu1 %v10355_v42, %s9960_s9  ;;  %3560 = vmatprep.subr.mxu0 %v3329_v62  ;;  %v1055_v42 = vrot.slane %v10124_v8, 2  ;;  %v1057_v61 = vrot.slane %v10235_v36, 2  ;;  %v3326_v8 = vld [vmem:[%s18436_s1 + $0x110] sm:$0xff]  ;;  %v1066_v62 = vrot.slane %v10114_v5, 2 }
  0xe5   : > { %8408 = vrot.lane.b32.xlu0 %v10363_v48, %s9960_s9  ;;  %v1059_v48 = vrot.slane %v10127_v9, 2  ;;  %3561 = vmatpush2.msra.mxu0 %v3328_v49  ;;  %v3324_v9 = vld [vmem:[%s18436_s1 + $0x100] sm:$0xff]  ;;  %v1067_v49 = vrot.slane %v10117_v6, 2 }
  0xe6   : > { %v10805_v38 = vpop.permute.xlu1 %8133  ;;  %3562 = vmatprep.subr.mxu0 %v3327_v56  ;;  %v1052_v56 = vrot.slane %v10104_v2, 2  ;;  %v1062_v2 = vrot.slane %v10101_v1, 2  ;;  %v1074_v1 = vrot.slane %v10140_v12, 2 }
  0xe7   : > { %18761 = vst [vmem:[#allocation65_spill] sm:$0xff] %v10805_v38  ;;  %v10807_v11 = vpop.permute.xlu0 %8128  ;;  %3563 = vmatpush2.msra.mxu0 %v3326_v8  ;;  %v1061_v38 = vsel %vm18648_vm1, %v1059_v48, %v1060_v16 }
  0xe8   : > { %18762 = vst [vmem:[#allocation66_spill] sm:$0xff] %v10807_v11  ;;  %8423 = vrot.lane.b32.xlu1 %v10393_v29, %s9960_s9  ;;  %v1053_v29 = vrot.slane %v10111_v4, 2  ;;  %3564 = vmatprep.subr.mxu0 %v3325_v0  ;;  %v1069_v11 = vrot.slane %v10146_v14, 2  ;;  %v1064_v4 = vrot.slane %v10248_v43, 2  ;;  %v1068_v14 = vsel %vm18648_vm1, %v1066_v62, %v1067_v49 }
  0xe9   : > { %8418 = vrot.lane.b32.xlu0 %v10403_v27, %s9960_s9  ;;  %v1058_v27 = vsel %vm18648_vm1, %v1055_v42, %v1057_v61  ;;  %3565 = vmatpush2.msra.mxu0 %v3324_v9  ;;  %v1076_v43 = vrot.slane %v10143_v13, 2 }
  0xea   : > { %v10829_v36 = vpop.permute.xlu1 %8143  ;;  %v10848_v6 = vpack.i.bf16 %v1061_v38, %v1058_v27  ;;  %v1054_v61 = vsel %vm18648_vm1, %v1052_v56, %v1053_v29  ;;  %v1056_v48 = vsel %vm18648_vm1, %v1053_v29, %v1055_v42  ;;  %v1070_v9 = vsel %vm18648_vm1, %v1067_v49, %v1069_v11 }
  0xeb   : > { %18763 = vst [vmem:[#allocation67_spill] sm:$0xff] %v10829_v36  ;;  %v10835_v8 = vpop.permute.xlu0 %8138  ;;  %v1063_v27 = vsel %vm18648_vm1, %v1060_v16, %v1062_v2  ;;  %v1065_v38 = vsel %vm18648_vm1, %v1062_v2, %v1064_v4  ;;  %v1071_v42 = vrot.slane %v10280_v55, 2  ;;  %v1073_v56 = vrot.slane %v10149_v15, 2 }
  0xec   : > { %18764 = vst [vmem:[#allocation68_spill] sm:$0xff] %v10835_v8  ;;  %8433 = vrot.lane.b32.xlu1 %v10427_v31, %s9960_s9  ;;  %v10867_v29 = vpack.i.bf16 %v1056_v48, %v1054_v61  ;;  %v1077_v16 = vsel %vm18648_vm1, %v1074_v1, %v1076_v43  ;;  %v1085_v49 = vrot.slane %v10312_v10, 2  ;;  %v1087_v2 = vrot.slane %v10162_v19, 2  ;;  %v11085_v8 = vld [vmem:[%s10095_s17 + $0x68] sm:$0xff] }
  0xed   : > { %8428 = vrot.lane.b32.xlu0 %v10433_v34, %s9960_s9  ;;  %v1078_v34 = vrot.slane %v10273_v53, 2  ;;  %v10873_v53 = vpack.i.bf16 %v1070_v9, %v1068_v14  ;;  %v1072_v15 = vsel %vm18648_vm1, %v1069_v11, %v1071_v42  ;;  %v1075_v55 = vsel %vm18648_vm1, %v1073_v56, %v1074_v1  ;;  %18792 = vst [vmem:[#allocation96_spill] sm:$0xff] %v11085_v8 }
  0xee   : > { %v10846_v5 = vpop.permute.xlu1 %8153  ;;  %v1088_v4 = vrot.slane %v10183_v26, 2  ;;  %v1080_v61 = vrot.slane %v10165_v20, 2  ;;  %v1081_v48 = vrot.slane %v10168_v21, 2  ;;  %v1094_v26 = vrot.slane %v10177_v24, 2 }
  0xef   : > { %18765 = vst [vmem:[#allocation69_spill] sm:$0xff] %v10846_v5  ;;  %v10853_v0 = vpop.permute.xlu0 %8148  ;;  %v1079_v62 = vsel %vm18648_vm1, %v1076_v43, %v1078_v34  ;;  %v1095_v20 = vrot.slane %v10180_v25, 2  ;;  %v1097_v43 = vrot.slane %v10201_v32, 2  ;;  %v1092_v25 = vrot.slane %v10349_v41, 2 }
  0xf0   : > { %18766 = vst [vmem:[#allocation70_spill] sm:$0xff] %v10853_v0  ;;  %8443 = vrot.lane.b32.xlu1 %v10453_v39, %s9960_s9  ;;  %v10875_v39 = vpack.i.bf16 %v1065_v38, %v1063_v27  ;;  %v10895_v9 = vpack.i.bf16 %v1079_v62, %v1077_v16  ;;  %v1089_v21 = vsel %vm18648_vm1, %v1087_v2, %v1088_v4  ;;  %v10913_v27 = vld [vmem:[%s10095_s17 + $0xb0] sm:$0xff]  ;;  %v10930_v62 = vld [vmem:[%s10095_s17 + $0xe8] sm:$0xff]  ;;  %v7951_v0 = vunpack.i.h.bf16 %v10489_v17 }
  0xf1   : > { %8438 = vrot.lane.b32.xlu0 %v10459_v3, %s9960_s9  ;;  %v1083_v3 = vrot.slane %v10159_v18, 2  ;;  %v10899_v18 = vpack.i.bf16 %v1075_v55, %v1072_v15  ;;  %v1082_v10 = vsel %vm18648_vm1, %v1080_v61, %v1081_v48  ;;  %18772 = vst [vmem:[#allocation76_spill] sm:$0xff] %v10913_v27  ;;  %v1090_v24 = vrot.slane %v10913_v27, 2  ;;  %18774 = vst [vmem:[#allocation78_spill] sm:$0xff] %v10930_v62  ;;  %v10934_v15 = vld [vmem:[%s10095_s17 + $0xf0] sm:$0xff]  ;;  %s9962_s9 = smov 7  }
  0xf2   : > { %v10869_v12 = vpop.permute.xlu1 %8163  ;;  %v1096_v32 = vsel %vm18648_vm1, %v1094_v26, %v1095_v20  ;;  %v1098_v16 = vsel %vm18648_vm1, %v1095_v20, %v1097_v43  ;;  %v1102_v41 = vrot.slane %v10930_v62, 2  ;;  %18775 = vst [vmem:[#allocation79_spill] sm:$0xff] %v10934_v15  ;;  %v1104_v55 = vrot.slane %v10934_v15, 2 }
  0xf3   : > { %18767 = vst [vmem:[#allocation71_spill] sm:$0xff] %v10869_v12  ;;  %v10871_v13 = vpop.permute.xlu0 %8158  ;;  %v1086_v19 = vsel %vm18648_vm1, %v1083_v3, %v1085_v49  ;;  %v1084_v1 = vsel %vm18648_vm1, %v1081_v48, %v1083_v3  ;;  %v1106_v3 = vrot.slane %v10384_v37, 2  ;;  %v1091_v2 = vsel %vm18648_vm1, %v1088_v4, %v1090_v24 }
  0xf4   : > { %18768 = vst [vmem:[#allocation72_spill] sm:$0xff] %v10871_v13  ;;  %8453 = vrot.lane.b32.xlu1 %v10848_v6, %s18640_s20  ;;  %v10921_v42 = vpack.i.bf16 %v1089_v21, %v1086_v19  ;;  %v10923_v56 = vpack.i.bf16 %v1084_v1, %v1082_v10  ;;  %v1093_v61 = vsel %vm18648_vm1, %v1090_v24, %v1092_v25  ;;  %v1099_v48 = vrot.slane %v10387_v28, 2  ;;  %v10944_v19 = vld [vmem:[%s10095_s17 + $0xe0] sm:$0xff] }
  0xf5   : > { %8448 = vrot.lane.b32.xlu0 %v10867_v29, %s18640_s20  ;;  %18777 = vst [vmem:[#allocation81_spill] sm:$0xff] %v10944_v19  ;;  %v1101_v26 = vrot.slane %v10944_v19, 2  ;;  %v10951_v21 = vpack.i.bf16 %v1098_v16, %v1096_v32  ;;  %v10955_v37 = vpack.i.bf16 %v1093_v61, %v1091_v2  ;;  %v1105_v4 = vsel %vm18648_vm1, %v1102_v41, %v1104_v55  ;;  %v11092_v13 = vld [vmem:[%s10095_s17 + $0x60] sm:$0xff] }
  0xf6   : > { %v10891_v14 = vpop.permute.xlu1 %8173  ;;  %v1107_v28 = vsel %vm18648_vm1, %v1104_v55, %v1106_v3  ;;  %v1100_v1 = vsel %vm18648_vm1, %v1097_v43, %v1099_v48  ;;  %v7921_v3 = vunpack.i.h.bf16 %v10461_v58  ;;  %v7920_v61 = vunpack.i.l.bf16 %v10461_v58  ;;  %v11004_v58 = vld [vmem:[%s10095_s17 + $0x30] sm:$0xff]  ;;  %18793 = vst [vmem:[#allocation97_spill] sm:$0xff] %v11092_v13 }
  0xf7   : > { %18769 = vst [vmem:[#allocation73_spill] sm:$0xff] %v10891_v14  ;;  %v10893_v11 = vpop.permute.xlu0 %8168  ;;  %v1103_v24 = vsel %vm18648_vm1, %v1101_v26, %v1102_v41  ;;  %v10967_v32 = vpack.i.bf16 %v1107_v28, %v1105_v4  ;;  %v7911_v26 = vunpack.i.h.bf16 %v10463_v59  ;;  %v7910_v28 = vunpack.i.l.bf16 %v10463_v59  ;;  %18787 = vst [vmem:[#allocation91_spill] sm:$0xff] %v11004_v58  ;;  %v11011_v59 = vld [vmem:[%s10095_s17 + $0x28] sm:$0xff]  ;;  %v11078_v14 = vld [vmem:[%s10095_s17 + $0x70] sm:$0xff] }
  0xf8   : > { %18770 = vst [vmem:[#allocation74_spill] sm:$0xff] %v10893_v11  ;;  %8463 = vrot.lane.b32.xlu1 %v10873_v53, %s18640_s20  ;;  %v10971_v16 = vpack.i.bf16 %v1103_v24, %v1100_v1  ;;  %v7926_v1 = vunpack.i.h.bf16 %v10469_v63  ;;  %v7925_v24 = vunpack.i.l.bf16 %v10469_v63  ;;  %v11008_v31 = vsel %vm1597_vm2, %v11004_v58, %v7921_v3  ;;  %18791 = vst [vmem:[#allocation95_spill] sm:$0xff] %v11078_v14 }
  0xf9   : > { %8458 = vrot.lane.b32.xlu0 %v10875_v39, %s18640_s20  ;;  %v11015_v63 = vsel %vm1597_vm2, %v11011_v59, %v7920_v61  ;;  %v7936_v3 = vunpack.i.h.bf16 %v10475_v33  ;;  %v7931_v61 = vunpack.i.h.bf16 %v10477_v23  ;;  %v7940_v11 = vunpack.i.l.bf16 %v10483_v51 }
  0xfa   : > { %v10910_v34 = vpop.permute.xlu1 %8183  ;;  %v7956_v12 = vunpack.i.h.bf16 %v10487_v47  ;;  %v7950_v5 = vunpack.i.l.bf16 %v10489_v17  ;;  %v7961_v58 = vunpack.i.h.bf16 %v10495_v44  ;;  %vm1922_vm1 = vcmask 654336  }
  0xfb   : > { %18771 = vst [vmem:[#allocation75_spill] sm:$0xff] %v10910_v34  ;;  %v10917_v38 = vpop.permute.xlu0 %8178 }
  0xfc   : > { %18773 = vst [vmem:[#allocation77_spill] sm:$0xff] %v10917_v38  ;;  %8473 = vrot.lane.b32.xlu1 %v10895_v9, %s18640_s20  ;;  %v11069_v38 = vld [vmem:[%s10095_s17 + $0x10] sm:$0xff] }
  0xfd   : > { %8468 = vrot.lane.b32.xlu0 %v10899_v18, %s18640_s20 }
  0xfe   : > { %v10938_v49 = vpop.permute.xlu1 %8193 }
  0xff   : > { %18776 = vst [vmem:[#allocation80_spill] sm:$0xff] %v10938_v49  ;;  %v10947_v20 = vpop.permute.xlu0 %8188  ;;  %v7945_v49 = vunpack.i.l.bf16 %v10481_v40 }
 0x100   : > { %18778 = vst [vmem:[#allocation82_spill] sm:$0xff] %v10947_v20  ;;  %8483 = vrot.lane.b32.xlu1 %v10921_v42, %s18640_s20  ;;  %v11048_v20 = vld [vmem:[%s10095_s17 + $0x40] sm:$0xff] }
 0x101   : > { %8478 = vrot.lane.b32.xlu0 %v10923_v56, %s18640_s20 }
 0x102   : > { %v10959_v10 = vpop.permute.xlu1 %8203 }
 0x103   : > { %18779 = vst [vmem:[#allocation83_spill] sm:$0xff] %v10959_v10  ;;  %v10963_v25 = vpop.permute.xlu0 %8198  ;;  %v11034_v10 = vld [vmem:[%s10095_s17] sm:$0xff] }
 0x104   : > { %18780 = vst [vmem:[#allocation84_spill] sm:$0xff] %v10963_v25  ;;  %8493 = vrot.lane.b32.xlu1 %v10951_v21, %s18640_s20  ;;  %v7935_v25 = vunpack.i.l.bf16 %v10475_v33  ;;  %v11052_v33 = vsel %vm1597_vm2, %v11048_v20, %v7925_v24 }
 0x105   : > { %8488 = vrot.lane.b32.xlu0 %v10955_v37, %s18640_s20 }
 0x106   : > { %v10973_v2 = vpop.permute.xlu1 %8213 }
 0x107   : > { %18781 = vst [vmem:[#allocation85_spill] sm:$0xff] %v10973_v2  ;;  %v10975_v55 = vpop.permute.xlu0 %8208 }
 0x108   : > { %18782 = vst [vmem:[#allocation86_spill] sm:$0xff] %v10975_v55  ;;  %8503 = vrot.lane.b32.xlu1 %v10967_v32, %s18640_s20 }
 0x109   : > { %8498 = vrot.lane.b32.xlu0 %v10971_v16, %s18640_s20  ;;  %s9974_s20 = smov 37  }
 0x10a   : > { %v10981_v43 = vpop.permute.xlu1 %8223 }
 0x10b   : > { %18783 = vst [vmem:[#allocation87_spill] sm:$0xff] %v10981_v43  ;;  %v10983_v41 = vpop.permute.xlu0 %8218 }
 0x10c   : > { %18784 = vst [vmem:[#allocation88_spill] sm:$0xff] %v10983_v41  ;;  %8513 = vrot.lane.b32.xlu1 %v10848_v6, %s9962_s9  ;;  %v11022_v41 = vld [vmem:[%s10095_s17 + $0x8] sm:$0xff] }
 0x10d   : > { %8508 = vrot.lane.b32.xlu0 %v10867_v29, %s9962_s9  ;;  %v11026_v2 = vsel %vm1597_vm2, %v11022_v41, %v7911_v26 }
 0x10e   : > { %v10991_v48 = vpop.permute.xlu1 %8233 }
 0x10f   : > { %18785 = vst [vmem:[#allocation89_spill] sm:$0xff] %v10991_v48  ;;  %v10994_v4 = vpop.permute.xlu0 %8228  ;;  %v7915_v48 = vunpack.i.l.bf16 %v10471_v22 }
 0x110   : > { %18786 = vst [vmem:[#allocation90_spill] sm:$0xff] %v10994_v4  ;;  %8523 = vrot.lane.b32.xlu1 %v10873_v53, %s9962_s9  ;;  %v7916_v4 = vunpack.i.h.bf16 %v10471_v22  ;;  %v11038_v22 = vsel %vm1597_vm2, %v11034_v10, %v7910_v28  ;;  %v7930_v28 = vunpack.i.l.bf16 %v10477_v23  ;;  %v7941_v23 = vunpack.i.h.bf16 %v10483_v51 }
 0x111   : > { %8518 = vrot.lane.b32.xlu0 %v10875_v39, %s9962_s9  ;;  %v1600_v34 = vsel %vm1597_vm2, %v11069_v38, %v7915_v48  ;;  %v11089_v48 = vsel %vm1597_vm2, %v11085_v8, %v7935_v25  ;;  %v11096_v51 = vsel %vm1597_vm2, %v11092_v13, %v7931_v61  ;;  %v11107_v25 = vld [vmem:[%s10095_s17 + $0x50] sm:$0xff]  ;;  %v11114_v13 = vld [vmem:[%s10095_s17 + $0xa0] sm:$0xff] }
 0x112   : > { %v11019_v43 = vpop.permute.xlu1 %8243  ;;  %18795 = vst [vmem:[#allocation99_spill] sm:$0xff] %v11107_v25  ;;  %v11111_v61 = vsel %vm1597_vm2, %v11107_v25, %v7930_v28  ;;  %18796 = vst [vmem:[#allocation100_spill] sm:$0xff] %v11114_v13  ;;  %v11130_v28 = vld [vmem:[%s10095_s17 + $0x88] sm:$0xff]  ;;  %v11137_v8 = vld [vmem:[%s10095_s17 + $0x80] sm:$0xff]  ;;  %v7960_v25 = vunpack.i.l.bf16 %v10495_v44 }
 0x113   : > { %18788 = vst [vmem:[#allocation92_spill] sm:$0xff] %v11019_v43  ;;  %v11031_v55 = vpop.permute.xlu0 %8238  ;;  %v11041_v43 = vld [vmem:[%s10095_s17 + $0x48] sm:$0xff]  ;;  %18798 = vst [vmem:[#allocation102_spill] sm:$0xff] %v11130_v28 }
 0x114   : > { %18789 = vst [vmem:[#allocation93_spill] sm:$0xff] %v11031_v55  ;;  %v11045_v26 = vsel %vm1597_vm2, %v11041_v43, %v7926_v1  ;;  %8533 = vrot.lane.b32.xlu1 %v10895_v9, %s9962_s9  ;;  %v7946_v55 = vunpack.i.h.bf16 %v10481_v40  ;;  %v11062_v1 = vld [vmem:[%s10095_s17 + $0x20] sm:$0xff]  ;;  %18799 = vst [vmem:[#allocation103_spill] sm:$0xff] %v11137_v8  ;;  %v11170_v44 = vld [vmem:[%s10095_s17 + $0xa8] sm:$0xff] }
 0x115   : > { %8528 = vrot.lane.b32.xlu0 %v10899_v18, %s9962_s9  ;;  %v11066_v24 = vsel %vm1597_vm2, %v11062_v1, %v7916_v4  ;;  %v11082_v4 = vsel %vm1597_vm2, %v11078_v14, %v7936_v3  ;;  %v7955_v3 = vunpack.i.l.bf16 %v10487_v47  ;;  %v11121_v47 = vld [vmem:[%s10095_s17 + $0x90] sm:$0xff]  ;;  %v11134_v14 = vsel %vm1597_vm2, %v11130_v28, %v7941_v23  ;;  %v11152_v23 = vld [vmem:[%s10095_s17 + $0xc8] sm:$0xff]  ;;  %18804 = vst [vmem:[#allocation108_spill] sm:$0xff] %v11170_v44 }
 0x116   : > { %v11075_v40 = vpop.permute.xlu1 %8253  ;;  %18797 = vst [vmem:[#allocation101_spill] sm:$0xff] %v11121_v47  ;;  %v11125_v17 = vsel %vm1597_vm2, %v11121_v47, %v7945_v49  ;;  %v7965_v49 = vunpack.i.l.bf16 %v10493_v30  ;;  %18802 = vst [vmem:[#allocation106_spill] sm:$0xff] %v11152_v23  ;;  %v11156_v28 = vsel %vm1597_vm2, %v11152_v23, %v7956_v12  ;;  %v7976_v12 = vunpack.i.h.bf16 %v10499_v7 }
 0x117   : > { %18790 = vst [vmem:[#allocation94_spill] sm:$0xff] %v11075_v40  ;;  %v11098_v40 = vpop.permute.xlu0 %8248  ;;  %v7975_v23 = vunpack.i.l.bf16 %v10499_v7  ;;  %v11196_v7 = vsel %vm1597_vm2, %v10944_v19, %v7961_v58 }
 0x118   : > { %18794 = vst [vmem:[#allocation98_spill] sm:$0xff] %v11098_v40  ;;  %8543 = vrot.lane.b32.xlu1 %v10921_v42, %s9962_s9  ;;  %v11118_v40 = vsel %vm1597_vm2, %v11114_v13, %v7946_v55  ;;  %v11141_v55 = vsel %vm1597_vm2, %v11137_v8, %v7940_v11  ;;  %v7966_v13 = vunpack.i.h.bf16 %v10493_v30  ;;  %v11159_v11 = vld [vmem:[%s10095_s17 + $0xc0] sm:$0xff]  ;;  %v11199_v8 = vld [vmem:[%s10095_s17 + $0xd0] sm:$0xff] }
 0x119   : > { %8538 = vrot.lane.b32.xlu0 %v10923_v56, %s9962_s9  ;;  %18803 = vst [vmem:[#allocation107_spill] sm:$0xff] %v11159_v11  ;;  %v11163_v30 = vsel %vm1597_vm2, %v11159_v11, %v7955_v3  ;;  %v7971_v3 = vunpack.i.h.bf16 %v10501_v35  ;;  %v7970_v11 = vunpack.i.l.bf16 %v10501_v35  ;;  %v11203_v35 = vsel %vm1597_vm2, %v11199_v8, %v7960_v25 }
 0x11a   : > { %v11145_v47 = vpop.permute.xlu1 %8263  ;;  %v11214_v58 = vsel %vm1622_vm3, %v1600_v34, %v7975_v23  ;;  %v11218_v25 = vsel %vm1622_vm3, %v11066_v24, %v7976_v12  ;;  %v7995_v34 = vunpack.i.l.bf16 %v10522_v46  ;;  %v7991_v23 = vunpack.i.h.bf16 %v10527_v52 }
 0x11b   : > { %18800 = vst [vmem:[#allocation104_spill] sm:$0xff] %v11145_v47  ;;  %v11149_v36 = vpop.permute.xlu0 %8258  ;;  %v11167_v47 = vsel %vm1597_vm2, %v10913_v27, %v7951_v0  ;;  %v11186_v0 = vsel %vm1597_vm2, %v10934_v15, %v7966_v13  ;;  %v7985_v13 = vunpack.i.l.bf16 %v10505_v60  ;;  %v11222_v19 = vsel %vm1622_vm3, %v11038_v22, %v7970_v11 }
 0x11c   : > { %18801 = vst [vmem:[#allocation105_spill] sm:$0xff] %v11149_v36  ;;  %v11174_v36 = vsel %vm1597_vm2, %v11170_v44, %v7950_v5  ;;  %8553 = vrot.lane.b32.xlu1 %v10951_v21, %s9962_s9  ;;  %v11190_v5 = vsel %vm1597_vm2, %v10930_v62, %v7965_v49  ;;  %v7986_v44 = vunpack.i.h.bf16 %v10505_v60  ;;  %v7981_v49 = vunpack.i.h.bf16 %v10507_v57 }
 0x11d   : > { %8548 = vrot.lane.b32.xlu0 %v10955_v37, %s9962_s9  ;;  %v11226_v60 = vsel %vm1622_vm3, %v11026_v2, %v7971_v3  ;;  %v7990_v24 = vunpack.i.l.bf16 %v10527_v52  ;;  %v11242_v2 = vsel %vm1622_vm3, %v11052_v33, %v7985_v13  ;;  %v18809_v52 = vld [vmem:[#allocation42_spill] sm:$0xff]  ;;  %v11276_v13 = vsel %vm1622_vm3, %v11096_v51, %v7991_v23 }
 0x11e   : > { %v11192_v27 = vpop.permute.xlu1 %8273  ;;  %v11238_v22 = vsel %vm1622_vm3, %v11045_v26, %v7986_v44  ;;  %v11248_v3 = vsel %vm1622_vm3, %v11008_v31, %v7981_v49  ;;  %v18810_v26 = vld [vmem:[#allocation43_spill] sm:$0xff] }
 0x11f   : > { %18805 = vst [vmem:[#allocation109_spill] sm:$0xff] %v11192_v27  ;;  %v11207_v15 = vpop.permute.xlu0 %8268  ;;  %v7980_v27 = vunpack.i.l.bf16 %v10507_v57  ;;  %v7996_v57 = vunpack.i.h.bf16 %v10522_v46  ;;  %v8001_v33 = vunpack.i.h.bf16 %v18810_v26  ;;  %v8000_v44 = vunpack.i.l.bf16 %v18810_v26 }
 0x120   : > { %18806 = vst [vmem:[#allocation110_spill] sm:$0xff] %v11207_v15  ;;  %8563 = vrot.lane.b32.xlu1 %v10967_v32, %s9962_s9  ;;  %v8005_v15 = vunpack.i.l.bf16 %v18809_v52 }
 0x121   : > { %8558 = vrot.lane.b32.xlu0 %v10971_v16, %s9962_s9  ;;  %v11252_v46 = vsel %vm1622_vm3, %v11015_v63, %v7980_v27  ;;  %v11264_v31 = vsel %vm1622_vm3, %v11082_v4, %v7996_v57  ;;  %v11268_v27 = vsel %vm1622_vm3, %v11089_v48, %v7995_v34  ;;  %v11272_v63 = vsel %vm1622_vm3, %v11111_v61, %v7990_v24  ;;  %v18813_v4 = vld [vmem:[#allocation45_spill] sm:$0xff]  ;;  %v18815_v24 = vld [vmem:[#allocation46_spill] sm:$0xff]  ;;  %s9969_s9 = smov 68  }
 0x122   : > { %v11234_v12 = vpop.permute.xlu1 %8283  ;;  %v8011_v57 = vunpack.i.h.bf16 %v18813_v4  ;;  %v8010_v62 = vunpack.i.l.bf16 %v18813_v4  ;;  %v11292_v51 = vsel %vm1622_vm3, %v11125_v17, %v8005_v15  ;;  %v11298_v34 = vsel %vm1622_vm3, %v11141_v55, %v8000_v44  ;;  %v18816_v15 = vld [vmem:[#allocation47_spill] sm:$0xff] }
 0x123   : > { %18807 = vst [vmem:[#allocation111_spill] sm:$0xff] %v11234_v12  ;;  %v11244_v11 = vpop.permute.xlu0 %8278  ;;  %v8006_v12 = vunpack.i.h.bf16 %v18809_v52  ;;  %v18812_v52 = vld [vmem:[#allocation44_spill] sm:$0xff]  ;;  %v11302_v23 = vsel %vm1622_vm3, %v11134_v14, %v8001_v33  ;;  %v8021_v17 = vunpack.i.h.bf16 %v18816_v15 }
 0x124   : > { %18808 = vst [vmem:[#allocation112_spill] sm:$0xff] %v11244_v11  ;;  %8573 = vrot.lane.b32.xlu1 %v10848_v6, %s9963_s21  ;;  %v8016_v26 = vunpack.i.h.bf16 %v18812_v52  ;;  %v8015_v11 = vunpack.i.l.bf16 %v18812_v52  ;;  %v8026_v52 = vunpack.i.h.bf16 %v18815_v24  ;;  %v11322_v33 = vsel %vm1622_vm3, %v11174_v36, %v8010_v62 }
 0x125   : > { %8568 = vrot.lane.b32.xlu0 %v10867_v29, %s9963_s21  ;;  %v11288_v61 = vsel %vm1622_vm3, %v11118_v40, %v8006_v12  ;;  %v8025_v40 = vunpack.i.l.bf16 %v18815_v24  ;;  %v8020_v12 = vunpack.i.l.bf16 %v18816_v15  ;;  %v11326_v44 = vsel %vm1622_vm3, %v11167_v47, %v8011_v57  ;;  %v18819_v15 = vld [vmem:[#allocation48_spill] sm:$0xff] }
 0x126   : > { %v11278_v49 = vpop.permute.xlu1 %8293  ;;  %v11314_v55 = vsel %vm1622_vm3, %v11156_v28, %v8016_v26  ;;  %v11318_v14 = vsel %vm1622_vm3, %v11163_v30, %v8015_v11  ;;  %v18820_v28 = vld [vmem:[#allocation49_spill] sm:$0xff]  ;;  %v11338_v36 = vsel %vm1622_vm3, %v11186_v0, %v8026_v52  ;;  %v11352_v30 = vsel %vm1622_vm3, %v11196_v7, %v8021_v17  ;;  %v18821_v11 = vld [vmem:[#allocation50_spill] sm:$0xff] }
 0x127   : > { %18811 = vst [vmem:[#allocation42_spill] sm:$0xff] %v11278_v49  ;;  %v11284_v48 = vpop.permute.xlu0 %8288  ;;  %v8035_v49 = vunpack.i.l.bf16 %v18819_v15  ;;  %v8031_v26 = vunpack.i.h.bf16 %v18820_v28  ;;  %v11342_v62 = vsel %vm1622_vm3, %v11190_v5, %v8025_v40  ;;  %v11348_v47 = vsel %vm1622_vm3, %v11203_v35, %v8020_v12 }
 0x128   : > { %18814 = vst [vmem:[#allocation43_spill] sm:$0xff] %v11284_v48  ;;  %8583 = vrot.lane.b32.xlu1 %v10873_v53, %s9963_s21  ;;  %v8030_v48 = vunpack.i.l.bf16 %v18820_v28  ;;  %v8046_v57 = vunpack.i.h.bf16 %v18821_v11  ;;  %v8045_v0 = vunpack.i.l.bf16 %v18821_v11  ;;  %v18825_v11 = vld [vmem:[#allocation52_spill] sm:$0xff] }
 0x129   : > { %8578 = vrot.lane.b32.xlu0 %v10875_v39, %s9963_s21  ;;  %v11370_v7 = vsel %vm1647_vm4, %v11226_v60, %v8031_v26  ;;  %v11374_v17 = vsel %vm1647_vm4, %v11214_v58, %v8035_v49  ;;  %v18828_v49 = vld [vmem:[#allocation54_spill] sm:$0xff] }
 0x12a   : > { %v11310_v4 = vpop.permute.xlu1 %8303  ;;  %v11366_v35 = vsel %vm1647_vm4, %v11222_v19, %v8030_v48  ;;  %v11390_v58 = vsel %vm1647_vm4, %v11242_v2, %v8045_v0  ;;  %v8066_v48 = vunpack.i.h.bf16 %v18828_v49  ;;  %v18830_v2 = vld [vmem:[#allocation55_spill] sm:$0xff] }
 0x12b   : > { %18817 = vst [vmem:[#allocation44_spill] sm:$0xff] %v11310_v4  ;;  %v11328_v24 = vpop.permute.xlu0 %8298  ;;  %v8036_v4 = vunpack.i.h.bf16 %v18819_v15  ;;  %v18823_v15 = vld [vmem:[#allocation51_spill] sm:$0xff]  ;;  %v8061_v0 = vunpack.i.h.bf16 %v18830_v2 }
 0x12c   : > { %18818 = vst [vmem:[#allocation45_spill] sm:$0xff] %v11328_v24  ;;  %8593 = vrot.lane.b32.xlu1 %v10895_v9, %s9963_s21  ;;  %v8041_v5 = vunpack.i.h.bf16 %v18823_v15  ;;  %v8040_v40 = vunpack.i.l.bf16 %v18823_v15  ;;  %v8056_v15 = vunpack.i.h.bf16 %v18825_v11 }
 0x12d   : > { %8588 = vrot.lane.b32.xlu0 %v10899_v18, %s9963_s21  ;;  %v11378_v12 = vsel %vm1647_vm4, %v11218_v25, %v8036_v4  ;;  %v11394_v25 = vsel %vm1647_vm4, %v11238_v22, %v8046_v57  ;;  %v8065_v4 = vunpack.i.l.bf16 %v18828_v49 }
 0x12e   : > { %v11356_v52 = vpop.permute.xlu1 %8313  ;;  %v11428_v57 = vsel %vm1647_vm4, %v11264_v31, %v8056_v15  ;;  %v11444_v31 = vsel %vm1647_vm4, %v11288_v61, %v8066_v48 }
 0x12f   : > { %18822 = vst [vmem:[#allocation46_spill] sm:$0xff] %v11356_v52  ;;  %v11360_v28 = vpop.permute.xlu0 %8308  ;;  %v18826_v52 = vld [vmem:[#allocation53_spill] sm:$0xff] }
 0x130   : > { %18824 = vst [vmem:[#allocation47_spill] sm:$0xff] %v11360_v28  ;;  %8603 = vrot.lane.b32.xlu1 %v10921_v42, %s9963_s21  ;;  %v8055_v28 = vunpack.i.l.bf16 %v18825_v11  ;;  %v8051_v24 = vunpack.i.h.bf16 %v18826_v52  ;;  %v8050_v19 = vunpack.i.l.bf16 %v18826_v52  ;;  %v11402_v52 = vsel %vm1647_vm4, %v11252_v46, %v8040_v40 }
 0x131   : > { %8598 = vrot.lane.b32.xlu0 %v10923_v56, %s9963_s21  ;;  %v11406_v11 = vsel %vm1647_vm4, %v11248_v3, %v8041_v5  ;;  %v18831_v5 = vld [vmem:[#allocation56_spill] sm:$0xff] }
 0x132   : > { %v11386_v60 = vpop.permute.xlu1 %8323  ;;  %v11416_v22 = vsel %vm1647_vm4, %v11272_v63, %v8050_v19  ;;  %v11420_v46 = vsel %vm1647_vm4, %v11276_v13, %v8051_v24  ;;  %v11424_v3 = vsel %vm1647_vm4, %v11268_v27, %v8055_v28  ;;  %v8076_v40 = vunpack.i.h.bf16 %v18831_v5  ;;  %v18835_v24 = vld [vmem:[#allocation58_spill] sm:$0xff] }
 0x133   : > { %18827 = vst [vmem:[#allocation48_spill] sm:$0xff] %v11386_v60  ;;  %v11398_v26 = vpop.permute.xlu0 %8318  ;;  %v8060_v60 = vunpack.i.l.bf16 %v18830_v2  ;;  %v8075_v49 = vunpack.i.l.bf16 %v18831_v5  ;;  %v18832_v2 = vld [vmem:[#allocation57_spill] sm:$0xff]  ;;  %v11440_v27 = vsel %vm1647_vm4, %v11292_v51, %v8065_v4  ;;  %v8086_v28 = vunpack.i.h.bf16 %v18835_v24  ;;  %v18836_v51 = vld [vmem:[#allocation59_spill] sm:$0xff] }
 0x134   : > { %18829 = vst [vmem:[#allocation49_spill] sm:$0xff] %v11398_v26  ;;  %8613 = vrot.lane.b32.xlu1 %v10951_v21, %s9963_s21  ;;  %v8071_v26 = vunpack.i.h.bf16 %v18832_v2  ;;  %v8070_v63 = vunpack.i.l.bf16 %v18832_v2  ;;  %v8085_v15 = vunpack.i.l.bf16 %v18835_v24  ;;  %v11456_v2 = vsel %vm1647_vm4, %v11302_v23, %v8061_v0  ;;  %v18839_v0 = vld [vmem:[#allocation60_spill] sm:$0xff] }
 0x135   : > { %8608 = vrot.lane.b32.xlu0 %v10955_v37, %s9963_s21  ;;  %v11452_v5 = vsel %vm1647_vm4, %v11298_v34, %v8060_v60  ;;  %v8081_v4 = vunpack.i.h.bf16 %v18836_v51  ;;  %v8080_v61 = vunpack.i.l.bf16 %v18836_v51  ;;  %v11474_v23 = vsel %vm1647_vm4, %v11318_v14, %v8075_v49 }
 0x136   : > { %v11434_v19 = vpop.permute.xlu1 %8333  ;;  %v11466_v24 = vsel %vm1647_vm4, %v11322_v33, %v8070_v63  ;;  %v11470_v34 = vsel %vm1647_vm4, %v11326_v44, %v8071_v26  ;;  %v11478_v60 = vsel %vm1647_vm4, %v11314_v55, %v8076_v40  ;;  %v8096_v51 = vunpack.i.h.bf16 %v18839_v0 }
 0x137   : > { %18833 = vst [vmem:[#allocation50_spill] sm:$0xff] %v11434_v19  ;;  %v11436_v13 = vpop.permute.xlu0 %8328  ;;  %18838 = vst [vmem:[#allocation53_spill] sm:$0xff] %v11478_v60  ;;  %v18840_v19 = vld [vmem:[#allocation61_spill] sm:$0xff]  ;;  %v11490_v14 = vsel %vm1647_vm4, %v11342_v62, %v8085_v15  ;;  %v11494_v55 = vsel %vm1647_vm4, %v11338_v36, %v8086_v28  ;;  %v8106_v44 = vunpack.i.h.bf16 %v10745_v50  ;;  %v8105_v26 = vunpack.i.l.bf16 %v10745_v50  ;;  %v18846_v62 = vld [vmem:[#allocation62_spill] sm:$0xff] }
 0x138   : > { %18834 = vst [vmem:[#allocation51_spill] sm:$0xff] %v11436_v13  ;;  %8623 = vrot.lane.b32.xlu1 %v10967_v32, %s9963_s21  ;;  %v8091_v13 = vunpack.i.h.bf16 %v18840_v19  ;;  %v8090_v33 = vunpack.i.l.bf16 %v18840_v19  ;;  %18842 = vst [vmem:[#allocation55_spill] sm:$0xff] %v11490_v14  ;;  %v11502_v40 = vsel %vm1647_vm4, %v11348_v47, %v8080_v61  ;;  %v11506_v49 = vsel %vm1647_vm4, %v11352_v30, %v8081_v4  ;;  %v9853_v14 = vld [vmem:[%s10095_s17 + $0x78] sm:$0xf] }
 0x139   : > { %8618 = vrot.lane.b32.xlu0 %v10971_v16, %s9963_s21  ;;  %18843 = vst [vmem:[#allocation56_spill] sm:$0xff] %v11494_v55  ;;  %18844 = vst [vmem:[#allocation57_spill] sm:$0xff] %v11502_v40  ;;  %v8101_v19 = vunpack.i.h.bf16 %v18846_v62  ;;  %v8100_v36 = vunpack.i.l.bf16 %v18846_v62  ;;  %v11528_v4 = vsel %vm1672_vm5, %v11378_v12, %v8096_v51  ;;  %v8116_v61 = vunpack.i.h.bf16 %v10765_v45  ;;  %v18851_v51 = vld [vmem:[#allocation64_spill] sm:$0xff]  ;;  %v3387_v55 = vld [vmem:[%s18436_s1 + $0x2f8] sm:$0xff]  ;;  %s9983_s21 = smov 16  }
 0x13a   : > { %v11462_v48 = vpop.permute.xlu1 %8343  ;;  %18845 = vst [vmem:[#allocation58_spill] sm:$0xff] %v11506_v49  ;;  %v11516_v50 = vsel %vm1672_vm5, %v11366_v35, %v8090_v33  ;;  %v11520_v47 = vsel %vm1672_vm5, %v11370_v7, %v8091_v13  ;;  %v8111_v62 = vunpack.i.h.bf16 %v10767_v54  ;;  %v8110_v35 = vunpack.i.l.bf16 %v10767_v54  ;;  %v18850_v13 = vld [vmem:[#allocation63_spill] sm:$0xff]  ;;  %3711 = vmatprep.subr.mxu1 %v3387_v55  ;;  %v18874_v49 = vld [vmem:[#allocation72_spill] sm:$0xff] }
 0x13b   : > { %18837 = vst [vmem:[#allocation52_spill] sm:$0xff] %v11462_v48  ;;  %v8095_v48 = vunpack.i.l.bf16 %v18839_v0  ;;  %v11484_v63 = vpop.permute.xlu0 %8338  ;;  %v8115_v0 = vunpack.i.l.bf16 %v10765_v45  ;;  %v11540_v7 = vsel %vm1672_vm5, %v11390_v58, %v8105_v26  ;;  %v11550_v54 = vsel %vm1672_vm5, %v11402_v52, %v8100_v36  ;;  %v9854_v55 = vld [vmem:[%s10095_s17 + $0x58] sm:$0xf] }
 0x13c   : > { %18841 = vst [vmem:[#allocation54_spill] sm:$0xff] %v11484_v63  ;;  %8633 = vrot.lane.b32.xlu1 %v10848_v6, %s9964_s22  ;;  %v11554_v12 = vsel %vm1672_vm5, %v11406_v11, %v8101_v19  ;;  %v8125_v58 = vunpack.i.l.bf16 %v18850_v13  ;;  %v8121_v33 = vunpack.i.h.bf16 %v18851_v51  ;;  %v11566_v52 = vsel %vm1672_vm5, %v11416_v22, %v8110_v35  ;;  %v18854_v35 = vld [vmem:[#allocation66_spill] sm:$0xff] }
 0x13d   : > { %8628 = vrot.lane.b32.xlu0 %v10867_v29, %s9964_s22  ;;  %v11524_v30 = vsel %vm1672_vm5, %v11374_v17, %v8095_v48  ;;  %v11544_v17 = vsel %vm1672_vm5, %v11394_v25, %v8106_v44  ;;  %v8126_v48 = vunpack.i.h.bf16 %v18850_v13  ;;  %v8120_v25 = vunpack.i.l.bf16 %v18851_v51  ;;  %v11584_v13 = vld [vmem:[%s10095_s17 + $0x18] sm:$0xf] }
 0x13e   : > { %v11510_v28 = vpop.permute.xlu1 %8353  ;;  %v11570_v11 = vsel %vm1672_vm5, %v11420_v46, %v8111_v62  ;;  %v11574_v26 = vsel %vm1672_vm5, %v11424_v3, %v8115_v0  ;;  %v11578_v19 = vsel %vm1672_vm5, %v11428_v57, %v8116_v61  ;;  %v1472_v36 = vrot.slane %v11069_v38, 3  ;;  %18853 = vst [vmem:[#allocation63_spill] sm:$0xff] %v11584_v13 }
 0x13f   : > { %18847 = vst [vmem:[#allocation59_spill] sm:$0xff] %v11510_v28  ;;  %v11512_v15 = vpop.permute.xlu0 %8348  ;;  %v1474_v22 = vrot.slane %v11584_v13, 3  ;;  %v8130_v46 = vunpack.i.l.bf16 %v18854_v35  ;;  %v1476_v3 = vrot.slane %v11062_v1, 3  ;;  %v1477_v0 = vrot.slane %v11011_v59, 3  ;;  %v18857_v59 = vld [vmem:[#allocation65_spill] sm:$0xff] }
 0x140   : > { %18848 = vst [vmem:[#allocation60_spill] sm:$0xff] %v11512_v15  ;;  %8643 = vrot.lane.b32.xlu1 %v10873_v53, %s9964_s22  ;;  %v11596_v61 = vsel %vm1672_vm5, %v11452_v5, %v8120_v25  ;;  %v11600_v38 = vsel %vm1672_vm5, %v11456_v2, %v8121_v33  ;;  %v11604_v51 = vsel %vm1672_vm5, %v11440_v27, %v8125_v58  ;;  %v8131_v5 = vunpack.i.h.bf16 %v18854_v35 }
 0x141   : > { %8638 = vrot.lane.b32.xlu0 %v10875_v39, %s9964_s22  ;;  %v11608_v1 = vsel %vm1672_vm5, %v11444_v31, %v8126_v48  ;;  %v11618_v27 = vsel %vm1468_vm6, %v1472_v36, %v1474_v22  ;;  %v1469_v2 = vrot.slane %v11034_v10, 3  ;;  %v1470_v31 = vrot.slane %v11022_v41, 3 }
 0x142   : > { %v11546_v45 = vpop.permute.xlu1 %8363  ;;  %v11625_v58 = vsel %vm1468_vm6, %v1476_v3, %v1477_v0  ;;  %v1483_v33 = vrot.slane %v11048_v20, 3  ;;  %v1484_v25 = vrot.slane %v11041_v43, 3  ;;  %v11631_v35 = vsel %vm1672_vm5, %v11466_v24, %v8130_v46  ;;  %v18863_v20 = vld [vmem:[#allocation96_spill] sm:$0xff]  ;;  %v18864_v43 = vld [vmem:[#allocation95_spill] sm:$0xff] }
 0x143   : > { %18849 = vst [vmem:[#allocation61_spill] sm:$0xff] %v11546_v45  ;;  %v11560_v44 = vpop.permute.xlu0 %8358  ;;  %v1491_v3 = vrot.slane %v18863_v20, 3  ;;  %v1493_v13 = vrot.slane %v18864_v43, 3  ;;  %v1495_v24 = vrot.slane %v9853_v14, 3  ;;  %v11646_v46 = vsel %vm1672_vm5, %v11470_v34, %v8131_v5  ;;  %v3386_v34 = vld [vmem:[%s18436_s1 + $0x2f0] sm:$0xff]  ;;  %v3385_v5 = vld [vmem:[%s18436_s1 + $0x2e8] sm:$0xff] }
 0x144   : > { %18852 = vst [vmem:[#allocation62_spill] sm:$0xff] %v11560_v44  ;;  %8653 = vrot.lane.b32.xlu1 %v10895_v9, %s9964_s22  ;;  %v18862_v44 = vld [vmem:[#allocation91_spill] sm:$0xff]  ;;  %v11657_v20 = vsel %vm1468_vm6, %v1469_v2, %v1470_v31  ;;  %v11660_v14 = vsel %vm1468_vm6, %v1470_v31, %v1472_v36  ;;  %v18867_v43 = vld [vmem:[#allocation69_spill] sm:$0xff]  ;;  %v18868_v45 = vld [vmem:[#allocation70_spill] sm:$0xff]  ;;  %v11674_v36 = vsel %vm1468_vm6, %v1483_v33, %v1484_v25  ;;  %v1488_v2 = vrot.slane %v9854_v55, 3 }
 0x145   : > { %8648 = vrot.lane.b32.xlu0 %v10899_v18, %s9964_s22  ;;  %v1479_v28 = vrot.slane %v18862_v44, 3  ;;  %18866 = vst [vmem:[#allocation91_spill] sm:$0xff] %v11660_v14  ;;  %3712 = vmatpush1.msra.mxu1 %v3386_v34  ;;  %v11693_v33 = vsel %vm1468_vm6, %v1491_v3, %v1493_v13  ;;  %v11696_v34 = vsel %vm1468_vm6, %v1493_v13, %v1495_v24  ;;  %v3382_v24 = vld [vmem:[%s18436_s1 + $0x2d0] sm:$0xff]  ;;  %v3381_v55 = vld [vmem:[%s18436_s1 + $0x2c8] sm:$0xff] }
 0x146   : > { %v11588_v62 = vpop.permute.xlu1 %8373  ;;  %3713 = vmatprep.subr.mxu1 %v3385_v5  ;;  %18870 = vst [vmem:[#allocation96_spill] sm:$0xff] %v11693_v33  ;;  %18871 = vst [vmem:[#allocation95_spill] sm:$0xff] %v11696_v34  ;;  %v18876_v5 = vunpack.i.l.bf16 %v18868_v45  ;;  %v18912_v33 = vld [vmem:[#allocation77_spill] sm:$0xff] }
 0x147   : > { %18855 = vst [vmem:[#allocation64_spill] sm:$0xff] %v11588_v62  ;;  %v11592_v57 = vpop.permute.xlu0 %8368  ;;  %v18861_v62 = vld [vmem:[#allocation99_spill] sm:$0xff]  ;;  %v11685_v44 = vsel %vm1468_vm6, %v1477_v0, %v1479_v28  ;;  %v3384_v0 = vld [vmem:[%s18436_s1 + $0x2e0] sm:$0xff] }
 0x148   : > { %18856 = vst [vmem:[#allocation66_spill] sm:$0xff] %v11592_v57  ;;  %8663 = vrot.lane.b32.xlu1 %v10921_v42, %s9964_s22  ;;  %18865 = vst [vmem:[#allocation99_spill] sm:$0xff] %v11657_v20  ;;  %v18869_v22 = vrot.slane %v18861_v62, 3  ;;  %3714 = vmatpush1.msra.mxu1 %v3384_v0  ;;  %v11725_v40 = vsel %vm1697_vm7, %v11516_v50, %v18876_v5  ;;  %v18877_v0 = vunpack.i.l.bf16 %v18867_v43  ;;  %v18878_v20 = vunpack.i.l.bf16 %v18857_v59 }
 0x149   : > { %8658 = vrot.lane.b32.xlu0 %v10923_v56, %s9964_s22  ;;  %v18879_v5 = vunpack.i.h.bf16 %v18868_v45 }
 0x14a   : > { %v11622_v48 = vpop.permute.xlu1 %8383  ;;  %v11682_v63 = vsel %vm1468_vm6, %v1484_v25, %v18869_v22  ;;  %v18872_v25 = vld [vmem:[#allocation97_spill] sm:$0xff]  ;;  %v11733_v60 = vsel %vm1697_vm7, %v11524_v30, %v18877_v0  ;;  %v18893_v30 = vld [vmem:[#allocation74_spill] sm:$0xff] }
 0x14b   : > { %18858 = vst [vmem:[#allocation65_spill] sm:$0xff] %v11622_v48  ;;  %v11634_v57 = vpop.permute.xlu0 %8378  ;;  %v9852_v48 = vld [vmem:[%s10095_s17 + $0x38] sm:$0xf]  ;;  %v1490_v22 = vrot.slane %v18872_v25, 3  ;;  %v11748_v13 = vsel %vm1697_vm7, %v11520_v47, %v18879_v5  ;;  %v18884_v5 = vunpack.i.h.bf16 %v18867_v43 }
 0x14c   : > { %18860 = vst [vmem:[#allocation113_spill] sm:$0xff] %v11634_v57  ;;  %v1481_v15 = vrot.slane %v9852_v48, 3  ;;  %8673 = vrot.lane.b32.xlu1 %v10951_v21, %s9964_s22 }
 0x14d   : > { %8668 = vrot.lane.b32.xlu0 %v10955_v37, %s9964_s22  ;;  %v11763_v47 = vsel %vm1468_vm6, %v1490_v22, %v1491_v3  ;;  %v11769_v0 = vsel %vm1697_vm7, %v11528_v4, %v18884_v5  ;;  %v18886_v3 = vunpack.i.l.bf16 %v18874_v49  ;;  %v18888_v22 = vunpack.i.h.bf16 %v18874_v49  ;;  %v18892_v5 = vld [vmem:[#allocation73_spill] sm:$0xff] }
 0x14e   : > { %v11671_v57 = vpop.permute.xlu1 %8393  ;;  %v11688_v48 = vsel %vm1468_vm6, %v1479_v28, %v1481_v15  ;;  %v3383_v28 = vld [vmem:[%s18436_s1 + $0x2d8] sm:$0xff]  ;;  %18883 = vst [vmem:[#allocation97_spill] sm:$0xff] %v11763_v47  ;;  %18885 = vst [vmem:[#allocation72_spill] sm:$0xff] %v11769_v0 }
 0x14f   : > { %v11677_v31 = vpop.permute.xlu0 %8388  ;;  %v18873_v15 = vld [vmem:[#allocation71_spill] sm:$0xff]  ;;  %3715 = vmatprep.subr.mxu1 %v3383_v28  ;;  %v18881_v28 = vrot.slane %v18861_v62, 3  ;;  %v11784_v4 = vsel %vm1697_vm7, %v11550_v54, %v18886_v3  ;;  %v3377_v54 = vld [vmem:[%s18436_s1 + $0x2a8] sm:$0xff] }
 0x150   : > { %8683 = vrot.lane.b32.xlu1 %v10967_v32, %s9964_s22  ;;  %3716 = vmatpush1.msra.mxu1 %v3382_v24  ;;  %v3379_v62 = vld [vmem:[%s18436_s1 + $0x2b8] sm:$0xff]  ;;  %v11790_v24 = vsel %vm1697_vm7, %v11554_v12, %v18888_v22  ;;  %v18897_v3 = vunpack.i.h.bf16 %v18873_v15 }
 0x151   : > { %8678 = vrot.lane.b32.xlu0 %v10971_v16, %s9964_s22  ;;  %s18641_s22 = smov 76   ;;  %v11760_v14 = vsel %vm1468_vm6, %v18881_v28, %v1488_v2  ;;  %3717 = vmatprep.subr.mxu1 %v3381_v55  ;;  %18889 = vst [vmem:[#allocation114_spill] sm:$0xff] %v11790_v24  ;;  %v18890_v55 = vunpack.i.l.bf16 %v18873_v15  ;;  %v9855_v24 = vld [vmem:[%s10095_s17 + $0x98] sm:$0xf] }
 0x152   : > { %v11719_v25 = vpop.permute.xlu1 %8403  ;;  %18882 = vst [vmem:[#allocation70_spill] sm:$0xff] %v11760_v14  ;;  %v11820_v12 = vsel %vm1697_vm7, %v11544_v17, %v18897_v3  ;;  %v3375_v17 = vld [vmem:[%s18436_s1 + $0x298] sm:$0xff]  ;;  %v18904_v3 = vld [vmem:[#allocation106_spill] sm:$0xff] }
 0x153   : > { %18875 = vst [vmem:[#allocation69_spill] sm:$0xff] %v11719_v25  ;;  %v11739_v25 = vsel %vm1672_vm5, %v11474_v23, %v18878_v20  ;;  %v11742_v50 = vpop.permute.xlu0 %8398  ;;  %v18880_v23 = vld [vmem:[#allocation68_spill] sm:$0xff]  ;;  %v11796_v28 = vsel %vm1697_vm7, %v11540_v7, %v18890_v55  ;;  %v18895_v20 = vld [vmem:[#allocation101_spill] sm:$0xff]  ;;  %v1502_v7 = vrot.slane %v9855_v24, 3  ;;  %v18901_v55 = vld [vmem:[#allocation103_spill] sm:$0xff] }
 0x154   : > { %8693 = vrot.lane.b32.xlu1 %v10848_v6, %s18641_s22  ;;  %v3380_v6 = vld [vmem:[%s18436_s1 + $0x2c0] sm:$0xff]  ;;  %18887 = vst [vmem:[#allocation68_spill] sm:$0xff] %v11784_v4  ;;  %18891 = vst [vmem:[#allocation115_spill] sm:$0xff] %v11796_v28  ;;  %v1500_v2 = vrot.slane %v18895_v20, 3  ;;  %v18911_v15 = vld [vmem:[#allocation75_spill] sm:$0xff] }
 0x155   : > { %8688 = vrot.lane.b32.xlu0 %v10867_v29, %s18641_s22  ;;  %3718 = vmatpush1.msra.mxu1 %v3380_v6  ;;  %v3378_v29 = vld [vmem:[%s18436_s1 + $0x2b0] sm:$0xff]  ;;  %18898 = vst [vmem:[#allocation101_spill] sm:$0xff] %v11820_v12  ;;  %v18899_v20 = vld [vmem:[#allocation100_spill] sm:$0xff]  ;;  %v3373_v12 = vld [vmem:[%s18436_s1 + $0x288] sm:$0xff] }
 0x156   : > { %v11806_v22 = vpop.permute.xlu1 %8413  ;;  %3719 = vmatprep.subr.mxu1 %v3379_v62  ;;  %v1504_v62 = vrot.slane %v18899_v20, 3  ;;  %v18900_v24 = vld [vmem:[#allocation108_spill] sm:$0xff]  ;;  %v1512_v20 = vrot.slane %v18904_v3, 3 }
 0x157   : > { %18894 = vst [vmem:[#allocation73_spill] sm:$0xff] %v11806_v22  ;;  %v11812_v28 = vpop.permute.xlu0 %8408  ;;  %3720 = vmatpush1.msra.mxu1 %v3378_v29  ;;  %v1505_v6 = vrot.slane %v18900_v24, 3  ;;  %v1497_v22 = vrot.slane %v18901_v55, 3  ;;  %v3376_v4 = vld [vmem:[%s18436_s1 + $0x2a0] sm:$0xff]  ;;  %v18907_v55 = vunpack.i.l.bf16 %v18893_v30 }
 0x158   : > { %18896 = vst [vmem:[#allocation74_spill] sm:$0xff] %v11812_v28  ;;  %8703 = vrot.lane.b32.xlu1 %v10873_v53, %s18641_s22  ;;  %v18902_v28 = vld [vmem:[#allocation102_spill] sm:$0xff]  ;;  %3721 = vmatprep.subr.mxu1 %v3377_v54  ;;  %v18903_v53 = vld [vmem:[#allocation107_spill] sm:$0xff]  ;;  %v18905_v24 = vld [vmem:[#allocation76_spill] sm:$0xff] }
 0x159   : > { %v1498_v0 = vrot.slane %v18902_v28, 3  ;;  %8698 = vrot.lane.b32.xlu0 %v10875_v39, %s18641_s22  ;;  %v1511_v29 = vrot.slane %v18903_v53, 3  ;;  %v1507_v28 = vrot.slane %v18905_v24, 3  ;;  %3722 = vmatpush1.msra.mxu1 %v3376_v4  ;;  %v3374_v54 = vld [vmem:[%s18436_s1 + $0x290] sm:$0xff]  ;;  %v11849_v39 = vsel %vm1468_vm6, %v1500_v2, %v1502_v7  ;;  %v9856_v53 = vld [vmem:[%s10095_s17 + $0xb8] sm:$0xf] }
 0x15a   : > { %v11846_v14 = vpop.permute.xlu1 %8423  ;;  %v1509_v3 = vrot.slane %v9856_v53, 3  ;;  %v11856_v4 = vsel %vm1697_vm7, %v11566_v52, %v18907_v55  ;;  %v18909_v24 = vunpack.i.l.bf16 %v18892_v5  ;;  %3723 = vmatprep.subr.mxu1 %v3375_v17  ;;  %v18914_v53 = vunpack.i.h.bf16 %v18893_v30  ;;  %v9858_v7 = vld [vmem:[%s10095_s17 + $0xd8] sm:$0xf] }
 0x15b   : > { %18906 = vst [vmem:[#allocation100_spill] sm:$0xff] %v11846_v14  ;;  %18908 = vst [vmem:[#allocation108_spill] sm:$0xff] %v11856_v4  ;;  %v11866_v34 = vpop.permute.xlu0 %8418  ;;  %v18916_v55 = vunpack.i.h.bf16 %v18892_v5  ;;  %3724 = vmatpush1.msra.mxu1 %v3374_v54  ;;  %v11887_v14 = vsel %vm1468_vm6, %v1497_v22, %v1498_v0  ;;  %v3371_v54 = vld [vmem:[%s18436_s1 + $0x278] sm:$0xff]  ;;  %v11902_v22 = vsel %vm1468_vm6, %v1511_v29, %v1512_v20 }
 0x15c   : > { %v11862_v47 = vsel %vm1697_vm7, %v11574_v26, %v18909_v24  ;;  %18913 = vst [vmem:[#allocation102_spill] sm:$0xff] %v11866_v34  ;;  %v11872_v52 = vsel %vm1697_vm7, %v11570_v11, %v18914_v53  ;;  %8713 = vrot.lane.b32.xlu1 %v10895_v9, %s18641_s22  ;;  %v11884_v24 = vsel %vm1468_vm6, %v1504_v62, %v1505_v6  ;;  %v3370_v62 = vld [vmem:[%s18436_s1 + $0x270] sm:$0xff]  ;;  %v18923_v9 = vld [vmem:[#allocation80_spill] sm:$0xff]  ;;  %v18945_v34 = vld [vmem:[#allocation85_spill] sm:$0xff] }
 0x15d   : > { %18910 = vst [vmem:[#allocation103_spill] sm:$0xff] %v11862_v47  ;;  %18915 = vst [vmem:[#allocation107_spill] sm:$0xff] %v11872_v52  ;;  %v11878_v26 = vsel %vm1697_vm7, %v11578_v19, %v18916_v55  ;;  %v11890_v11 = vsel %vm1468_vm6, %v1498_v0, %v1500_v2  ;;  %3725 = vmatprep.subr.mxu1 %v3373_v12  ;;  %v3372_v19 = vld [vmem:[%s18436_s1 + $0x280] sm:$0xff]  ;;  %8708 = vrot.lane.b32.xlu0 %v10899_v18, %s18641_s22  ;;  %v18918_v0 = vrot.slane %v11199_v8, 3  ;;  %v3369_v18 = vld [vmem:[%s18436_s1 + $0x268] sm:$0xff] }
 0x15e   : > { %18917 = vst [vmem:[#allocation106_spill] sm:$0xff] %v11878_v26  ;;  %v11910_v12 = vsel %vm1468_vm6, %v1505_v6, %v1507_v28  ;;  %3726 = vmatpush1.msra.mxu1 %v3372_v19  ;;  %v11918_v53 = vpop.permute.xlu1 %8433  ;;  %v11921_v29 = vsel %vm1468_vm6, %v1507_v28, %v1509_v3  ;;  %v18922_v6 = vld [vmem:[#allocation79_spill] sm:$0xff]  ;;  %v18925_v3 = vunpack.i.l.bf16 %v18912_v33  ;;  %v3368_v28 = vld [vmem:[%s18436_s1 + $0x260] sm:$0xff]  ;;  %v18935_v52 = vld [vmem:[#allocation110_spill] sm:$0xff] }
 0x15f   : > { %v11907_v2 = vsel %vm1468_vm6, %v1512_v20, %v18918_v0  ;;  %18919 = vst [vmem:[#allocation76_spill] sm:$0xff] %v11910_v12  ;;  %18920 = vst [vmem:[#allocation75_spill] sm:$0xff] %v11918_v53  ;;  %v18921_v20 = vld [vmem:[#allocation78_spill] sm:$0xff]  ;;  %v1521_v0 = vrot.slane %v18922_v6, 3  ;;  %v9857_v19 = vld [vmem:[%s10095_s17 + $0xf8] sm:$0xf]  ;;  %3727 = vmatprep.subr.mxu1 %v3371_v54  ;;  %v11927_v26 = vpop.permute.xlu0 %8428  ;;  %v8270_v4 = vunpack.i.l.bf16 %v18935_v52 }
 0x160   : > { %v1519_v55 = vrot.slane %v18921_v20, 3  ;;  %v1523_v17 = vrot.slane %v9857_v19, 3  ;;  %18924 = vst [vmem:[#allocation78_spill] sm:$0xff] %v11927_v26  ;;  %v11937_v20 = vsel %vm1697_vm7, %v11596_v61, %v18925_v3  ;;  %3728 = vmatpush1.msra.mxu1 %v3370_v62  ;;  %v18927_v6 = vld [vmem:[#allocation82_spill] sm:$0xff]  ;;  %8723 = vrot.lane.b32.xlu1 %v10921_v42, %s18641_s22  ;;  %v1516_v26 = vrot.slane %v9858_v7, 3  ;;  %v18928_v53 = vld [vmem:[#allocation81_spill] sm:$0xff] }
 0x161   : > { %18926 = vst [vmem:[#allocation79_spill] sm:$0xff] %v11937_v20  ;;  %v1518_v47 = vrot.slane %v18928_v53, 3  ;;  %3729 = vmatprep.subr.mxu1 %v3369_v18  ;;  %v3367_v61 = vld [vmem:[%s18436_s1 + $0x258] sm:$0xff]  ;;  %8718 = vrot.lane.b32.xlu0 %v10923_v56, %s18641_s22  ;;  %v18929_v18 = vunpack.i.h.bf16 %v18912_v33  ;;  %v3366_v3 = vld [vmem:[%s18436_s1 + $0x250] sm:$0xff]  ;;  %v3365_v56 = vld [vmem:[%s18436_s1 + $0x248] sm:$0xff] }
 0x162   : > { %3730 = vmatpush1.msra.mxu1 %v3368_v28  ;;  %v18931_v54 = vld [vmem:[#allocation83_spill] sm:$0xff]  ;;  %v18932_v19 = vld [vmem:[#allocation86_spill] sm:$0xff]  ;;  %v11972_v7 = vpop.permute.xlu1 %8443  ;;  %v11975_v20 = vsel %vm1468_vm6, %v1519_v55, %v1521_v0  ;;  %v8271_v28 = vunpack.i.h.bf16 %v18935_v52  ;;  %v3361_v52 = vld [vmem:[%s18436_s1 + $0x228] sm:$0xff] }
 0x163   : > { %v11962_v53 = vsel %vm1697_vm7, %v11600_v38, %v18929_v18  ;;  %v8210_v62 = vunpack.i.l.bf16 %v18932_v19  ;;  %18933 = vst [vmem:[#allocation82_spill] sm:$0xff] %v11972_v7  ;;  %v11978_v38 = vsel %vm1468_vm6, %v1521_v0, %v1523_v17  ;;  %3731 = vmatprep.subr.mxu1 %v3367_v61  ;;  %v18934_v18 = vld [vmem:[#allocation84_spill] sm:$0xff]  ;;  %v11984_v42 = vpop.permute.xlu0 %8438  ;;  %v8211_v7 = vunpack.i.h.bf16 %v18932_v19  ;;  %v18937_v33 = vld [vmem:[#allocation51_spill] sm:$0xff] }
 0x164   : > { %18930 = vst [vmem:[#allocation80_spill] sm:$0xff] %v11962_v53  ;;  %18936 = vst [vmem:[#allocation81_spill] sm:$0xff] %v11984_v42  ;;  %3732 = vmatpush1.msra.mxu1 %v3366_v3  ;;  %v8330_v12 = vunpack.i.l.bf16 %v18937_v33  ;;  %8733 = vrot.lane.b32.xlu1 %v10951_v21, %s18641_s22  ;;  %v18938_v17 = vrot.slane %v11199_v8, 3  ;;  %v11996_v61 = vsel %vm1468_vm6, %v1518_v47, %v1519_v55  ;;  %v3364_v3 = vld [vmem:[%s18436_s1 + $0x240] sm:$0xff]  ;;  %v3363_v19 = vld [vmem:[%s18436_s1 + $0x238] sm:$0xff]  ;;  %v8390_v21 = vunpack.i.l.bf16 %v11677_v31 }
 0x165   : > { %3733 = vmatprep.subr.mxu1 %v3365_v56  ;;  %8728 = vrot.lane.b32.xlu0 %v10955_v37, %s18641_s22  ;;  %v18939_v47 = vunpack.i.l.bf16 %v18911_v15  ;;  %v3362_v55 = vld [vmem:[%s18436_s1 + $0x230] sm:$0xff]  ;;  %v18941_v37 = vunpack.i.l.bf16 %v18868_v45 }
 0x166   : > { %v11993_v0 = vsel %vm1468_vm6, %v18938_v17, %v1516_v26  ;;  %3734 = vmatpush1.msra.mxu1 %v3364_v3  ;;  %v8331_v17 = vunpack.i.h.bf16 %v18937_v33  ;;  %v12026_v8 = vpop.permute.xlu1 %8453 }
 0x167   : > { %v12014_v26 = vsel %vm1697_vm7, %v11604_v51, %v18939_v47  ;;  %v1723_v56 = vsel %vm1722_vm8, %v18941_v37, %v8210_v62  ;;  %18942 = vst [vmem:[#allocation84_spill] sm:$0xff] %v12026_v8  ;;  %v18943_v51 = vunpack.i.h.bf16 %v18911_v15  ;;  %v18944_v47 = vunpack.i.l.bf16 %v18927_v6  ;;  %3735 = vmatprep.subr.mxu1 %v3363_v19  ;;  %v12042_v33 = vpop.permute.xlu0 %8448 }
 0x168   : > { %18940 = vst [vmem:[#allocation86_spill] sm:$0xff] %v12014_v26  ;;  %v8215_v26 = vunpack.i.l.bf16 %v18945_v34  ;;  %v8391_v62 = vunpack.i.h.bf16 %v11677_v31  ;;  %18946 = vst [vmem:[#allocation110_spill] sm:$0xff] %v12042_v33  ;;  %v1748_v37 = vsel %vm1747_vm9, %v1723_v56, %v8270_v4  ;;  %3736 = vmatpush1.msra.mxu1 %v3362_v55  ;;  %v18625_v19 = vunpack.i.l.bf16 %v12042_v33  ;;  %8743 = vrot.lane.b32.xlu1 %v10967_v32, %s18641_s22  ;;  %v3360_v4 = vld [vmem:[%s18436_s1 + $0x220] sm:$0xff]  ;;  %v18948_v55 = vld [vmem:[#allocation109_spill] sm:$0xff] }
 0x169   : > { %v12032_v3 = vsel %vm1697_vm7, %v11608_v1, %v18943_v51  ;;  %v12038_v53 = vsel %vm1697_vm7, %v11631_v35, %v18944_v47  ;;  %v18947_v1 = vunpack.i.h.bf16 %v18868_v45  ;;  %v18624_v35 = vunpack.i.h.bf16 %v12042_v33  ;;  %3737 = vmatprep.subr.mxu1 %v3361_v52  ;;  %v3359_v45 = vld [vmem:[%s18436_s1 + $0x218] sm:$0xff]  ;;  %8738 = vrot.lane.b32.xlu0 %v10971_v16, %s18641_s22  ;;  %v3358_v52 = vld [vmem:[%s18436_s1 + $0x210] sm:$0xff]  ;;  %s18667_s22 = smov 60  }
 0x16a   : > { %v1773_v31 = vsel %vm1772_vm10, %v1748_v37, %v8330_v12  ;;  %3738 = vmatpush1.msra.mxu1 %v3360_v4  ;;  %v8216_v47 = vunpack.i.h.bf16 %v18945_v34  ;;  %v18949_v37 = vld [vmem:[#allocation50_spill] sm:$0xff]  ;;  %v12073_v42 = vpop.permute.xlu1 %8463  ;;  %v12084_v4 = vld [vmem:[%s10095_s17 + $0x8] sm:$0xff]  ;;  %v18950_v12 = vunpack.i.h.bf16 %v18927_v6  ;;  %v18993_v33 = vunpack.i.h.bf16 %v18874_v49 }
 0x16b   : > { %v1724_v51 = vsel %vm1722_vm8, %v18947_v1, %v8211_v7  ;;  %v8275_v7 = vunpack.i.l.bf16 %v18948_v55  ;;  %v1798_v32 = vsel %vm1797_vm11, %v1773_v31, %v8390_v21  ;;  %v8335_v1 = vunpack.i.l.bf16 %v18949_v37  ;;  %3739 = vmatprep.subr.mxu1 %v3359_v45 }
 0x16c   : > { %v1749_v56 = vsel %vm1747_vm9, %v1724_v51, %v8271_v28  ;;  %v1823_v16 = vsel %vm1822_vm12, %v1798_v32, %v18625_v19  ;;  %v8395_v21 = vunpack.i.l.bf16 %v11671_v57  ;;  %v12080_v51 = vpop.permute.xlu0 %8458  ;;  %v12092_v32 = vsel %vm1697_vm7, %v11646_v46, %v18950_v12  ;;  %3740 = vmatpush1.msra.mxu1 %v3358_v52  ;;  %v18954_v52 = vld [vmem:[#allocation53_spill] sm:$0xff] }
 0x16d   : > { %v1774_v28 = vsel %vm1772_vm10, %v1749_v56, %v8331_v17  ;;  %3566 = vmatprep.mubr.f32.mxu0 %v1823_v16  ;;  %v3357_v17 = vld [vmem:[%s18436_s1 + $0x208] sm:$0xff]  ;;  %v18951_v45 = vunpack.i.l.bf16 %v18867_v43  ;;  %v18623_v56 = vunpack.i.l.bf16 %v12026_v8  ;;  %v18952_v16 = vpack.i.bf16 %v11625_v58, %v11618_v27  ;;  %v18955_v27 = vld [vmem:[#allocation91_spill] sm:$0xff] }
 0x16e   : > { %v1799_v31 = vsel %vm1797_vm11, %v1774_v28, %v8391_v62  ;;  %3567 = vmatmul.mubr.f32.vlgmr.msra.gmra.mxu0 %v11725_v40  ;;  %v18953_v12 = vunpack.i.h.bf16 %v18857_v59  ;;  %v8276_v40 = vunpack.i.h.bf16 %v18948_v55  ;;  %v18956_v58 = vld [vmem:[#allocation99_spill] sm:$0xff]  ;;  %v18962_v55 = vunpack.i.h.bf16 %v18867_v43  ;;  %3741 = vmatprep.subr.mxu1 %v3357_v17 }
 0x16f   : > { %v1725_v62 = vsel %vm1722_vm8, %v18951_v45, %v8215_v26  ;;  %8753 = vrot.lane.b32.xlu1 %v18952_v16, %s9966_s18  ;;  %v1824_v46 = vsel %vm1822_vm12, %v1799_v31, %v18624_v35  ;;  %v3356_v26 = vld [vmem:[%s18436_s1 + $0x200] sm:$0xff]  ;;  %v18957_v16 = vpack.i.bf16 %v18955_v27, %v18956_v58  ;;  %v18958_v31 = vunpack.i.l.bf16 %v18923_v9  ;;  %v12137_v27 = vpop.permute.xlu1 %8473  ;;  %v3419_v17 = vld [vmem:[%s18436_s1 + $0x3f8] sm:$0xff] }
 0x170   : > { %v1692_v28 = vsel %vm1672_vm5, %v18954_v52, %v18953_v12  ;;  %v1750_v45 = vsel %vm1747_vm9, %v1725_v62, %v8275_v7  ;;  %3572 = vmatprep.mubr.f32.mxu0 %v1824_v46  ;;  %v18960_v12 = vunpack.i.h.bf16 %v18923_v9  ;;  %v1726_v7 = vsel %vm1722_vm8, %v18962_v55, %v8216_v47  ;;  %3742 = vmatpush1.msra.mxu1 %v3356_v26  ;;  %v9860_v26 = vld [vmem:[%s10095_s17] sm:$0xff] }
 0x171   : > { %8748 = vrot.lane.b32.xlu0 %v18957_v16, %s9966_s18  ;;  %v12126_v59 = vsel %vm1697_vm7, %v11739_v25, %v18958_v31  ;;  %v8336_v62 = vunpack.i.h.bf16 %v18949_v37  ;;  %v1775_v46 = vsel %vm1772_vm10, %v1750_v45, %v8335_v1  ;;  %v18963_v58 = vunpack.i.l.bf16 %v18880_v23  ;;  %v18964_v25 = vld [vmem:[#allocation57_spill] sm:$0xff]  ;;  %v12145_v31 = vpop.permute.xlu0 %8468  ;;  %v18968_v1 = vld [vmem:[#allocation58_spill] sm:$0xff]  ;;  %3743 = vmatprep.subr.mxu1 %v3419_v17 }
 0x172   : > { %18959 = vst [vmem:[#allocation51_spill] sm:$0xff] %v12126_v59  ;;  %v12131_v52 = vsel %vm1697_vm7, %v1692_v28, %v18960_v12  ;;  %v8396_v28 = vunpack.i.h.bf16 %v11671_v57  ;;  %v1800_v43 = vsel %vm1797_vm11, %v1775_v46, %v8395_v21  ;;  %v18965_v47 = vunpack.i.l.bf16 %v18934_v18  ;;  %v18969_v57 = vld [vmem:[#allocation88_spill] sm:$0xff]  ;;  %3573 = vmatmul.mubr.f32.gmra.mxu0 %v11748_v13 }
 0x173   : > { %18961 = vst [vmem:[#allocation85_spill] sm:$0xff] %v12131_v52  ;;  %v1693_v16 = vsel %vm1672_vm5, %v18964_v25, %v18963_v58  ;;  %v18967_v12 = vunpack.i.h.bf16 %v18880_v23  ;;  %v8220_v55 = vunpack.i.l.bf16 %v18969_v57  ;;  %v18626_v58 = vunpack.i.h.bf16 %v12026_v8  ;;  %v3418_v25 = vld [vmem:[%s18436_s1 + $0x3f0] sm:$0xff] }
 0x174   : > { %v12151_v37 = vsel %vm1697_vm7, %v1693_v16, %v18965_v47  ;;  %v18970_v21 = vpack.i.bf16 %v11682_v63, %v11674_v36  ;;  %v1825_v23 = vsel %vm1822_vm12, %v1800_v43, %v18623_v56  ;;  %v12172_v46 = vpack.i.bf16 %v12084_v4, %v9860_v26  ;;  %v18971_v16 = vld [vmem:[#allocation87_spill] sm:$0xff]  ;;  %v12187_v56 = vpop.permute.xlu1 %8483  ;;  %3744 = vmatpush2.msra.mxu1 %v3418_v25 }
 0x175   : > { %18966 = vst [vmem:[#allocation109_spill] sm:$0xff] %v12151_v37  ;;  %v1694_v45 = vsel %vm1672_vm5, %v18968_v1, %v18967_v12  ;;  %v8225_v47 = vunpack.i.l.bf16 %v18971_v16  ;;  %v1751_v13 = vsel %vm1747_vm9, %v1726_v7, %v8276_v40  ;;  %v18972_v12 = vld [vmem:[#allocation112_spill] sm:$0xff]  ;;  %v18973_v63 = vpack.i.bf16 %v11688_v48, %v11685_v44  ;;  %3578 = vmatprep.mubr.f32.mxu0 %v1825_v23  ;;  %v12191_v7 = vpop.permute.xlu0 %8478  ;;  %v18977_v23 = vld [vmem:[#allocation67_spill] sm:$0xff] }
 0x176   : > { %8763 = vrot.lane.b32.xlu1 %v18970_v21, %s9966_s18  ;;  %v8280_v1 = vunpack.i.l.bf16 %v18972_v12  ;;  %v8226_v36 = vunpack.i.h.bf16 %v18971_v16  ;;  %v8221_v43 = vunpack.i.h.bf16 %v18969_v57  ;;  %v18974_v21 = vld [vmem:[#allocation54_spill] sm:$0xff]  ;;  %v1776_v35 = vsel %vm1772_vm10, %v1751_v13, %v8336_v62  ;;  %v18979_v16 = vld [vmem:[#allocation55_spill] sm:$0xff]  ;;  %v3417_v62 = vld [vmem:[%s18436_s1 + $0x3e8] sm:$0xff]  ;;  %3579 = vmatmul.mubr.f32.gmra.mxu0 %v11733_v60 }
 0x177   : > { %8758 = vrot.lane.b32.xlu0 %v18973_v63, %s9966_s18  ;;  %v8340_v26 = vunpack.i.l.bf16 %v18974_v21  ;;  %v8400_v40 = vunpack.i.l.bf16 %v11742_v50  ;;  %v1801_v19 = vsel %vm1797_vm11, %v1776_v35, %v8396_v28  ;;  %v18975_v44 = vunpack.i.h.bf16 %v18934_v18  ;;  %v18981_v28 = vld [vmem:[#allocation95_spill] sm:$0xff]  ;;  %v18990_v35 = vld [vmem:[#allocation70_spill] sm:$0xff]  ;;  %3745 = vmatprep.subr.mxu1 %v3417_v62 }
 0x178   : > { %v18978_v57 = vunpack.i.l.bf16 %v18977_v23  ;;  %v18980_v17 = vunpack.i.l.bf16 %v18874_v49  ;;  %v1826_v25 = vsel %vm1822_vm12, %v1801_v19, %v18626_v58  ;;  %v18989_v58 = vld [vmem:[#allocation97_spill] sm:$0xff]  ;;  %v3415_v49 = vld [vmem:[%s18436_s1 + $0x3d8] sm:$0xff]  ;;  %v18998_v62 = vunpack.i.l.bf16 %v12080_v51 }
 0x179   : > { %v12197_v48 = vsel %vm1697_vm7, %v1694_v45, %v18975_v44  ;;  %v18982_v45 = vld [vmem:[#allocation96_spill] sm:$0xff]  ;;  %3584 = vmatprep.mubr.f32.mxu0 %v1826_v25  ;;  %v9861_v25 = vld [vmem:[%s10095_s17 + $0x10] sm:$0xff] }
 0x17a   : > { %18976 = vst [vmem:[#allocation50_spill] sm:$0xff] %v12197_v48  ;;  %v1695_v63 = vsel %vm1672_vm5, %v18979_v16, %v18978_v57  ;;  %v1727_v13 = vsel %vm1722_vm8, %v18980_v17, %v8220_v55  ;;  %v18983_v44 = vpack.i.bf16 %v18981_v28, %v18982_v45  ;;  %v18984_v57 = vunpack.i.l.bf16 %v18931_v54  ;;  %v3416_v55 = vld [vmem:[%s18436_s1 + $0x3e0] sm:$0xff]  ;;  %v18986_v17 = vld [vmem:[#allocation71_spill] sm:$0xff]  ;;  %v18988_v28 = vld [vmem:[#allocation89_spill] sm:$0xff] }
 0x17b   : > { %v18987_v60 = vunpack.i.l.bf16 %v18986_v17  ;;  %v8235_v45 = vunpack.i.l.bf16 %v18988_v28  ;;  %v1752_v19 = vsel %vm1747_vm9, %v1727_v13, %v8280_v1  ;;  %v12249_v13 = vpop.permute.xlu0 %8488  ;;  %3746 = vmatpush2.msra.mxu1 %v3416_v55 }
 0x17c   : > { %8773 = vrot.lane.b32.xlu1 %v18983_v44, %s9966_s18  ;;  %v12221_v16 = vsel %vm1697_vm7, %v1695_v63, %v18984_v57  ;;  %v8281_v44 = vunpack.i.h.bf16 %v18972_v12  ;;  %v18991_v63 = vpack.i.bf16 %v18989_v58, %v18990_v35  ;;  %v18992_v57 = vunpack.i.h.bf16 %v18986_v17  ;;  %v12245_v12 = vpop.permute.xlu1 %8493  ;;  %3747 = vmatprep.subr.mxu1 %v3415_v49 }
 0x17d   : > { %18985 = vst [vmem:[#allocation53_spill] sm:$0xff] %v12221_v16  ;;  %v1729_v34 = vsel %vm1722_vm8, %v18987_v60, %v8225_v47  ;;  %v1728_v47 = vsel %vm1722_vm8, %v18993_v33, %v8221_v43  ;;  %v8341_v60 = vunpack.i.h.bf16 %v18974_v21  ;;  %v1777_v1 = vsel %vm1772_vm10, %v1752_v19, %v8340_v26  ;;  %v18995_v43 = vld [vmem:[#allocation90_spill] sm:$0xff] }
 0x17e   : > { %8768 = vrot.lane.b32.xlu0 %v18991_v63, %s9966_s18  ;;  %v12239_v8 = vsel %vm1722_vm8, %v18992_v57, %v8226_v36  ;;  %v8401_v58 = vunpack.i.h.bf16 %v11742_v50  ;;  %v1802_v35 = vsel %vm1797_vm11, %v1777_v1, %v8400_v40  ;;  %v18994_v36 = vld [vmem:[#allocation63_spill] sm:$0xff]  ;;  %v8236_v33 = vunpack.i.h.bf16 %v18988_v28  ;;  %v18996_v50 = vld [vmem:[#allocation72_spill] sm:$0xff]  ;;  %v3414_v19 = vld [vmem:[%s18436_s1 + $0x3d0] sm:$0xff] }
 0x17f   : > { %v12254_v17 = vpack.i.bf16 %v18994_v36, %v9861_v25  ;;  %v8230_v21 = vunpack.i.l.bf16 %v18995_v43  ;;  %3585 = vmatmul.mubr.f32.gmra.mxu0 %v18996_v50  ;;  %v18997_v40 = vpack.i.bf16 %v11884_v24, %v11849_v39  ;;  %v1827_v55 = vsel %vm1822_vm12, %v1802_v35, %v18998_v62  ;;  %v19000_v1 = vld [vmem:[#allocation111_spill] sm:$0xff]  ;;  %v19002_v35 = vld [vmem:[#allocation92_spill] sm:$0xff]  ;;  %3748 = vmatpush2.msra.mxu1 %v3414_v19 }
 0x180   : > { %v18999_v28 = vunpack.i.l.bf16 %v18892_v5  ;;  %v8231_v57 = vunpack.i.h.bf16 %v18995_v43  ;;  %v8285_v25 = vunpack.i.l.bf16 %v19000_v1  ;;  %v1753_v39 = vsel %vm1747_vm9, %v1728_v47, %v8281_v44  ;;  %3590 = vmatprep.mubr.f32.mxu0 %v1827_v55  ;;  %v19005_v47 = vld [vmem:[#allocation69_spill] sm:$0xff] }
 0x181   : > { %8783 = vrot.lane.b32.xlu1 %v18997_v40, %s9966_s18  ;;  %v19001_v24 = vpack.i.bf16 %v11890_v11, %v11887_v14  ;;  %v8246_v36 = vunpack.i.h.bf16 %v19002_v35  ;;  %v8245_v50 = vunpack.i.l.bf16 %v19002_v35  ;;  %v19003_v40 = vld [vmem:[#allocation52_spill] sm:$0xff]  ;;  %v1778_v43 = vsel %vm1772_vm10, %v1753_v39, %v8341_v60  ;;  %v12294_v14 = vpop.permute.xlu0 %8498  ;;  %v3413_v55 = vld [vmem:[%s18436_s1 + $0x3c8] sm:$0xff] }
 0x182   : > { %v12276_v63 = vsel %vm1722_vm8, %v18999_v28, %v8235_v45  ;;  %v8345_v62 = vunpack.i.l.bf16 %v19003_v40  ;;  %v12288_v45 = vpop.permute.xlu1 %8503  ;;  %v19004_v28 = vld [vmem:[#allocation93_spill] sm:$0xff]  ;;  %v8405_v23 = vunpack.i.l.bf16 %v19005_v47  ;;  %v1803_v11 = vsel %vm1797_vm11, %v1778_v43, %v8401_v58  ;;  %3749 = vmatprep.subr.mxu1 %v3413_v55  ;;  %v19021_v55 = vld [vmem:[#allocation94_spill] sm:$0xff] }
 0x183   : > { %8778 = vrot.lane.b32.xlu0 %v19001_v24, %s9966_s18  ;;  %v8241_v26 = vunpack.i.h.bf16 %v19004_v28  ;;  %v8240_v44 = vunpack.i.l.bf16 %v19004_v28  ;;  %v19006_v24 = vunpack.i.h.bf16 %v18892_v5  ;;  %v19007_v49 = vunpack.i.l.bf16 %v18893_v30  ;;  %v19008_v28 = vld [vmem:[#allocation68_spill] sm:$0xff] }
 0x184   : > { %v18631_v35 = vunpack.i.l.bf16 %v12073_v42  ;;  %3591 = vmatmul.mubr.f32.gmra.mxu0 %v19008_v28  ;;  %v19009_v58 = vpack.i.bf16 %v11907_v2, %v11902_v22  ;;  %v19010_v19 = vunpack.i.h.bf16 %v12080_v51  ;;  %v19011_v43 = vunpack.i.h.bf16 %v18893_v30  ;;  %v19012_v22 = vld [vmem:[#allocation76_spill] sm:$0xff] }
 0x185   : > { %v12303_v60 = vsel %vm1722_vm8, %v19006_v24, %v8236_v33  ;;  %v1731_v39 = vsel %vm1722_vm8, %v19007_v49, %v8230_v21  ;;  %v3412_v33 = vld [vmem:[%s18436_s1 + $0x3c0] sm:$0xff]  ;;  %v8286_v24 = vunpack.i.h.bf16 %v19000_v1  ;;  %v1754_v49 = vsel %vm1747_vm9, %v1729_v34, %v8285_v25 }
 0x186   : > { %8793 = vrot.lane.b32.xlu1 %v19009_v58, %s9966_s18  ;;  %v1828_v5 = vsel %vm1822_vm12, %v1803_v11, %v19010_v19  ;;  %v12323_v21 = vsel %vm1722_vm8, %v19011_v43, %v8231_v57  ;;  %v19013_v2 = vpack.i.bf16 %v11921_v29, %v19012_v22  ;;  %v19014_v11 = vunpack.i.l.bf16 %v18911_v15  ;;  %v12342_v58 = vpop.permute.xlu1 %8513  ;;  %v19017_v29 = vld [vmem:[#allocation77_spill] sm:$0xff]  ;;  %3750 = vmatpush2.msra.mxu1 %v3412_v33  ;;  %v19022_v22 = vld [vmem:[#allocation114_spill] sm:$0xff] }
 0x187   : > { %3596 = vmatprep.mubr.f32.mxu0 %v1828_v5  ;;  %v19015_v30 = vunpack.i.h.bf16 %v18911_v15  ;;  %v8346_v1 = vunpack.i.h.bf16 %v19003_v40  ;;  %19016 = vst [vmem:[#allocation91_spill] sm:$0xff] %v12342_v58  ;;  %v1779_v34 = vsel %vm1772_vm10, %v1754_v49, %v8345_v62  ;;  %v19018_v25 = vunpack.i.l.bf16 %v19017_v29  ;;  %v3411_v62 = vld [vmem:[%s18436_s1 + $0x3b8] sm:$0xff]  ;;  %v19024_v33 = vld [vmem:[#allocation98_spill] sm:$0xff] }
 0x188   : > { %8788 = vrot.lane.b32.xlu0 %v19013_v2, %s9966_s18  ;;  %v12334_v28 = vsel %vm1722_vm8, %v19014_v11, %v8245_v50  ;;  %v19019_v50 = vunpack.i.h.bf16 %v19017_v29  ;;  %v8406_v15 = vunpack.i.h.bf16 %v19005_v47  ;;  %v1804_v40 = vsel %vm1797_vm11, %v1779_v34, %v8405_v23  ;;  %3597 = vmatmul.mubr.f32.gmra.mxu0 %v19022_v22  ;;  %v3410_v47 = vld [vmem:[%s18436_s1 + $0x3b0] sm:$0xff]  ;;  %v19025_v34 = vld [vmem:[#allocation43_spill] sm:$0xff] }
 0x189   : > { %v12339_v57 = vsel %vm1722_vm8, %v19015_v30, %v8246_v36  ;;  %v12348_v19 = vsel %vm1722_vm8, %v19018_v25, %v8240_v44  ;;  %v12356_v36 = vpop.permute.xlu0 %8508  ;;  %v8256_v43 = vunpack.i.h.bf16 %v19021_v55  ;;  %v8255_v44 = vunpack.i.l.bf16 %v19021_v55  ;;  %3751 = vmatprep.subr.mxu1 %v3411_v62 }
 0x18a   : > { %v12353_v5 = vsel %vm1722_vm8, %v19019_v50, %v8241_v26  ;;  %19020 = vst [vmem:[#allocation99_spill] sm:$0xff] %v12356_v36  ;;  %v19023_v26 = vpack.i.bf16 %v11978_v38, %v11975_v20  ;;  %v1829_v23 = vsel %vm1822_vm12, %v1804_v40, %v18631_v35  ;;  %v8251_v2 = vunpack.i.h.bf16 %v19024_v33  ;;  %v19027_v38 = vld [vmem:[#allocation104_spill] sm:$0xff]  ;;  %v12387_v55 = vpop.permute.xlu1 %8523  ;;  %3752 = vmatpush2.msra.mxu1 %v3410_v47  ;;  %v19050_v36 = vld [vmem:[#allocation6_spill] sm:$0xff] }
 0x18b   : > { %v8250_v11 = vunpack.i.l.bf16 %v19024_v33  ;;  %v1755_v30 = vsel %vm1747_vm9, %v12239_v8, %v8286_v24  ;;  %v8290_v29 = vunpack.i.l.bf16 %v19025_v34  ;;  %v19026_v20 = vpack.i.bf16 %v11996_v61, %v11993_v0  ;;  %3602 = vmatprep.mubr.f32.mxu0 %v1829_v23  ;;  %v19028_v50 = vld [vmem:[#allocation60_spill] sm:$0xff]  ;;  %v19029_v8 = vld [vmem:[#allocation105_spill] sm:$0xff]  ;;  %v19030_v33 = vld [vmem:[#allocation74_spill] sm:$0xff] }
 0x18c   : > { %8803 = vrot.lane.b32.xlu1 %v19023_v26, %s9966_s18  ;;  %v8265_v25 = vunpack.i.l.bf16 %v19027_v38  ;;  %v8350_v40 = vunpack.i.l.bf16 %v19028_v50  ;;  %v1780_v22 = vsel %vm1772_vm10, %v1755_v30, %v8346_v1  ;;  %v8266_v26 = vunpack.i.h.bf16 %v19027_v38  ;;  %v3409_v61 = vld [vmem:[%s18436_s1 + $0x3a8] sm:$0xff]  ;;  %v19033_v38 = vld [vmem:[#allocation115_spill] sm:$0xff] }
 0x18d   : > { %8798 = vrot.lane.b32.xlu0 %v19026_v20, %s9966_s18  ;;  %v8260_v24 = vunpack.i.l.bf16 %v19029_v8  ;;  %v8410_v35 = vunpack.i.l.bf16 %v19030_v33  ;;  %v12393_v49 = vpop.permute.xlu0 %8518  ;;  %v1805_v0 = vsel %vm1797_vm11, %v1780_v22, %v8406_v15  ;;  %v19031_v23 = vunpack.i.l.bf16 %v18923_v9  ;;  %3603 = vmatmul.mubr.f32.gmra.mxu0 %v19033_v38  ;;  %s9982_s18 = smov 86  }
 0x18e   : > { %v19032_v62 = vunpack.i.h.bf16 %v18923_v9  ;;  %v18632_v20 = vunpack.i.l.bf16 %v12145_v31  ;;  %v19034_v15 = vpack.i.bf16 %v11022_v41, %v11034_v10  ;;  %v19035_v47 = vunpack.i.h.bf16 %v12073_v42  ;;  %v3408_v9 = vld [vmem:[%s18436_s1 + $0x3a0] sm:$0xff]  ;;  %3753 = vmatprep.subr.mxu1 %v3409_v61  ;;  %v19042_v61 = vld [vmem:[#allocation42_spill] sm:$0xff] }
 0x18f   : > { %v12402_v1 = vsel %vm1722_vm8, %v19031_v23, %v8255_v44  ;;  %v19037_v23 = vunpack.i.h.bf16 %v18927_v6  ;;  %v8291_v41 = vunpack.i.h.bf16 %v19025_v34  ;;  %v1756_v38 = vsel %vm1747_vm9, %v1731_v39, %v8290_v29  ;;  %3754 = vmatpush2.msra.mxu1 %v3408_v9  ;;  %v3406_v9 = vld [vmem:[%s18436_s1 + $0x390] sm:$0xff] }
 0x190   : > { %v12407_v30 = vsel %vm1722_vm8, %v19032_v62, %v8256_v43  ;;  %8813 = vrot.lane.b32.xlu1 %v19034_v15, %s9967_s23  ;;  %v1830_v44 = vsel %vm1822_vm12, %v1805_v0, %v19035_v47  ;;  %v19036_v43 = vunpack.i.l.bf16 %v18927_v6  ;;  %v19038_v0 = vpack.i.bf16 %v12084_v4, %v11034_v10  ;;  %v12444_v47 = vpop.permute.xlu1 %8533 }
 0x191   : > { %v12429_v62 = vsel %vm1722_vm8, %v19037_v23, %v8251_v2  ;;  %3608 = vmatprep.mubr.f32.mxu0 %v1830_v44  ;;  %v19039_v15 = vunpack.i.l.bf16 %v18931_v54  ;;  %v8261_v6 = vunpack.i.h.bf16 %v19029_v8  ;;  %v8351_v2 = vunpack.i.h.bf16 %v19028_v50  ;;  %v12458_v8 = vpop.permute.xlu0 %8528 }
 0x192   : > { %v12424_v22 = vsel %vm1722_vm8, %v19036_v43, %v8250_v11  ;;  %8808 = vrot.lane.b32.xlu0 %v19038_v0, %s9968_s13  ;;  %v1781_v39 = vsel %vm1772_vm10, %v1756_v38, %v8350_v40  ;;  %v19040_v34 = vunpack.i.h.bf16 %v18931_v54  ;;  %v19041_v4 = vunpack.i.l.bf16 %v18934_v18  ;;  %v3407_v40 = vld [vmem:[%s18436_s1 + $0x398] sm:$0xff]  ;;  %v19044_v38 = vld [vmem:[#allocation44_spill] sm:$0xff]  ;;  %v19060_v54 = vld [vmem:[#allocation62_spill] sm:$0xff] }
 0x193   : > { %v12440_v11 = vsel %vm1722_vm8, %v19039_v15, %v8265_v25  ;;  %v8411_v25 = vunpack.i.h.bf16 %v19030_v33  ;;  %v1806_v50 = vsel %vm1797_vm11, %v1781_v39, %v8410_v35  ;;  %v8296_v44 = vunpack.i.h.bf16 %v19042_v61  ;;  %v19043_v33 = vld [vmem:[#allocation101_spill] sm:$0xff]  ;;  %3755 = vmatprep.subr.mxu1 %v3407_v40 }
 0x194   : > { %v12450_v10 = vsel %vm1722_vm8, %v19040_v34, %v8266_v26  ;;  %v12455_v29 = vsel %vm1722_vm8, %v19041_v4, %v8260_v24  ;;  %v3441_v26 = vld [vmem:[%s18436_s1 + $0x4a8] sm:$0xff]  ;;  %v8295_v24 = vunpack.i.l.bf16 %v19042_v61  ;;  %3609 = vmatmul.mubr.f32.gmra.mxu0 %v19043_v33  ;;  %8823 = vrot.lane.b32.xlu1 %v12172_v46, %s9969_s9  ;;  %v1831_v35 = vsel %vm1822_vm12, %v1806_v50, %v18632_v20  ;;  %v3440_v4 = vld [vmem:[%s18436_s1 + $0x4a0] sm:$0xff] }
 0x195   : > { %v1757_v23 = vsel %vm1747_vm9, %v12323_v21, %v8291_v41  ;;  %v8306_v0 = vunpack.i.h.bf16 %v19044_v38  ;;  %v8305_v15 = vunpack.i.l.bf16 %v19044_v38  ;;  %v19045_v39 = vld [vmem:[#allocation45_spill] sm:$0xff]  ;;  %3614 = vmatprep.mubr.f32.mxu0 %v1831_v35  ;;  %v19046_v50 = vunpack.i.h.bf16 %v18934_v18  ;;  %v19047_v41 = vld [vmem:[#allocation59_spill] sm:$0xff]  ;;  %v12496_v38 = vpop.permute.xlu1 %8543  ;;  %3930 = vmatprep.subr.mxu0 %v3441_v26  ;;  %v12500_v43 = vpop.permute.xlu0 %8538 }
 0x196   : > { %v8300_v34 = vunpack.i.l.bf16 %v19045_v39  ;;  %8818 = vrot.lane.b32.xlu0 %v12172_v46, %s9970_s29  ;;  %v8301_v21 = vunpack.i.h.bf16 %v19045_v39  ;;  %v8355_v33 = vunpack.i.l.bf16 %v19047_v41  ;;  %v1782_v20 = vsel %vm1772_vm10, %v1757_v23, %v8351_v2  ;;  %v19048_v46 = vld [vmem:[#allocation73_spill] sm:$0xff]  ;;  %v19049_v18 = vld [vmem:[#allocation7_spill] sm:$0xff]  ;;  %3756 = vmatpush2.msra.mxu1 %v3406_v9 }
 0x197   : > { %v12492_v61 = vsel %vm1722_vm8, %v19046_v50, %v8261_v6  ;;  %v8415_v35 = vunpack.i.l.bf16 %v19048_v46  ;;  %v1807_v58 = vsel %vm1797_vm11, %v1782_v20, %v8411_v25  ;;  %v3405_v39 = vld [vmem:[%s18436_s1 + $0x388] sm:$0xff]  ;;  %3931 = vmatpush1.msra.mxu0 %v3440_v4  ;;  %v3439_v2 = vld [vmem:[%s18436_s1 + $0x498] sm:$0xff]  ;;  %v1758_v40 = vsel %vm1747_vm9, %v12276_v63, %v8295_v24  ;;  %v19051_v25 = vld [vmem:[#allocation108_spill] sm:$0xff] }
 0x198   : > { %v1759_v26 = vsel %vm1747_vm9, %v12303_v60, %v8296_v44  ;;  %v18635_v20 = vunpack.i.l.bf16 %v12137_v27  ;;  %3615 = vmatmul.mubr.f32.gmra.mxu0 %v19051_v25  ;;  %8833 = vrot.lane.b32.xlu1 %v12254_v17, %s9968_s13  ;;  %v19052_v9 = vunpack.i.h.bf16 %v12145_v31  ;;  %v3404_v4 = vld [vmem:[%s18436_s1 + $0x380] sm:$0xff]  ;;  %v3438_v63 = vld [vmem:[%s18436_s1 + $0x490] sm:$0xff]  ;;  %v12530_v60 = vsel %vm1747_vm9, %v12334_v28, %v8305_v15  ;;  %v19055_v15 = vld [vmem:[#allocation47_spill] sm:$0xff] }
 0x199   : > { %v12534_v44 = vsel %vm1747_vm9, %v12339_v57, %v8306_v0  ;;  %v12538_v24 = vsel %vm1747_vm9, %v12348_v19, %v8300_v34  ;;  %v19054_v25 = vld [vmem:[#allocation12_spill] sm:$0xff]  ;;  %v8356_v57 = vunpack.i.h.bf16 %v19047_v41  ;;  %v12549_v0 = vpop.permute.xlu1 %8553  ;;  %v1783_v19 = vsel %vm1772_vm10, %v1758_v40, %v8355_v33  ;;  %3757 = vmatprep.subr.mxu1 %v3405_v39  ;;  %3932 = vmatprep.subr.mxu0 %v3439_v2  ;;  %v3403_v41 = vld [vmem:[%s18436_s1 + $0x378] sm:$0xff]  ;;  %v3437_v33 = vld [vmem:[%s18436_s1 + $0x488] sm:$0xff] }
 0x19a   : > { %v1832_v23 = vsel %vm1822_vm12, %v1807_v58, %v19052_v9  ;;  %v19053_v58 = vld [vmem:[#allocation46_spill] sm:$0xff]  ;;  %8828 = vrot.lane.b32.xlu0 %v19054_v25, %s9971_s16  ;;  %v12545_v9 = vsel %vm1747_vm9, %v12353_v5, %v8301_v21  ;;  %v8311_v34 = vunpack.i.h.bf16 %v19055_v15  ;;  %v8416_v25 = vunpack.i.h.bf16 %v19048_v46  ;;  %v12555_v5 = vpop.permute.xlu0 %8548  ;;  %3758 = vmatpush2.msra.mxu1 %v3404_v4  ;;  %v19056_v2 = vld [vmem:[#allocation107_spill] sm:$0xff]  ;;  %v19057_v46 = vld [vmem:[#allocation9_spill] sm:$0xff] }
 0x19b   : > { %v8315_v50 = vunpack.i.l.bf16 %v19053_v58  ;;  %3620 = vmatprep.mubr.f32.mxu0 %v1832_v23  ;;  %v8316_v28 = vunpack.i.h.bf16 %v19053_v58  ;;  %v8310_v23 = vunpack.i.l.bf16 %v19055_v15  ;;  %v1808_v21 = vsel %vm1797_vm11, %v1783_v19, %v8415_v35  ;;  %3933 = vmatpush1.msra.mxu0 %v3438_v63  ;;  %v9862_v40 = vld [vmem:[%s10095_s17 + $0x28] sm:$0xff]  ;;  %v9863_v4 = vld [vmem:[%s10095_s17 + $0x20] sm:$0xff]  ;;  %v3402_v63 = vld [vmem:[%s18436_s1 + $0x370] sm:$0xff] }
 0x19c   : > { %3621 = vmatmul.mubr.f32.gmra.mxu0 %v19056_v2  ;;  %2452 = vrot.lane.b32.xlu1 %v19057_v46, %s9972_s14  ;;  %v1833_v35 = vsel %vm1822_vm12, %v1808_v21, %v18635_v20  ;;  %v12573_v58 = vpack.i.bf16 %v9862_v40, %v9863_v4  ;;  %v3436_v19 = vld [vmem:[%s18436_s1 + $0x480] sm:$0xff]  ;;  %v19059_v20 = vld [vmem:[#allocation49_spill] sm:$0xff]  ;;  %v8360_v16 = vunpack.i.l.bf16 %v19060_v54 }
 0x19d   : > { %v12583_v15 = vsel %vm1747_vm9, %v12402_v1, %v8315_v50  ;;  %v19058_v2 = vld [vmem:[#allocation48_spill] sm:$0xff]  ;;  %v8320_v39 = vunpack.i.l.bf16 %v19059_v20  ;;  %3626 = vmatprep.mubr.f32.mxu0 %v1833_v35  ;;  %v12592_v40 = vsel %vm1747_vm9, %v12407_v30, %v8316_v28  ;;  %v8321_v4 = vunpack.i.h.bf16 %v19059_v20  ;;  %v12596_v1 = vpop.permute.xlu1 %8563  ;;  %3759 = vmatprep.subr.mxu1 %v3403_v41  ;;  %v19061_v30 = vld [vmem:[#allocation102_spill] sm:$0xff] }
 0x19e   : > { %v8326_v6 = vunpack.i.h.bf16 %v19058_v2  ;;  %v8325_v21 = vunpack.i.l.bf16 %v19058_v2  ;;  %8838 = vrot.lane.b32.xlu0 %v12254_v17, %s9967_s23  ;;  %v1784_v50 = vsel %vm1772_vm10, %v1759_v26, %v8356_v57  ;;  %3934 = vmatprep.subr.mxu0 %v3437_v33  ;;  %v12601_v2 = vsel %vm1747_vm9, %v12424_v22, %v8310_v23  ;;  %v12608_v48 = vpop.permute.xlu0 %8558  ;;  %v3401_v26 = vld [vmem:[%s18436_s1 + $0x368] sm:$0xff]  ;;  %v3435_v22 = vld [vmem:[%s18436_s1 + $0x478] sm:$0xff]  ;;  %v3400_v33 = vld [vmem:[%s18436_s1 + $0x360] sm:$0xff] }
 0x19f   : > { %v12605_v35 = vsel %vm1747_vm9, %v12429_v62, %v8311_v34  ;;  %v8420_v28 = vunpack.i.l.bf16 %v19061_v30  ;;  %v1809_v20 = vsel %vm1797_vm11, %v1784_v50, %v8416_v25  ;;  %3760 = vmatpush2.msra.mxu1 %v3402_v63  ;;  %3935 = vmatpush1.msra.mxu0 %v3436_v19  ;;  %v19062_v57 = vld [vmem:[#allocation61_spill] sm:$0xff]  ;;  %v19063_v34 = vld [vmem:[#allocation103_spill] sm:$0xff]  ;;  %v19064_v25 = vunpack.i.h.bf16 %v12137_v27  ;;  %v3434_v63 = vld [vmem:[%s18436_s1 + $0x470] sm:$0xff] }
 0x1a0   : > { %v8365_v23 = vunpack.i.l.bf16 %v19062_v57  ;;  %3627 = vmatmul.mubr.f32.gmra.mxu0 %v19063_v34  ;;  %8843 = vrot.lane.b32.xlu1 %v12254_v17, %s9970_s29  ;;  %v12633_v19 = vsel %vm1747_vm9, %v12440_v11, %v8325_v21  ;;  %v12637_v50 = vsel %vm1747_vm9, %v12450_v10, %v8326_v6  ;;  %v8366_v34 = vunpack.i.h.bf16 %v19062_v57  ;;  %v19077_v57 = vld [vmem:[#allocation100_spill] sm:$0xff] }
 0x1a1   : > { %v1834_v41 = vsel %vm1822_vm12, %v1809_v20, %v19064_v25  ;;  %v12641_v20 = vsel %vm1747_vm9, %v12455_v29, %v8320_v39  ;;  %v19065_v25 = vld [vmem:[#allocation10_spill] sm:$0xff]  ;;  %v12648_v11 = vsel %vm1747_vm9, %v12492_v61, %v8321_v4  ;;  %v8361_v21 = vunpack.i.h.bf16 %v19060_v54  ;;  %v12651_v62 = vpop.permute.xlu1 %8573  ;;  %3761 = vmatprep.subr.mxu1 %v3401_v26  ;;  %3936 = vmatprep.subr.mxu0 %v3435_v22  ;;  %v9865_v4 = vld [vmem:[%s10095_s17 + $0x38] sm:$0xf] }
 0x1a2   : > { %2454 = vrot.lane.b32.xlu0 %v19065_v25, %s9972_s14  ;;  %3632 = vmatprep.mubr.f32.mxu0 %v1834_v41  ;;  %19066 = vst [vmem:[#allocation57_spill] sm:$0xff] %v12651_v62  ;;  %v1785_v10 = vsel %vm1772_vm10, %v12538_v24, %v8360_v16  ;;  %v8421_v29 = vunpack.i.h.bf16 %v19061_v30  ;;  %v12656_v6 = vpop.permute.xlu0 %8568  ;;  %v9864_v61 = vld [vmem:[%s10095_s17 + $0x30] sm:$0xff]  ;;  %v3399_v54 = vld [vmem:[%s18436_s1 + $0x358] sm:$0xff]  ;;  %v3433_v16 = vld [vmem:[%s18436_s1 + $0x468] sm:$0xff]  ;;  %v1787_v22 = vsel %vm1772_vm10, %v12530_v60, %v8365_v23  ;;  %v8425_v41 = vunpack.i.l.bf16 %v19077_v57 }
 0x1a3   : > { %19067 = vst [vmem:[#allocation58_spill] sm:$0xff] %v12656_v6  ;;  %v1810_v39 = vsel %vm1797_vm11, %v1785_v10, %v8420_v28  ;;  %v12663_v52 = vpack.i.bf16 %v9865_v4, %v9864_v61  ;;  %3762 = vmatpush2.msra.mxu1 %v3400_v33  ;;  %3937 = vmatpush1.msra.mxu0 %v3434_v63  ;;  %v19071_v30 = vld [vmem:[#allocation106_spill] sm:$0xff]  ;;  %v19072_v28 = vunpack.i.l.bf16 %v12191_v7  ;;  %v3432_v63 = vld [vmem:[%s18436_s1 + $0x460] sm:$0xff]  ;;  %v19076_v6 = vld [vmem:[#allocation113_spill] sm:$0xff] }
 0x1a4   : > { %3633 = vmatmul.mubr.f32.gmra.mxu0 %v19071_v30  ;;  %2550 = vrot.lane.b32.xlu1 %v19065_v25, %s9973_s19  ;;  %v3398_v33 = vld [vmem:[%s18436_s1 + $0x350] sm:$0xff]  ;;  %v19073_v10 = vld [vmem:[#allocation64_spill] sm:$0xff]  ;;  %v1788_v60 = vsel %vm1772_vm10, %v12534_v44, %v8366_v34 }
 0x1a5   : > { %19070 = vst [vmem:[#allocation88_spill] sm:$0xff] %v12663_v52  ;;  %v1835_v26 = vsel %vm1822_vm12, %v1810_v39, %v19072_v28  ;;  %v8376_v61 = vunpack.i.h.bf16 %v19073_v10  ;;  %v8375_v4 = vunpack.i.l.bf16 %v19073_v10  ;;  %v19074_v30 = vld [vmem:[#allocation66_spill] sm:$0xff]  ;;  %v19075_v39 = vld [vmem:[#allocation65_spill] sm:$0xff]  ;;  %v12696_v62 = vpop.permute.xlu1 %8583  ;;  %v1786_v10 = vsel %vm1772_vm10, %v12545_v9, %v8361_v21  ;;  %3763 = vmatprep.subr.mxu1 %v3399_v54  ;;  %3938 = vmatprep.subr.mxu0 %v3433_v16  ;;  %v3431_v9 = vld [vmem:[%s18436_s1 + $0x458] sm:$0xff] }
 0x1a6   : > { %v8370_v37 = vunpack.i.l.bf16 %v19074_v30  ;;  %2548 = vrot.lane.b32.xlu0 %v19057_v46, %s9973_s19  ;;  %3638 = vmatprep.mubr.f32.mxu0 %v1835_v26  ;;  %v8371_v23 = vunpack.i.h.bf16 %v19074_v30  ;;  %v8386_v28 = vunpack.i.h.bf16 %v19075_v39  ;;  %v8385_v24 = vunpack.i.l.bf16 %v19075_v39  ;;  %v12703_v44 = vpop.permute.xlu0 %8578  ;;  %v3397_v30 = vld [vmem:[%s18436_s1 + $0x348] sm:$0xff]  ;;  %v19078_v54 = vld [vmem:[#allocation79_spill] sm:$0xff] }
 0x1a7   : > { %v8381_v52 = vunpack.i.h.bf16 %v19076_v6  ;;  %v8380_v26 = vunpack.i.l.bf16 %v19076_v6  ;;  %v1811_v34 = vsel %vm1797_vm11, %v1786_v10, %v8421_v29  ;;  %3764 = vmatpush2.msra.mxu1 %v3398_v33  ;;  %3939 = vmatpush1.msra.mxu0 %v3432_v63  ;;  %v8426_v21 = vunpack.i.h.bf16 %v19077_v57  ;;  %v3396_v33 = vld [vmem:[%s18436_s1 + $0x340] sm:$0xff]  ;;  %v3430_v57 = vld [vmem:[%s18436_s1 + $0x450] sm:$0xff]  ;;  %v19080_v63 = vld [vmem:[#allocation75_spill] sm:$0xff] }
 0x1a8   : > { %3639 = vmatmul.mubr.f32.gmra.mxu0 %v19078_v54  ;;  %2644 = vrot.lane.b32.xlu1 %v19057_v46, %s9974_s20  ;;  %v19079_v29 = vunpack.i.h.bf16 %v12191_v7  ;;  %v8435_v39 = vunpack.i.l.bf16 %v19080_v63  ;;  %v1789_v10 = vsel %vm1772_vm10, %v12601_v2, %v8370_v37  ;;  %v1792_v54 = vsel %vm1772_vm10, %v12592_v40, %v8376_v61  ;;  %v19081_v37 = vld [vmem:[#allocation78_spill] sm:$0xff] }
 0x1a9   : > { %v12736_v6 = vpop.permute.xlu1 %8593  ;;  %v1790_v59 = vsel %vm1772_vm10, %v12605_v35, %v8371_v23  ;;  %3765 = vmatprep.subr.mxu1 %v3397_v30  ;;  %3940 = vmatprep.subr.mxu0 %v3431_v9  ;;  %v1812_v40 = vsel %vm1797_vm11, %v1787_v22, %v8425_v41  ;;  %v1793_v61 = vsel %vm1772_vm10, %v12641_v20, %v8380_v26  ;;  %v18643_v41 = vunpack.i.h.bf16 %v12187_v56  ;;  %v19082_v22 = vld [vmem:[#allocation80_spill] sm:$0xff]  ;;  %v3394_v23 = vld [vmem:[%s18436_s1 + $0x330] sm:$0xff] }
 0x1aa   : > { %v1836_v16 = vsel %vm1822_vm12, %v1811_v34, %v19079_v29  ;;  %8848 = vrot.lane.b32.xlu0 %v12254_v17, %s9969_s9  ;;  %v1791_v34 = vsel %vm1772_vm10, %v12583_v15, %v8375_v4  ;;  %v8436_v29 = vunpack.i.h.bf16 %v19080_v63  ;;  %v1795_v17 = vsel %vm1772_vm10, %v12633_v19, %v8385_v24  ;;  %v12745_v2 = vpop.permute.xlu0 %8588  ;;  %3766 = vmatpush2.msra.mxu1 %v3396_v33  ;;  %v3395_v19 = vld [vmem:[%s18436_s1 + $0x338] sm:$0xff]  ;;  %v19085_v26 = vld [vmem:[#allocation82_spill] sm:$0xff]  ;;  %v19086_v33 = vld [vmem:[#allocation81_spill] sm:$0xff] }
 0x1ab   : > { %3644 = vmatprep.mubr.f32.mxu0 %v1836_v16  ;;  %v1796_v16 = vsel %vm1772_vm10, %v12637_v50, %v8386_v28  ;;  %v8430_v15 = vunpack.i.l.bf16 %v19081_v37  ;;  %v1794_v35 = vsel %vm1772_vm10, %v12648_v11, %v8381_v52  ;;  %3941 = vmatpush1.msra.mxu0 %v3430_v57  ;;  %v3429_v50 = vld [vmem:[%s18436_s1 + $0x448] sm:$0xff]  ;;  %v8431_v24 = vunpack.i.h.bf16 %v19081_v37  ;;  %v3428_v28 = vld [vmem:[%s18436_s1 + $0x440] sm:$0xff] }
 0x1ac   : > { %3645 = vmatmul.mubr.f32.gmra.mxu0 %v19082_v22  ;;  %v19083_v52 = vpack.i.bf16 %v19050_v36, %v19049_v18  ;;  %v19084_v20 = vunpack.i.l.bf16 %v12187_v56  ;;  %v1813_v4 = vsel %vm1797_vm11, %v1788_v60, %v8426_v21  ;;  %v8446_v30 = vunpack.i.h.bf16 %v19085_v26  ;;  %3767 = vmatprep.subr.mxu1 %v3395_v19 }
 0x1ad   : > { %v8445_v9 = vunpack.i.l.bf16 %v19085_v26  ;;  %v8440_v57 = vunpack.i.l.bf16 %v19086_v33  ;;  %v1816_v60 = vsel %vm1797_vm11, %v1791_v34, %v8435_v39  ;;  %v8441_v21 = vunpack.i.h.bf16 %v19086_v33  ;;  %3942 = vmatprep.subr.mxu0 %v3429_v50  ;;  %3768 = vmatpush2.msra.mxu1 %v3394_v23  ;;  %v3393_v34 = vld [vmem:[%s18436_s1 + $0x328] sm:$0xff]  ;;  %v19087_v50 = vld [vmem:[#allocation86_spill] sm:$0xff]  ;;  %v3392_v23 = vld [vmem:[%s18436_s1 + $0x320] sm:$0xff] }
 0x1ae   : > { %8853 = vrot.lane.b32.xlu1 %v19083_v52, %s9971_s16  ;;  %v1837_v11 = vsel %vm1822_vm12, %v1812_v40, %v19084_v20  ;;  %2646 = vrot.lane.b32.xlu0 %v19065_v25, %s9974_s20  ;;  %v8496_v63 = vunpack.i.h.bf16 %v12245_v12  ;;  %v8495_v37 = vunpack.i.l.bf16 %v12245_v12  ;;  %v12784_v40 = vpop.permute.xlu1 %8603  ;;  %v1817_v22 = vsel %vm1797_vm11, %v1792_v54, %v8436_v29  ;;  %v12790_v26 = vpop.permute.xlu0 %8598  ;;  %v3427_v54 = vld [vmem:[%s18436_s1 + $0x438] sm:$0xff]  ;;  %v3420_v12 = vld [vmem:[%s18436_s1 + $0x400] sm:$0xff] }
 0x1af   : > { %3650 = vmatprep.mubr.f32.mxu0 %v1837_v11  ;;  %v8491_v52 = vunpack.i.h.bf16 %v12249_v13  ;;  %v8490_v20 = vunpack.i.l.bf16 %v12249_v13  ;;  %v18647_v11 = vunpack.i.l.bf16 %v12288_v45  ;;  %v1814_v39 = vsel %vm1797_vm11, %v1789_v10, %v8430_v15  ;;  %3943 = vmatpush1.msra.mxu0 %v3428_v28  ;;  %v3426_v28 = vld [vmem:[%s18436_s1 + $0x430] sm:$0xff] }
 0x1b0   : > { %v18646_v29 = vunpack.i.h.bf16 %v12288_v45  ;;  %v18645_v19 = vunpack.i.l.bf16 %v12294_v14  ;;  %3651 = vmatmul.mubr.f32.gmra.mxu0 %v19087_v50  ;;  %v1838_v10 = vsel %vm1822_vm12, %v1813_v4, %v18643_v41  ;;  %v1815_v15 = vsel %vm1797_vm11, %v1790_v59, %v8431_v24  ;;  %3769 = vmatprep.subr.mxu1 %v3393_v34  ;;  %v3390_v34 = vld [vmem:[%s18436_s1 + $0x310] sm:$0xff] }
 0x1b1   : > { %v18644_v33 = vunpack.i.h.bf16 %v12294_v14  ;;  %3656 = vmatprep.mubr.f32.mxu0 %v1838_v10  ;;  %v1820_v4 = vsel %vm1797_vm11, %v1795_v17, %v8445_v9  ;;  %v1821_v59 = vsel %vm1797_vm11, %v1796_v16, %v8446_v30  ;;  %v8525_v24 = vunpack.i.l.bf16 %v12387_v55  ;;  %3944 = vmatprep.subr.mxu0 %v3427_v54 }
 0x1b2   : > { %2742 = vrot.lane.b32.xlu1 %v19065_v25, %s18667_s22  ;;  %2740 = vrot.lane.b32.xlu0 %v19057_v46, %s18667_s22  ;;  %v1818_v25 = vsel %vm1797_vm11, %v1793_v61, %v8440_v57  ;;  %v12821_v50 = vpop.permute.xlu1 %8613  ;;  %v12826_v41 = vsel %vm1822_vm12, %v1816_v60, %v8495_v37  ;;  %v12831_v46 = vsel %vm1822_vm12, %v1817_v22, %v8496_v63  ;;  %v8526_v17 = vunpack.i.h.bf16 %v12387_v55  ;;  %v12835_v16 = vpop.permute.xlu0 %8608  ;;  %v3391_v55 = vld [vmem:[%s18436_s1 + $0x318] sm:$0xff] }
 0x1b3   : > { %v1819_v61 = vsel %vm1797_vm11, %v1794_v35, %v8441_v21  ;;  %v1839_v30 = vsel %vm1822_vm12, %v1814_v39, %v8490_v20  ;;  %v1840_v9 = vsel %vm1822_vm12, %v1815_v15, %v8491_v52  ;;  %v12846_v57 = vsel %vm1822_vm12, %v1820_v4, %v18647_v11  ;;  %3770 = vmatpush2.msra.mxu1 %v3392_v23  ;;  %v3425_v35 = vld [vmem:[%s18436_s1 + $0x428] sm:$0xff] }
 0x1b4   : > { %3945 = vmatpush1.msra.mxu0 %v3426_v28  ;;  %v8521_v60 = vunpack.i.h.bf16 %v12393_v49  ;;  %v8520_v21 = vunpack.i.l.bf16 %v12393_v49  ;;  %v12862_v22 = vsel %vm1822_vm12, %v1818_v25, %v18645_v19  ;;  %v12867_v39 = vsel %vm1822_vm12, %v1821_v59, %v18646_v29  ;;  %3771 = vmatprep.subr.mxu1 %v3391_v55 }
 0x1b5   : > { %3657 = vmatmul.mubr.f32.gmra.mxu0 %v12032_v3  ;;  %v3424_v3 = vld [vmem:[%s18436_s1 + $0x420] sm:$0xff]  ;;  %v8536_v49 = vunpack.i.h.bf16 %v12444_v47  ;;  %v8535_v54 = vunpack.i.l.bf16 %v12444_v47  ;;  %v8530_v10 = vunpack.i.l.bf16 %v12458_v8  ;;  %v12883_v15 = vsel %vm1822_vm12, %v1819_v61, %v18644_v33  ;;  %3946 = vmatprep.subr.mxu0 %v3425_v35 }
 0x1b6   : > { %2552 = vrot.lane.b32.xlu1 %v19049_v18, %s9973_s19  ;;  %2456 = vrot.lane.b32.xlu0 %v19049_v18, %s9972_s14  ;;  %v19088_v23 = vunpack.i.l.bf16 %v12073_v42  ;;  %v8531_v25 = vunpack.i.h.bf16 %v12458_v8  ;;  %v8546_v47 = vunpack.i.h.bf16 %v12496_v38  ;;  %v8545_v4 = vunpack.i.l.bf16 %v12496_v38  ;;  %v12893_v59 = vpop.permute.xlu1 %8623  ;;  %v3389_v38 = vld [vmem:[%s18436_s1 + $0x308] sm:$0xff] }
 0x1b7   : > { %3662 = vmatprep.mubr.f32.mxu0 %v1839_v30  ;;  %v19089_v30 = vunpack.i.h.bf16 %v12073_v42  ;;  %v8541_v33 = vunpack.i.h.bf16 %v12500_v43  ;;  %v8555_v8 = vunpack.i.l.bf16 %v12549_v0  ;;  %3772 = vmatpush2.msra.mxu1 %v3390_v34  ;;  %v3423_v42 = vld [vmem:[%s18436_s1 + $0x418] sm:$0xff]  ;;  %v8550_v34 = vunpack.i.l.bf16 %v12555_v5 }
 0x1b8   : > { %v12888_v28 = vsel %vm1847_vm13, %v19088_v23, %v8525_v24  ;;  %v8540_v24 = vunpack.i.l.bf16 %v12500_v43  ;;  %v12903_v23 = vpop.permute.xlu0 %8618  ;;  %3947 = vmatpush1.msra.mxu0 %v3424_v3  ;;  %v19091_v43 = vunpack.i.h.bf16 %v12080_v51  ;;  %v3388_v3 = vld [vmem:[%s18436_s1 + $0x300] sm:$0xff]  ;;  %v8551_v19 = vunpack.i.h.bf16 %v12555_v5  ;;  %3773 = vmatprep.subr.mxu1 %v3389_v38 }
 0x1b9   : > { %v12898_v61 = vsel %vm1847_vm13, %v19089_v30, %v8526_v17  ;;  %v19090_v17 = vunpack.i.l.bf16 %v12080_v51  ;;  %v8556_v30 = vunpack.i.h.bf16 %v12549_v0  ;;  %3663 = vmatmul.mubr.f32.gmra.mxu0 %v12038_v53  ;;  %v3422_v51 = vld [vmem:[%s18436_s1 + $0x410] sm:$0xff]  ;;  %v19095_v29 = vunpack.i.h.bf16 %v12145_v31  ;;  %3948 = vmatprep.subr.mxu0 %v3423_v42 }
 0x1ba   : > { %v1853_v35 = vsel %vm1847_vm13, %v19091_v43, %v8521_v60  ;;  %2744 = vrot.lane.b32.xlu1 %v19049_v18, %s18667_s22  ;;  %v19092_v60 = vunpack.i.l.bf16 %v12137_v27  ;;  %2648 = vrot.lane.b32.xlu0 %v19049_v18, %s9974_s20  ;;  %v8565_v5 = vunpack.i.l.bf16 %v12596_v1  ;;  %v8560_v13 = vunpack.i.l.bf16 %v12608_v48 }
 0x1bb   : > { %v1852_v55 = vsel %vm1847_vm13, %v19090_v17, %v8520_v21  ;;  %v19093_v21 = vunpack.i.h.bf16 %v12137_v27  ;;  %v19094_v17 = vunpack.i.l.bf16 %v12145_v31  ;;  %3668 = vmatprep.mubr.f32.mxu0 %v1840_v9  ;;  %v12943_v11 = vsel %vm1847_vm13, %v19095_v29, %v8531_v25  ;;  %3774 = vmatpush2.msra.mxu1 %v3388_v3 }
 0x1bc   : > { %v1858_v0 = vsel %vm1847_vm13, %v19092_v60, %v8535_v54  ;;  %v19096_v54 = vunpack.i.l.bf16 %v12187_v56  ;;  %v12956_v60 = vpop.permute.xlu1 %8633  ;;  %v19098_v31 = vunpack.i.l.bf16 %v12191_v7  ;;  %v19099_v29 = vunpack.i.h.bf16 %v12191_v7  ;;  %3949 = vmatpush1.msra.mxu0 %v3422_v51 }
 0x1bd   : > { %v1859_v53 = vsel %vm1847_vm13, %v19093_v21, %v8536_v49  ;;  %v1856_v43 = vsel %vm1847_vm13, %v19094_v17, %v8530_v10  ;;  %v19097_v49 = vunpack.i.h.bf16 %v12187_v56  ;;  %v12971_v56 = vsel %vm1847_vm13, %v8495_v37, %v8555_v8  ;;  %3669 = vmatmul.mubr.f32.gmra.mxu0 %v12092_v32 }
 0x1be   : > { %v12948_v27 = vsel %vm1847_vm13, %v19096_v54, %v8545_v4  ;;  %v12961_v18 = vsel %vm1847_vm13, %v19098_v31, %v8540_v24  ;;  %v12966_v9 = vsel %vm1847_vm13, %v19099_v29, %v8541_v33  ;;  %v8585_v25 = vunpack.i.l.bf16 %v12696_v62  ;;  %v3421_v4 = vld [vmem:[%s18436_s1 + $0x408] sm:$0xff]  ;;  %8863 = vrot.lane.b32.xlu1 %v12573_v58, %s9967_s23  ;;  %8858 = vrot.lane.b32.xlu0 %v12573_v58, %s9968_s13 }
 0x1bf   : > { %v12953_v10 = vsel %vm1847_vm13, %v19097_v49, %v8546_v47  ;;  %v12974_v47 = vpop.permute.xlu0 %8628  ;;  %v12982_v7 = vsel %vm1847_vm13, %v8496_v63, %v8556_v30  ;;  %v12987_v37 = vsel %vm1847_vm13, %v8490_v20, %v8550_v34  ;;  %v8586_v33 = vunpack.i.h.bf16 %v12696_v62  ;;  %3674 = vmatprep.mubr.f32.mxu0 %v12826_v41  ;;  %3950 = vmatprep.subr.mxu0 %v3421_v4  ;;  %v19101_v49 = vld [vmem:[#allocation51_spill] sm:$0xff] }
 0x1c0   : > { %v8580_v24 = vunpack.i.l.bf16 %v12703_v44  ;;  %v13000_v63 = vsel %vm1847_vm13, %v8491_v52, %v8551_v19  ;;  %v8566_v20 = vunpack.i.h.bf16 %v12596_v1  ;;  %v8561_v62 = vunpack.i.h.bf16 %v12608_v48  ;;  %v8644_v42 = vpop.permute.xlu1 %8643  ;;  %3951 = vmatpush1.msra.mxu0 %v3420_v12 }
 0x1c1   : > { %v8581_v8 = vunpack.i.h.bf16 %v12703_v44  ;;  %v19100_v32 = vunpack.i.l.bf16 %v12288_v45  ;;  %v8596_v52 = vunpack.i.h.bf16 %v12736_v6  ;;  %v8595_v19 = vunpack.i.l.bf16 %v12736_v6  ;;  %3675 = vmatmul.mubr.f32.gmra.mxu0 %v19101_v49  ;;  %v19104_v49 = vld [vmem:[#allocation15_spill] sm:$0xff] }
 0x1c2   : > { %v1879_v44 = vsel %vm1872_vm14, %v12888_v28, %v8585_v25  ;;  %v8590_v30 = vunpack.i.l.bf16 %v12745_v2  ;;  %v8646_v34 = vunpack.i.h.bf16 %v8644_v42  ;;  %v8645_v41 = vunpack.i.l.bf16 %v8644_v42  ;;  %8868 = vrot.lane.b32.xlu1 %v12573_v58, %s9970_s29  ;;  %2458 = vrot.lane.b32.xlu0 %v19050_v36, %s9972_s14 }
 0x1c3   : > { %v13011_v38 = vsel %vm1847_vm13, %v19100_v32, %v8565_v5  ;;  %v8639_v3 = vpop.permute.xlu0 %8638  ;;  %v1880_v51 = vsel %vm1872_vm14, %v12898_v61, %v8586_v33  ;;  %v1877_v21 = vsel %vm1872_vm14, %v1852_v55, %v8580_v24  ;;  %v1878_v6 = vsel %vm1872_vm14, %v1853_v35, %v8581_v8  ;;  %3680 = vmatprep.mubr.f32.mxu0 %v12831_v46  ;;  %v19102_v32 = vld [vmem:[#allocation85_spill] sm:$0xff] }
 0x1c4   : > { %v8641_v17 = vunpack.i.h.bf16 %v8639_v3  ;;  %v8640_v54 = vunpack.i.l.bf16 %v8639_v3  ;;  %v8591_v28 = vunpack.i.h.bf16 %v12745_v2  ;;  %v13031_v61 = vsel %vm1897_vm15, %v1879_v44, %v8645_v41  ;;  %v8654_v29 = vpop.permute.xlu1 %8653 }
 0x1c5   : > { %v13034_v55 = vsel %vm1897_vm15, %v1880_v51, %v8646_v34  ;;  %v1883_v5 = vsel %vm1872_vm14, %v1858_v0, %v8595_v19  ;;  %v1884_v31 = vsel %vm1872_vm14, %v1859_v53, %v8596_v52  ;;  %v1881_v25 = vsel %vm1872_vm14, %v1856_v43, %v8590_v30  ;;  %3681 = vmatmul.mubr.f32.gmra.mxu0 %v19102_v32 }
 0x1c6   : > { %v13039_v35 = vsel %vm1897_vm15, %v1877_v21, %v8640_v54  ;;  %v13042_v2 = vsel %vm1897_vm15, %v1878_v6, %v8641_v17  ;;  %v8605_v46 = vunpack.i.l.bf16 %v12784_v40  ;;  %v8656_v4 = vunpack.i.h.bf16 %v8654_v29  ;;  %8873 = vrot.lane.b32.xlu1 %v12573_v58, %s9969_s9  ;;  %2554 = vrot.lane.b32.xlu0 %v19050_v36, %s9973_s19  ;;  %v19103_v54 = vld [vmem:[#allocation109_spill] sm:$0xff]  ;;  %v19105_v6 = vld [vmem:[#allocation8_spill] sm:$0xff] }
 0x1c7   : > { %v8655_v33 = vunpack.i.l.bf16 %v8654_v29  ;;  %v8649_v24 = vpop.permute.xlu0 %8648  ;;  %v8606_v12 = vunpack.i.h.bf16 %v12784_v40  ;;  %v8600_v0 = vunpack.i.l.bf16 %v12790_v26  ;;  %v1882_v52 = vsel %vm1872_vm14, %v12943_v11, %v8591_v28  ;;  %3686 = vmatprep.mubr.f32.mxu0 %v12862_v22 }
 0x1c8   : > { %v8651_v8 = vunpack.i.h.bf16 %v8649_v24  ;;  %v8650_v53 = vunpack.i.l.bf16 %v8649_v24  ;;  %v8601_v43 = vunpack.i.h.bf16 %v12790_v26  ;;  %v13061_v19 = vsel %vm1897_vm15, %v1884_v31, %v8656_v4  ;;  %v8664_v44 = vpop.permute.xlu1 %8663 }
 0x1c9   : > { %v13058_v40 = vsel %vm1897_vm15, %v1883_v5, %v8655_v33  ;;  %v8616_v42 = vunpack.i.h.bf16 %v12821_v50  ;;  %v8615_v58 = vunpack.i.l.bf16 %v12821_v50  ;;  %v1887_v22 = vsel %vm1872_vm14, %v12948_v27, %v8605_v46  ;;  %3687 = vmatmul.mubr.f32.gmra.mxu0 %v19103_v54 }
 0x1ca   : > { %v13066_v11 = vsel %vm1897_vm15, %v1881_v25, %v8650_v53  ;;  %v13069_v26 = vsel %vm1897_vm15, %v1882_v52, %v8651_v8  ;;  %v8610_v30 = vunpack.i.l.bf16 %v12835_v16  ;;  %v8666_v34 = vunpack.i.h.bf16 %v8664_v44  ;;  %2650 = vrot.lane.b32.xlu0 %v19050_v36, %s9974_s20  ;;  %3692 = vmatprep.mubr.f32.mxu0 %v12883_v15  ;;  %v19107_v8 = vld [vmem:[#allocation50_spill] sm:$0xff]  ;;  %v19108_v53 = vld [vmem:[#allocation88_spill] sm:$0xff] }
 0x1cb   : > { %v8665_v41 = vunpack.i.l.bf16 %v8664_v44  ;;  %v8659_v3 = vpop.permute.xlu0 %8658  ;;  %v1888_v51 = vsel %vm1872_vm14, %v12953_v10, %v8606_v12  ;;  %v1885_v50 = vsel %vm1872_vm14, %v12961_v18, %v8600_v0  ;;  %v19106_v28 = vpack.i.bf16 %v19104_v49, %v19105_v6 }
 0x1cc   : > { %v8661_v21 = vunpack.i.h.bf16 %v8659_v3  ;;  %v8660_v17 = vunpack.i.l.bf16 %v8659_v3  ;;  %v1886_v27 = vsel %vm1872_vm14, %v12966_v9, %v8601_v43  ;;  %v8611_v5 = vunpack.i.h.bf16 %v12835_v16  ;;  %v8674_v9 = vpop.permute.xlu1 %8673 }
 0x1cd   : > { %8878 = vrot.lane.b32.xlu1 %v19106_v28, %s9971_s16  ;;  %v13090_v10 = vsel %vm1897_vm15, %v1887_v22, %v8665_v41  ;;  %v13093_v18 = vsel %vm1897_vm15, %v1888_v51, %v8666_v34  ;;  %v1891_v31 = vsel %vm1872_vm14, %v12971_v56, %v8615_v58  ;;  %v1892_v29 = vsel %vm1872_vm14, %v12982_v7, %v8616_v42  ;;  %v19112_v51 = vld [vmem:[#allocation53_spill] sm:$0xff] }
 0x1ce   : > { %v13100_v16 = vsel %vm1897_vm15, %v1885_v50, %v8660_v17  ;;  %v13103_v25 = vsel %vm1897_vm15, %v1886_v27, %v8661_v21  ;;  %v1889_v15 = vsel %vm1872_vm14, %v12987_v37, %v8610_v30  ;;  %v8625_v46 = vunpack.i.l.bf16 %v12893_v59  ;;  %3693 = vmatmul.mubr.f32.gmra.mxu0 %v19107_v8  ;;  %2746 = vrot.lane.b32.xlu0 %v19050_v36, %s18667_s22  ;;  %v19113_v50 = vld [vmem:[#allocation67_spill] sm:$0xff]  ;;  %v19115_v17 = vld [vmem:[#allocation56_spill] sm:$0xff] }
 0x1cf   : > { %v8676_v4 = vunpack.i.h.bf16 %v8674_v9  ;;  %v8675_v33 = vunpack.i.l.bf16 %v8674_v9  ;;  %v8669_v24 = vpop.permute.xlu0 %8668  ;;  %v8626_v56 = vunpack.i.h.bf16 %v12893_v59  ;;  %v8620_v12 = vunpack.i.l.bf16 %v12903_v23  ;;  %3698 = vmatprep.mubr.f32.mxu0 %v12846_v57 }
 0x1d0   : > { %v8671_v7 = vunpack.i.h.bf16 %v8669_v24  ;;  %v8670_v0 = vunpack.i.l.bf16 %v8669_v24  ;;  %v1890_v32 = vsel %vm1872_vm14, %v13000_v63, %v8611_v5  ;;  %v8621_v37 = vunpack.i.h.bf16 %v12903_v23  ;;  %v8684_v63 = vpop.permute.xlu1 %8683  ;;  %v19116_v5 = vld [vmem:[#allocation83_spill] sm:$0xff]  ;;  %v19118_v24 = vld [vmem:[#allocation16_spill] sm:$0xff] }
 0x1d1   : > { %8883 = vrot.lane.b32.xlu1 %v19108_v53, %s9968_s13  ;;  %v13120_v59 = vsel %vm1897_vm15, %v1891_v31, %v8675_v33  ;;  %v13123_v52 = vsel %vm1897_vm15, %v1892_v29, %v8676_v4  ;;  %v19109_v43 = vunpack.i.h.bf16 %v12288_v45  ;;  %v19110_v23 = vunpack.i.l.bf16 %v12294_v14 }
 0x1d2   : > { %v13136_v57 = vsel %vm1897_vm15, %v1889_v15, %v8670_v0  ;;  %v13139_v58 = vsel %vm1897_vm15, %v1890_v32, %v8671_v7  ;;  %v19111_v1 = vunpack.i.h.bf16 %v12294_v14  ;;  %v8686_v44 = vunpack.i.h.bf16 %v8684_v63  ;;  %3699 = vmatmul.mubr.f32.gmra.mxu0 %v19112_v51  ;;  %8888 = vrot.lane.b32.xlu0 %v19108_v53, %s9967_s23 }
 0x1d3   : > { %v1871_v42 = vsel %vm1847_vm13, %v19109_v43, %v8566_v20  ;;  %v1868_v36 = vsel %vm1847_vm13, %v19110_v23, %v8560_v13  ;;  %v1895_v20 = vsel %vm1872_vm14, %v13011_v38, %v8625_v46  ;;  %v8685_v22 = vunpack.i.l.bf16 %v8684_v63  ;;  %v8679_v30 = vpop.permute.xlu0 %8678  ;;  %3704 = vmatprep.mubr.f32.mxu0 %v12867_v39  ;;  %v9867_v23 = vld [vmem:[%s10095_s17 + $0x48] sm:$0xff] }
 0x1d4   : > { %v1869_v45 = vsel %vm1847_vm13, %v19111_v1, %v8561_v62  ;;  %v1896_v13 = vsel %vm1872_vm14, %v1871_v42, %v8626_v56  ;;  %v1893_v34 = vsel %vm1872_vm14, %v1868_v36, %v8620_v12  ;;  %v8681_v41 = vunpack.i.h.bf16 %v8679_v30  ;;  %v13163_v38 = vpop.permute.xlu1 %8693  ;;  %v19119_v56 = vld [vmem:[#allocation11_spill] sm:$0xff] }
 0x1d5   : > { %v8680_v3 = vunpack.i.l.bf16 %v8679_v30  ;;  %2460 = vrot.lane.b32.xlu1 %v19105_v6, %s9972_s14  ;;  %v1894_v48 = vsel %vm1872_vm14, %v1869_v45, %v8621_v37  ;;  %v13158_v14 = vsel %vm1897_vm15, %v1895_v20, %v8685_v22  ;;  %v13161_v62 = vsel %vm1897_vm15, %v1896_v13, %v8686_v44  ;;  %v9868_v30 = vld [vmem:[%s10095_s17 + $0x50] sm:$0xff]  ;;  %v9869_v13 = vld [vmem:[%s10095_s17 + $0x58] sm:$0xf] }
 0x1d6   : > { %v19114_v21 = vunpack.i.h.bf16 %v19113_v50  ;;  %v13173_v27 = vsel %vm1897_vm15, %v1894_v48, %v8681_v41  ;;  %v19117_v31 = vunpack.i.h.bf16 %v19116_v5  ;;  %2462 = vrot.lane.b32.xlu0 %v19104_v49, %s9972_s14  ;;  %v18650_v9 = vmov 0.0  }
 0x1d7   : > { %v13170_v28 = vsel %vm1897_vm15, %v1893_v34, %v8680_v3  ;;  %v13175_v39 = vpop.permute.xlu0 %8688  ;;  %v8902_v12 = vpack.i.bf16 %v19119_v56, %v19118_v24  ;;  %v13230_v34 = vpack.i.bf16 %v9869_v13, %v9868_v30 }
 0x1d8   : > { %v1696_v54 = vsel %vm1672_vm5, %v19115_v17, %v19114_v21  ;;  %v8704_v15 = vpop.permute.xlu1 %8703 }
 0x1d9   : > { %v1721_v29 = vsel %vm1697_vm7, %v1696_v54, %v19117_v31  ;;  %8893 = vrot.lane.b32.xlu1 %v19108_v53, %s9970_s29  ;;  %v8705_v63 = vunpack.i.l.bf16 %v8704_v15 }
 0x1da   : > { %3705 = vmatmul.mubr.f32.gmra.mxu0 %v1721_v29  ;;  %2556 = vrot.lane.b32.xlu0 %v19105_v6, %s9973_s19 }
 0x1db   : > { %3984 = vmatprep.mubr.f32.mxu0 %v18650_v9  ;;  %v8699_v46 = vpop.permute.xlu0 %8698  ;;  %v1929_v54 = vsel %vm1922_vm1, %v13031_v61, %v8705_v63 }
 0x1dc   : > { %v8714_v4 = vpop.permute.xlu1 %8713  ;;  %v8701_v1 = vunpack.i.h.bf16 %v8699_v46  ;;  %v8700_v45 = vunpack.i.l.bf16 %v8699_v46 }
 0x1dd   : > { %2558 = vrot.lane.b32.xlu1 %v19104_v49, %s9973_s19  ;;  %v8716_v20 = vunpack.i.h.bf16 %v8714_v4  ;;  %v8715_v44 = vunpack.i.l.bf16 %v8714_v4 }
 0x1de   : > { %8898 = vrot.lane.b32.xlu0 %v19108_v53, %s9969_s9  ;;  %v1927_v31 = vsel %vm1922_vm1, %v13039_v35, %v8700_v45  ;;  %v1928_v29 = vsel %vm1922_vm1, %v13042_v2, %v8701_v1 }
 0x1df   : > { %v8709_v33 = vpop.permute.xlu0 %8708  ;;  %v1934_v35 = vsel %vm1922_vm1, %v13061_v19, %v8716_v20 }
 0x1e0   : > { %v13195_v7 = vpop.permute.xlu1 %8723  ;;  %v8711_v41 = vunpack.i.h.bf16 %v8709_v33  ;;  %v8710_v3 = vunpack.i.l.bf16 %v8709_v33  ;;  %v1933_v33 = vsel %vm1922_vm1, %v13058_v40, %v8715_v44 }
 0x1e1   : > { %2652 = vrot.lane.b32.xlu1 %v19105_v6, %s9974_s20  ;;  %v8725_v63 = vunpack.i.l.bf16 %v13195_v7 }
 0x1e2   : > { %2654 = vrot.lane.b32.xlu0 %v19104_v49, %s9974_s20 }
 0x1e3   : > { %v13197_v0 = vpop.permute.xlu0 %8718 }
 0x1e4   : > { %v13202_v8 = vpop.permute.xlu1 %8733  ;;  %v8721_v40 = vunpack.i.h.bf16 %v13197_v0  ;;  %v8720_v19 = vunpack.i.l.bf16 %v13197_v0 }
 0x1e5   : > { %8903 = vrot.lane.b32.xlu1 %v8902_v12, %s9971_s16  ;;  %v8736_v20 = vunpack.i.h.bf16 %v13202_v8 }
 0x1e6   : > { %2748 = vrot.lane.b32.xlu0 %v19105_v6, %s18667_s22  ;;  %v8706_v6 = vunpack.i.h.bf16 %v8704_v15 }
 0x1e7   : > { %v13204_v32 = vpop.permute.xlu0 %8728 }
 0x1e8   : > { %v13210_v53 = vpop.permute.xlu1 %8743  ;;  %v1930_v5 = vsel %vm1922_vm1, %v13034_v55, %v8706_v6  ;;  %v8726_v6 = vunpack.i.h.bf16 %v13195_v7  ;;  %v8735_v7 = vunpack.i.l.bf16 %v13202_v8  ;;  %v8731_v0 = vunpack.i.h.bf16 %v13204_v32 }
 0x1e9   : > { %2750 = vrot.lane.b32.xlu1 %v19104_v49, %s18667_s22  ;;  %v9866_v49 = vld [vmem:[%s10095_s17 + $0x40] sm:$0xff]  ;;  %v8730_v13 = vunpack.i.l.bf16 %v13204_v32  ;;  %v1937_v8 = vsel %vm1922_vm1, %v13090_v10, %v8725_v63  ;;  %v1936_v32 = vsel %vm1922_vm1, %v13103_v25, %v8721_v40 }
 0x1ea   : > { %2464 = vrot.lane.b32.xlu0 %v19118_v24, %s9972_s14  ;;  %v8912_v36 = vpack.i.bf16 %v9867_v23, %v9866_v49  ;;  %v1931_v49 = vsel %vm1922_vm1, %v13066_v11, %v8710_v3  ;;  %v1932_v23 = vsel %vm1922_vm1, %v13069_v26, %v8711_v41 }
 0x1eb   : > { %v13212_v37 = vpop.permute.xlu0 %8738 }
 0x1ec   : > { %v13218_v43 = vpop.permute.xlu1 %8753 }
 0x1ed   : > { %2560 = vrot.lane.b32.xlu1 %v19118_v24, %s9973_s19 }
 0x1ee   : > { %2656 = vrot.lane.b32.xlu0 %v19118_v24, %s9974_s20 }
 0x1ef   : > { %v13220_v42 = vpop.permute.xlu0 %8748 }
 0x1f0   : > { %v8764_v22 = vpop.permute.xlu1 %8763 }
 0x1f1   : > { %2752 = vrot.lane.b32.xlu1 %v19118_v24, %s18667_s22  ;;  %v8766_v51 = vunpack.i.h.bf16 %v8764_v22  ;;  %v8765_v48 = vunpack.i.l.bf16 %v8764_v22 }
 0x1f2   : > { %8908 = vrot.lane.b32.xlu0 %v8912_v36, %s9968_s13 }
 0x1f3   : > { %v8759_v50 = vpop.permute.xlu0 %8758  ;;  %v13243_v15 = vsel %vm1947_vm0, %v1929_v54, %v8765_v48  ;;  %v13246_v46 = vsel %vm1947_vm0, %v1930_v5, %v8766_v51 }
 0x1f4   : > { %v8761_v21 = vunpack.i.h.bf16 %v8759_v50  ;;  %v8760_v17 = vunpack.i.l.bf16 %v8759_v50  ;;  %v8774_v4 = vpop.permute.xlu1 %8773 }
 0x1f5   : > { %8913 = vrot.lane.b32.xlu1 %v8912_v36, %s9967_s23  ;;  %v8776_v2 = vunpack.i.h.bf16 %v8774_v4  ;;  %v8775_v24 = vunpack.i.l.bf16 %v8774_v4 }
 0x1f6   : > { %v13249_v61 = vsel %vm1947_vm0, %v1927_v31, %v8760_v17  ;;  %v13252_v55 = vsel %vm1947_vm0, %v1928_v29, %v8761_v21  ;;  %2466 = vrot.lane.b32.xlu0 %v19119_v56, %s9972_s14  ;;  %v1938_v21 = vsel %vm1922_vm1, %v13093_v18, %v8726_v6  ;;  %v1935_v17 = vsel %vm1922_vm1, %v13100_v16, %v8720_v19 }
 0x1f7   : > { %v8769_v12 = vpop.permute.xlu0 %8768  ;;  %v13270_v11 = vsel %vm1947_vm0, %v1933_v33, %v8775_v24  ;;  %v13273_v26 = vsel %vm1947_vm0, %v1934_v35, %v8776_v2  ;;  %v1941_v31 = vsel %vm1922_vm1, %v13120_v59, %v8735_v7  ;;  %v1942_v16 = vsel %vm1922_vm1, %v13123_v52, %v8736_v20  ;;  %v19120_v59 = vld [vmem:[#allocation19_spill] sm:$0xff] }
 0x1f8   : > { %v8771_v1 = vunpack.i.h.bf16 %v8769_v12  ;;  %v8770_v45 = vunpack.i.l.bf16 %v8769_v12  ;;  %v8784_v44 = vpop.permute.xlu1 %8783  ;;  %v1939_v33 = vsel %vm1922_vm1, %v13136_v57, %v8730_v13  ;;  %v1940_v35 = vsel %vm1922_vm1, %v13139_v58, %v8731_v0 }
 0x1f9   : > { %8918 = vrot.lane.b32.xlu1 %v8912_v36, %s9970_s29  ;;  %v8786_v41 = vunpack.i.h.bf16 %v8784_v44  ;;  %v8785_v3 = vunpack.i.l.bf16 %v8784_v44  ;;  %v8746_v2 = vunpack.i.h.bf16 %v13210_v53  ;;  %v8745_v24 = vunpack.i.l.bf16 %v13210_v53 }
 0x1fa   : > { %v13278_v22 = vsel %vm1947_vm0, %v1931_v49, %v8770_v45  ;;  %v13281_v30 = vsel %vm1947_vm0, %v1932_v23, %v8771_v1  ;;  %2562 = vrot.lane.b32.xlu0 %v19119_v56, %s9973_s19  ;;  %v8741_v52 = vunpack.i.h.bf16 %v13212_v37  ;;  %v8740_v23 = vunpack.i.l.bf16 %v13212_v37 }
 0x1fb   : > { %v8779_v51 = vpop.permute.xlu0 %8778  ;;  %v13297_v54 = vsel %vm1947_vm0, %v1937_v8, %v8785_v3  ;;  %v1945_v20 = vsel %vm1922_vm1, %v13158_v14, %v8745_v24  ;;  %v1946_v7 = vsel %vm1922_vm1, %v13161_v62, %v8746_v2 }
 0x1fc   : > { %v8781_v48 = vunpack.i.h.bf16 %v8779_v51  ;;  %v8780_v50 = vunpack.i.l.bf16 %v8779_v51  ;;  %v8794_v5 = vpop.permute.xlu1 %8793  ;;  %v1943_v44 = vsel %vm1922_vm1, %v13170_v28, %v8740_v23  ;;  %v1944_v0 = vsel %vm1922_vm1, %v13173_v27, %v8741_v52  ;;  %v19123_v51 = vld [vmem:[#allocation13_spill] sm:$0xff] }
 0x1fd   : > { %8923 = vrot.lane.b32.xlu1 %v8912_v36, %s9969_s9  ;;  %v13300_v36 = vsel %vm1947_vm0, %v1938_v21, %v8786_v41  ;;  %v8796_v25 = vunpack.i.h.bf16 %v8794_v5  ;;  %v8795_v29 = vunpack.i.l.bf16 %v8794_v5  ;;  %v19124_v21 = vld [vmem:[#allocation14_spill] sm:$0xff] }
 0x1fe   : > { %v13303_v10 = vsel %vm1947_vm0, %v1935_v17, %v8780_v50  ;;  %v13306_v18 = vsel %vm1947_vm0, %v1936_v32, %v8781_v48  ;;  %2658 = vrot.lane.b32.xlu0 %v19119_v56, %s9974_s20 }
 0x1ff   : > { %v8789_v4 = vpop.permute.xlu0 %8788  ;;  %v13325_v57 = vsel %vm1947_vm0, %v1941_v31, %v8795_v29  ;;  %v13328_v58 = vsel %vm1947_vm0, %v1942_v16, %v8796_v25 }
 0x200   : > { %v8791_v12 = vunpack.i.h.bf16 %v8789_v4  ;;  %v8790_v49 = vunpack.i.l.bf16 %v8789_v4  ;;  %v8804_v6 = vpop.permute.xlu1 %8803 }
 0x201   : > { %8928 = vrot.lane.b32.xlu1 %v19120_v59, %s9971_s16  ;;  %v8806_v1 = vunpack.i.h.bf16 %v8804_v6  ;;  %v8805_v45 = vunpack.i.l.bf16 %v8804_v6  ;;  %v19125_v6 = vld [vmem:[#allocation99_spill] sm:$0xff] }
 0x202   : > { %v13331_v53 = vsel %vm1947_vm0, %v1939_v33, %v8790_v49  ;;  %v13334_v63 = vsel %vm1947_vm0, %v1940_v35, %v8791_v12  ;;  %2754 = vrot.lane.b32.xlu0 %v19119_v56, %s18667_s22 }
 0x203   : > { %v8799_v40 = vpop.permute.xlu0 %8798  ;;  %v13349_v13 = vsel %vm1947_vm0, %v1945_v20, %v8805_v45  ;;  %v13352_v41 = vsel %vm1947_vm0, %v1946_v7, %v8806_v1  ;;  %v8510_v1 = vunpack.i.l.bf16 %v19125_v6  ;;  %v19126_v45 = vld [vmem:[#allocation23_spill] sm:$0xff]  ;;  %v8630_v7 = vunpack.i.l.bf16 %v12974_v47 }
 0x204   : > { %v8801_v37 = vunpack.i.h.bf16 %v8799_v40  ;;  %v8800_v19 = vunpack.i.l.bf16 %v8799_v40  ;;  %19121 = vst [vmem:[#allocation87_spill] sm:$0xff] %v13349_v13  ;;  %19122 = vst [vmem:[#allocation112_spill] sm:$0xff] %v13352_v41  ;;  %v8814_v3 = vpop.permute.xlu1 %8813  ;;  %v19127_v40 = vld [vmem:[#allocation18_spill] sm:$0xff] }
 0x205   : > { %8933 = vrot.lane.b32.xlu1 %v13230_v34, %s9968_s13  ;;  %v8815_v28 = vunpack.i.l.bf16 %v8814_v3  ;;  %v8816_v17 = vunpack.i.h.bf16 %v8814_v3 }
 0x206   : > { %v13355_v14 = vsel %vm1947_vm0, %v1943_v44, %v8800_v19  ;;  %v13358_v62 = vsel %vm1947_vm0, %v1944_v0, %v8801_v37  ;;  %8938 = vrot.lane.b32.xlu0 %v13230_v34, %s9967_s23  ;;  %v8952_v37 = vpack.i.bf16 %v19127_v40, %v19126_v45  ;;  %v19128_v19 = vld [vmem:[#allocation58_spill] sm:$0xff] }
 0x207   : > { %v8809_v56 = vpop.permute.xlu0 %8808  ;;  %v8570_v20 = vunpack.i.l.bf16 %v19128_v19 }
 0x208   : > { %v8810_v27 = vunpack.i.l.bf16 %v8809_v56  ;;  %v8824_v48 = vpop.permute.xlu1 %8823  ;;  %v8811_v32 = vunpack.i.h.bf16 %v8809_v56  ;;  %v8690_v56 = vunpack.i.l.bf16 %v13175_v39 }
 0x209   : > { %2468 = vrot.lane.b32.xlu1 %v19123_v51, %s9972_s14  ;;  %v8825_v31 = vunpack.i.l.bf16 %v8824_v48  ;;  %v8826_v2 = vunpack.i.h.bf16 %v8824_v48  ;;  %v19129_v48 = vld [vmem:[#allocation110_spill] sm:$0xff] }
 0x20a   : > { %2470 = vrot.lane.b32.xlu0 %v19124_v21, %s9972_s14  ;;  %v2836_v5 = vsel %vm1597_vm2, %v8810_v27, %v8815_v28  ;;  %v2837_v35 = vsel %vm1597_vm2, %v8811_v32, %v8816_v17  ;;  %v8750_v17 = vunpack.i.l.bf16 %v13220_v42 }
 0x20b   : > { %v8819_v50 = vpop.permute.xlu0 %8818 }
 0x20c   : > { %v8820_v8 = vunpack.i.l.bf16 %v8819_v50  ;;  %v13369_v16 = vpop.permute.xlu1 %8833  ;;  %v8821_v25 = vunpack.i.h.bf16 %v8819_v50  ;;  %v19130_v50 = vunpack.i.l.bf16 %v19129_v48 }
 0x20d   : > { %8943 = vrot.lane.b32.xlu1 %v13230_v34, %s9970_s29 }
 0x20e   : > { %v2868_v29 = vsel %vm1622_vm3, %v2836_v5, %v8820_v8  ;;  %2564 = vrot.lane.b32.xlu0 %v19123_v51, %s9973_s19  ;;  %v2869_v49 = vsel %vm1622_vm3, %v2837_v35, %v8821_v25  ;;  %v1848_v8 = vsel %vm1847_vm13, %v19130_v50, %v8510_v1  ;;  %v9870_v1 = vld [vmem:[%s10095_s17 + $0x68] sm:$0xff] }
 0x20f   : > { %v8829_v4 = vpop.permute.xlu0 %8828  ;;  %v2900_v12 = vsel %vm1647_vm4, %v2868_v29, %v8825_v31  ;;  %v2901_v3 = vsel %vm1647_vm4, %v2869_v49, %v8826_v2  ;;  %v1873_v32 = vsel %vm1872_vm14, %v1848_v8, %v8570_v20  ;;  %v8511_v8 = vunpack.i.h.bf16 %v19125_v6 }
 0x210   : > { %v8830_v33 = vunpack.i.l.bf16 %v8829_v4  ;;  %v2453_v24 = vpop.permute.xlu1 %2452  ;;  %v8831_v59 = vunpack.i.h.bf16 %v8829_v4  ;;  %v1898_v29 = vsel %vm1897_vm15, %v1873_v32, %v8630_v7  ;;  %v8631_v6 = vunpack.i.h.bf16 %v12974_v47 }
 0x211   : > { %2566 = vrot.lane.b32.xlu1 %v19124_v21, %s9973_s19  ;;  %v1923_v35 = vsel %vm1922_vm1, %v1898_v29, %v8690_v56 }
 0x212   : > { %v2932_v52 = vsel %vm1672_vm5, %v2900_v12, %v8830_v33  ;;  %8948 = vrot.lane.b32.xlu0 %v13230_v34, %s9969_s9  ;;  %v2933_v27 = vsel %vm1672_vm5, %v2901_v3, %v8831_v59  ;;  %v1948_v2 = vsel %vm1947_vm0, %v1923_v35, %v8750_v17 }
 0x213   : > { %v13380_v23 = vpop.permute.xlu0 %8838  ;;  %v2964_v44 = vsel %vm1697_vm7, %v2932_v52, %v2453_v24 }
 0x214   : > { %v13392_v0 = vpop.permute.xlu1 %8843  ;;  %v3156_v5 = vrot.slane %v2964_v44, 3  ;;  %v8835_v44 = vunpack.i.l.bf16 %v13369_v16 }
 0x215   : > { %2660 = vrot.lane.b32.xlu1 %v19123_v51, %s9974_s20  ;;  %v8845_v20 = vunpack.i.l.bf16 %v13392_v0 }
 0x216   : > { %2662 = vrot.lane.b32.xlu0 %v19124_v21, %s9974_s20 }
 0x217   : > { %v2455_v28 = vpop.permute.xlu0 %2454 }
 0x218   : > { %v13402_v34 = vsel %vm1697_vm7, %v2933_v27, %v2455_v28  ;;  %v2551_v25 = vpop.permute.xlu1 %2550 }
 0x219   : > { %8953 = vrot.lane.b32.xlu1 %v8952_v37, %s9971_s16  ;;  %v3157_v31 = vrot.slane %v13402_v34, 3  ;;  %v2997_v7 = vsel %vm1722_vm8, %v2455_v28, %v2551_v25  ;;  %v8846_v34 = vunpack.i.h.bf16 %v13392_v0  ;;  %v19134_v0 = vld [vmem:[#allocation91_spill] sm:$0xff] }
 0x21a   : > { %2756 = vrot.lane.b32.xlu0 %v19123_v51, %s18667_s22  ;;  %v9871_v51 = vld [vmem:[%s10095_s17 + $0x60] sm:$0xff] }
 0x21b   : > { %v2549_v4 = vpop.permute.xlu0 %2548  ;;  %v3158_v33 = vsel %vm1468_vm6, %v3156_v5, %v3157_v31  ;;  %v8962_v37 = vpack.i.bf16 %v9870_v1, %v9871_v51  ;;  %v19131_v51 = vunpack.i.h.bf16 %v19129_v48 }
 0x21c   : > { %3775 = vmatprep.mubr.f32.mxu1 %v3158_v33  ;;  %v2645_v12 = vpop.permute.xlu1 %2644  ;;  %v2996_v3 = vsel %vm1722_vm8, %v2453_v24, %v2549_v4  ;;  %v8571_v24 = vunpack.i.h.bf16 %v19128_v19 }
 0x21d   : > { %2758 = vrot.lane.b32.xlu1 %v19124_v21, %s18667_s22  ;;  %3776 = vmatmul.mubr.f32.vlgmr.msra.gmra.mxu1 %v1948_v2  ;;  %v8840_v21 = vunpack.i.l.bf16 %v13380_v23  ;;  %v3028_v17 = vsel %vm1747_vm9, %v2996_v3, %v2645_v12  ;;  %v8691_v12 = vunpack.i.h.bf16 %v13175_v39  ;;  %v1849_v19 = vsel %vm1847_vm13, %v19131_v51, %v8511_v8 }
 0x21e   : > { %2472 = vrot.lane.b32.xlu0 %v19126_v45, %s9972_s14  ;;  %v1874_v47 = vsel %vm1872_vm14, %v1849_v19, %v8571_v24 }
 0x21f   : > { %v13419_v49 = vpop.permute.xlu0 %8848  ;;  %v1899_v48 = vsel %vm1897_vm15, %v1874_v47, %v8631_v6 }
 0x220   : > { %v13425_v59 = vpop.permute.xlu1 %8853  ;;  %v8850_v56 = vunpack.i.l.bf16 %v13419_v49 }
 0x221   : > { %2568 = vrot.lane.b32.xlu1 %v19126_v45, %s9973_s19  ;;  %v8855_v32 = vunpack.i.l.bf16 %v13425_v59  ;;  %v8856_v24 = vunpack.i.h.bf16 %v13425_v59 }
 0x222   : > { %2664 = vrot.lane.b32.xlu0 %v19126_v45, %s9974_s20 }
 0x223   : > { %v2647_v52 = vpop.permute.xlu0 %2646 }
 0x224   : > { %v3029_v27 = vsel %vm1747_vm9, %v2997_v7, %v2647_v52  ;;  %v2743_v50 = vpop.permute.xlu1 %2742 }
 0x225   : > { %2760 = vrot.lane.b32.xlu1 %v19126_v45, %s18667_s22  ;;  %v3061_v28 = vsel %vm1772_vm10, %v3029_v27, %v2743_v50  ;;  %v2838_v45 = vsel %vm1597_vm2, %v8835_v44, %v8840_v21  ;;  %v1924_v27 = vsel %vm1922_vm1, %v1899_v48, %v8691_v12  ;;  %v8841_v50 = vunpack.i.h.bf16 %v13380_v23  ;;  %v19135_v12 = vld [vmem:[#allocation57_spill] sm:$0xff] }
 0x226   : > { %v3160_v25 = vrot.slane %v3061_v28, 3  ;;  %v2870_v4 = vsel %vm1622_vm3, %v2838_v45, %v8845_v20  ;;  %8958 = vrot.lane.b32.xlu0 %v8962_v37, %s9968_s13  ;;  %v8751_v20 = vunpack.i.h.bf16 %v13220_v42  ;;  %v19133_v28 = vld [vmem:[#allocation20_spill] sm:$0xff]  ;;  %v8836_v23 = vunpack.i.h.bf16 %v13369_v16 }
 0x227   : > { %v2741_v5 = vpop.permute.xlu0 %2740  ;;  %v2902_v2 = vsel %vm1647_vm4, %v2870_v4, %v8850_v56  ;;  %v8755_v48 = vunpack.i.l.bf16 %v13218_v43 }
 0x228   : > { %v3060_v29 = vsel %vm1772_vm10, %v3028_v17, %v2741_v5  ;;  %v2553_v35 = vpop.permute.xlu1 %2552  ;;  %v2934_v1 = vsel %vm1672_vm5, %v2902_v2, %v8855_v32  ;;  %v1949_v17 = vsel %vm1947_vm0, %v1924_v27, %v8751_v20  ;;  %v19132_v32 = vld [vmem:[#allocation24_spill] sm:$0xff]  ;;  %v2839_v6 = vsel %vm1597_vm2, %v8836_v23, %v8841_v50 }
 0x229   : > { %8963 = vrot.lane.b32.xlu1 %v8962_v37, %s9967_s23  ;;  %v3159_v33 = vrot.slane %v3060_v29, 3  ;;  %v8977_v5 = vpack.i.bf16 %v19133_v28, %v19132_v32  ;;  %v2871_v59 = vsel %vm1622_vm3, %v2839_v6, %v8846_v34 }
 0x22a   : > { %2474 = vrot.lane.b32.xlu0 %v19127_v40, %s9972_s14 }
 0x22b   : > { %v3161_v52 = vsel %vm1468_vm6, %v3159_v33, %v3160_v25  ;;  %v2457_v21 = vpop.permute.xlu0 %2456  ;;  %v8515_v33 = vunpack.i.l.bf16 %v19134_v0 }
 0x22c   : > { %v2966_v7 = vsel %vm1697_vm7, %v2934_v1, %v2457_v21  ;;  %7716 = vmatmul.mubr.msk.f32.vlgmr.msra.gmra.mxu0 %vm1797_vm11, %v3161_v52  ;;  %v2745_v44 = vpop.permute.xlu1 %2744  ;;  %v2998_v3 = vsel %vm1722_vm8, %v2457_v21, %v2553_v35  ;;  %v9872_v35 = vld [vmem:[%s10095_s17 + $0x70] sm:$0xff]  ;;  %v8575_v52 = vunpack.i.l.bf16 %v19135_v12  ;;  %v8635_v21 = vunpack.i.l.bf16 %v12956_v60 }
 0x22d   : > { %8968 = vrot.lane.b32.xlu1 %v8962_v37, %s9970_s29  ;;  %v3162_v39 = vrot.slane %v2966_v7, 3  ;;  %3990 = vmatprep.mubr.f32.mxu0 %v18650_v9  ;;  %v19136_v7 = vld [vmem:[#allocation84_spill] sm:$0xff] }
 0x22e   : > { %2570 = vrot.lane.b32.xlu0 %v19127_v40, %s9973_s19  ;;  %v19137_v47 = vunpack.i.l.bf16 %v19136_v7  ;;  %v13530_v23 = vpop.f32.mrf.mxu0 }
 0x22f   : > { %v2649_v42 = vpop.permute.xlu0 %2648  ;;  %v3163_v56 = vsel %vm1468_vm6, %v3157_v31, %v3162_v39 }
 0x230   : > { %v3030_v8 = vsel %vm1747_vm9, %v2998_v3, %v2649_v42  ;;  %3781 = vmatprep.mubr.f32.mxu1 %v3163_v56  ;;  %v13487_v29 = vpop.permute.xlu1 %8863  ;;  %v13539_v6 = vpop.f32.mrf.mxu0 }
 0x231   : > { %8973 = vrot.lane.b32.xlu1 %v8962_v37, %s9969_s9  ;;  %v13480_v31 = vsel %vm1772_vm10, %v3030_v8, %v2745_v44  ;;  %3782 = vmatmul.mubr.f32.gmra.mxu1 %v1949_v17  ;;  %v8851_v37 = vunpack.i.h.bf16 %v13419_v49  ;;  %v9873_v49 = vld [vmem:[%s10095_s17 + $0x78] sm:$0xf]  ;;  %v1850_v44 = vsel %vm1847_vm13, %v19137_v47, %v8515_v33 }
 0x232   : > { %v3164_v45 = vrot.slane %v13480_v31, 3  ;;  %v13500_v2 = vpack.i.bf16 %v9873_v49, %v9872_v35  ;;  %2666 = vrot.lane.b32.xlu0 %v19127_v40, %s9974_s20  ;;  %v1875_v42 = vsel %vm1872_vm14, %v1850_v44, %v8575_v52 }
 0x233   : > { %v13490_v4 = vpop.permute.xlu0 %8858  ;;  %v2903_v51 = vsel %vm1647_vm4, %v2871_v59, %v8851_v37  ;;  %v1900_v50 = vsel %vm1897_vm15, %v1875_v42, %v8635_v21  ;;  %v8866_v59 = vunpack.i.h.bf16 %v13487_v29 }
 0x234   : > { %v3165_v16 = vsel %vm1468_vm6, %v3160_v25, %v3164_v45  ;;  %v8869_v1 = vpop.permute.xlu1 %8868  ;;  %v8695_v25 = vunpack.i.l.bf16 %v13163_v38  ;;  %v2935_v20 = vsel %vm1672_vm5, %v2903_v51, %v8856_v24  ;;  %v8860_v24 = vunpack.i.l.bf16 %v13490_v4 }
 0x235   : > { %8978 = vrot.lane.b32.xlu1 %v8977_v5, %s9971_s16  ;;  %7717 = vmatmul.mubr.msk.f32.gmra.mxu0 %vm1797_vm11, %v3165_v16  ;;  %v8870_v35 = vunpack.i.l.bf16 %v8869_v1  ;;  %v8861_v21 = vunpack.i.h.bf16 %v13490_v4 }
 0x236   : > { %3996 = vmatprep.mubr.f32.mxu0 %v18650_v9  ;;  %2762 = vrot.lane.b32.xlu0 %v19127_v40, %s18667_s22  ;;  %v1925_v5 = vsel %vm1922_vm1, %v1900_v50, %v8695_v25  ;;  %v8516_v50 = vunpack.i.h.bf16 %v19134_v0  ;;  %v8636_v0 = vunpack.i.h.bf16 %v12956_v60 }
 0x237   : > { %v2459_v19 = vpop.permute.xlu0 %2458  ;;  %v1950_v34 = vsel %vm1947_vm0, %v1925_v5, %v8755_v48  ;;  %v19139_v5 = vld [vmem:[#allocation17_spill] sm:$0xff] }
 0x238   : > { %v2967_v3 = vsel %vm1697_vm7, %v2935_v20, %v2459_v19  ;;  %v8874_v27 = vpop.permute.xlu1 %8873  ;;  %v8871_v20 = vunpack.i.h.bf16 %v8869_v1 }
 0x239   : > { %8983 = vrot.lane.b32.xlu1 %v13500_v2, %s9968_s13  ;;  %v3166_v56 = vrot.slane %v2967_v3, 3  ;;  %v8875_v51 = vunpack.i.l.bf16 %v8874_v27  ;;  %v8876_v48 = vunpack.i.h.bf16 %v8874_v27  ;;  %v13552_v3 = vpop.f32.mrf.mxu0  ;;  %v19138_v27 = vld [vmem:[#allocation21_spill] sm:$0xff] }
 0x23a   : > { %8988 = vrot.lane.b32.xlu0 %v13500_v2, %s9967_s23 }
 0x23b   : > { %v2555_v8 = vpop.permute.xlu0 %2554  ;;  %v3167_v17 = vsel %vm1468_vm6, %v3162_v39, %v3166_v56  ;;  %v8865_v39 = vunpack.i.l.bf16 %v13487_v29 }
 0x23c   : > { %3787 = vmatprep.mubr.f32.mxu1 %v3167_v17  ;;  %v2999_v33 = vsel %vm1722_vm8, %v2459_v19, %v2555_v8  ;;  %v2841_v8 = vsel %vm1597_vm2, %v8861_v21, %v8866_v59  ;;  %v8756_v59 = vunpack.i.h.bf16 %v13218_v43 }
 0x23d   : > { %2476 = vrot.lane.b32.xlu1 %v19132_v32, %s9972_s14  ;;  %3788 = vmatmul.mubr.f32.gmra.mxu1 %v1950_v34  ;;  %v2840_v44 = vsel %vm1597_vm2, %v8860_v24, %v8865_v39  ;;  %v9002_v34 = vpack.i.bf16 %v19139_v5, %v19138_v27  ;;  %v2873_v31 = vsel %vm1622_vm3, %v2841_v8, %v8871_v20 }
 0x23e   : > { %2478 = vrot.lane.b32.xlu0 %v19133_v28, %s9972_s14  ;;  %v2872_v4 = vsel %vm1622_vm3, %v2840_v44, %v8870_v35 }
 0x23f   : > { %v8879_v40 = vpop.permute.xlu1 %8878  ;;  %v2651_v37 = vpop.permute.xlu0 %2650  ;;  %v2904_v17 = vsel %vm1647_vm4, %v2872_v4, %v8875_v51 }
 0x240   : > { %v3031_v49 = vsel %vm1747_vm9, %v2999_v33, %v2651_v37  ;;  %v8880_v19 = vunpack.i.l.bf16 %v8879_v40  ;;  %v8881_v42 = vunpack.i.h.bf16 %v8879_v40  ;;  %v8576_v40 = vunpack.i.h.bf16 %v19135_v12  ;;  %v13575_v37 = vpop.f32.mrf.mxu0 }
 0x241   : > { %8993 = vrot.lane.b32.xlu1 %v13500_v2, %s9970_s29  ;;  %v2905_v33 = vsel %vm1647_vm4, %v2873_v31, %v8876_v48  ;;  %v8696_v12 = vunpack.i.h.bf16 %v13163_v38 }
 0x242   : > { %2572 = vrot.lane.b32.xlu0 %v19132_v32, %s9973_s19  ;;  %v13595_v38 = vpop.f32.mrf.mxu0 }
 0x243   : > { %v13541_v16 = vpop.permute.xlu1 %8883  ;;  %v2747_v52 = vpop.permute.xlu0 %2746 }
 0x244   : > { %v3063_v25 = vsel %vm1772_vm10, %v3031_v49, %v2747_v52  ;;  %v2937_v49 = vsel %vm1672_vm5, %v2905_v33, %v8881_v42  ;;  %v19140_v52 = vunpack.i.h.bf16 %v19136_v7  ;;  %v13607_v48 = vpop.f32.mrf.mxu0 }
 0x245   : > { %2574 = vrot.lane.b32.xlu1 %v19133_v28, %s9973_s19  ;;  %v3168_v47 = vrot.slane %v3063_v25, 3  ;;  %19141 = vst [vmem:[#allocation54_spill] sm:$0xff] %v13607_v48 }
 0x246   : > { %8998 = vrot.lane.b32.xlu0 %v13500_v2, %s9969_s9  ;;  %v1851_v2 = vsel %vm1847_vm13, %v19140_v52, %v8516_v50 }
 0x247   : > { %v2461_v29 = vpop.permute.xlu1 %2460  ;;  %v13555_v56 = vpop.permute.xlu0 %8888  ;;  %v3169_v1 = vsel %vm1468_vm6, %v3164_v45, %v3168_v47  ;;  %v2936_v45 = vsel %vm1672_vm5, %v2904_v17, %v8880_v19  ;;  %v1876_v21 = vsel %vm1872_vm14, %v1851_v2, %v8576_v40  ;;  %v9875_v17 = vld [vmem:[%s10095_s17 + $0x88] sm:$0xff] }
 0x248   : > { %7718 = vmatmul.mubr.msk.f32.gmra.mxu0 %vm1797_vm11, %v3169_v1  ;;  %v2968_v39 = vsel %vm1697_vm7, %v2936_v45, %v2461_v29  ;;  %v1901_v20 = vsel %vm1897_vm15, %v1876_v21, %v8636_v0  ;;  %v13615_v1 = vpop.f32.mrf.mxu0  ;;  %v8890_v8 = vunpack.i.l.bf16 %v13555_v56  ;;  %v8885_v45 = vunpack.i.l.bf16 %v13541_v16 }
 0x249   : > { %2668 = vrot.lane.b32.xlu1 %v19132_v32, %s9974_s20  ;;  %4002 = vmatprep.mubr.f32.mxu0 %v18650_v9  ;;  %v3170_v51 = vrot.slane %v2968_v39, 3  ;;  %v1926_v47 = vsel %vm1922_vm1, %v1901_v20, %v8696_v12 }
 0x24a   : > { %2670 = vrot.lane.b32.xlu0 %v19133_v28, %s9974_s20  ;;  %v1951_v44 = vsel %vm1947_vm0, %v1926_v47, %v8756_v59  ;;  %v13629_v0 = vpop.f32.mrf.mxu0  ;;  %vm19226_vm0 = vcmask 1046528  }
 0x24b   : > { %v13578_v24 = vpop.permute.xlu1 %8893  ;;  %v2463_v35 = vpop.permute.xlu0 %2462 }
 0x24c   : > { %v13588_v60 = vsel %vm1697_vm7, %v2937_v49, %v2463_v35  ;;  %v8895_v40 = vunpack.i.l.bf16 %v13578_v24  ;;  %v13642_v20 = vpop.f32.mrf.mxu0 }
 0x24d   : > { %9003 = vrot.lane.b32.xlu1 %v9002_v34, %s9971_s16  ;;  %v3171_v25 = vrot.slane %v13588_v60, 3  ;;  %v8886_v60 = vunpack.i.h.bf16 %v13541_v16 }
 0x24e   : > { %2764 = vrot.lane.b32.xlu0 %v19132_v32, %s18667_s22  ;;  %v9874_v32 = vld [vmem:[%s10095_s17 + $0x80] sm:$0xff] }
 0x24f   : > { %v2559_v7 = vpop.permute.xlu1 %2558  ;;  %v2557_v19 = vpop.permute.xlu0 %2556  ;;  %v3172_v43 = vsel %vm1468_vm6, %v3170_v51, %v3171_v25  ;;  %v9012_v34 = vpack.i.bf16 %v9875_v17, %v9874_v32 }
 0x250   : > { %3793 = vmatprep.mubr.f32.mxu1 %v3172_v43  ;;  %v3001_v31 = vsel %vm1722_vm8, %v2463_v35, %v2559_v7  ;;  %v3000_v39 = vsel %vm1722_vm8, %v2461_v29, %v2557_v19  ;;  %v13653_v32 = vpop.f32.mrf.mxu0 }
 0x251   : > { %2766 = vrot.lane.b32.xlu1 %v19133_v28, %s18667_s22  ;;  %3794 = vmatmul.mubr.f32.gmra.mxu1 %v1951_v44 }
 0x252   : > { %2480 = vrot.lane.b32.xlu0 %v19138_v27, %s9972_s14 }
 0x253   : > { %v2653_v4 = vpop.permute.xlu1 %2652  ;;  %v13609_v42 = vpop.permute.xlu0 %8898 }
 0x254   : > { %v8900_v33 = vunpack.i.l.bf16 %v13609_v42  ;;  %v3032_v52 = vsel %vm1747_vm9, %v3000_v39, %v2653_v4  ;;  %v8891_v39 = vunpack.i.h.bf16 %v13555_v56  ;;  %v13670_v56 = vpop.f32.mrf.mxu0 }
 0x255   : > { %2576 = vrot.lane.b32.xlu1 %v19138_v27, %s9973_s19 }
 0x256   : > { %2672 = vrot.lane.b32.xlu0 %v19138_v27, %s9974_s20 }
 0x257   : > { %v13617_v28 = vpop.permute.xlu1 %8903  ;;  %v2655_v50 = vpop.permute.xlu0 %2654 }
 0x258   : > { %v3033_v12 = vsel %vm1747_vm9, %v3001_v31, %v2655_v50  ;;  %v8905_v2 = vunpack.i.l.bf16 %v13617_v28 }
 0x259   : > { %2768 = vrot.lane.b32.xlu1 %v19138_v27, %s18667_s22  ;;  %v2842_v27 = vsel %vm1597_vm2, %v8885_v45, %v8890_v8 }
 0x25a   : > { %v2874_v29 = vsel %vm1622_vm3, %v2842_v27, %v8895_v40  ;;  %9008 = vrot.lane.b32.xlu0 %v9012_v34, %s9968_s13 }
 0x25b   : > { %v2751_v49 = vpop.permute.xlu1 %2750  ;;  %v2749_v59 = vpop.permute.xlu0 %2748  ;;  %v2906_v43 = vsel %vm1647_vm4, %v2874_v29, %v8900_v33 }
 0x25c   : > { %v3065_v35 = vsel %vm1772_vm10, %v3033_v12, %v2751_v49  ;;  %v3064_v51 = vsel %vm1772_vm10, %v3032_v52, %v2749_v59  ;;  %v2938_v44 = vsel %vm1672_vm5, %v2906_v43, %v8905_v2  ;;  %v8896_v12 = vunpack.i.h.bf16 %v13578_v24  ;;  %v19142_v59 = vld [vmem:[#allocation31_spill] sm:$0xff] }
 0x25d   : > { %v3174_v21 = vrot.slane %v3065_v35, 3  ;;  %9013 = vrot.lane.b32.xlu1 %v9012_v34, %s9967_s23  ;;  %v3173_v7 = vrot.slane %v3064_v51, 3  ;;  %v8906_v2 = vunpack.i.h.bf16 %v13617_v28  ;;  %v2843_v35 = vsel %vm1597_vm2, %v8886_v60, %v8891_v39  ;;  %v9877_v51 = vld [vmem:[%s10095_s17 + $0x98] sm:$0xf] }
 0x25e   : > { %2482 = vrot.lane.b32.xlu0 %v19139_v5, %s9972_s14  ;;  %v2875_v29 = vsel %vm1622_vm3, %v2843_v35, %v8896_v12 }
 0x25f   : > { %v2561_v19 = vpop.permute.xlu1 %2560  ;;  %v2465_v47 = vpop.permute.xlu0 %2464  ;;  %v3175_v4 = vsel %vm1468_vm6, %v3173_v7, %v3174_v21 }
 0x260   : > { %v2970_v50 = vsel %vm1697_vm7, %v2938_v44, %v2465_v47  ;;  %7719 = vmatmul.mubr.msk.f32.gmra.mxu0 %vm1797_vm11, %v3175_v4  ;;  %v3002_v40 = vsel %vm1722_vm8, %v2465_v47, %v2561_v19 }
 0x261   : > { %9018 = vrot.lane.b32.xlu1 %v9012_v34, %s9970_s29  ;;  %v3176_v8 = vrot.slane %v2970_v50, 3  ;;  %4008 = vmatprep.mubr.f32.mxu0 %v18650_v9 }
 0x262   : > { %2578 = vrot.lane.b32.xlu0 %v19139_v5, %s9973_s19 }
 0x263   : > { %v2753_v17 = vpop.permute.xlu1 %2752  ;;  %v2657_v31 = vpop.permute.xlu0 %2656  ;;  %v3177_v45 = vsel %vm1468_vm6, %v3171_v25, %v3176_v8  ;;  %v8901_v25 = vunpack.i.h.bf16 %v13609_v42 }
 0x264   : > { %v3034_v33 = vsel %vm1747_vm9, %v3002_v40, %v2657_v31  ;;  %3799 = vmatprep.mubr.f32.mxu1 %v3177_v45  ;;  %v13685_v42 = vpop.f32.mrf.mxu0  ;;  %v19144_v40 = vld [vmem:[#allocation27_spill] sm:$0xff] }
 0x265   : > { %9023 = vrot.lane.b32.xlu1 %v9012_v34, %s9969_s9  ;;  %v13664_v49 = vsel %vm1772_vm10, %v3034_v33, %v2753_v17  ;;  %3800 = vmatmul.mubr.f32.gmra.mxu1 %v13249_v61  ;;  %v9876_v61 = vld [vmem:[%s10095_s17 + $0x90] sm:$0xff]  ;;  %19143 = vst [vmem:[#allocation55_spill] sm:$0xff] %v13685_v42  ;;  %v2907_v7 = vsel %vm1647_vm4, %v2875_v29, %v8901_v25 }
 0x266   : > { %v3178_v52 = vrot.slane %v13664_v49, 3  ;;  %v9032_v16 = vpack.i.bf16 %v9877_v51, %v9876_v61  ;;  %2674 = vrot.lane.b32.xlu0 %v19139_v5, %s9974_s20  ;;  %v13694_v44 = vpop.f32.mrf.mxu0 }
 0x267   : > { %v8914_v34 = vpop.permute.xlu1 %8913  ;;  %v8909_v24 = vpop.permute.xlu0 %8908 }
 0x268   : > { %v3179_v27 = vsel %vm1468_vm6, %v3174_v21, %v3178_v52  ;;  %v2939_v21 = vsel %vm1672_vm5, %v2907_v7, %v8906_v2  ;;  %v13701_v31 = vpop.f32.mrf.mxu0  ;;  %v8910_v12 = vunpack.i.l.bf16 %v8909_v24  ;;  %v8916_v35 = vunpack.i.h.bf16 %v8914_v34 }
 0x269   : > { %9028 = vrot.lane.b32.xlu1 %v19142_v59, %s9971_s16  ;;  %7720 = vmatmul.mubr.msk.f32.gmra.mxu0 %vm1797_vm11, %v3179_v27  ;;  %v8911_v59 = vunpack.i.h.bf16 %v8909_v24 }
 0x26a   : > { %4014 = vmatprep.mubr.f32.mxu0 %v18650_v9  ;;  %2770 = vrot.lane.b32.xlu0 %v19139_v5, %s18667_s22  ;;  %v19145_v5 = vld [vmem:[#allocation28_spill] sm:$0xff]  ;;  %v13706_v33 = vpop.f32.mrf.mxu0 }
 0x26b   : > { %v8919_v28 = vpop.permute.xlu1 %8918  ;;  %v2467_v19 = vpop.permute.xlu0 %2466 }
 0x26c   : > { %v2971_v43 = vsel %vm1697_vm7, %v2939_v21, %v2467_v19  ;;  %v8920_v25 = vunpack.i.l.bf16 %v8919_v28  ;;  %v8921_v51 = vunpack.i.h.bf16 %v8919_v28  ;;  %v2845_v28 = vsel %vm1597_vm2, %v8911_v59, %v8916_v35 }
 0x26d   : > { %9033 = vrot.lane.b32.xlu1 %v9032_v16, %s9968_s13  ;;  %v3180_v47 = vrot.slane %v2971_v43, 3 }
 0x26e   : > { %9038 = vrot.lane.b32.xlu0 %v9032_v16, %s9967_s23 }
 0x26f   : > { %v8924_v4 = vpop.permute.xlu1 %8923  ;;  %v2563_v50 = vpop.permute.xlu0 %2562  ;;  %v3181_v17 = vsel %vm1468_vm6, %v3176_v8, %v3180_v47  ;;  %v8915_v8 = vunpack.i.l.bf16 %v8914_v34 }
 0x270   : > { %3805 = vmatprep.mubr.f32.mxu1 %v3181_v17  ;;  %v3003_v49 = vsel %vm1722_vm8, %v2467_v19, %v2563_v50  ;;  %v8925_v27 = vunpack.i.l.bf16 %v8924_v4  ;;  %v13717_v19 = vpop.f32.mrf.mxu0  ;;  %v8926_v43 = vunpack.i.h.bf16 %v8924_v4 }
 0x271   : > { %2484 = vrot.lane.b32.xlu1 %v19144_v40, %s9972_s14  ;;  %3806 = vmatmul.mubr.f32.gmra.mxu1 %v13252_v55  ;;  %v2844_v21 = vsel %vm1597_vm2, %v8910_v12, %v8915_v8  ;;  %v19147_v8 = vld [vmem:[#allocation22_spill] sm:$0xff]  ;;  %v2877_v12 = vsel %vm1622_vm3, %v2845_v28, %v8921_v51 }
 0x272   : > { %2486 = vrot.lane.b32.xlu0 %v19145_v5, %s9972_s14  ;;  %v2876_v34 = vsel %vm1622_vm3, %v2844_v21, %v8920_v25 }
 0x273   : > { %v8929_v45 = vpop.permute.xlu1 %8928  ;;  %v2659_v39 = vpop.permute.xlu0 %2658 }
 0x274   : > { %v3035_v55 = vsel %vm1747_vm9, %v3003_v49, %v2659_v39  ;;  %v8930_v29 = vunpack.i.l.bf16 %v8929_v45  ;;  %v8931_v24 = vunpack.i.h.bf16 %v8929_v45  ;;  %v2908_v39 = vsel %vm1647_vm4, %v2876_v34, %v8925_v27  ;;  %v19146_v49 = vld [vmem:[#allocation25_spill] sm:$0xff] }
 0x275   : > { %9043 = vrot.lane.b32.xlu1 %v9032_v16, %s9970_s29  ;;  %v9052_v4 = vpack.i.bf16 %v19147_v8, %v19146_v49 }
 0x276   : > { %2580 = vrot.lane.b32.xlu0 %v19144_v40, %s9973_s19  ;;  %v2940_v45 = vsel %vm1672_vm5, %v2908_v39, %v8930_v29  ;;  %v9879_v39 = vld [vmem:[%s10095_s17 + $0xa8] sm:$0xff] }
 0x277   : > { %v13709_v60 = vpop.permute.xlu1 %8933  ;;  %v2755_v2 = vpop.permute.xlu0 %2754 }
 0x278   : > { %v3067_v61 = vsel %vm1772_vm10, %v3035_v55, %v2755_v2  ;;  %v2909_v2 = vsel %vm1647_vm4, %v2877_v12, %v8926_v43 }
 0x279   : > { %2582 = vrot.lane.b32.xlu1 %v19145_v5, %s9973_s19  ;;  %v3182_v7 = vrot.slane %v3067_v61, 3  ;;  %v2941_v59 = vsel %vm1672_vm5, %v2909_v2, %v8931_v24  ;;  %v8935_v2 = vunpack.i.l.bf16 %v13709_v60 }
 0x27a   : > { %9048 = vrot.lane.b32.xlu0 %v9032_v16, %s9969_s9 }
 0x27b   : > { %v2469_v47 = vpop.permute.xlu1 %2468  ;;  %v13721_v50 = vpop.permute.xlu0 %8938  ;;  %v3183_v17 = vsel %vm1468_vm6, %v3178_v52, %v3182_v7 }
 0x27c   : > { %7721 = vmatmul.mubr.msk.f32.gmra.mxu0 %vm1797_vm11, %v3183_v17  ;;  %v13735_v52 = vpop.f32.mrf.mxu0  ;;  %v2972_v25 = vsel %vm1697_vm7, %v2940_v45, %v2469_v47 }
 0x27d   : > { %2676 = vrot.lane.b32.xlu1 %v19144_v40, %s9974_s20  ;;  %4020 = vmatprep.mubr.f32.mxu0 %v18650_v9  ;;  %v3184_v61 = vrot.slane %v2972_v25, 3 }
 0x27e   : > { %2678 = vrot.lane.b32.xlu0 %v19145_v5, %s9974_s20  ;;  %v13749_v51 = vpop.f32.mrf.mxu0 }
 0x27f   : > { %v13738_v55 = vpop.permute.xlu1 %8943  ;;  %v2471_v35 = vpop.permute.xlu0 %2470 }
 0x280   : > { %v13743_v27 = vsel %vm1697_vm7, %v2941_v59, %v2471_v35  ;;  %v13757_v43 = vpop.f32.mrf.mxu0  ;;  %v8945_v12 = vunpack.i.l.bf16 %v13738_v55 }
 0x281   : > { %9053 = vrot.lane.b32.xlu1 %v9052_v4, %s9971_s16  ;;  %v3185_v16 = vrot.slane %v13743_v27, 3 }
 0x282   : > { %2772 = vrot.lane.b32.xlu0 %v19144_v40, %s18667_s22  ;;  %v13765_v17 = vpop.f32.mrf.mxu0  ;;  %v8940_v40 = vunpack.i.l.bf16 %v13721_v50 }
 0x283   : > { %v2567_v29 = vpop.permute.xlu1 %2566  ;;  %v2565_v7 = vpop.permute.xlu0 %2564  ;;  %v3186_v21 = vsel %vm1468_vm6, %v3184_v61, %v3185_v16 }
 0x284   : > { %3811 = vmatprep.mubr.f32.mxu1 %v3186_v21  ;;  %v3005_v45 = vsel %vm1722_vm8, %v2471_v35, %v2567_v29  ;;  %v13778_v25 = vpop.f32.mrf.mxu0  ;;  %v3004_v59 = vsel %vm1722_vm8, %v2469_v47, %v2565_v7 }
 0x285   : > { %2774 = vrot.lane.b32.xlu1 %v19145_v5, %s18667_s22  ;;  %3812 = vmatmul.mubr.f32.gmra.mxu1 %v13243_v15  ;;  %v9878_v15 = vld [vmem:[%s10095_s17 + $0xa0] sm:$0xff] }
 0x286   : > { %2488 = vrot.lane.b32.xlu0 %v19146_v49, %s9972_s14  ;;  %v9062_v4 = vpack.i.bf16 %v9879_v39, %v9878_v15 }
 0x287   : > { %v2661_v34 = vpop.permute.xlu1 %2660  ;;  %v13759_v24 = vpop.permute.xlu0 %8948 }
 0x288   : > { %v8950_v27 = vunpack.i.l.bf16 %v13759_v24  ;;  %v3036_v15 = vsel %vm1747_vm9, %v3004_v59, %v2661_v34 }
 0x289   : > { %2584 = vrot.lane.b32.xlu1 %v19146_v49, %s9973_s19 }
 0x28a   : > { %2680 = vrot.lane.b32.xlu0 %v19146_v49, %s9974_s20 }
 0x28b   : > { %v13767_v28 = vpop.permute.xlu1 %8953  ;;  %v2663_v5 = vpop.permute.xlu0 %2662 }
 0x28c   : > { %v3037_v61 = vsel %vm1747_vm9, %v3005_v45, %v2663_v5  ;;  %v8955_v39 = vunpack.i.l.bf16 %v13767_v28  ;;  %v13792_v5 = vpop.f32.mrf.mxu0 }
 0x28d   : > { %2776 = vrot.lane.b32.xlu1 %v19146_v49, %s18667_s22  ;;  %v2846_v49 = vsel %vm1597_vm2, %v8935_v2, %v8940_v40  ;;  %19148 = vst [vmem:[#allocation95_spill] sm:$0xff] %v13792_v5 }
 0x28e   : > { %v2878_v47 = vsel %vm1622_vm3, %v2846_v49, %v8945_v12  ;;  %9058 = vrot.lane.b32.xlu0 %v9062_v4, %s9968_s13 }
 0x28f   : > { %v2759_v21 = vpop.permute.xlu1 %2758  ;;  %v2757_v29 = vpop.permute.xlu0 %2756  ;;  %v2910_v45 = vsel %vm1647_vm4, %v2878_v47, %v8950_v27  ;;  %v19151_v47 = vld [vmem:[#allocation26_spill] sm:$0xff] }
 0x290   : > { %v3069_v35 = vsel %vm1772_vm10, %v3037_v61, %v2759_v21  ;;  %v3068_v42 = vsel %vm1772_vm10, %v3036_v15, %v2757_v29  ;;  %v2942_v61 = vsel %vm1672_vm5, %v2910_v45, %v8955_v39  ;;  %v13803_v21 = vpop.f32.mrf.mxu0  ;;  %v8941_v29 = vunpack.i.h.bf16 %v13721_v50 }
 0x291   : > { %v3188_v9 = vrot.slane %v3069_v35, 3  ;;  %9063 = vrot.lane.b32.xlu1 %v9062_v4, %s9967_s23  ;;  %v3187_v7 = vrot.slane %v3068_v42, 3  ;;  %v19149_v42 = vmov 0.0   ;;  %19150 = vst [vmem:[#allocation96_spill] sm:$0xff] %v13803_v21 }
 0x292   : > { %2490 = vrot.lane.b32.xlu0 %v19147_v8, %s9972_s14  ;;  %v13819_v50 = vpop.f32.mrf.mxu0 }
 0x293   : > { %v2569_v34 = vpop.permute.xlu1 %2568  ;;  %v2473_v59 = vpop.permute.xlu0 %2472  ;;  %v3189_v40 = vsel %vm1468_vm6, %v3187_v7, %v3188_v9  ;;  %v19152_v7 = vld [vmem:[#allocation34_spill] sm:$0xff]  ;;  %19153 = vst [vmem:[#allocation71_spill] sm:$0xff] %v13819_v50 }
 0x294   : > { %v2974_v2 = vsel %vm1697_vm7, %v2942_v61, %v2473_v59  ;;  %7722 = vmatmul.mubr.msk.f32.gmra.mxu0 %vm1797_vm11, %v3189_v40  ;;  %v3006_v15 = vsel %vm1722_vm8, %v2473_v59, %v2569_v34  ;;  %v9077_v45 = vpack.i.bf16 %v19152_v7, %v19151_v47  ;;  %v8946_v61 = vunpack.i.h.bf16 %v13738_v55  ;;  %v19189_v50 = vld [vmem:[#allocation38_spill] sm:$0xff] }
 0x295   : > { %9068 = vrot.lane.b32.xlu1 %v9062_v4, %s9970_s29  ;;  %v3190_v12 = vrot.slane %v2974_v2, 3  ;;  %4026 = vmatprep.mubr.f32.mxu0 %v19149_v42  ;;  %v8956_v2 = vunpack.i.h.bf16 %v13767_v28 }
 0x296   : > { %2586 = vrot.lane.b32.xlu0 %v19147_v8, %s9973_s19 }
 0x297   : > { %v2761_v27 = vpop.permute.xlu1 %2760  ;;  %v2665_v39 = vpop.permute.xlu0 %2664  ;;  %v3191_v35 = vsel %vm1468_vm6, %v3185_v16, %v3190_v12  ;;  %v8936_v16 = vunpack.i.h.bf16 %v13709_v60 }
 0x298   : > { %v3038_v49 = vsel %vm1747_vm9, %v3006_v15, %v2665_v39  ;;  %3817 = vmatprep.mubr.f32.mxu1 %v3191_v35  ;;  %v9880_v39 = vld [vmem:[%s10095_s17 + $0xb0] sm:$0xff]  ;;  %v13834_v60 = vpop.f32.mrf.mxu0 }
 0x299   : > { %9073 = vrot.lane.b32.xlu1 %v9062_v4, %s9969_s9  ;;  %v13814_v40 = vsel %vm1772_vm10, %v3038_v49, %v2761_v27  ;;  %3818 = vmatmul.mubr.f32.gmra.mxu1 %v13246_v46  ;;  %v8951_v4 = vunpack.i.h.bf16 %v13759_v24  ;;  %v2847_v27 = vsel %vm1597_vm2, %v8936_v16, %v8941_v29  ;;  %v9881_v46 = vld [vmem:[%s10095_s17 + $0xb8] sm:$0xf]  ;;  %19154 = vst [vmem:[#allocation89_spill] sm:$0xff] %v13834_v60 }
 0x29a   : > { %v3192_v34 = vrot.slane %v13814_v40, 3  ;;  %v9082_v35 = vpack.i.bf16 %v9881_v46, %v9880_v39  ;;  %v2879_v49 = vsel %vm1622_vm3, %v2847_v27, %v8946_v61  ;;  %2682 = vrot.lane.b32.xlu0 %v19147_v8, %s9974_s20  ;;  %v13843_v40 = vpop.f32.mrf.mxu0 }
 0x29b   : > { %v8964_v59 = vpop.permute.xlu1 %8963  ;;  %v8959_v55 = vpop.permute.xlu0 %8958  ;;  %v2911_v28 = vsel %vm1647_vm4, %v2879_v49, %v8951_v4  ;;  %19155 = vst [vmem:[#allocation97_spill] sm:$0xff] %v13843_v40 }
 0x29c   : > { %v3193_v15 = vsel %vm1468_vm6, %v3188_v9, %v3192_v34  ;;  %v2943_v9 = vsel %vm1672_vm5, %v2911_v28, %v8956_v2  ;;  %v13850_v4 = vpop.f32.mrf.mxu0  ;;  %v8960_v46 = vunpack.i.l.bf16 %v8959_v55 }
 0x29d   : > { %9078 = vrot.lane.b32.xlu1 %v9077_v45, %s9971_s16  ;;  %7723 = vmatmul.mubr.msk.f32.gmra.mxu0 %vm1797_vm11, %v3193_v15  ;;  %19156 = vst [vmem:[#allocation70_spill] sm:$0xff] %v13850_v4 }
 0x29e   : > { %4032 = vmatprep.mubr.f32.mxu0 %v19149_v42  ;;  %2778 = vrot.lane.b32.xlu0 %v19147_v8, %s18667_s22  ;;  %v13855_v8 = vpop.f32.mrf.mxu0 }
 0x29f   : > { %v8969_v24 = vpop.permute.xlu1 %8968  ;;  %v2475_v29 = vpop.permute.xlu0 %2474  ;;  %19157 = vst [vmem:[#allocation63_spill] sm:$0xff] %v13855_v8 }
 0x2a0   : > { %v2975_v45 = vsel %vm1697_vm7, %v2943_v9, %v2475_v29  ;;  %v8970_v9 = vunpack.i.l.bf16 %v8969_v24  ;;  %v8971_v40 = vunpack.i.h.bf16 %v8969_v24 }
 0x2a1   : > { %9083 = vrot.lane.b32.xlu1 %v9082_v35, %s9968_s13  ;;  %v3194_v61 = vrot.slane %v2975_v45, 3 }
 0x2a2   : > { %9088 = vrot.lane.b32.xlu0 %v9082_v35, %s9967_s23 }
 0x2a3   : > { %v8974_v16 = vpop.permute.xlu1 %8973  ;;  %v2571_v27 = vpop.permute.xlu0 %2570  ;;  %v3195_v15 = vsel %vm1468_vm6, %v3190_v12, %v3194_v61  ;;  %v8965_v12 = vunpack.i.l.bf16 %v8964_v59  ;;  %v8966_v61 = vunpack.i.h.bf16 %v8964_v59 }
 0x2a4   : > { %3823 = vmatprep.mubr.f32.mxu1 %v3195_v15  ;;  %v3007_v49 = vsel %vm1722_vm8, %v2475_v29, %v2571_v27  ;;  %v8961_v15 = vunpack.i.h.bf16 %v8959_v55  ;;  %v8975_v48 = vunpack.i.l.bf16 %v8974_v16  ;;  %v13866_v29 = vpop.f32.mrf.mxu0 }
 0x2a5   : > { %2492 = vrot.lane.b32.xlu1 %v19151_v47, %s9972_s14  ;;  %3824 = vmatmul.mubr.f32.gmra.mxu1 %v13278_v22  ;;  %19158 = vst [vmem:[#allocation90_spill] sm:$0xff] %v13866_v29  ;;  %v2848_v27 = vsel %vm1597_vm2, %v8960_v46, %v8965_v12  ;;  %v19160_v12 = vld [vmem:[#allocation29_spill] sm:$0xff] }
 0x2a6   : > { %2494 = vrot.lane.b32.xlu0 %v19152_v7, %s9972_s14  ;;  %v2880_v59 = vsel %vm1622_vm3, %v2848_v27, %v8970_v9  ;;  %v2849_v24 = vsel %vm1597_vm2, %v8961_v15, %v8966_v61 }
 0x2a7   : > { %v8979_v2 = vpop.permute.xlu1 %8978  ;;  %v2667_v39 = vpop.permute.xlu0 %2666  ;;  %v2881_v46 = vsel %vm1622_vm3, %v2849_v24, %v8971_v40 }
 0x2a8   : > { %v3039_v22 = vsel %vm1747_vm9, %v3007_v49, %v2667_v39  ;;  %v8980_v8 = vunpack.i.l.bf16 %v8979_v2  ;;  %v8976_v39 = vunpack.i.h.bf16 %v8974_v16  ;;  %v8981_v55 = vunpack.i.h.bf16 %v8979_v2 }
 0x2a9   : > { %9093 = vrot.lane.b32.xlu1 %v9082_v35, %s9970_s29 }
 0x2aa   : > { %2588 = vrot.lane.b32.xlu0 %v19151_v47, %s9973_s19  ;;  %v2913_v9 = vsel %vm1647_vm4, %v2881_v46, %v8976_v39 }
 0x2ab   : > { %v13858_v28 = vpop.permute.xlu1 %8983  ;;  %v2763_v45 = vpop.permute.xlu0 %2762  ;;  %v2945_v15 = vsel %vm1672_vm5, %v2913_v9, %v8981_v55 }
 0x2ac   : > { %v3071_v4 = vsel %vm1772_vm10, %v3039_v22, %v2763_v45  ;;  %v19159_v45 = vld [vmem:[#allocation35_spill] sm:$0xff] }
 0x2ad   : > { %2590 = vrot.lane.b32.xlu1 %v19152_v7, %s9973_s19  ;;  %v3196_v60 = vrot.slane %v3071_v4, 3  ;;  %v2912_v4 = vsel %vm1647_vm4, %v2880_v59, %v8975_v48  ;;  %v9102_v16 = vpack.i.bf16 %v19160_v12, %v19159_v45 }
 0x2ae   : > { %v2944_v2 = vsel %vm1672_vm5, %v2912_v4, %v8980_v8  ;;  %9098 = vrot.lane.b32.xlu0 %v9082_v35, %s9969_s9 }
 0x2af   : > { %v2477_v49 = vpop.permute.xlu1 %2476  ;;  %v13870_v41 = vpop.permute.xlu0 %8988  ;;  %v3197_v22 = vsel %vm1468_vm6, %v3192_v34, %v3196_v60 }
 0x2b0   : > { %7724 = vmatmul.mubr.msk.f32.gmra.mxu0 %vm1797_vm11, %v3197_v22  ;;  %v13884_v34 = vpop.f32.mrf.mxu0  ;;  %v2976_v48 = vsel %vm1697_vm7, %v2944_v2, %v2477_v49  ;;  %v9883_v2 = vld [vmem:[%s10095_s17 + $0xc8] sm:$0xff] }
 0x2b1   : > { %2684 = vrot.lane.b32.xlu1 %v19151_v47, %s9974_s20  ;;  %4038 = vmatprep.mubr.f32.mxu0 %v19149_v42  ;;  %19161 = vst [vmem:[#allocation72_spill] sm:$0xff] %v13884_v34  ;;  %v3198_v40 = vrot.slane %v2976_v48, 3 }
 0x2b2   : > { %2686 = vrot.lane.b32.xlu0 %v19152_v7, %s9974_s20  ;;  %v13898_v8 = vpop.f32.mrf.mxu0 }
 0x2b3   : > { %v13887_v60 = vpop.permute.xlu1 %8993  ;;  %v2479_v61 = vpop.permute.xlu0 %2478  ;;  %19162 = vst [vmem:[#allocation111_spill] sm:$0xff] %v13898_v8 }
 0x2b4   : > { %v13892_v27 = vsel %vm1697_vm7, %v2945_v15, %v2479_v61  ;;  %v13906_v55 = vpop.f32.mrf.mxu0  ;;  %v8995_v9 = vunpack.i.l.bf16 %v13887_v60 }
 0x2b5   : > { %9103 = vrot.lane.b32.xlu1 %v9102_v16, %s9971_s16  ;;  %v3199_v35 = vrot.slane %v13892_v27, 3  ;;  %19163 = vst [vmem:[#allocation92_spill] sm:$0xff] %v13906_v55 }
 0x2b6   : > { %2780 = vrot.lane.b32.xlu0 %v19151_v47, %s18667_s22  ;;  %v13914_v16 = vpop.f32.mrf.mxu0  ;;  %v8990_v47 = vunpack.i.l.bf16 %v13870_v41 }
 0x2b7   : > { %v2575_v59 = vpop.permute.xlu1 %2574  ;;  %v2573_v22 = vpop.permute.xlu0 %2572  ;;  %v3200_v39 = vsel %vm1468_vm6, %v3198_v40, %v3199_v35  ;;  %19164 = vst [vmem:[#allocation52_spill] sm:$0xff] %v13914_v16  ;;  %v8985_v40 = vunpack.i.l.bf16 %v13858_v28 }
 0x2b8   : > { %3829 = vmatprep.mubr.f32.mxu1 %v3200_v39  ;;  %v3009_v15 = vsel %vm1722_vm8, %v2479_v61, %v2575_v59  ;;  %v13927_v27 = vpop.f32.mrf.mxu0  ;;  %v3008_v39 = vsel %vm1722_vm8, %v2477_v49, %v2573_v22 }
 0x2b9   : > { %2782 = vrot.lane.b32.xlu1 %v19152_v7, %s18667_s22  ;;  %3830 = vmatmul.mubr.f32.gmra.mxu1 %v13281_v30  ;;  %v9882_v30 = vld [vmem:[%s10095_s17 + $0xc0] sm:$0xff]  ;;  %19165 = vst [vmem:[#allocation93_spill] sm:$0xff] %v13927_v27 }
 0x2ba   : > { %2496 = vrot.lane.b32.xlu0 %v19159_v45, %s9972_s14  ;;  %v9112_v48 = vpack.i.bf16 %v9883_v2, %v9882_v30 }
 0x2bb   : > { %v2669_v24 = vpop.permute.xlu1 %2668  ;;  %v13908_v4 = vpop.permute.xlu0 %8998 }
 0x2bc   : > { %v9000_v16 = vunpack.i.l.bf16 %v13908_v4  ;;  %v3040_v30 = vsel %vm1747_vm9, %v3008_v39, %v2669_v24 }
 0x2bd   : > { %2592 = vrot.lane.b32.xlu1 %v19159_v45, %s9973_s19 }
 0x2be   : > { %2688 = vrot.lane.b32.xlu0 %v19159_v45, %s9974_s20 }
 0x2bf   : > { %v13916_v46 = vpop.permute.xlu1 %9003  ;;  %v2671_v7 = vpop.permute.xlu0 %2670 }
 0x2c0   : > { %v3041_v55 = vsel %vm1747_vm9, %v3009_v15, %v2671_v7  ;;  %v9005_v2 = vunpack.i.l.bf16 %v13916_v46  ;;  %v13941_v7 = vpop.f32.mrf.mxu0 }
 0x2c1   : > { %2784 = vrot.lane.b32.xlu1 %v19159_v45, %s18667_s22  ;;  %v2850_v45 = vsel %vm1597_vm2, %v8985_v40, %v8990_v47  ;;  %19166 = vst [vmem:[#allocation69_spill] sm:$0xff] %v13941_v7 }
 0x2c2   : > { %v2882_v49 = vsel %vm1622_vm3, %v2850_v45, %v8995_v9  ;;  %9108 = vrot.lane.b32.xlu0 %v9112_v48, %s9968_s13  ;;  %v8996_v45 = vunpack.i.h.bf16 %v13887_v60 }
 0x2c3   : > { %v2767_v8 = vpop.permute.xlu1 %2766  ;;  %v2765_v59 = vpop.permute.xlu0 %2764  ;;  %v2914_v15 = vsel %vm1647_vm4, %v2882_v49, %v9000_v16 }
 0x2c4   : > { %v3073_v61 = vsel %vm1772_vm10, %v3041_v55, %v2767_v8  ;;  %v3072_v27 = vsel %vm1772_vm10, %v3040_v30, %v2765_v59  ;;  %v2946_v8 = vsel %vm1672_vm5, %v2914_v15, %v9005_v2  ;;  %v9006_v15 = vunpack.i.h.bf16 %v13916_v46 }
 0x2c5   : > { %v3202_v34 = vrot.slane %v3073_v61, 3  ;;  %9113 = vrot.lane.b32.xlu1 %v9112_v48, %s9967_s23  ;;  %v3201_v22 = vrot.slane %v3072_v27, 3  ;;  %v13952_v27 = vpop.f32.mrf.mxu0  ;;  %v8991_v61 = vunpack.i.h.bf16 %v13870_v41  ;;  %v8986_v41 = vunpack.i.h.bf16 %v13858_v28 }
 0x2c6   : > { %2498 = vrot.lane.b32.xlu0 %v19160_v12, %s9972_s14  ;;  %19167 = vst [vmem:[#allocation68_spill] sm:$0xff] %v13952_v27 }
 0x2c7   : > { %v2577_v24 = vpop.permute.xlu1 %2576  ;;  %v2481_v39 = vpop.permute.xlu0 %2480  ;;  %v3203_v55 = vsel %vm1468_vm6, %v3201_v22, %v3202_v34  ;;  %v9001_v22 = vunpack.i.h.bf16 %v13908_v4 }
 0x2c8   : > { %v2978_v47 = vsel %vm1697_vm7, %v2946_v8, %v2481_v39  ;;  %7725 = vmatmul.mubr.msk.f32.gmra.mxu0 %vm1797_vm11, %v3203_v55  ;;  %v3010_v40 = vsel %vm1722_vm8, %v2481_v39, %v2577_v24  ;;  %v2851_v39 = vsel %vm1597_vm2, %v8986_v41, %v8991_v61  ;;  %v19169_v8 = vld [vmem:[#allocation37_spill] sm:$0xff] }
 0x2c9   : > { %9118 = vrot.lane.b32.xlu1 %v9112_v48, %s9970_s29  ;;  %v3204_v9 = vrot.slane %v2978_v47, 3  ;;  %4044 = vmatprep.mubr.f32.mxu0 %v19149_v42  ;;  %v9885_v47 = vld [vmem:[%s10095_s17 + $0xd8] sm:$0xf]  ;;  %v2883_v28 = vsel %vm1622_vm3, %v2851_v39, %v8996_v45 }
 0x2ca   : > { %2594 = vrot.lane.b32.xlu0 %v19160_v12, %s9973_s19 }
 0x2cb   : > { %v2769_v16 = vpop.permute.xlu1 %2768  ;;  %v2673_v30 = vpop.permute.xlu0 %2672  ;;  %v3205_v2 = vsel %vm1468_vm6, %v3199_v35, %v3204_v9 }
 0x2cc   : > { %v3042_v59 = vsel %vm1747_vm9, %v3010_v40, %v2673_v30  ;;  %3835 = vmatprep.mubr.f32.mxu1 %v3205_v2  ;;  %v13966_v35 = vpop.f32.mrf.mxu0  ;;  %v2915_v40 = vsel %vm1647_vm4, %v2883_v28, %v9001_v22  ;;  %v19172_v22 = vld [vmem:[#allocation30_spill] sm:$0xff] }
 0x2cd   : > { %9123 = vrot.lane.b32.xlu1 %v9112_v48, %s9969_s9  ;;  %v13961_v49 = vsel %vm1772_vm10, %v3042_v59, %v2769_v16  ;;  %3836 = vmatmul.mubr.f32.gmra.mxu1 %v13270_v11  ;;  %19168 = vst [vmem:[#allocation76_spill] sm:$0xff] %v13966_v35  ;;  %v9884_v11 = vld [vmem:[%s10095_s17 + $0xd0] sm:$0xff] }
 0x2ce   : > { %v3206_v24 = vrot.slane %v13961_v49, 3  ;;  %v9132_v16 = vpack.i.bf16 %v9885_v47, %v9884_v11  ;;  %2690 = vrot.lane.b32.xlu0 %v19160_v12, %s9974_s20  ;;  %v13982_v4 = vpop.f32.mrf.mxu0 }
 0x2cf   : > { %v9014_v48 = vpop.permute.xlu1 %9013  ;;  %v9009_v60 = vpop.permute.xlu0 %9008  ;;  %19170 = vst [vmem:[#allocation77_spill] sm:$0xff] %v13982_v4 }
 0x2d0   : > { %v3207_v55 = vsel %vm1468_vm6, %v3202_v34, %v3206_v24  ;;  %v2947_v34 = vsel %vm1672_vm5, %v2915_v40, %v9006_v15  ;;  %v13991_v59 = vpop.f32.mrf.mxu0  ;;  %v9010_v11 = vunpack.i.l.bf16 %v9009_v60 }
 0x2d1   : > { %9128 = vrot.lane.b32.xlu1 %v19169_v8, %s9971_s16  ;;  %7726 = vmatmul.mubr.msk.f32.gmra.mxu0 %vm1797_vm11, %v3207_v55  ;;  %19171 = vst [vmem:[#allocation94_spill] sm:$0xff] %v13991_v59 }
 0x2d2   : > { %4050 = vmatprep.mubr.f32.mxu0 %v19149_v42  ;;  %2786 = vrot.lane.b32.xlu0 %v19160_v12, %s18667_s22  ;;  %v13998_v15 = vpop.f32.mrf.mxu0  ;;  %v19174_v12 = vld [vmem:[#allocation32_spill] sm:$0xff] }
 0x2d3   : > { %v9019_v46 = vpop.permute.xlu1 %9018  ;;  %v2483_v30 = vpop.permute.xlu0 %2482  ;;  %19173 = vst [vmem:[#allocation114_spill] sm:$0xff] %v13998_v15 }
 0x2d4   : > { %v2979_v2 = vsel %vm1697_vm7, %v2947_v34, %v2483_v30  ;;  %v14003_v55 = vpop.f32.mrf.mxu0  ;;  %v9020_v40 = vunpack.i.l.bf16 %v9019_v46  ;;  %v9021_v59 = vunpack.i.h.bf16 %v9019_v46 }
 0x2d5   : > { %9133 = vrot.lane.b32.xlu1 %v9132_v16, %s9968_s13  ;;  %v3208_v61 = vrot.slane %v2979_v2, 3  ;;  %19175 = vst [vmem:[#allocation98_spill] sm:$0xff] %v14003_v55  ;;  %v9016_v2 = vunpack.i.h.bf16 %v9014_v48 }
 0x2d6   : > { %9138 = vrot.lane.b32.xlu0 %v9132_v16, %s9967_s23 }
 0x2d7   : > { %v9024_v45 = vpop.permute.xlu1 %9023  ;;  %v2579_v49 = vpop.permute.xlu0 %2578  ;;  %v3209_v41 = vsel %vm1468_vm6, %v3204_v9, %v3208_v61  ;;  %v9015_v9 = vunpack.i.l.bf16 %v9014_v48  ;;  %v9011_v61 = vunpack.i.h.bf16 %v9009_v60 }
 0x2d8   : > { %3841 = vmatprep.mubr.f32.mxu1 %v3209_v41  ;;  %v3011_v47 = vsel %vm1722_vm8, %v2483_v30, %v2579_v49  ;;  %v9025_v41 = vunpack.i.l.bf16 %v9024_v45  ;;  %v14014_v30 = vpop.f32.mrf.mxu0 }
 0x2d9   : > { %2500 = vrot.lane.b32.xlu1 %v19172_v22, %s9972_s14  ;;  %3842 = vmatmul.mubr.f32.gmra.mxu1 %v13273_v26  ;;  %19176 = vst [vmem:[#allocation43_spill] sm:$0xff] %v14014_v30  ;;  %v2852_v49 = vsel %vm1597_vm2, %v9010_v11, %v9015_v9  ;;  %v2853_v46 = vsel %vm1597_vm2, %v9011_v61, %v9016_v2  ;;  %v19178_v9 = vld [vmem:[#allocation36_spill] sm:$0xff] }
 0x2da   : > { %2502 = vrot.lane.b32.xlu0 %v19174_v12, %s9972_s14  ;;  %v2884_v48 = vsel %vm1622_vm3, %v2852_v49, %v9020_v40  ;;  %v2885_v11 = vsel %vm1622_vm3, %v2853_v46, %v9021_v59 }
 0x2db   : > { %v9029_v39 = vpop.permute.xlu1 %9028  ;;  %v2675_v8 = vpop.permute.xlu0 %2674 }
 0x2dc   : > { %v3043_v26 = vsel %vm1747_vm9, %v3011_v47, %v2675_v8  ;;  %v9030_v55 = vunpack.i.l.bf16 %v9029_v39  ;;  %v9026_v8 = vunpack.i.h.bf16 %v9024_v45  ;;  %v9031_v60 = vunpack.i.h.bf16 %v9029_v39 }
 0x2dd   : > { %9143 = vrot.lane.b32.xlu1 %v9132_v16, %s9970_s29 }
 0x2de   : > { %2596 = vrot.lane.b32.xlu0 %v19172_v22, %s9973_s19  ;;  %v2917_v2 = vsel %vm1647_vm4, %v2885_v11, %v9026_v8 }
 0x2df   : > { %v14006_v28 = vpop.permute.xlu1 %9033  ;;  %v2771_v34 = vpop.permute.xlu0 %2770 }
 0x2e0   : > { %v3075_v15 = vsel %vm1772_vm10, %v3043_v26, %v2771_v34  ;;  %v19177_v34 = vld [vmem:[#allocation40_spill] sm:$0xff] }
 0x2e1   : > { %2598 = vrot.lane.b32.xlu1 %v19174_v12, %s9973_s19  ;;  %v3210_v4 = vrot.slane %v3075_v15, 3  ;;  %v2916_v15 = vsel %vm1647_vm4, %v2884_v48, %v9025_v41  ;;  %v9152_v45 = vpack.i.bf16 %v19178_v9, %v19177_v34  ;;  %v2949_v41 = vsel %vm1672_vm5, %v2917_v2, %v9031_v60  ;;  %v9886_v2 = vld [vmem:[%s10095_s17 + $0xe8] sm:$0xff] }
 0x2e2   : > { %v2948_v39 = vsel %vm1672_vm5, %v2916_v15, %v9030_v55  ;;  %9148 = vrot.lane.b32.xlu0 %v9132_v16, %s9969_s9  ;;  %v3444_v60 = vlaneseq }
 0x2e3   : > { %v2485_v47 = vpop.permute.xlu1 %2484  ;;  %v14018_v35 = vpop.permute.xlu0 %9038  ;;  %v3211_v26 = vsel %vm1468_vm6, %v3206_v24, %v3210_v4 }
 0x2e4   : > { %7727 = vmatmul.mubr.msk.f32.gmra.mxu0 %vm1797_vm11, %v3211_v26  ;;  %v14032_v24 = vpop.f32.mrf.mxu0  ;;  %v2980_v4 = vsel %vm1697_vm7, %v2948_v39, %v2485_v47  ;;  %v14062_v11 = vshrl.u32 %v3444_v60, 7  ;;  %v14064_v39 = vpop.f32.mrf.mxu1 }
 0x2e5   : > { %2692 = vrot.lane.b32.xlu1 %v19172_v22, %s9974_s20  ;;  %4056 = vmatprep.mubr.f32.mxu0 %v19149_v42  ;;  %19179 = vst [vmem:[#allocation104_spill] sm:$0xff] %v14032_v24  ;;  %v3212_v59 = vrot.slane %v2980_v4, 3  ;;  %v9040_v4 = vunpack.i.l.bf16 %v14018_v35 }
 0x2e6   : > { %2694 = vrot.lane.b32.xlu0 %v19174_v12, %s9974_s20  ;;  %v14046_v55 = vpop.f32.mrf.mxu0  ;;  %19182 = vst [vmem:[#allocation74_spill] sm:$0xff] %v14062_v11  ;;  %v14078_v60 = vpop.f32.mrf.mxu1 }
 0x2e7   : > { %v14035_v40 = vpop.permute.xlu1 %9043  ;;  %v2487_v61 = vpop.permute.xlu0 %2486  ;;  %19180 = vst [vmem:[#allocation60_spill] sm:$0xff] %v14046_v55 }
 0x2e8   : > { %v14040_v49 = vsel %vm1697_vm7, %v2949_v41, %v2487_v61  ;;  %v14056_v46 = vpop.f32.mrf.mxu0  ;;  %v9887_v41 = vld [vmem:[%s10095_s17 + $0xe0] sm:$0xff] }
 0x2e9   : > { %9153 = vrot.lane.b32.xlu1 %v9152_v45, %s9971_s16  ;;  %v18652_v16 = vrot.slane %v14040_v49, 3  ;;  %19181 = vst [vmem:[#allocation105_spill] sm:$0xff] %v14056_v46  ;;  %v9035_v46 = vunpack.i.l.bf16 %v14006_v28 }
 0x2ea   : > { %2788 = vrot.lane.b32.xlu0 %v19172_v22, %s18667_s22 }
 0x2eb   : > { %v2583_v48 = vpop.permute.xlu1 %2582  ;;  %v2581_v26 = vpop.permute.xlu0 %2580  ;;  %v3214_v8 = vsel %vm1468_vm6, %v3212_v59, %v18652_v16  ;;  %v9162_v59 = vpack.i.bf16 %v9886_v2, %v9887_v41  ;;  %v9045_v16 = vunpack.i.l.bf16 %v14035_v40 }
 0x2ec   : > { %3847 = vmatprep.mubr.f32.mxu1 %v3214_v8  ;;  %v3013_v30 = vsel %vm1722_vm8, %v2487_v61, %v2583_v48  ;;  %v3012_v55 = vsel %vm1722_vm8, %v2485_v47, %v2581_v26  ;;  %v14093_v8 = vld [vmem:[%s18437_s2] sm:$0x3]  ;;  %v2854_v47 = vsel %vm1597_vm2, %v9035_v46, %v9040_v4 }
 0x2ed   : > { %2790 = vrot.lane.b32.xlu1 %v19174_v12, %s18667_s22  ;;  %3848 = vmatmul.mubr.f32.gmra.mxu1 %v13303_v10  ;;  %v14068_v12 = vpop.f32.mrf.mxu0 }
 0x2ee   : > { %2504 = vrot.lane.b32.xlu0 %v19177_v34, %s9972_s14  ;;  %19183 = vst [vmem:[#allocation115_spill] sm:$0xff] %v14068_v12 }
 0x2ef   : > { %v2677_v15 = vpop.permute.xlu1 %2676  ;;  %v14058_v45 = vpop.permute.xlu0 %9048 }
 0x2f0   : > { %v14084_v12 = vpop.f32.mrf.mxu0  ;;  %v9050_v24 = vunpack.i.l.bf16 %v14058_v45  ;;  %v3044_v61 = vsel %vm1747_vm9, %v3012_v55, %v2677_v15  ;;  %v19185_v55 = vsub.s32 0, %v14062_v11 }
 0x2f1   : > { %2600 = vrot.lane.b32.xlu1 %v19177_v34, %s9973_s19  ;;  %19184 = vst [vmem:[#allocation42_spill] sm:$0xff] %v14084_v12  ;;  %v14096_v48 = vpop.f32.mrf.mxu1 }
 0x2f2   : > { %2696 = vrot.lane.b32.xlu0 %v19177_v34, %s9974_s20  ;;  %v14108_v15 = vrot.slane %v14093_v8, %v19185_v55  ;;  %v14110_v29 = vpop.f32.mrf.mxu0  ;;  %v19187_v55 = vrot.slane %v14040_v49, 3 }
 0x2f3   : > { %v14070_v22 = vpop.permute.xlu1 %9053  ;;  %v2679_v10 = vpop.permute.xlu0 %2678  ;;  %19186 = vst [vmem:[#allocation101_spill] sm:$0xff] %v14110_v29  ;;  %v19188_v29 = vld [vmem:[#allocation41_spill] sm:$0xff] }
 0x2f4   : > { %v3045_v2 = vsel %vm1747_vm9, %v3013_v30, %v2679_v10  ;;  %v2886_v10 = vsel %vm1622_vm3, %v2854_v47, %v9045_v16 }
 0x2f5   : > { %2792 = vrot.lane.b32.xlu1 %v19177_v34, %s18667_s22  ;;  %v9055_v34 = vunpack.i.l.bf16 %v14070_v22  ;;  %v2918_v46 = vsel %vm1647_vm4, %v2886_v10, %v9050_v24 }
 0x2f6   : > { %9158 = vrot.lane.b32.xlu0 %v9162_v59, %s9968_s13 }
 0x2f7   : > { %v2775_v41 = vpop.permute.xlu1 %2774  ;;  %v2773_v27 = vpop.permute.xlu0 %2772  ;;  %v2950_v4 = vsel %vm1672_vm5, %v2918_v46, %v9055_v34 }
 0x2f8   : > { %v3077_v12 = vsel %vm1772_vm10, %v3045_v2, %v2775_v41  ;;  %v3076_v30 = vsel %vm1772_vm10, %v3044_v61, %v2773_v27  ;;  %v3581_v41 = vadd.f32 %v13595_v38, %v14108_v15  ;;  %v14119_v61 = vpop.f32.mrf.mxu0 }
 0x2f9   : > { %v3216_v26 = vrot.slane %v3077_v12, 3  ;;  %9163 = vrot.lane.b32.xlu1 %v9162_v59, %s9967_s23  ;;  %v3215_v7 = vrot.slane %v3076_v30, 3  ;;  %v14113_v12 = vpop.f32.mrf.mxu1 }
 0x2fa   : > { %2506 = vrot.lane.b32.xlu0 %v19178_v9, %s9972_s14 }
 0x2fb   : > { %v2585_v2 = vpop.permute.xlu1 %2584  ;;  %v2489_v27 = vpop.permute.xlu0 %2488  ;;  %v3217_v16 = vsel %vm1468_vm6, %v3215_v7, %v3216_v26 }
 0x2fc   : > { %v2982_v47 = vsel %vm1697_vm7, %v2950_v4, %v2489_v27  ;;  %7728 = vmatmul.mubr.msk.f32.gmra.mxu0 %vm1797_vm11, %v3217_v16  ;;  %v3014_v10 = vsel %vm1722_vm8, %v2489_v27, %v2585_v2  ;;  %v9041_v4 = vunpack.i.h.bf16 %v14018_v35  ;;  %v14132_v16 = vpop.f32.mrf.mxu0  ;;  %v9046_v2 = vunpack.i.h.bf16 %v14035_v40 }
 0x2fd   : > { %9168 = vrot.lane.b32.xlu1 %v9162_v59, %s9970_s29  ;;  %v3218_v30 = vrot.slane %v2982_v47, 3  ;;  %v3789_v24 = vpop.f32.mrf.mxu1  ;;  %4062 = vmatprep.mubr.f32.mxu0 %v19149_v42  ;;  %v9036_v35 = vunpack.i.h.bf16 %v14006_v28  ;;  %v9051_v27 = vunpack.i.h.bf16 %v14058_v45 }
 0x2fe   : > { %v3790_v34 = vadd.f32 %v3789_v24, %v3581_v41  ;;  %v9177_v41 = vpack.i.bf16 %v19189_v50, %v19188_v29  ;;  %2602 = vrot.lane.b32.xlu0 %v19178_v9, %s9973_s19 }
 0x2ff   : > { %v2777_v7 = vpop.permute.xlu1 %2776  ;;  %v2681_v38 = vpop.permute.xlu0 %2680  ;;  %v3219_v46 = vsel %vm1468_vm6, %v19187_v55, %v3218_v30 }
 0x300   : > { %v3046_v47 = vsel %vm1747_vm9, %v3014_v10, %v2681_v38  ;;  %3853 = vmatprep.mubr.f32.mxu1 %v3219_v46  ;;  %v9056_v38 = vunpack.i.h.bf16 %v14070_v22  ;;  %v9888_v46 = vld [vmem:[%s10095_s17 + $0xf0] sm:$0xff] }
 0x301   : > { %9173 = vrot.lane.b32.xlu1 %v9162_v59, %s9969_s9  ;;  %v14140_v49 = vsel %vm1772_vm10, %v3046_v47, %v2777_v7  ;;  %3854 = vmatmul.mubr.f32.gmra.mxu1 %v13306_v18  ;;  %v14147_v59 = vpop.f32.mrf.mxu0  ;;  %v2855_v7 = vsel %vm1597_vm2, %v9036_v35, %v9041_v4  ;;  %v9889_v18 = vld [vmem:[%s10095_s17 + $0xf8] sm:$0xf]  ;;  %s9977_s17 = smov 8  }
 0x302   : > { %v3220_v24 = vrot.slane %v14140_v49, 3  ;;  %v9182_v47 = vpack.i.bf16 %v9889_v18, %v9888_v46  ;;  %v2887_v28 = vsel %vm1622_vm3, %v2855_v7, %v9046_v2  ;;  %2698 = vrot.lane.b32.xlu0 %v19178_v9, %s9974_s20 }
 0x303   : > { %v9064_v10 = vpop.permute.xlu1 %9063  ;;  %v9059_v40 = vpop.permute.xlu0 %9058  ;;  %v2919_v49 = vsel %vm1647_vm4, %v2887_v28, %v9051_v27 }
 0x304   : > { %v3221_v55 = vsel %vm1468_vm6, %v3216_v26, %v3220_v24  ;;  %v14160_v45 = vpop.f32.mrf.mxu0  ;;  %v2951_v26 = vsel %vm1672_vm5, %v2919_v49, %v9056_v38 }
 0x305   : > { %9178 = vrot.lane.b32.xlu1 %v9177_v41, %s9971_s16  ;;  %7729 = vmatmul.mubr.msk.f32.gmra.mxu0 %vm1797_vm11, %v3221_v55 }
 0x306   : > { %4068 = vmatprep.mubr.f32.mxu0 %v19149_v42  ;;  %2794 = vrot.lane.b32.xlu0 %v19178_v9, %s18667_s22  ;;  %v9065_v9 = vunpack.i.l.bf16 %v9064_v10 }
 0x307   : > { %v9069_v22 = vpop.permute.xlu1 %9068  ;;  %v2491_v4 = vpop.permute.xlu0 %2490 }
 0x308   : > { %v2983_v41 = vsel %vm1697_vm7, %v2951_v26, %v2491_v4  ;;  %v3998_v35 = vpop.f32.mrf.mxu0  ;;  %v9070_v49 = vunpack.i.l.bf16 %v9069_v22 }
 0x309   : > { %9183 = vrot.lane.b32.xlu1 %v9182_v47, %s9968_s13  ;;  %v3222_v2 = vrot.slane %v2983_v41, 3  ;;  %v14167_v7 = vadd.f32 %v3998_v35, %v3790_v34  ;;  %v9060_v34 = vunpack.i.l.bf16 %v9059_v40  ;;  %v9066_v35 = vunpack.i.h.bf16 %v9064_v10  ;;  %s19253_s13 = smov 118  }
 0x30a   : > { %9188 = vrot.lane.b32.xlu0 %v9182_v47, %s9967_s23  ;;  %s9979_s23 = smov 12  }
 0x30b   : > { %19190 = vst [vmem:[#allocation44_spill] sm:$0xff] %v14167_v7  ;;  %v9074_v55 = vpop.permute.xlu1 %9073  ;;  %v2587_v46 = vpop.permute.xlu0 %2586  ;;  %v3223_v27 = vsel %vm1468_vm6, %v3218_v30, %v3222_v2  ;;  %v9061_v2 = vunpack.i.h.bf16 %v9059_v40  ;;  %v9071_v7 = vunpack.i.h.bf16 %v9069_v22 }
 0x30c   : > { %3859 = vmatprep.mubr.f32.mxu1 %v3223_v27  ;;  %v3015_v28 = vsel %vm1722_vm8, %v2491_v4, %v2587_v46  ;;  %v2856_v4 = vsel %vm1597_vm2, %v9060_v34, %v9065_v9  ;;  %v9076_v46 = vunpack.i.h.bf16 %v9074_v55  ;;  %v19192_v9 = vld [vmem:[#allocation33_spill] sm:$0xff] }
 0x30d   : > { %2508 = vrot.lane.b32.xlu1 %v19188_v29, %s9972_s14  ;;  %3860 = vmatmul.mubr.f32.gmra.mxu1 %v13297_v54  ;;  %v9075_v54 = vunpack.i.l.bf16 %v9074_v55 }
 0x30e   : > { %2510 = vrot.lane.b32.xlu0 %v19189_v50, %s9972_s14 }
 0x30f   : > { %v9079_v38 = vpop.permute.xlu1 %9078  ;;  %v2683_v18 = vpop.permute.xlu0 %2682 }
 0x310   : > { %v3047_v26 = vsel %vm1747_vm9, %v3015_v28, %v2683_v18  ;;  %v9080_v13 = vunpack.i.l.bf16 %v9079_v38  ;;  %v2888_v18 = vsel %vm1622_vm3, %v2856_v4, %v9070_v49  ;;  %v9081_v10 = vunpack.i.h.bf16 %v9079_v38 }
 0x311   : > { %9193 = vrot.lane.b32.xlu1 %v9182_v47, %s9970_s29  ;;  %v2920_v22 = vsel %vm1647_vm4, %v2888_v18, %v9075_v54  ;;  %v14224_v18 = vpop.f32.mrf.mxu1 }
 0x312   : > { %2604 = vrot.lane.b32.xlu0 %v19188_v29, %s9973_s19  ;;  %v2952_v38 = vsel %vm1672_vm5, %v2920_v22, %v9080_v13 }
 0x313   : > { %v14180_v30 = vpop.permute.xlu1 %9083  ;;  %v2779_v41 = vpop.permute.xlu0 %2778 }
 0x314   : > { %v3079_v27 = vsel %vm1772_vm10, %v3047_v26, %v2779_v41  ;;  %v2857_v26 = vsel %vm1597_vm2, %v9061_v2, %v9066_v35  ;;  %v19191_v41 = vld [vmem:[#allocation39_spill] sm:$0xff] }
 0x315   : > { %2606 = vrot.lane.b32.xlu1 %v19189_v50, %s9973_s19  ;;  %v3224_v21 = vrot.slane %v3079_v27, 3  ;;  %v9202_v55 = vpack.i.bf16 %v19192_v9, %v19191_v41  ;;  %v2889_v34 = vsel %vm1622_vm3, %v2857_v26, %v9071_v7  ;;  %v14231_v26 = vpop.f32.mrf.mxu1 }
 0x316   : > { %9198 = vrot.lane.b32.xlu0 %v9182_v47, %s9969_s9  ;;  %v2921_v49 = vsel %vm1647_vm4, %v2889_v34, %v9076_v46  ;;  %s9984_s9 = smov 40  }
 0x317   : > { %v2493_v5 = vpop.permute.xlu1 %2492  ;;  %v14190_v40 = vpop.permute.xlu0 %9088  ;;  %v3225_v28 = vsel %vm1468_vm6, %v3220_v24, %v3224_v21  ;;  %v2953_v2 = vsel %vm1672_vm5, %v2921_v49, %v9081_v10 }
 0x318   : > { %7730 = vmatmul.mubr.msk.f32.gmra.mxu0 %vm1797_vm11, %v3225_v28  ;;  %v2984_v21 = vsel %vm1697_vm7, %v2952_v38, %v2493_v5  ;;  %v18654_v28 = vsub.s32 1, %v14062_v11 }
 0x319   : > { %2700 = vrot.lane.b32.xlu1 %v19188_v29, %s9974_s20  ;;  %4074 = vmatprep.mubr.f32.mxu0 %v19149_v42  ;;  %v3226_v7 = vrot.slane %v2984_v21, 3  ;;  %v9085_v21 = vunpack.i.l.bf16 %v14180_v30 }
 0x31a   : > { %2702 = vrot.lane.b32.xlu0 %v19189_v50, %s9974_s20  ;;  %v14243_v22 = vrot.slane %v14093_v8, %v18654_v28 }
 0x31b   : > { %v14205_v24 = vpop.permute.xlu1 %9093  ;;  %v2495_v35 = vpop.permute.xlu0 %2494 }
 0x31c   : > { %v14210_v54 = vsel %vm1697_vm7, %v2953_v2, %v2495_v35  ;;  %v9095_v34 = vunpack.i.l.bf16 %v14205_v24 }
 0x31d   : > { %9203 = vrot.lane.b32.xlu1 %v9202_v55, %s9971_s16  ;;  %v18655_v13 = vrot.slane %v14210_v54, 3  ;;  %v14245_v55 = vpop.f32.mrf.mxu1  ;;  %s18669_s16 = smov 32  }
 0x31e   : > { %2796 = vrot.lane.b32.xlu0 %v19188_v29, %s18667_s22 }
 0x31f   : > { %v2591_v47 = vpop.permute.xlu1 %2590  ;;  %v2589_v27 = vpop.permute.xlu0 %2588  ;;  %v3228_v4 = vsel %vm1468_vm6, %v3226_v7, %v18655_v13 }
 0x320   : > { %3865 = vmatprep.mubr.f32.mxu1 %v3228_v4  ;;  %v3017_v38 = vsel %vm1722_vm8, %v2495_v35, %v2591_v47  ;;  %v3016_v49 = vsel %vm1722_vm8, %v2493_v5, %v2589_v27 }
 0x321   : > { %2798 = vrot.lane.b32.xlu1 %v19189_v50, %s18667_s22  ;;  %3866 = vmatmul.mubr.f32.gmra.mxu1 %v13300_v36  ;;  %v9090_v36 = vunpack.i.l.bf16 %v14190_v40 }
 0x322   : > { %2512 = vrot.lane.b32.xlu0 %v19191_v41, %s9972_s14 }
 0x323   : > { %v2685_v46 = vpop.permute.xlu1 %2684  ;;  %v14226_v10 = vpop.permute.xlu0 %9098 }
 0x324   : > { %v9100_v2 = vunpack.i.l.bf16 %v14226_v10  ;;  %v3048_v8 = vsel %vm1747_vm9, %v3016_v49, %v2685_v46 }
 0x325   : > { %2608 = vrot.lane.b32.xlu1 %v19191_v41, %s9973_s19  ;;  %v14256_v28 = vpop.f32.mrf.mxu1 }
 0x326   : > { %2704 = vrot.lane.b32.xlu0 %v19191_v41, %s9974_s20 }
 0x327   : > { %v14235_v50 = vpop.permute.xlu1 %9103  ;;  %v2687_v29 = vpop.permute.xlu0 %2686 }
 0x328   : > { %v3049_v7 = vsel %vm1747_vm9, %v3017_v38, %v2687_v29  ;;  %v9105_v13 = vunpack.i.l.bf16 %v14235_v50  ;;  %v3571_v29 = vadd.f32 %v13539_v6, %v14243_v22  ;;  %v14272_v38 = vpop.f32.mrf.mxu0 }
 0x329   : > { %2800 = vrot.lane.b32.xlu1 %v19191_v41, %s18667_s22  ;;  %v2858_v41 = vsel %vm1597_vm2, %v9085_v21, %v9090_v36  ;;  %v3569_v21 = vadd.f32 %v13530_v23, %v14108_v15 }
 0x32a   : > { %v2890_v27 = vsel %vm1622_vm3, %v2858_v41, %v9095_v34  ;;  %2514 = vrot.lane.b32.xlu0 %v19192_v9, %s9972_s14  ;;  %v3780_v6 = vadd.f32 %v14078_v60, %v3571_v29  ;;  %s9980_s14 = smov 82  }
 0x32b   : > { %v2783_v4 = vpop.permute.xlu1 %2782  ;;  %v2781_v47 = vpop.permute.xlu0 %2780  ;;  %v2922_v36 = vsel %vm1647_vm4, %v2890_v27, %v9100_v2  ;;  %v3778_v23 = vadd.f32 %v14064_v39, %v3569_v21 }
 0x32c   : > { %v14260_v35 = vsel %vm1772_vm10, %v3049_v7, %v2783_v4  ;;  %v3080_v5 = vsel %vm1772_vm10, %v3048_v8, %v2781_v47  ;;  %v14277_v7 = vpop.f32.mrf.mxu1  ;;  %v2954_v34 = vsel %vm1672_vm5, %v2922_v36, %v9105_v13  ;;  %v4004_v47 = vpop.f32.mrf.mxu0  ;;  %v3989_v60 = vadd.f32 %v14132_v16, %v3780_v6 }
 0x32d   : > { %v3230_v11 = vrot.slane %v14260_v35, 3  ;;  %2610 = vrot.lane.b32.xlu1 %v19192_v9, %s9973_s19  ;;  %v3229_v46 = vrot.slane %v3080_v5, 3  ;;  %v3599_v35 = vadd.f32 %v13670_v56, %v14108_v15  ;;  %v3577_v56 = vadd.f32 %v13575_v37, %v14243_v22  ;;  %s9995_s19 = smov 72  }
 0x32e   : > { %2706 = vrot.lane.b32.xlu0 %v19192_v9, %s9974_s20  ;;  %v14301_v39 = vadd.f32 %v14119_v61, %v3778_v23  ;;  %v9091_v16 = vunpack.i.h.bf16 %v14190_v40  ;;  %v9086_v40 = vunpack.i.h.bf16 %v14180_v30  ;;  %s9986_s20 = smov 28  }
 0x32f   : > { %v2593_v49 = vpop.permute.xlu1 %2592  ;;  %v2497_v4 = vpop.permute.xlu0 %2496  ;;  %v3231_v8 = vsel %vm1468_vm6, %v3229_v46, %v3230_v11  ;;  %v3575_v46 = vadd.f32 %v13552_v3, %v14108_v15  ;;  %v3786_v37 = vadd.f32 %v14113_v12, %v3577_v56  ;;  %v3589_v3 = vadd.f32 %v13629_v0, %v14243_v22 }
 0x330   : > { %v14285_v41 = vsel %vm1697_vm7, %v2954_v34, %v2497_v4  ;;  %7731 = vmatmul.mubr.msk.f32.gmra.mxu0 %vm1797_vm11, %v3231_v8  ;;  %v3018_v29 = vsel %vm1722_vm8, %v2497_v4, %v2593_v49  ;;  %v4006_v34 = vpop.f32.mrf.mxu0  ;;  %v9101_v4 = vunpack.i.h.bf16 %v14226_v10  ;;  %v2859_v30 = vsel %vm1597_vm2, %v9086_v40, %v9091_v16 }
 0x331   : > { %2802 = vrot.lane.b32.xlu1 %v19192_v9, %s18667_s22  ;;  %v3232_v13 = vrot.slane %v14285_v41, 3  ;;  %v3807_v2 = vpop.f32.mrf.mxu1  ;;  %4080 = vmatprep.mubr.f32.mxu0 %v19149_v42  ;;  %v19193_v9 = vrot.slane %v14210_v54, 3  ;;  %v3784_v61 = vadd.f32 %v14096_v48, %v3575_v46  ;;  %v9096_v54 = vunpack.i.h.bf16 %v14205_v24  ;;  %s9996_s22 = smov 64  }
 0x332   : > { %v3808_v5 = vadd.f32 %v3807_v2, %v3599_v35  ;;  %4177 = vrot.lane.b32.xlu0 %v14301_v39, %s9977_s17  ;;  %v3995_v12 = vadd.f32 %v14160_v45, %v3786_v37  ;;  %v4010_v35 = vpop.f32.mrf.mxu0  ;;  %v3587_v24 = vadd.f32 %v13615_v1, %v14108_v15  ;;  %v3798_v45 = vadd.f32 %v14245_v55, %v3589_v3 }
 0x333   : > { %v2785_v27 = vpop.permute.xlu1 %2784  ;;  %v2689_v36 = vpop.permute.xlu0 %2688  ;;  %v3233_v21 = vsel %vm1468_vm6, %v19193_v9, %v3232_v13  ;;  %v14332_v6 = vadd.f32 %v14147_v59, %v3784_v61  ;;  %v2891_v1 = vsel %vm1622_vm3, %v2859_v30, %v9096_v54  ;;  %v3595_v59 = vadd.f32 %v13653_v32, %v14243_v22 }
 0x334   : > { %v3050_v8 = vsel %vm1747_vm9, %v3018_v29, %v2689_v36  ;;  %3871 = vmatprep.mubr.f32.mxu1 %v3233_v21  ;;  %v3796_v2 = vadd.f32 %v14231_v26, %v3587_v24  ;;  %v4012_v55 = vpop.f32.mrf.mxu0 }
 0x335   : > { %4179 = vrot.lane.b32.xlu1 %v3989_v60, %s9977_s17  ;;  %v14318_v49 = vsel %vm1772_vm10, %v3050_v8, %v2785_v27  ;;  %3872 = vmatmul.mubr.f32.gmra.mxu1 %v13331_v53  ;;  %v9106_v53 = vunpack.i.h.bf16 %v14235_v50  ;;  %v4007_v50 = vadd.f32 %v4006_v34, %v3798_v45  ;;  %v2923_v60 = vsel %vm1647_vm4, %v2891_v1, %v9101_v4 }
 0x336   : > { %v3234_v0 = vrot.slane %v14318_v49, 3  ;;  %4181 = vrot.lane.b32.xlu0 %v14332_v6, %s9977_s17  ;;  %v14352_v26 = vadd.f32 %v4004_v47, %v3796_v2  ;;  %v3804_v29 = vadd.f32 %v14277_v7, %v3595_v59 }
 0x337   : > { %v14327_v48 = vpop.permute.xlu1 %9113  ;;  %v9109_v23 = vpop.permute.xlu0 %9108  ;;  %v2955_v46 = vsel %vm1672_vm5, %v2923_v60, %v9106_v53 }
 0x338   : > { %v3235_v10 = vsel %vm1468_vm6, %v3230_v11, %v3234_v0  ;;  %v3593_v11 = vadd.f32 %v13642_v20, %v14108_v15  ;;  %v4013_v20 = vadd.f32 %v4012_v55, %v3804_v29  ;;  %v9115_v8 = vunpack.i.l.bf16 %v14327_v48 }
 0x339   : > { %4183 = vrot.lane.b32.xlu1 %v3995_v12, %s9977_s17  ;;  %7732 = vmatmul.mubr.msk.f32.gmra.mxu0 %vm1797_vm11, %v3235_v10  ;;  %v9110_v3 = vunpack.i.l.bf16 %v9109_v23  ;;  %v9116_v40 = vunpack.i.h.bf16 %v14327_v48  ;;  %v9111_v4 = vunpack.i.h.bf16 %v9109_v23  ;;  %v14386_v23 = vpop.f32.mrf.mxu1 }
 0x33a   : > { %4086 = vmatprep.mubr.f32.mxu0 %v19149_v42  ;;  %v3802_v9 = vadd.f32 %v14256_v28, %v3593_v11  ;;  %4189 = vrot.lane.b32.xlu0 %v14352_v26, %s9977_s17 }
 0x33b   : > { %v9119_v56 = vpop.permute.xlu1 %9118  ;;  %v2499_v27 = vpop.permute.xlu0 %2498  ;;  %v2860_v30 = vsel %vm1597_vm2, %v9110_v3, %v9115_v8  ;;  %v2861_v55 = vsel %vm1597_vm2, %v9111_v4, %v9116_v40 }
 0x33c   : > { %v2987_v36 = vsel %vm1697_vm7, %v2955_v46, %v2499_v27  ;;  %v4016_v32 = vpop.f32.mrf.mxu0  ;;  %v14363_v16 = vadd.f32 %v4010_v35, %v3802_v9  ;;  %v9120_v41 = vunpack.i.l.bf16 %v9119_v56  ;;  %v9121_v24 = vunpack.i.h.bf16 %v9119_v56 }
 0x33d   : > { %4191 = vrot.lane.b32.xlu1 %v4007_v50, %s9977_s17  ;;  %v3236_v21 = vrot.slane %v2987_v36, 3  ;;  %v14359_v37 = vadd.f32 %v4016_v32, %v3808_v5  ;;  %v3605_v9 = vadd.f32 %v13694_v44, %v14108_v15 }
 0x33e   : > { %4193 = vrot.lane.b32.xlu0 %v14363_v16, %s9977_s17  ;;  %v2892_v1 = vsel %vm1622_vm3, %v2860_v30, %v9120_v41  ;;  %v2893_v60 = vsel %vm1622_vm3, %v2861_v55, %v9121_v24 }
 0x33f   : > { %v9124_v47 = vpop.permute.xlu1 %9123  ;;  %v2595_v34 = vpop.permute.xlu0 %2594  ;;  %v3237_v7 = vsel %vm1468_vm6, %v3232_v13, %v3236_v21 }
 0x340   : > { %3877 = vmatprep.mubr.f32.mxu1 %v3237_v7  ;;  %v3019_v61 = vsel %vm1722_vm8, %v2499_v27, %v2595_v34  ;;  %v9126_v10 = vunpack.i.h.bf16 %v9124_v47  ;;  %v14404_v21 = vpop.f32.mrf.mxu0 }
 0x341   : > { %4195 = vrot.lane.b32.xlu1 %v4013_v20, %s9977_s17  ;;  %3878 = vmatmul.mubr.f32.gmra.mxu1 %v13334_v63  ;;  %v9125_v63 = vunpack.i.l.bf16 %v9124_v47 }
 0x343   : > { %v9129_v28 = vpop.permute.xlu1 %9128  ;;  %v2691_v5 = vpop.permute.xlu0 %2690  ;;  %v2924_v56 = vsel %vm1647_vm4, %v2892_v1, %v9125_v63  ;;  %v3611_v63 = vadd.f32 %v13706_v33, %v14108_v15 }
 0x344   : > { %v3051_v13 = vsel %vm1747_vm9, %v3019_v61, %v2691_v5  ;;  %v9130_v53 = vunpack.i.l.bf16 %v9129_v28  ;;  %v9131_v59 = vunpack.i.h.bf16 %v9129_v28  ;;  %v3607_v28 = vadd.f32 %v13701_v31, %v14243_v22 }
 0x345   : > { %v3813_v27 = vpop.f32.mrf.mxu1 }
 0x346   : > { %v2956_v11 = vsel %vm1672_vm5, %v2924_v56, %v9130_v53  ;;  %v3814_v5 = vadd.f32 %v3813_v27, %v3605_v9 }
 0x347   : > { %v14374_v54 = vpop.permute.xlu1 %9133  ;;  %v2787_v12 = vpop.permute.xlu0 %2786 }
 0x348   : > { %v3083_v35 = vsel %vm1772_vm10, %v3051_v13, %v2787_v12  ;;  %v3815_v34 = vpop.f32.mrf.mxu1 }
 0x349   : > { %v3238_v45 = vrot.slane %v3083_v35, 3  ;;  %v3816_v41 = vadd.f32 %v3815_v34, %v3607_v28 }
 0x34b   : > { %v2501_v2 = vpop.permute.xlu1 %2500  ;;  %v14381_v50 = vpop.permute.xlu0 %9138  ;;  %v3239_v48 = vsel %vm1468_vm6, %v3234_v0, %v3238_v45  ;;  %v2925_v0 = vsel %vm1647_vm4, %v2893_v60, %v9126_v10  ;;  %v9135_v10 = vunpack.i.l.bf16 %v14374_v54 }
 0x34c   : > { %7733 = vmatmul.mubr.msk.f32.gmra.mxu0 %vm1797_vm11, %v3239_v48  ;;  %v2988_v46 = vsel %vm1697_vm7, %v2956_v11, %v2501_v2  ;;  %v2957_v36 = vsel %vm1672_vm5, %v2925_v0, %v9131_v59  ;;  %v9140_v45 = vunpack.i.l.bf16 %v14381_v50 }
 0x34d   : > { %4092 = vmatprep.mubr.f32.mxu0 %v19149_v42  ;;  %v3240_v20 = vrot.slane %v2988_v46, 3 }
 0x34f   : > { %v14395_v49 = vpop.permute.xlu1 %9143  ;;  %v2503_v29 = vpop.permute.xlu0 %2502 }
 0x350   : > { %v14400_v32 = vsel %vm1697_vm7, %v2957_v36, %v2503_v29  ;;  %v9145_v1 = vunpack.i.l.bf16 %v14395_v49 }
 0x351   : > { %v3241_v47 = vrot.slane %v14400_v32, 3 }
 0x353   : > { %v2599_v7 = vpop.permute.xlu1 %2598  ;;  %v2597_v8 = vpop.permute.xlu0 %2596  ;;  %v3242_v3 = vsel %vm1468_vm6, %v3240_v20, %v3241_v47 }
 0x354   : > { %3883 = vmatprep.mubr.f32.mxu1 %v3242_v3  ;;  %v4022_v61 = vpop.f32.mrf.mxu0  ;;  %v3021_v59 = vsel %vm1722_vm8, %v2503_v29, %v2599_v7  ;;  %v3020_v48 = vsel %vm1722_vm8, %v2501_v2, %v2597_v8  ;;  %v2862_v29 = vsel %vm1597_vm2, %v9135_v10, %v9140_v45  ;;  %v9146_v10 = vunpack.i.h.bf16 %v14395_v49 }
 0x355   : > { %v14412_v44 = vadd.f32 %v4022_v61, %v3814_v5  ;;  %3884 = vmatmul.mubr.f32.gmra.mxu1 %v13325_v57  ;;  %v3613_v57 = vadd.f32 %v13717_v19, %v14243_v22  ;;  %v2894_v7 = vsel %vm1622_vm3, %v2862_v29, %v9145_v1 }
 0x356   : > { %v4024_v13 = vpop.f32.mrf.mxu0 }
 0x357   : > { %v2693_v12 = vpop.permute.xlu1 %2692  ;;  %v4025_v40 = vadd.f32 %v4024_v13, %v3816_v41  ;;  %v14415_v4 = vpop.permute.xlu0 %9148  ;;  %4201 = vrot.lane.b32.xlu0 %v14412_v44, %s9977_s17  ;;  %v3617_v13 = vadd.f32 %v13735_v52, %v14108_v15 }
 0x358   : > { %v9150_v33 = vunpack.i.l.bf16 %v14415_v4  ;;  %v3052_v27 = vsel %vm1747_vm9, %v3020_v48, %v2693_v12  ;;  %v9151_v48 = vunpack.i.h.bf16 %v14415_v4 }
 0x359   : > { %v3819_v31 = vpop.f32.mrf.mxu1  ;;  %4203 = vrot.lane.b32.xlu1 %v4025_v40, %s9977_s17 }
 0x35a   : > { %v3820_v30 = vadd.f32 %v3819_v31, %v3611_v63  ;;  %v2926_v8 = vsel %vm1647_vm4, %v2894_v7, %v9150_v33 }
 0x35b   : > { %v14422_v35 = vpop.permute.xlu1 %9153  ;;  %v2695_v24 = vpop.permute.xlu0 %2694 }
 0x35c   : > { %v3821_v53 = vpop.f32.mrf.mxu1  ;;  %v3053_v56 = vsel %vm1747_vm9, %v3021_v59, %v2695_v24  ;;  %v9155_v46 = vunpack.i.l.bf16 %v14422_v35  ;;  %v9136_v59 = vunpack.i.h.bf16 %v14374_v54  ;;  %v9156_v32 = vunpack.i.h.bf16 %v14422_v35 }
 0x35d   : > { %v4028_v55 = vpop.f32.mrf.mxu0  ;;  %v3822_v60 = vadd.f32 %v3821_v53, %v3613_v57  ;;  %v3619_v54 = vadd.f32 %v13749_v51, %v14243_v22 }
 0x35e   : > { %v14433_v11 = vadd.f32 %v4028_v55, %v3820_v30  ;;  %v2958_v61 = vsel %vm1672_vm5, %v2926_v8, %v9155_v46  ;;  %v9141_v30 = vunpack.i.h.bf16 %v14381_v50 }
 0x35f   : > { %v2791_v19 = vpop.permute.xlu1 %2790  ;;  %v2789_v36 = vpop.permute.xlu0 %2788 }
 0x360   : > { %v3085_v0 = vsel %vm1772_vm10, %v3053_v56, %v2791_v19  ;;  %v4030_v9 = vpop.f32.mrf.mxu0  ;;  %v3084_v20 = vsel %vm1772_vm10, %v3052_v27, %v2789_v36  ;;  %4205 = vrot.lane.b32.xlu0 %v14433_v11, %s9977_s17  ;;  %v2863_v50 = vsel %vm1597_vm2, %v9136_v59, %v9141_v30 }
 0x361   : > { %v3244_v2 = vrot.slane %v3085_v0, 3  ;;  %v4031_v34 = vadd.f32 %v4030_v9, %v3822_v60  ;;  %v3243_v28 = vrot.slane %v3084_v20, 3  ;;  %v2895_v60 = vsel %vm1622_vm3, %v2863_v50, %v9146_v10 }
 0x363   : > { %4207 = vrot.lane.b32.xlu1 %v4031_v34, %s9977_s17  ;;  %v2601_v5 = vpop.permute.xlu1 %2600  ;;  %v2505_v3 = vpop.permute.xlu0 %2504  ;;  %v3245_v41 = vsel %vm1468_vm6, %v3243_v28, %v3244_v2 }
 0x364   : > { %v2990_v12 = vsel %vm1697_vm7, %v2958_v61, %v2505_v3  ;;  %7734 = vmatmul.mubr.msk.f32.gmra.mxu0 %vm1797_vm11, %v3245_v41  ;;  %v3022_v53 = vsel %vm1722_vm8, %v2505_v3, %v2601_v5 }
 0x365   : > { %v3246_v40 = vrot.slane %v2990_v12, 3  ;;  %v3825_v31 = vpop.f32.mrf.mxu1  ;;  %4098 = vmatprep.mubr.f32.mxu0 %v19149_v42 }
 0x366   : > { %v3826_v63 = vadd.f32 %v3825_v31, %v3617_v13 }
 0x367   : > { %v2793_v24 = vpop.permute.xlu1 %2792  ;;  %v2697_v57 = vpop.permute.xlu0 %2696  ;;  %v3247_v45 = vsel %vm1468_vm6, %v3241_v47, %v3246_v40 }
 0x368   : > { %v3054_v52 = vsel %vm1747_vm9, %v3022_v53, %v2697_v57  ;;  %3889 = vmatprep.mubr.f32.mxu1 %v3247_v45  ;;  %v3827_v49 = vpop.f32.mrf.mxu1 }
 0x369   : > { %v3086_v1 = vsel %vm1772_vm10, %v3054_v52, %v2793_v24  ;;  %3890 = vmatmul.mubr.f32.gmra.mxu1 %v13328_v58  ;;  %v2927_v58 = vsel %vm1647_vm4, %v2895_v60, %v9151_v48  ;;  %v3828_v0 = vadd.f32 %v3827_v49, %v3619_v54 }
 0x36a   : > { %v3248_v55 = vrot.slane %v3086_v1, 3  ;;  %v2959_v35 = vsel %vm1672_vm5, %v2927_v58, %v9156_v32 }
 0x36b   : > { %v9164_v33 = vpop.permute.xlu1 %9163  ;;  %v9159_v47 = vpop.permute.xlu0 %9158 }
 0x36c   : > { %v3249_v56 = vsel %vm1468_vm6, %v3244_v2, %v3248_v55  ;;  %v9165_v5 = vunpack.i.l.bf16 %v9164_v33  ;;  %v9160_v8 = vunpack.i.l.bf16 %v9159_v47  ;;  %v9166_v31 = vunpack.i.h.bf16 %v9164_v33 }
 0x36d   : > { %7735 = vmatmul.mubr.msk.f32.gmra.mxu0 %vm1797_vm11, %v3249_v56 }
 0x36e   : > { %4104 = vmatprep.mubr.f32.mxu0 %v19149_v42  ;;  %v2864_v45 = vsel %vm1597_vm2, %v9160_v8, %v9165_v5 }
 0x36f   : > { %v9169_v19 = vpop.permute.xlu1 %9168  ;;  %v2507_v4 = vpop.permute.xlu0 %2506 }
 0x370   : > { %v2991_v27 = vsel %vm1697_vm7, %v2959_v35, %v2507_v4  ;;  %v4034_v46 = vpop.f32.mrf.mxu0  ;;  %v9170_v41 = vunpack.i.l.bf16 %v9169_v19  ;;  %v9171_v53 = vunpack.i.h.bf16 %v9169_v19 }
 0x371   : > { %v3250_v36 = vrot.slane %v2991_v27, 3  ;;  %v14474_v9 = vadd.f32 %v4034_v46, %v3826_v63  ;;  %v9161_v63 = vunpack.i.h.bf16 %v9159_v47 }
 0x372   : > { %v4036_v29 = vpop.f32.mrf.mxu0  ;;  %v2896_v10 = vsel %vm1622_vm3, %v2864_v45, %v9170_v41  ;;  %v3629_v41 = vadd.f32 %v13778_v25, %v14108_v15 }
 0x373   : > { %v9174_v2 = vpop.permute.xlu1 %9173  ;;  %v14476_v20 = vadd.f32 %v4036_v29, %v3828_v0  ;;  %v2603_v34 = vpop.permute.xlu0 %2602  ;;  %v3251_v7 = vsel %vm1468_vm6, %v3246_v40, %v3250_v36  ;;  %v2865_v33 = vsel %vm1597_vm2, %v9161_v63, %v9166_v31  ;;  %v3625_v36 = vadd.f32 %v13765_v17, %v14243_v22  ;;  %v19194_v63 = vld [vmem:[#allocation95_spill] sm:$0xff] }
 0x374   : > { %3895 = vmatprep.mubr.f32.mxu1 %v3251_v7  ;;  %v3023_v3 = vsel %vm1722_vm8, %v2507_v4, %v2603_v34  ;;  %v9175_v24 = vunpack.i.l.bf16 %v9174_v2  ;;  %v9176_v30 = vunpack.i.h.bf16 %v9174_v2  ;;  %v2897_v47 = vsel %vm1622_vm3, %v2865_v33, %v9171_v53 }
 0x375   : > { %3896 = vmatmul.mubr.f32.gmra.mxu1 %v13355_v14  ;;  %v3623_v4 = vadd.f32 %v13757_v43, %v14108_v15 }
 0x376   : > { %v2928_v32 = vsel %vm1647_vm4, %v2896_v10, %v9175_v24  ;;  %v2929_v19 = vsel %vm1647_vm4, %v2897_v47, %v9176_v30 }
 0x377   : > { %v9179_v51 = vpop.permute.xlu1 %9178  ;;  %v2699_v28 = vpop.permute.xlu0 %2698 }
 0x378   : > { %v3055_v13 = vsel %vm1747_vm9, %v3023_v3, %v2699_v28  ;;  %v9180_v57 = vunpack.i.l.bf16 %v9179_v51  ;;  %v9181_v1 = vunpack.i.h.bf16 %v9179_v51 }
 0x379   : > { %v3831_v56 = vpop.f32.mrf.mxu1 }
 0x37a   : > { %v2960_v50 = vsel %vm1672_vm5, %v2928_v32, %v9180_v57  ;;  %v2961_v58 = vsel %vm1672_vm5, %v2929_v19, %v9181_v1  ;;  %v3832_v29 = vadd.f32 %v3831_v56, %v3623_v4 }
 0x37b   : > { %v14481_v61 = vpop.permute.xlu1 %9183  ;;  %v2795_v12 = vpop.permute.xlu0 %2794 }
 0x37c   : > { %v3087_v40 = vsel %vm1772_vm10, %v3055_v13, %v2795_v12  ;;  %v3833_v46 = vpop.f32.mrf.mxu1  ;;  %v9185_v53 = vunpack.i.l.bf16 %v14481_v61 }
 0x37d   : > { %v3252_v14 = vrot.slane %v3087_v40, 3  ;;  %v3834_v51 = vadd.f32 %v3833_v46, %v3625_v36 }
 0x37f   : > { %v2509_v52 = vpop.permute.xlu1 %2508  ;;  %v14487_v59 = vpop.permute.xlu0 %9188  ;;  %v3253_v48 = vsel %vm1468_vm6, %v3248_v55, %v3252_v14 }
 0x380   : > { %7736 = vmatmul.mubr.msk.f32.gmra.mxu0 %vm1797_vm11, %v3253_v48  ;;  %v2992_v60 = vsel %vm1697_vm7, %v2960_v50, %v2509_v52  ;;  %v9190_v24 = vunpack.i.l.bf16 %v14487_v59 }
 0x381   : > { %4110 = vmatprep.mubr.f32.mxu0 %v19149_v42  ;;  %v3254_v35 = vrot.slane %v2992_v60, 3 }
 0x382   : > { %v2866_v19 = vsel %vm1597_vm2, %v9185_v53, %v9190_v24 }
 0x383   : > { %v14497_v49 = vpop.permute.xlu1 %9193  ;;  %v2511_v55 = vpop.permute.xlu0 %2510 }
 0x384   : > { %v14502_v54 = vsel %vm1697_vm7, %v2961_v58, %v2511_v55  ;;  %v9195_v57 = vunpack.i.l.bf16 %v14497_v49 }
 0x385   : > { %v3255_v27 = vrot.slane %v14502_v54, 3 }
 0x386   : > { %v2898_v4 = vsel %vm1622_vm3, %v2866_v19, %v9195_v57 }
 0x387   : > { %v2607_v0 = vpop.permute.xlu1 %2606  ;;  %v2605_v2 = vpop.permute.xlu0 %2604  ;;  %v3256_v34 = vsel %vm1468_vm6, %v3254_v35, %v3255_v27 }
 0x388   : > { %3901 = vmatprep.mubr.f32.mxu1 %v3256_v34  ;;  %v4040_v7 = vpop.f32.mrf.mxu0  ;;  %v3025_v14 = vsel %vm1722_vm8, %v2511_v55, %v2607_v0  ;;  %v3024_v45 = vsel %vm1722_vm8, %v2509_v52, %v2605_v2  ;;  %v19195_v34 = vld [vmem:[#allocation96_spill] sm:$0xff] }
 0x389   : > { %v14512_v28 = vadd.f32 %v4040_v7, %v3832_v29  ;;  %3902 = vmatmul.mubr.f32.gmra.mxu1 %v13358_v62  ;;  %v3631_v62 = vadd.f32 %v19194_v63, %v14243_v22  ;;  %v3635_v7 = vadd.f32 %v19195_v34, %v14108_v15 }
 0x38a   : > { %v4042_v43 = vpop.f32.mrf.mxu0 }
 0x38b   : > { %v2701_v5 = vpop.permute.xlu1 %2700  ;;  %v4043_v8 = vadd.f32 %v4042_v43, %v3834_v51  ;;  %v14515_v3 = vpop.permute.xlu0 %9198  ;;  %4213 = vrot.lane.b32.xlu0 %v14512_v28, %s9977_s17  ;;  %v9191_v51 = vunpack.i.h.bf16 %v14487_v59 }
 0x38c   : > { %v9200_v25 = vunpack.i.l.bf16 %v14515_v3  ;;  %v3056_v32 = vsel %vm1747_vm9, %v3024_v45, %v2701_v5  ;;  %v9196_v5 = vunpack.i.h.bf16 %v14497_v49 }
 0x38d   : > { %v3837_v17 = vpop.f32.mrf.mxu1  ;;  %4215 = vrot.lane.b32.xlu1 %v4043_v8, %s9977_s17 }
 0x38e   : > { %v3838_v40 = vadd.f32 %v3837_v17, %v3629_v41  ;;  %v2930_v0 = vsel %vm1647_vm4, %v2898_v4, %v9200_v25  ;;  %v9186_v41 = vunpack.i.h.bf16 %v14481_v61 }
 0x38f   : > { %v9204_v13 = vpop.permute.xlu1 %9203  ;;  %v2703_v12 = vpop.permute.xlu0 %2702 }
 0x390   : > { %v3839_v31 = vpop.f32.mrf.mxu1  ;;  %v3057_v10 = vsel %vm1747_vm9, %v3025_v14, %v2703_v12  ;;  %v9205_v47 = vunpack.i.l.bf16 %v9204_v13  ;;  %v9201_v12 = vunpack.i.h.bf16 %v14515_v3  ;;  %v2867_v49 = vsel %vm1597_vm2, %v9186_v41, %v9191_v51  ;;  %v19196_v3 = vld [vmem:[#allocation87_spill] sm:$0xff]  ;;  %vm19227_vm2 = vmmov %vm19226_vm0 }
 0x391   : > { %v4046_v30 = vpop.f32.mrf.mxu0  ;;  %v3840_v1 = vadd.f32 %v3839_v31, %v3631_v62  ;;  %v9206_v62 = vunpack.i.h.bf16 %v9204_v13  ;;  %v2899_v57 = vsel %vm1622_vm3, %v2867_v49, %v9196_v5 }
 0x392   : > { %v14531_v48 = vadd.f32 %v4046_v30, %v3838_v40  ;;  %v2962_v29 = vsel %vm1672_vm5, %v2930_v0, %v9205_v47  ;;  %v2931_v45 = vsel %vm1647_vm4, %v2899_v57, %v9201_v12  ;;  %v19197_v47 = vld [vmem:[#allocation71_spill] sm:$0xff]  ;;  %v19200_v57 = vld [vmem:[#allocation97_spill] sm:$0xff]  ;;  %vm19228_vm4 = vmmov %vm19226_vm0 }
 0x393   : > { %v2799_v33 = vpop.permute.xlu1 %2798  ;;  %v2797_v56 = vpop.permute.xlu0 %2796  ;;  %v2963_v54 = vsel %vm1672_vm5, %v2931_v45, %v9206_v62 }
 0x394   : > { %v3089_v50 = vsel %vm1772_vm10, %v3057_v10, %v2799_v33  ;;  %v4048_v60 = vpop.f32.mrf.mxu0  ;;  %v3088_v52 = vsel %vm1772_vm10, %v3056_v32, %v2797_v56  ;;  %4217 = vrot.lane.b32.xlu0 %v14531_v48, %s9977_s17 }
 0x395   : > { %v3258_v55 = vrot.slane %v3089_v50, 3  ;;  %v4049_v58 = vadd.f32 %v4048_v60, %v3840_v1  ;;  %v3257_v35 = vrot.slane %v3088_v52, 3  ;;  %v3637_v50 = vadd.f32 %v19197_v47, %v14243_v22 }
 0x397   : > { %4219 = vrot.lane.b32.xlu1 %v4049_v58, %s9977_s17  ;;  %v2609_v46 = vpop.permute.xlu1 %2608  ;;  %v2513_v36 = vpop.permute.xlu0 %2512  ;;  %v3259_v2 = vsel %vm1468_vm6, %v3257_v35, %v3258_v55  ;;  %v19198_v35 = vld [vmem:[#allocation112_spill] sm:$0xff] }
 0x398   : > { %v2994_v43 = vsel %vm1697_vm7, %v2962_v29, %v2513_v36  ;;  %7737 = vmatmul.mubr.msk.f32.gmra.mxu0 %vm1797_vm11, %v3259_v2  ;;  %v3026_v24 = vsel %vm1722_vm8, %v2513_v36, %v2609_v46 }
 0x399   : > { %v3260_v8 = vrot.slane %v2994_v43, 3  ;;  %v3843_v17 = vpop.f32.mrf.mxu1  ;;  %4116 = vmatprep.mubr.f32.mxu0 %v19149_v42 }
 0x39a   : > { %v3844_v31 = vadd.f32 %v3843_v17, %v3635_v7 }
 0x39b   : > { %v2801_v63 = vpop.permute.xlu1 %2800  ;;  %v2705_v59 = vpop.permute.xlu0 %2704  ;;  %v3261_v40 = vsel %vm1468_vm6, %v3255_v27, %v3260_v8 }
 0x39c   : > { %v3058_v53 = vsel %vm1747_vm9, %v3026_v24, %v2705_v59  ;;  %3907 = vmatprep.mubr.f32.mxu1 %v3261_v40  ;;  %v3845_v33 = vpop.f32.mrf.mxu1 }
 0x39d   : > { %v3090_v61 = vsel %vm1772_vm10, %v3058_v53, %v2801_v63  ;;  %3908 = vmatmul.mubr.f32.gmra.mxu1 %v19196_v3 }
 0x39e   : > { %v3262_v14 = vrot.slane %v3090_v61, 3  ;;  %v3643_v61 = vadd.f32 %v19200_v57, %v14243_v22 }
 0x39f   : > { %v2611_v13 = vpop.permute.xlu1 %2610  ;;  %v2515_v30 = vpop.permute.xlu0 %2514 }
 0x3a0   : > { %v2995_v27 = vsel %vm1697_vm7, %v2963_v54, %v2515_v30  ;;  %v3263_v25 = vsel %vm1468_vm6, %v3258_v55, %v3262_v14  ;;  %v3027_v10 = vsel %vm1722_vm8, %v2515_v30, %v2611_v13  ;;  %v3846_v55 = vadd.f32 %v3845_v33, %v3637_v50  ;;  %v19201_v54 = vld [vmem:[#allocation70_spill] sm:$0xff] }
 0x3a1   : > { %v3264_v1 = vrot.slane %v2995_v27, 3  ;;  %7738 = vmatmul.mubr.msk.f32.gmra.mxu0 %vm1797_vm11, %v3263_v25  ;;  %v3647_v27 = vadd.f32 %v19201_v54, %v14108_v15 }
 0x3a2   : > { %4122 = vmatprep.mubr.f32.mxu0 %v19149_v42 }
 0x3a3   : > { %v2803_v32 = vpop.permute.xlu1 %2802  ;;  %v2707_v56 = vpop.permute.xlu0 %2706  ;;  %v3265_v60 = vsel %vm1468_vm6, %v3260_v8, %v3264_v1 }
 0x3a4   : > { %v3059_v19 = vsel %vm1747_vm9, %v3027_v10, %v2707_v56  ;;  %3913 = vmatprep.mubr.f32.mxu1 %v3265_v60  ;;  %v4052_v52 = vpop.f32.mrf.mxu0  ;;  %v19202_v10 = vld [vmem:[#allocation63_spill] sm:$0xff]  ;;  %vm19229_vm9 = vmmov %vm19226_vm0 }
 0x3a5   : > { %v3091_v58 = vsel %vm1772_vm10, %v3059_v19, %v2803_v32  ;;  %v14574_v4 = vadd.f32 %v4052_v52, %v3844_v31  ;;  %3914 = vmatmul.mubr.f32.gmra.mxu1 %v19198_v35  ;;  %v3649_v1 = vadd.f32 %v19202_v10, %v14243_v22 }
 0x3a6   : > { %v3266_v46 = vrot.slane %v3091_v58, 3  ;;  %v4054_v0 = vpop.f32.mrf.mxu0 }
 0x3a7   : > { %v4180_v36 = vpop.permute.xlu1 %4179  ;;  %v14577_v29 = vadd.f32 %v4054_v0, %v3846_v55  ;;  %v4178_v2 = vpop.permute.xlu0 %4177  ;;  %v19203_v55 = vld [vmem:[#allocation90_spill] sm:$0xff] }
 0x3a8   : > { %v4273_v34 = vsel %vm1847_vm13, %v4178_v2, %v4180_v36  ;;  %v3267_v7 = vsel %vm1468_vm6, %v3262_v14, %v3266_v46  ;;  %v3653_v58 = vadd.f32 %v19203_v55, %v14108_v15 }
 0x3a9   : > { %v4321_v51 = vmax.f32 %v14301_v39, %v4273_v34  ;;  %7739 = vmatmul.mubr.msk.f32.gmra.mxu0 %vm1797_vm11, %v3267_v7  ;;  %vm19230_vm11 = vmmov %vm19226_vm0 }
 0x3ab   : > { %v4184_v43 = vpop.permute.xlu1 %4183  ;;  %4345 = vst.msk [vmem:[#allocation2] sm:$0xff] %vm1697_vm7, %v4321_v51  ;;  %v4182_v5 = vpop.permute.xlu0 %4181 }
 0x3ac   : > { %v4274_v8 = vsel %vm1847_vm13, %v4182_v5, %v4184_v43  ;;  %v19204_v5 = vld [vmem:[#allocation72_spill] sm:$0xff] }
 0x3ad   : > { %v4322_v17 = vmax.f32 %v14332_v6, %v4274_v8  ;;  %v3849_v40 = vpop.f32.mrf.mxu1  ;;  %v19199_v6 = vld [vmem:[#allocation89_spill] sm:$0xff]  ;;  %v3655_v8 = vadd.f32 %v19204_v5, %v14243_v22 }
 0x3ae   : > { %v3641_v49 = vadd.f32 %v19199_v6, %v14108_v15 }
 0x3af   : > { %v4192_v41 = vpop.permute.xlu1 %4191  ;;  %4346 = vst.msk [vmem:[#allocation2 + $0x8] sm:$0xff] %vm1697_vm7, %v4322_v17  ;;  %v4190_v12 = vpop.permute.xlu0 %4189 }
 0x3b0   : > { %v4276_v31 = vsel %vm1847_vm13, %v4190_v12, %v4192_v41  ;;  %v3851_v53 = vpop.f32.mrf.mxu1  ;;  %v3850_v3 = vadd.f32 %v3849_v40, %v3641_v49 }
 0x3b1   : > { %v4324_v63 = vmax.f32 %v14352_v26, %v4276_v31  ;;  %v3852_v14 = vadd.f32 %v3851_v53, %v3643_v61 }
 0x3b3   : > { %v4196_v62 = vpop.permute.xlu1 %4195  ;;  %4348 = vst.msk [vmem:[#allocation2 + $0x18] sm:$0xff] %vm1697_vm7, %v4324_v63  ;;  %v4194_v39 = vpop.permute.xlu0 %4193 }
 0x3b4   : > { %v4277_v24 = vsel %vm1847_vm13, %v4194_v39, %v4196_v62  ;;  %v19205_v62 = vld [vmem:[#allocation111_spill] sm:$0xff] }
 0x3b5   : > { %v4325_v59 = vmax.f32 %v14363_v16, %v4277_v24  ;;  %v3659_v39 = vadd.f32 %v19205_v62, %v14108_v15  ;;  %v19212_v62 = vld [vmem:[#allocation77_spill] sm:$0xff] }
 0x3b7   : > { %4349 = vst.msk [vmem:[#allocation2 + $0x20] sm:$0xff] %vm1697_vm7, %v4325_v59  ;;  %v19206_v59 = vld [vmem:[#allocation92_spill] sm:$0xff] }
 0x3bc   : > { %v4058_v26 = vpop.f32.mrf.mxu0 }
 0x3bd   : > { %v14597_v13 = vadd.f32 %v4058_v26, %v3850_v3  ;;  %v19207_v26 = vld [vmem:[#allocation52_spill] sm:$0xff] }
 0x3be   : > { %v4060_v45 = vpop.f32.mrf.mxu0 }
 0x3bf   : > { %v4061_v30 = vadd.f32 %v4060_v45, %v3852_v14  ;;  %4225 = vrot.lane.b32.xlu0 %v14597_v13, %s9977_s17  ;;  %v3665_v14 = vadd.f32 %v19207_v26, %v14108_v15  ;;  %v19214_v26 = vld [vmem:[#allocation114_spill] sm:$0xff] }
 0x3c1   : > { %v3855_v16 = vpop.f32.mrf.mxu1  ;;  %4227 = vrot.lane.b32.xlu1 %v4061_v30, %s9977_s17  ;;  %v19208_v30 = vld [vmem:[#allocation93_spill] sm:$0xff] }
 0x3c2   : > { %v3856_v33 = vadd.f32 %v3855_v16, %v3647_v27  ;;  %v3667_v16 = vadd.f32 %v19208_v30, %v14243_v22 }
 0x3c3   : > { %v3857_v25 = vpop.f32.mrf.mxu1 }
 0x3c4   : > { %v3858_v47 = vadd.f32 %v3857_v25, %v3649_v1 }
 0x3c5   : > { %v4064_v32 = vpop.f32.mrf.mxu0 }
 0x3c6   : > { %v14606_v50 = vadd.f32 %v4064_v32, %v3856_v33 }
 0x3c7   : > { %v4066_v56 = vpop.f32.mrf.mxu0 }
 0x3c8   : > { %v4067_v60 = vadd.f32 %v4066_v56, %v3858_v47  ;;  %4229 = vrot.lane.b32.xlu0 %v14606_v50, %s9977_s17  ;;  %v19209_v56 = vld [vmem:[#allocation69_spill] sm:$0xff] }
 0x3c9   : > { %v4202_v19 = vpop.permute.xlu0 %4201 }
 0x3ca   : > { %4231 = vrot.lane.b32.xlu1 %v4067_v60, %s9977_s17  ;;  %v3671_v60 = vadd.f32 %v19209_v56, %v14108_v15 }
 0x3cb   : > { %v4204_v52 = vpop.permute.xlu1 %4203 }
 0x3cc   : > { %v4279_v35 = vsel %vm1847_vm13, %v4202_v19, %v4204_v52 }
 0x3cd   : > { %v4327_v46 = vmax.f32 %v14412_v44, %v4279_v35  ;;  %v3861_v0 = vpop.f32.mrf.mxu1 }
 0x3ce   : > { %v3862_v36 = vadd.f32 %v3861_v0, %v3653_v58 }
 0x3cf   : > { %4351 = vst.msk [vmem:[#allocation2 + $0x30] sm:$0xff] %vm1697_vm7, %v4327_v46  ;;  %v3863_v51 = vpop.f32.mrf.mxu1 }
 0x3d0   : > { %v3864_v41 = vadd.f32 %v3863_v51, %v3655_v8 }
 0x3d2   : > { %v4206_v2 = vpop.permute.xlu0 %4205 }
 0x3d5   : > { %v4208_v34 = vpop.permute.xlu1 %4207 }
 0x3d6   : > { %v4280_v7 = vsel %vm1847_vm13, %v4206_v2, %v4208_v34  ;;  %v19210_v34 = vld [vmem:[#allocation68_spill] sm:$0xff] }
 0x3d7   : > { %v4328_v43 = vmax.f32 %v14433_v11, %v4280_v7  ;;  %v3661_v11 = vadd.f32 %v19206_v59, %v14243_v22  ;;  %v3673_v7 = vadd.f32 %v19210_v34, %v14243_v22 }
 0x3d8   : > { %v4070_v17 = vpop.f32.mrf.mxu0 }
 0x3d9   : > { %4352 = vst.msk [vmem:[#allocation2 + $0x38] sm:$0xff] %vm1697_vm7, %v4328_v43  ;;  %v14621_v12 = vadd.f32 %v4070_v17, %v3862_v36 }
 0x3da   : > { %v4072_v44 = vpop.f32.mrf.mxu0 }
 0x3db   : > { %v14623_v31 = vadd.f32 %v4072_v44, %v3864_v41  ;;  %v19211_v41 = vld [vmem:[#allocation76_spill] sm:$0xff] }
 0x3dc   : > { %v3677_v44 = vadd.f32 %v19211_v41, %v14108_v15  ;;  %v5833_v41 = vld [vmem:[%s18438_s3 + $0x88] sm:$0xff] }
 0x3e1   : > { %v3867_v63 = vpop.f32.mrf.mxu1 }
 0x3e2   : > { %v3868_v40 = vadd.f32 %v3867_v63, %v3659_v39 }
 0x3e3   : > { %v3869_v24 = vpop.f32.mrf.mxu1 }
 0x3e4   : > { %v3870_v49 = vadd.f32 %v3869_v24, %v3661_v11 }
 0x3f0   : > { %v4076_v6 = vpop.f32.mrf.mxu0 }
 0x3f1   : > { %v14629_v53 = vadd.f32 %v4076_v6, %v3868_v40 }
 0x3f2   : > { %v4078_v57 = vpop.f32.mrf.mxu0 }
 0x3f3   : > { %v4079_v61 = vadd.f32 %v4078_v57, %v3870_v49  ;;  %4237 = vrot.lane.b32.xlu0 %v14629_v53, %s9977_s17  ;;  %v19213_v57 = vld [vmem:[#allocation94_spill] sm:$0xff] }
 0x3f5   : > { %v3873_v3 = vpop.f32.mrf.mxu1  ;;  %4239 = vrot.lane.b32.xlu1 %v4079_v61, %s9977_s17  ;;  %v3683_v61 = vadd.f32 %v19213_v57, %v14108_v15  ;;  %v5821_v57 = vld [vmem:[%s18438_s3 + $0x28] sm:$0xff] }
 0x3f6   : > { %v3874_v54 = vadd.f32 %v3873_v3, %v3665_v14  ;;  %v3685_v14 = vadd.f32 %v19214_v26, %v14243_v22  ;;  %v5819_v26 = vld [vmem:[%s18438_s3 + $0x18] sm:$0xff] }
 0x3f7   : > { %v3875_v45 = vpop.f32.mrf.mxu1 }
 0x3f8   : > { %v3876_v25 = vadd.f32 %v3875_v45, %v3667_v16 }
 0x3f9   : > { %v4082_v27 = vpop.f32.mrf.mxu0 }
 0x3fa   : > { %v14638_v10 = vadd.f32 %v4082_v27, %v3874_v54 }
 0x3fb   : > { %v4084_v1 = vpop.f32.mrf.mxu0 }
 0x3fc   : > { %v4085_v33 = vadd.f32 %v4084_v1, %v3876_v25  ;;  %4241 = vrot.lane.b32.xlu0 %v14638_v10, %s9977_s17  ;;  %v5847_v1 = vld [vmem:[%s18438_s3 + $0xf8] sm:$0xff] }
 0x3fd   : > { %v4214_v32 = vpop.permute.xlu0 %4213  ;;  %6344 = vmatprep.subr.mxu1 %v5847_v1 }
 0x3fe   : > { %4243 = vrot.lane.b32.xlu1 %v4085_v33, %s9977_s17  ;;  %v5846_v33 = vld [vmem:[%s18438_s3 + $0xf0] sm:$0xff] }
 0x3ff   : > { %v4216_v47 = vpop.permute.xlu1 %4215  ;;  %6345 = vmatpush1.msra.mxu1 %v5846_v33 }
 0x400   : > { %v4282_v19 = vsel %vm1847_vm13, %v4214_v32, %v4216_v47  ;;  %v5845_v32 = vld [vmem:[%s18438_s3 + $0xe8] sm:$0xff] }
 0x401   : > { %v4330_v52 = vmax.f32 %v14512_v28, %v4282_v19  ;;  %v3879_v55 = vpop.f32.mrf.mxu1  ;;  %6346 = vmatprep.subr.mxu1 %v5845_v32  ;;  %v5877_v32 = vld [vmem:[%s18438_s3 + $0x1e8] sm:$0xff] }
 0x402   : > { %v3880_v58 = vadd.f32 %v3879_v55, %v3671_v60  ;;  %v5844_v60 = vld [vmem:[%s18438_s3 + $0xe0] sm:$0xff] }
 0x403   : > { %4354 = vst.msk [vmem:[#allocation2 + $0x48] sm:$0xff] %vm1697_vm7, %v4330_v52  ;;  %v3881_v36 = vpop.f32.mrf.mxu1  ;;  %v5843_v52 = vld [vmem:[%s18438_s3 + $0xd8] sm:$0xff]  ;;  %6347 = vmatpush1.msra.mxu1 %v5844_v60  ;;  %v19215_v60 = vld [vmem:[#allocation104_spill] sm:$0xff] }
 0x404   : > { %v3882_v43 = vadd.f32 %v3881_v36, %v3673_v7  ;;  %6348 = vmatprep.subr.mxu1 %v5843_v52  ;;  %v5837_v36 = vld [vmem:[%s18438_s3 + $0xa8] sm:$0xff]  ;;  %v5874_v52 = vld [vmem:[%s18438_s3 + $0x1d0] sm:$0xff] }
 0x406   : > { %v4218_v35 = vpop.permute.xlu0 %4217 }
 0x409   : > { %v4220_v46 = vpop.permute.xlu1 %4219 }
 0x40a   : > { %v4283_v0 = vsel %vm1847_vm13, %v4218_v35, %v4220_v46  ;;  %v5841_v35 = vld [vmem:[%s18438_s3 + $0xc8] sm:$0xff]  ;;  %v5840_v46 = vld [vmem:[%s18438_s3 + $0xc0] sm:$0xff] }
 0x40b   : > { %v4331_v2 = vmax.f32 %v14531_v48, %v4283_v0  ;;  %v3679_v48 = vadd.f32 %v19212_v62, %v14243_v22  ;;  %v5838_v0 = vld [vmem:[%s18438_s3 + $0xb0] sm:$0xff]  ;;  %v5829_v62 = vld [vmem:[%s18438_s3 + $0x68] sm:$0xff] }
 0x40c   : > { %v4088_v51 = vpop.f32.mrf.mxu0 }
 0x40d   : > { %4355 = vst.msk [vmem:[#allocation2 + $0x50] sm:$0xff] %vm1697_vm7, %v4331_v2  ;;  %v14653_v5 = vadd.f32 %v4088_v51, %v3880_v58  ;;  %v5842_v58 = vld [vmem:[%s18438_s3 + $0xd0] sm:$0xff]  ;;  %v5836_v2 = vld [vmem:[%s18438_s3 + $0xa0] sm:$0xff]  ;;  %v5835_v51 = vld [vmem:[%s18438_s3 + $0x98] sm:$0xff] }
 0x40e   : > { %v4090_v28 = vpop.f32.mrf.mxu0  ;;  %6349 = vmatpush1.msra.mxu1 %v5842_v58 }
 0x40f   : > { %v14655_v8 = vadd.f32 %v4090_v28, %v3882_v43  ;;  %6350 = vmatprep.subr.mxu1 %v5841_v35  ;;  %v5834_v28 = vld [vmem:[%s18438_s3 + $0x90] sm:$0xff]  ;;  %v5873_v35 = vld [vmem:[%s18438_s3 + $0x1c8] sm:$0xff] }
 0x410   : > { %6351 = vmatpush1.msra.mxu1 %v5840_v46  ;;  %v19216_v46 = vld [vmem:[#allocation60_spill] sm:$0xff] }
 0x415   : > { %v3885_v17 = vpop.f32.mrf.mxu1 }
 0x416   : > { %v3886_v39 = vadd.f32 %v3885_v17, %v3677_v44  ;;  %v5832_v44 = vld [vmem:[%s18438_s3 + $0x80] sm:$0xff] }
 0x417   : > { %v3887_v63 = vpop.f32.mrf.mxu1 }
 0x418   : > { %v3888_v59 = vadd.f32 %v3887_v63, %v3679_v48  ;;  %v5831_v63 = vld [vmem:[%s18438_s3 + $0x78] sm:$0xff]  ;;  %v5828_v48 = vld [vmem:[%s18438_s3 + $0x60] sm:$0xff] }
 0x424   : > { %v4094_v24 = vpop.f32.mrf.mxu0 }
 0x425   : > { %v14661_v11 = vadd.f32 %v4094_v24, %v3886_v39  ;;  %v5827_v39 = vld [vmem:[%s18438_s3 + $0x58] sm:$0xff]  ;;  %v5826_v24 = vld [vmem:[%s18438_s3 + $0x50] sm:$0xff] }
 0x426   : > { %v4096_v40 = vpop.f32.mrf.mxu0 }
 0x427   : > { %v4097_v6 = vadd.f32 %v4096_v40, %v3888_v59  ;;  %4249 = vrot.lane.b32.xlu0 %v14661_v11, %s9977_s17  ;;  %v5825_v59 = vld [vmem:[%s18438_s3 + $0x48] sm:$0xff]  ;;  %v5824_v40 = vld [vmem:[%s18438_s3 + $0x40] sm:$0xff] }
 0x429   : > { %v3891_v49 = vpop.f32.mrf.mxu1  ;;  %4251 = vrot.lane.b32.xlu1 %v4097_v6, %s9977_s17  ;;  %v5823_v6 = vld [vmem:[%s18438_s3 + $0x38] sm:$0xff] }
 0x42a   : > { %v3892_v45 = vadd.f32 %v3891_v49, %v3683_v61  ;;  %v5822_v49 = vld [vmem:[%s18438_s3 + $0x30] sm:$0xff]  ;;  %v5820_v61 = vld [vmem:[%s18438_s3 + $0x20] sm:$0xff] }
 0x42b   : > { %v3893_v3 = vpop.f32.mrf.mxu1 }
 0x42c   : > { %v3894_v16 = vadd.f32 %v3893_v3, %v3685_v14  ;;  %v5818_v14 = vld [vmem:[%s18438_s3 + $0x10] sm:$0xff] }
 0x42d   : > { %v4100_v30 = vpop.f32.mrf.mxu0 }
 0x42e   : > { %v14670_v54 = vadd.f32 %v4100_v30, %v3892_v45  ;;  %v5817_v45 = vld [vmem:[%s18438_s3 + $0x8] sm:$0xff]  ;;  %v5816_v30 = vld [vmem:[%s18438_s3] sm:$0xff] }
 0x42f   : > { %v4102_v27 = vpop.f32.mrf.mxu0 }
 0x430   : > { %v4103_v25 = vadd.f32 %v4102_v27, %v3894_v16  ;;  %4253 = vrot.lane.b32.xlu0 %v14670_v54, %s9977_s17  ;;  %v5879_v27 = vld [vmem:[%s18438_s3 + $0x1f8] sm:$0xff] }
 0x431   : > { %v4226_v47 = vpop.permute.xlu0 %4225 }
 0x432   : > { %4255 = vrot.lane.b32.xlu1 %v4103_v25, %s9977_s17  ;;  %v5878_v25 = vld [vmem:[%s18438_s3 + $0x1f0] sm:$0xff] }
 0x433   : > { %v4228_v56 = vpop.permute.xlu1 %4227 }
 0x434   : > { %v4285_v19 = vsel %vm1847_vm13, %v4226_v47, %v4228_v56  ;;  %v5876_v47 = vld [vmem:[%s18438_s3 + $0x1e0] sm:$0xff]  ;;  %v5875_v56 = vld [vmem:[%s18438_s3 + $0x1d8] sm:$0xff] }
 0x435   : > { %v4333_v55 = vmax.f32 %v14597_v13, %v4285_v19  ;;  %v5839_v13 = vld [vmem:[%s18438_s3 + $0xb8] sm:$0xff]  ;;  %v14765_v3 = vpop.f32.mrf.mxu1  ;;  %v3695_v19 = vadd.f32 %v19215_v60, %v14108_v15  ;;  %v19219_v60 = vld [vmem:[#allocation54_spill] sm:$0xff] }
 0x436   : > { %6352 = vmatprep.subr.mxu1 %v5839_v13  ;;  %v3697_v13 = vadd.f32 %v19216_v46, %v14243_v22 }
 0x437   : > { %4357 = vst.msk [vmem:[#allocation2 + $0x60] sm:$0xff] %vm1697_vm7, %v4333_v55  ;;  %6353 = vmatpush1.msra.mxu1 %v5838_v0  ;;  %v14779_v16 = vpop.f32.mrf.mxu1 }
 0x438   : > { %6354 = vmatprep.subr.mxu1 %v5837_v36  ;;  %v5872_v36 = vld [vmem:[%s18438_s3 + $0x1c0] sm:$0xff] }
 0x439   : > { %6355 = vmatpush1.msra.mxu1 %v5836_v2 }
 0x43a   : > { %v4230_v34 = vpop.permute.xlu0 %4229  ;;  %6356 = vmatprep.subr.mxu1 %v5835_v51 }
 0x43b   : > { %6357 = vmatpush1.msra.mxu1 %v5834_v28 }
 0x43c   : > { %v4232_v7 = vpop.permute.xlu1 %4231  ;;  %6358 = vmatprep.subr.mxu1 %v5833_v41 }
 0x43d   : > { %v4286_v43 = vsel %vm1847_vm13, %v4230_v34, %v4232_v7  ;;  %6359 = vmatpush1.msra.mxu1 %v5832_v44  ;;  %v5871_v34 = vld [vmem:[%s18438_s3 + $0x1b8] sm:$0xff]  ;;  %v5868_v44 = vld [vmem:[%s18438_s3 + $0x1a0] sm:$0xff] }
 0x43e   : > { %v4334_v17 = vmax.f32 %v14606_v50, %v4286_v43  ;;  %v5830_v50 = vld [vmem:[%s18438_s3 + $0x70] sm:$0xff]  ;;  %6360 = vmatprep.subr.mxu1 %v5831_v63  ;;  %v5867_v63 = vld [vmem:[%s18438_s3 + $0x198] sm:$0xff] }
 0x43f   : > { %6361 = vmatpush1.msra.mxu1 %v5830_v50  ;;  %v5870_v43 = vld [vmem:[%s18438_s3 + $0x1b0] sm:$0xff] }
 0x440   : > { %4358 = vst.msk [vmem:[#allocation2 + $0x68] sm:$0xff] %vm1697_vm7, %v4334_v17  ;;  %6362 = vmatprep.subr.mxu1 %v5829_v62  ;;  %v14787_v1 = vpop.f32.mrf.mxu0  ;;  %v5869_v17 = vld [vmem:[%s18438_s3 + $0x1a8] sm:$0xff]  ;;  %v5866_v62 = vld [vmem:[%s18438_s3 + $0x190] sm:$0xff] }
 0x441   : > { %6363 = vmatpush1.msra.mxu1 %v5828_v48  ;;  %v19217_v48 = vld [vmem:[#allocation105_spill] sm:$0xff] }
 0x442   : > { %6364 = vmatprep.subr.mxu1 %v5827_v39  ;;  %v14803_v55 = vpop.f32.mrf.mxu0  ;;  %v3701_v39 = vadd.f32 %v19217_v48, %v14108_v15  ;;  %v5852_v48 = vld [vmem:[%s18438_s3 + $0x120] sm:$0xff] }
 0x443   : > { %6365 = vmatpush1.msra.mxu1 %v5826_v24  ;;  %v5865_v24 = vld [vmem:[%s18438_s3 + $0x188] sm:$0xff] }
 0x444   : > { %6366 = vmatprep.subr.mxu1 %v5825_v59  ;;  %v4373_v59 = vld [vmem:[#allocation2 + $0x18] ss:$2 sm:$0xff] }
 0x445   : > { %6367 = vmatpush1.msra.mxu1 %v5824_v40  ;;  %v4405_v40 = vld [vmem:[#allocation2 + $0x19] ss:$2 sm:$0xff] }
 0x446   : > { %6368 = vmatprep.subr.mxu1 %v5823_v6 }
 0x447   : > { %6369 = vmatpush1.msra.mxu1 %v5822_v49  ;;  %v5864_v49 = vld [vmem:[%s18438_s3 + $0x180] sm:$0xff] }
 0x448   : > { %6370 = vmatprep.subr.mxu1 %v5821_v57  ;;  %v19218_v57 = vld [vmem:[#allocation115_spill] sm:$0xff] }
 0x449   : > { %6371 = vmatpush1.msra.mxu1 %v5820_v61  ;;  %v3903_v33 = vpop.f32.mrf.mxu1  ;;  %v3703_v61 = vadd.f32 %v19218_v57, %v14243_v22 }
 0x44a   : > { %6372 = vmatprep.subr.mxu1 %v5819_v26  ;;  %v3904_v0 = vadd.f32 %v3903_v33, %v3695_v19  ;;  %v4434_v33 = vmax.f32 %v4373_v59, %v4405_v40  ;;  %v3583_v19 = vadd.f32 %v19219_v60, %v14243_v22  ;;  %v5851_v59 = vld [vmem:[%s18438_s3 + $0x118] sm:$0xff]  ;;  %v5850_v40 = vld [vmem:[%s18438_s3 + $0x110] sm:$0xff] }
 0x44b   : > { %6373 = vmatpush1.msra.mxu1 %v5818_v14  ;;  %v3905_v58 = vpop.f32.mrf.mxu1  ;;  %v5863_v14 = vld [vmem:[%s18438_s3 + $0x178] sm:$0xff] }
 0x44c   : > { %6374 = vmatprep.subr.mxu1 %v5817_v45  ;;  %v3906_v7 = vadd.f32 %v3905_v58, %v3697_v13  ;;  %v4369_v45 = vld [vmem:[#allocation2] ss:$2 sm:$0xff]  ;;  %v14859_v46 = vmax.f32 %v4434_v33, 0.0 }
 0x44d   : > { %6375 = vmatpush1.msra.mxu1 %v5816_v30  ;;  %v4401_v30 = vld [vmem:[#allocation2 + $0x1] ss:$2 sm:$0xff] }
 0x44e   : > { %6376 = vmatprep.subr.mxu1 %v5879_v27  ;;  %v5861_v13 = vld [vmem:[%s18438_s3 + $0x168] sm:$0xff] }
 0x44f   : > { %6377 = vmatpush2.msra.mxu1 %v5878_v25  ;;  %v5862_v25 = vld [vmem:[%s18438_s3 + $0x170] sm:$0xff] }
 0x450   : > { %6378 = vmatprep.subr.mxu1 %v5877_v32 }
 0x451   : > { %6379 = vmatpush2.msra.mxu1 %v5876_v47 }
 0x452   : > { %6380 = vmatprep.subr.mxu1 %v5875_v56 }
 0x453   : > { %6381 = vmatpush2.msra.mxu1 %v5874_v52  ;;  %v4432_v52 = vmax.f32 %v4369_v45, %v4401_v30  ;;  %v4381_v30 = vld [vmem:[#allocation2 + $0x48] ss:$2 sm:$0xff] }
 0x454   : > { %6382 = vmatprep.subr.mxu1 %v5873_v35  ;;  %v3792_v35 = vadd.f32 %v14224_v18, %v3583_v19  ;;  %v5858_v18 = vld [vmem:[%s18438_s3 + $0x150] sm:$0xff] }
 0x455   : > { %6383 = vmatpush2.msra.mxu1 %v5872_v36  ;;  %v5859_v36 = vld [vmem:[%s18438_s3 + $0x158] sm:$0xff] }
 0x456   : > { %6384 = vmatprep.subr.mxu1 %v5871_v34 }
 0x457   : > { %6385 = vmatpush2.msra.mxu1 %v5870_v43  ;;  %v14875_v43 = vmax.f32 %v4432_v52, 0.0 }
 0x458   : > { %v4112_v2 = vpop.f32.mrf.mxu0  ;;  %6386 = vmatprep.subr.mxu1 %v5869_v17  ;;  %v19220_v17 = vld [vmem:[#allocation44_spill] sm:$0xff] }
 0x459   : > { %v14816_v51 = vadd.f32 %v4112_v2, %v3904_v0  ;;  %6387 = vmatpush2.msra.mxu1 %v5868_v44  ;;  %v5860_v0 = vld [vmem:[%s18438_s3 + $0x160] sm:$0xff]  ;;  %v14884_v44 = vpack.i.bf16 %v14859_v46, %v14875_v43 }
 0x45a   : > { %v4114_v28 = vpop.f32.mrf.mxu0  ;;  %6388 = vmatprep.subr.mxu1 %v5867_v63  ;;  %v5856_v63 = vld [vmem:[%s18438_s3 + $0x140] sm:$0xff] }
 0x45b   : > { %v4115_v41 = vadd.f32 %v4114_v28, %v3906_v7  ;;  %4261 = vrot.lane.b32.xlu0 %v14816_v51, %s9977_s17  ;;  %6389 = vmatpush2.msra.mxu1 %v5866_v62  ;;  %v4001_v7 = vadd.f32 %v14272_v38, %v3792_v35  ;;  %v5857_v38 = vld [vmem:[%s18438_s3 + $0x148] sm:$0xff] }
 0x45c   : > { %6390 = vmatprep.subr.mxu1 %v5865_v24  ;;  %v5853_v62 = vld [vmem:[%s18438_s3 + $0x128] sm:$0xff] }
 0x45d   : > { %v3909_v50 = vpop.f32.mrf.mxu1  ;;  %4263 = vrot.lane.b32.xlu1 %v4115_v41, %s9977_s17  ;;  %6391 = vmatpush2.msra.mxu1 %v5864_v49 }
 0x45e   : > { %v3910_v26 = vadd.f32 %v3909_v50, %v3701_v39  ;;  %6392 = vmatprep.subr.mxu1 %v5863_v14  ;;  %v5854_v50 = vld [vmem:[%s18438_s3 + $0x130] sm:$0xff]  ;;  %v19221_v39 = vld [vmem:[#allocation55_spill] sm:$0xff]  ;;  %v5848_v14 = vld [vmem:[%s18438_s3 + $0x100] sm:$0xff] }
 0x45f   : > { %v3911_v6 = vpop.f32.mrf.mxu1  ;;  %6393 = vmatpush2.msra.mxu1 %v5862_v25  ;;  %v3601_v24 = vadd.f32 %v19221_v39, %v14243_v22 }
 0x460   : > { %v3912_v32 = vadd.f32 %v3911_v6, %v3703_v61  ;;  %6394 = vmatprep.subr.mxu1 %v5861_v13  ;;  %v5849_v61 = vld [vmem:[%s18438_s3 + $0x108] sm:$0xff] }
 0x461   : > { %v4118_v27 = vpop.f32.mrf.mxu0  ;;  %6395 = vmatpush2.msra.mxu1 %v5860_v0  ;;  %v3810_v6 = vadd.f32 %v14386_v23, %v3601_v24  ;;  %v4417_v0 = vld [vmem:[#allocation2 + $0x61] ss:$2 sm:$0xff] }
 0x462   : > { %v14852_v47 = vadd.f32 %v4118_v27, %v3910_v26  ;;  %6396 = vmatprep.subr.mxu1 %v5859_v36  ;;  %v4409_v27 = vld [vmem:[#allocation2 + $0x31] ss:$2 sm:$0xff] }
 0x463   : > { %v4120_v56 = vpop.f32.mrf.mxu0  ;;  %6397 = vmatpush2.msra.mxu1 %v5858_v18  ;;  %v4019_v23 = vadd.f32 %v14404_v21, %v3810_v6  ;;  %v4413_v21 = vld [vmem:[#allocation2 + $0x49] ss:$2 sm:$0xff] }
 0x464   : > { %v4121_v58 = vadd.f32 %v4120_v56, %v3912_v32  ;;  %4265 = vrot.lane.b32.xlu0 %v14852_v47, %s9977_s17  ;;  %6398 = vmatprep.subr.mxu1 %v5857_v38  ;;  %v4438_v25 = vmax.f32 %v4381_v30, %v4413_v21  ;;  %v19222_v56 = vld [vmem:[#allocation98_spill] sm:$0xff]  ;;  %v5969_v21 = vld [vmem:[%s18438_s3 + $0x4c8] sm:$0xff] }
 0x465   : > { %v4238_v2 = vpop.permute.xlu0 %4237  ;;  %6399 = vmatpush2.msra.mxu1 %v5856_v63  ;;  %v3689_v60 = vadd.f32 %v19222_v56, %v14108_v15  ;;  %v3915_v19 = vpop.f32.mrf.mxu1  ;;  %v5970_v30 = vld [vmem:[%s18438_s3 + $0x4d0] sm:$0xff] }
 0x466   : > { %4267 = vrot.lane.b32.xlu1 %v4121_v58, %s9977_s17  ;;  %v14943_v32 = vmax.f32 %v4438_v25, 0.0  ;;  %v19223_v58 = vld [vmem:[#allocation43_spill] sm:$0xff]  ;;  %v5966_v56 = vld [vmem:[%s18438_s3 + $0x4b0] sm:$0xff] }
 0x467   : > { %v4240_v34 = vpop.permute.xlu1 %4239  ;;  %v3691_v35 = vadd.f32 %v19223_v58, %v14243_v22  ;;  %v3898_v13 = vadd.f32 %v14765_v3, %v3689_v60  ;;  %v19225_v3 = vld [vmem:[#allocation101_spill] sm:$0xff]  ;;  %v5963_v58 = vld [vmem:[%s18438_s3 + $0x498] sm:$0xff] }
 0x468   : > { %v4288_v28 = vsel %vm1847_vm13, %v4238_v2, %v4240_v34  ;;  %4185 = vrot.lane.b32.xlu0 %v19220_v17, %s9977_s17  ;;  %v19224_v2 = vld [vmem:[#allocation42_spill] sm:$0xff]  ;;  %v3709_v38 = vadd.f32 %v19225_v3, %v14243_v22  ;;  %v5956_v3 = vld [vmem:[%s18438_s3 + $0x460] sm:$0xff] }
 0x469   : > { %v4336_v41 = vmax.f32 %v14629_v53, %v4288_v28  ;;  %v5855_v53 = vld [vmem:[%s18438_s3 + $0x138] sm:$0xff]  ;;  %v4124_v36 = vpop.f32.mrf.mxu0  ;;  %v3707_v34 = vadd.f32 %v19224_v2, %v14108_v15  ;;  %v3900_v18 = vadd.f32 %v14779_v16, %v3691_v35  ;;  %v5961_v35 = vld [vmem:[%s18438_s3 + $0x488] sm:$0xff] }
 0x46a   : > { %4187 = vrot.lane.b32.xlu1 %v4001_v7, %s9977_s17  ;;  %6400 = vmatprep.subr.mxu1 %v5855_v53  ;;  %v14970_v7 = vadd.f32 %v14787_v1, %v3898_v13 }
 0x46b   : > { %4360 = vst.msk [vmem:[#allocation2 + $0x78] sm:$0xff] %vm1697_vm7, %v4336_v41  ;;  %6401 = vmatpush2.msra.mxu1 %v5854_v50  ;;  %v3917_v41 = vpop.f32.mrf.mxu1  ;;  %v4109_v53 = vadd.f32 %v14803_v55, %v3900_v18  ;;  %v3916_v50 = vadd.f32 %v3915_v19, %v3707_v34  ;;  %v4126_v15 = vpop.f32.mrf.mxu0  ;;  %v5957_v18 = vld [vmem:[%s18438_s3 + $0x468] sm:$0xff] }
 0x46c   : > { %9208 = vrot.lane.b32.xlu0 %v14884_v44, %s9978_s8  ;;  %6402 = vmatprep.subr.mxu1 %v5853_v62  ;;  %v3918_v16 = vadd.f32 %v3917_v41, %v3709_v38  ;;  %v5955_v38 = vld [vmem:[%s18438_s3 + $0x458] sm:$0xff] }
 0x46d   : > { %6403 = vmatpush2.msra.mxu1 %v5852_v48  ;;  %v14979_v62 = vadd.f32 %v4124_v36, %v3916_v50  ;;  %v5958_v36 = vld [vmem:[%s18438_s3 + $0x470] sm:$0xff] }
 0x46e   : > { %9213 = vrot.lane.b32.xlu1 %v14884_v44, %s9979_s23  ;;  %v4242_v49 = vpop.permute.xlu0 %4241  ;;  %6404 = vmatprep.subr.mxu1 %v5851_v59  ;;  %v4127_v39 = vadd.f32 %v4126_v15, %v3918_v16 }
 0x46f   : > { %6405 = vmatpush2.msra.mxu1 %v5850_v40 }
 0x470   : > { %v4244_v57 = vpop.permute.xlu1 %4243  ;;  %9218 = vrot.lane.b32.xlu0 %v14884_v44, %s9980_s14  ;;  %6406 = vmatprep.subr.mxu1 %v5849_v61 }
 0x471   : > { %v4289_v26 = vsel %vm1847_vm13, %v4242_v49, %v4244_v57  ;;  %6407 = vmatpush2.msra.mxu1 %v5848_v14  ;;  %v5975_v14 = vld [vmem:[%s18438_s3 + $0x4f8] sm:$0xff] }
 0x472   : > { %v4337_v45 = vmax.f32 %v14638_v10, %v4289_v26  ;;  %4197 = vrot.lane.b32.xlu1 %v14359_v37, %s9977_s17  ;;  %v4377_v10 = vld [vmem:[#allocation2 + $0x30] ss:$2 sm:$0xff]  ;;  %6570 = vmatprep.subr.mxu0 %v5975_v14 }
 0x473   : > { %v4436_v33 = vmax.f32 %v4377_v10, %v4409_v27  ;;  %v5911_v26 = vld [vmem:[%s18438_s3 + $0x2f8] sm:$0xff]  ;;  %v5968_v10 = vld [vmem:[%s18438_s3 + $0x4c0] sm:$0xff] }
 0x474   : > { %4361 = vst.msk [vmem:[#allocation2 + $0x80] sm:$0xff] %vm1697_vm7, %v4337_v45  ;;  %4199 = vrot.lane.b32.xlu0 %v4019_v23, %s9977_s17  ;;  %6457 = vmatprep.subr.mxu1 %v5911_v26  ;;  %v5972_v23 = vld [vmem:[%s18438_s3 + $0x4e0] sm:$0xff]  ;;  %v5971_v45 = vld [vmem:[%s18438_s3 + $0x4d8] sm:$0xff] }
 0x476   : > { %4209 = vrot.lane.b32.xlu1 %v14474_v9, %s9977_s17 }
 0x478   : > { %4211 = vrot.lane.b32.xlu0 %v14476_v20, %s9977_s17  ;;  %v14947_v20 = vmax.f32 %v4436_v33, 0.0  ;;  %v5967_v33 = vld [vmem:[%s18438_s3 + $0x4b8] sm:$0xff] }
 0x47a   : > { %4221 = vrot.lane.b32.xlu1 %v14574_v4, %s9977_s17 }
 0x47b   : > { %v4421_v52 = vld [vmem:[#allocation2 + $0x79] ss:$2 sm:$0xff] }
 0x47c   : > { %4223 = vrot.lane.b32.xlu0 %v14577_v29, %s9977_s17  ;;  %v14955_v29 = vpack.i.bf16 %v14943_v32, %v14947_v20 }
 0x47e   : > { %4233 = vrot.lane.b32.xlu1 %v14621_v12, %s9977_s17 }
 0x480   : > { %4235 = vrot.lane.b32.xlu0 %v14623_v31, %s9977_s17  ;;  %v4389_v31 = vld [vmem:[#allocation2 + $0x78] ss:$2 sm:$0xff] }
 0x481   : > { %v4442_v28 = vmax.f32 %v4389_v31, %v4421_v52  ;;  %v5965_v31 = vld [vmem:[%s18438_s3 + $0x4a8] sm:$0xff]  ;;  %v5964_v52 = vld [vmem:[%s18438_s3 + $0x4a0] sm:$0xff] }
 0x482   : > { %4245 = vrot.lane.b32.xlu1 %v14653_v5, %s9977_s17 }
 0x483   : > { %v14981_v1 = vmax.f32 %v4442_v28, 0.0 }
 0x484   : > { %4247 = vrot.lane.b32.xlu0 %v14655_v8, %s9977_s17  ;;  %v4385_v8 = vld [vmem:[#allocation2 + $0x60] ss:$2 sm:$0xff] }
 0x485   : > { %v4440_v63 = vmax.f32 %v4385_v8, %v4417_v0  ;;  %v5960_v8 = vld [vmem:[%s18438_s3 + $0x480] sm:$0xff]  ;;  %v5959_v0 = vld [vmem:[%s18438_s3 + $0x478] sm:$0xff] }
 0x486   : > { %9223 = vrot.lane.b32.xlu1 %v14955_v29, %s9978_s8 }
 0x487   : > { %v14984_v48 = vmax.f32 %v4440_v63, 0.0 }
 0x488   : > { %9228 = vrot.lane.b32.xlu0 %v14955_v29, %s9979_s23 }
 0x489   : > { %v14991_v22 = vpack.i.bf16 %v14981_v1, %v14984_v48 }
 0x48a   : > { %9233 = vrot.lane.b32.xlu1 %v14955_v29, %s9980_s14 }
 0x48c   : > { %4257 = vrot.lane.b32.xlu0 %v14970_v7, %s9977_s17 }
 0x48e   : > { %4259 = vrot.lane.b32.xlu1 %v4109_v53, %s9977_s17 }
 0x490   : > { %4269 = vrot.lane.b32.xlu0 %v14979_v62, %s9977_s17 }
 0x492   : > { %4271 = vrot.lane.b32.xlu1 %v4127_v39, %s9977_s17  ;;  %v5953_v39 = vld [vmem:[%s18438_s3 + $0x448] sm:$0xff]  ;;  %s9981_s17 = smov 24  }
 0x494   : > { %9238 = vrot.lane.b32.xlu0 %v14991_v22, %s9978_s8 }
 0x496   : > { %9243 = vrot.lane.b32.xlu1 %v14991_v22, %s9979_s23 }
 0x498   : > { %9248 = vrot.lane.b32.xlu0 %v14991_v22, %s9980_s14 }
 0x499   : > { %v4250_v55 = vpop.permute.xlu0 %4249 }
 0x49b   : > { %v4252_v24 = vpop.permute.xlu1 %4251 }
 0x49c   : > { %v4291_v59 = vsel %vm1847_vm13, %v4250_v55, %v4252_v24  ;;  %v5952_v24 = vld [vmem:[%s18438_s3 + $0x440] sm:$0xff] }
 0x49d   : > { %v4339_v40 = vmax.f32 %v14661_v11, %v4291_v59  ;;  %v5974_v11 = vld [vmem:[%s18438_s3 + $0x4f0] sm:$0xff]  ;;  %v5951_v59 = vld [vmem:[%s18438_s3 + $0x438] sm:$0xff] }
 0x49e   : > { %6571 = vmatpush1.msra.mxu0 %v5974_v11  ;;  %v5949_v11 = vld [vmem:[%s18438_s3 + $0x428] sm:$0xff] }
 0x49f   : > { %4363 = vst.msk [vmem:[#allocation2 + $0x90] sm:$0xff] %vm1697_vm7, %v4339_v40 }
 0x4a2   : > { %v4254_v6 = vpop.permute.xlu0 %4253 }
 0x4a4   : > { %v4256_v49 = vpop.permute.xlu1 %4255 }
 0x4a5   : > { %v4292_v57 = vsel %vm1847_vm13, %v4254_v6, %v4256_v49 }
 0x4a6   : > { %v4340_v61 = vmax.f32 %v14670_v54, %v4292_v57  ;;  %v5973_v54 = vld [vmem:[%s18438_s3 + $0x4e8] sm:$0xff]  ;;  %v5950_v57 = vld [vmem:[%s18438_s3 + $0x430] sm:$0xff] }
 0x4a7   : > { %6572 = vmatprep.subr.mxu0 %v5973_v54 }
 0x4a8   : > { %4364 = vst.msk [vmem:[#allocation2 + $0x98] sm:$0xff] %vm1697_vm7, %v4340_v61  ;;  %6573 = vmatpush1.msra.mxu0 %v5972_v23 }
 0x4a9   : > { %6574 = vmatprep.subr.mxu0 %v5971_v45 }
 0x4aa   : > { %6575 = vmatpush1.msra.mxu0 %v5970_v30 }
 0x4ab   : > { %6576 = vmatprep.subr.mxu0 %v5969_v21 }
 0x4ac   : > { %6577 = vmatpush1.msra.mxu0 %v5968_v10  ;;  %v5948_v10 = vld [vmem:[%s18438_s3 + $0x420] sm:$0xff] }
 0x4ad   : > { %6578 = vmatprep.subr.mxu0 %v5967_v33 }
 0x4ae   : > { %6579 = vmatpush1.msra.mxu0 %v5966_v56  ;;  %v5947_v56 = vld [vmem:[%s18438_s3 + $0x418] sm:$0xff] }
 0x4af   : > { %6580 = vmatprep.subr.mxu0 %v5965_v31  ;;  %v4393_v50 = vld [vmem:[#allocation2 + $0x90] ss:$2 sm:$0xff]  ;;  %v4425_v55 = vld [vmem:[#allocation2 + $0x91] ss:$2 sm:$0xff] }
 0x4b0   : > { %6581 = vmatpush1.msra.mxu0 %v5964_v52  ;;  %v4444_v61 = vmax.f32 %v4393_v50, %v4425_v55  ;;  %v6007_v55 = vld [vmem:[%s18438_s3 + $0x5f8] sm:$0xff] }
 0x4b1   : > { %6582 = vmatprep.subr.mxu0 %v5963_v58 }
 0x4b2   : > { %v15120_v31 = vmax.f32 %v4444_v61, 0.0 }
 0x4cd   : > { %v4262_v27 = vpop.permute.xlu0 %4261 }
 0x4cf   : > { %v4264_v25 = vpop.permute.xlu1 %4263 }
 0x4d0   : > { %v4294_v60 = vsel %vm1847_vm13, %v4262_v27, %v4264_v25 }
 0x4d1   : > { %v4342_v19 = vmax.f32 %v14816_v51, %v4294_v60  ;;  %v5962_v51 = vld [vmem:[%s18438_s3 + $0x490] sm:$0xff] }
 0x4d2   : > { %6583 = vmatpush1.msra.mxu0 %v5962_v51  ;;  %v5946_v60 = vld [vmem:[%s18438_s3 + $0x410] sm:$0xff] }
 0x4d3   : > { %4366 = vst.msk [vmem:[#allocation2 + $0xa8] sm:$0xff] %vm1697_vm7, %v4342_v19  ;;  %6584 = vmatprep.subr.mxu0 %v5961_v35  ;;  %v5910_v35 = vld [vmem:[%s18438_s3 + $0x2f0] sm:$0xff] }
 0x4d4   : > { %6585 = vmatpush1.msra.mxu0 %v5960_v8 }
 0x4d5   : > { %6586 = vmatprep.subr.mxu0 %v5959_v0 }
 0x4d6   : > { %v4266_v13 = vpop.permute.xlu0 %4265  ;;  %6587 = vmatpush1.msra.mxu0 %v5958_v36 }
 0x4d7   : > { %6588 = vmatprep.subr.mxu0 %v5957_v18  ;;  %v5909_v18 = vld [vmem:[%s18438_s3 + $0x2e8] sm:$0xff] }
 0x4d8   : > { %v4268_v2 = vpop.permute.xlu1 %4267  ;;  %6589 = vmatpush1.msra.mxu0 %v5956_v3  ;;  %v5944_v3 = vld [vmem:[%s18438_s3 + $0x400] sm:$0xff] }
 0x4d9   : > { %v4295_v34 = vsel %vm1847_vm13, %v4266_v13, %v4268_v2  ;;  %6590 = vmatprep.subr.mxu0 %v5955_v38 }
 0x4da   : > { %v4343_v28 = vmax.f32 %v14852_v47, %v4295_v34  ;;  %v4186_v41 = vpop.permute.xlu0 %4185  ;;  %v5954_v47 = vld [vmem:[%s18438_s3 + $0x450] sm:$0xff] }
 0x4db   : > { %6591 = vmatpush1.msra.mxu0 %v5954_v47 }
 0x4dc   : > { %4367 = vst.msk [vmem:[#allocation2 + $0xb0] sm:$0xff] %vm1697_vm7, %v4343_v28  ;;  %v4188_v63 = vpop.permute.xlu1 %4187  ;;  %6592 = vmatprep.subr.mxu0 %v5953_v39  ;;  %v5945_v28 = vld [vmem:[%s18438_s3 + $0x408] sm:$0xff]  ;;  %v5906_v39 = vld [vmem:[%s18438_s3 + $0x2d0] sm:$0xff] }
 0x4dd   : > { %v4275_v53 = vsel %vm1847_vm13, %v4186_v41, %v4188_v63  ;;  %6593 = vmatpush1.msra.mxu0 %v5952_v24  ;;  %v5905_v24 = vld [vmem:[%s18438_s3 + $0x2c8] sm:$0xff] }
 0x4de   : > { %v4323_v15 = vmax.f32 %v19220_v17, %v4275_v53  ;;  %v15082_v16 = vpop.permute.xlu0 %9208  ;;  %6594 = vmatprep.subr.mxu0 %v5951_v59  ;;  %v5907_v53 = vld [vmem:[%s18438_s3 + $0x2d8] sm:$0xff] }
 0x4df   : > { %v9210_v40 = vunpack.i.l.bf16 %v15082_v16  ;;  %v9211_v26 = vunpack.i.h.bf16 %v15082_v16  ;;  %6595 = vmatpush1.msra.mxu0 %v5950_v57  ;;  %v6004_v57 = vld [vmem:[%s18438_s3 + $0x5e0] sm:$0xff] }
 0x4e0   : > { %4347 = vst.msk [vmem:[#allocation2 + $0x10] sm:$0xff] %vm1697_vm7, %v4323_v15  ;;  %v9214_v17 = vpop.permute.xlu1 %9213  ;;  %6596 = vmatprep.subr.mxu0 %v5949_v11 }
 0x4e1   : > { %v9216_v6 = vunpack.i.h.bf16 %v9214_v17  ;;  %v9215_v49 = vunpack.i.l.bf16 %v9214_v17  ;;  %6597 = vmatpush1.msra.mxu0 %v5948_v10  ;;  %v4912_v51 = vsel %vm1922_vm1, %v14875_v43, %v9210_v40  ;;  %v4913_v63 = vsel %vm1922_vm1, %v14859_v46, %v9211_v26  ;;  %v5904_v17 = vld [vmem:[%s18438_s3 + $0x2c0] sm:$0xff] }
 0x4e2   : > { %v15099_v14 = vpop.permute.xlu0 %9218  ;;  %6598 = vmatprep.subr.mxu0 %v5947_v56  ;;  %v6001_v56 = vld [vmem:[%s18438_s3 + $0x5c8] sm:$0xff] }
 0x4e3   : > { %v4397_v54 = vld [vmem:[#allocation2 + $0xa8] ss:$2 sm:$0xff]  ;;  %v4429_v23 = vld [vmem:[#allocation2 + $0xa9] ss:$2 sm:$0xff]  ;;  %v18661_v45 = vunpack.i.h.bf16 %v15099_v14  ;;  %v18662_v30 = vunpack.i.l.bf16 %v15099_v14  ;;  %v4920_v21 = vsel %vm1872_vm14, %v9210_v40, %v9215_v49  ;;  %v4921_v33 = vsel %vm1872_vm14, %v9211_v26, %v9216_v6  ;;  %6599 = vmatpush1.msra.mxu0 %v5946_v60  ;;  %v5903_v49 = vld [vmem:[%s18438_s3 + $0x2b8] sm:$0xff] }
 0x4e4   : > { %v4446_v27 = vmax.f32 %v4397_v54, %v4429_v23  ;;  %v4198_v25 = vpop.permute.xlu1 %4197  ;;  %6600 = vmatprep.subr.mxu0 %v5945_v28  ;;  %v6005_v40 = vld [vmem:[%s18438_s3 + $0x5e8] sm:$0xff]  ;;  %v6003_v23 = vld [vmem:[%s18438_s3 + $0x5d8] sm:$0xff] }
 0x4e5   : > { %v4928_v19 = vsel %vm1822_vm12, %v4920_v21, %v18662_v30  ;;  %v4929_v8 = vsel %vm1822_vm12, %v4921_v33, %v18661_v45  ;;  %6601 = vmatpush1.msra.mxu0 %v5944_v3  ;;  %v5901_v54 = vld [vmem:[%s18438_s3 + $0x2a8] sm:$0xff]  ;;  %v6002_v21 = vld [vmem:[%s18438_s3 + $0x5d0] sm:$0xff]  ;;  %v5900_v33 = vld [vmem:[%s18438_s3 + $0x2a0] sm:$0xff]  ;;  %v4579_v3 = vrot.slane %v14859_v46, 1  ;;  %v4594_v45 = vrot.slane %v15120_v31, 1 }
 0x4e6   : > { %v15122_v52 = vmax.f32 %v4446_v27, 0.0  ;;  %v4200_v58 = vpop.permute.xlu0 %4199  ;;  %6408 = vmatprep.mubr.f32.mxu1 %v4928_v19  ;;  %6602 = vmatprep.subr.mxu0 %v6007_v55  ;;  %v5899_v19 = vld [vmem:[%s18438_s3 + $0x298] sm:$0xff] }
 0x4e7   : > { %v4278_v13 = vsel %vm1847_vm13, %v4198_v25, %v4200_v58  ;;  %6409 = vmatmul.mubr.f32.vlgmr.msra.gmra.mxu1 %v4912_v51  ;;  %v4371_v0 = vld [vmem:[#allocation2 + $0x10] ss:$2 sm:$0xf]  ;;  %v4403_v41 = vld [vmem:[#allocation2 + $0x11] ss:$2 sm:$0xf] }
 0x4e8   : > { %v4326_v36 = vmax.f32 %v14359_v37, %v4278_v13  ;;  %v4210_v2 = vpop.permute.xlu1 %4209  ;;  %6414 = vmatprep.mubr.f32.mxu1 %v4929_v8  ;;  %v15136_v34 = vpack.i.bf16 %v15122_v52, %v15120_v31  ;;  %6458 = vmatpush1.msra.mxu1 %v5910_v35  ;;  %v5908_v37 = vld [vmem:[%s18438_s3 + $0x2e0] sm:$0xff]  ;;  %v4433_v50 = vmax.f32 %v4371_v0, %v4403_v41  ;;  %v5898_v0 = vld [vmem:[%s18438_s3 + $0x290] sm:$0xff] }
 0x4e9   : > { %6459 = vmatprep.subr.mxu1 %v5909_v18  ;;  %v6000_v58 = vld [vmem:[%s18438_s3 + $0x5c0] sm:$0xff] }
 0x4ea   : > { %4350 = vst.msk [vmem:[#allocation2 + $0x28] sm:$0xff] %vm1697_vm7, %v4326_v36  ;;  %9258 = vrot.lane.b32.xlu0 %v15136_v34, %s9979_s23  ;;  %9253 = vrot.lane.b32.xlu1 %v15136_v34, %s9978_s8  ;;  %v4212_v38 = vpop.permute.xlu0 %4211  ;;  %v15195_v61 = vmax.f32 %v4433_v50, 0.0  ;;  %v5897_v36 = vld [vmem:[%s18438_s3 + $0x288] sm:$0xff]  ;;  %v5895_v50 = vld [vmem:[%s18438_s3 + $0x278] sm:$0xff]  ;;  %s9985_s23 = smov 98   ;;  %s9987_s8 = smov 102  }
 0x4eb   : > { %v4281_v47 = vsel %vm1847_vm13, %v4210_v2, %v4212_v38  ;;  %6415 = vmatmul.mubr.f32.gmra.mxu1 %v4913_v63  ;;  %v5999_v2 = vld [vmem:[%s18438_s3 + $0x5b8] sm:$0xff]  ;;  %v5896_v63 = vld [vmem:[%s18438_s3 + $0x280] sm:$0xff] }
 0x4ec   : > { %v4329_v15 = vmax.f32 %v14474_v9, %v4281_v47  ;;  %v4222_v16 = vpop.permute.xlu1 %4221  ;;  %6460 = vmatpush1.msra.mxu1 %v5908_v37  ;;  %v6006_v9 = vld [vmem:[%s18438_s3 + $0x5f0] sm:$0xff]  ;;  %v15225_v8 = vrot.slane %v15195_v61, 1  ;;  %v4576_v37 = vrot.slane %v14875_v43, 1 }
 0x4ed   : > { %6461 = vmatprep.subr.mxu1 %v5907_v53  ;;  %6603 = vmatpush2.msra.mxu0 %v6006_v9  ;;  %v5998_v53 = vld [vmem:[%s18438_s3 + $0x5b0] sm:$0xff] }
 0x4ee   : > { %4353 = vst.msk [vmem:[#allocation2 + $0x40] sm:$0xff] %vm1697_vm7, %v4329_v15  ;;  %9268 = vrot.lane.b32.xlu0 %v14884_v44, %s9981_s17  ;;  %9263 = vrot.lane.b32.xlu1 %v15136_v34, %s9980_s14  ;;  %v4224_v59 = vpop.permute.xlu0 %4223  ;;  %v5902_v44 = vld [vmem:[%s18438_s3 + $0x2b0] sm:$0xff]  ;;  %v5997_v15 = vld [vmem:[%s18438_s3 + $0x5a8] sm:$0xff]  ;;  %s9989_s14 = smov 44  }
 0x4ef   : > { %v4284_v6 = vsel %vm1847_vm13, %v4222_v16, %v4224_v59  ;;  %6462 = vmatpush1.msra.mxu1 %v5906_v39  ;;  %6604 = vmatprep.subr.mxu0 %v6005_v40  ;;  %v5894_v59 = vld [vmem:[%s18438_s3 + $0x270] sm:$0xff] }
 0x4f0   : > { %v4332_v26 = vmax.f32 %v14574_v4, %v4284_v6  ;;  %v4234_v11 = vpop.permute.xlu1 %4233  ;;  %6463 = vmatprep.subr.mxu1 %v5905_v24  ;;  %6605 = vmatpush2.msra.mxu0 %v6004_v57  ;;  %v15262_v24 = vsel %vm19226_vm0, %v4576_v37, %v15225_v8  ;;  %v5893_v57 = vld [vmem:[%s18438_s3 + $0x268] sm:$0xff] }
 0x4f1   : > { %v4375_v10 = vld [vmem:[#allocation2 + $0x28] ss:$2 sm:$0xf]  ;;  %v4407_v27 = vld [vmem:[#allocation2 + $0x29] ss:$2 sm:$0xf]  ;;  %6464 = vmatpush1.msra.mxu1 %v5904_v17  ;;  %6606 = vmatprep.subr.mxu0 %v6003_v23 }
 0x4f2   : > { %v4435_v4 = vmax.f32 %v4375_v10, %v4407_v27  ;;  %4356 = vst.msk [vmem:[#allocation2 + $0x58] sm:$0xff] %vm1697_vm7, %v4332_v26  ;;  %v4236_v25 = vpop.permute.xlu0 %4235  ;;  %6465 = vmatprep.subr.mxu1 %v5903_v49  ;;  %6607 = vmatpush2.msra.mxu0 %v6002_v21  ;;  %v5995_v26 = vld [vmem:[%s18438_s3 + $0x598] sm:$0xff]  ;;  %v5892_v21 = vld [vmem:[%s18438_s3 + $0x260] sm:$0xff]  ;;  %v5994_v10 = vld [vmem:[%s18438_s3 + $0x590] sm:$0xff] }
 0x4f3   : > { %v4287_v60 = vsel %vm1847_vm13, %v4234_v11, %v4236_v25  ;;  %6466 = vmatpush1.msra.mxu1 %v5902_v44  ;;  %6608 = vmatprep.subr.mxu0 %v6001_v56 }
 0x4f4   : > { %v15221_v51 = vmax.f32 %v4435_v4, 0.0  ;;  %v4335_v35 = vmax.f32 %v14621_v12, %v4287_v60  ;;  %v4246_v13 = vpop.permute.xlu1 %4245  ;;  %6467 = vmatprep.subr.mxu1 %v5901_v54  ;;  %6609 = vmatpush2.msra.mxu0 %v6000_v58  ;;  %v5891_v60 = vld [vmem:[%s18438_s3 + $0x258] sm:$0xff] }
 0x4f5   : > { %v4379_v18 = vld [vmem:[#allocation2 + $0x40] ss:$2 sm:$0xf]  ;;  %v4411_v12 = vld [vmem:[#allocation2 + $0x41] ss:$2 sm:$0xf]  ;;  %6468 = vmatpush1.msra.mxu1 %v5900_v33  ;;  %6610 = vmatprep.subr.mxu0 %v5999_v2 }
 0x4f6   : > { %v4437_v28 = vmax.f32 %v4379_v18, %v4411_v12  ;;  %4359 = vst.msk [vmem:[#allocation2 + $0x70] sm:$0xff] %vm1697_vm7, %v4335_v35  ;;  %v4248_v41 = vpop.permute.xlu0 %4247  ;;  %v15240_v38 = vrot.slane %v15221_v51, 1  ;;  %6469 = vmatprep.subr.mxu1 %v5899_v19  ;;  %6611 = vmatpush2.msra.mxu0 %v5998_v53  ;;  %v4582_v33 = vrot.slane %v14947_v20, 1  ;;  %v5890_v19 = vld [vmem:[%s18438_s3 + $0x250] sm:$0xff]  ;;  %v5889_v53 = vld [vmem:[%s18438_s3 + $0x248] sm:$0xff] }
 0x4f7   : > { %v4290_v47 = vsel %vm1847_vm13, %v4246_v13, %v4248_v41  ;;  %6470 = vmatpush1.msra.mxu1 %v5898_v0  ;;  %6612 = vmatprep.subr.mxu0 %v5997_v15 }
 0x4f8   : > { %v15255_v16 = vmax.f32 %v4437_v28, 0.0  ;;  %v4338_v39 = vmax.f32 %v14653_v5, %v4290_v47  ;;  %v15258_v55 = vpop.permute.xlu1 %9223  ;;  %v15266_v9 = vsel %vm19227_vm2, %v4579_v3, %v15240_v38  ;;  %6471 = vmatprep.subr.mxu1 %v5897_v36  ;;  %v5996_v5 = vld [vmem:[%s18438_s3 + $0x5a0] sm:$0xff]  ;;  %v4585_v28 = vrot.slane %v14943_v32, 1  ;;  %vm19235_vm2 = vmmov %vm19226_vm0 }
 0x4f9   : > { %v4383_v17 = vld [vmem:[#allocation2 + $0x58] ss:$2 sm:$0xf]  ;;  %v4415_v40 = vld [vmem:[#allocation2 + $0x59] ss:$2 sm:$0xf]  ;;  %v15276_v6 = vpack.i.bf16 %v15266_v9, %v15262_v24  ;;  %6472 = vmatpush1.msra.mxu1 %v5896_v63  ;;  %v9225_v11 = vunpack.i.l.bf16 %v15258_v55  ;;  %v9226_v4 = vunpack.i.h.bf16 %v15258_v55  ;;  %6613 = vmatpush2.msra.mxu0 %v5996_v5 }
 0x4fa   : > { %v4439_v49 = vmax.f32 %v4383_v17, %v4415_v40  ;;  %4362 = vst.msk [vmem:[#allocation2 + $0x88] sm:$0xff] %vm1697_vm7, %v4338_v39  ;;  %v9229_v44 = vpop.permute.xlu0 %9228  ;;  %6473 = vmatprep.subr.mxu1 %v5895_v50  ;;  %v15303_v56 = vrot.slane %v15255_v16, 1  ;;  %6614 = vmatprep.subr.mxu0 %v5995_v26  ;;  %v4865_v3 = vrot.slane %v15195_v61, 3  ;;  %v4868_v63 = vrot.slane %v15221_v51, 3  ;;  %v5888_v55 = vld [vmem:[%s18438_s3 + $0x240] sm:$0xff] }
 0x4fb   : > { %v9231_v54 = vunpack.i.h.bf16 %v9229_v44  ;;  %v9230_v23 = vunpack.i.l.bf16 %v9229_v44  ;;  %9278 = vrot.lane.b32.xlu0 %v15276_v6, %s9982_s18  ;;  %9273 = vrot.lane.b32.xlu1 %v15276_v6, %s9983_s21 }
 0x4fc   : > { %v15296_v27 = vmax.f32 %v4439_v49, 0.0  ;;  %v15299_v25 = vpop.permute.xlu1 %9233  ;;  %6474 = vmatpush1.msra.mxu1 %v5894_v59  ;;  %6615 = vmatpush2.msra.mxu0 %v5994_v10  ;;  %v15335_v15 = vsel %vm19228_vm4, %v4582_v33, %v15303_v56  ;;  %v5993_v59 = vld [vmem:[%s18438_s3 + $0x588] sm:$0xff] }
 0x4fd   : > { %v4387_v58 = vld [vmem:[#allocation2 + $0x70] ss:$2 sm:$0xf]  ;;  %v4419_v35 = vld [vmem:[#allocation2 + $0x71] ss:$2 sm:$0xf]  ;;  %v18658_v13 = vunpack.i.h.bf16 %v15299_v25  ;;  %v18660_v0 = vunpack.i.l.bf16 %v15299_v25  ;;  %v4922_v36 = vsel %vm1872_vm14, %v9225_v11, %v9230_v23  ;;  %6475 = vmatprep.subr.mxu1 %v5893_v57  ;;  %v4923_v12 = vsel %vm1872_vm14, %v9226_v4, %v9231_v54  ;;  %6616 = vmatprep.subr.mxu0 %v5993_v59 }
 0x4fe   : > { %v4441_v2 = vmax.f32 %v4387_v58, %v4419_v35  ;;  %v4258_v18 = vpop.permute.xlu0 %4257  ;;  %v15317_v41 = vrot.slane %v15296_v27, 1  ;;  %6476 = vmatpush1.msra.mxu1 %v5892_v21  ;;  %v4864_v54 = vrot.slane %v14875_v43, 3  ;;  %v4867_v23 = vrot.slane %v14859_v46, 3  ;;  %v5887_v21 = vld [vmem:[%s18438_s3 + $0x238] sm:$0xff]  ;;  %v5886_v35 = vld [vmem:[%s18438_s3 + $0x230] sm:$0xff] }
 0x4ff   : > { %9283 = vrot.lane.b32.xlu1 %v14955_v29, %s9981_s17  ;;  %v4930_v37 = vsel %vm1822_vm12, %v4922_v36, %v18660_v0  ;;  %6477 = vmatprep.subr.mxu1 %v5891_v60  ;;  %v4914_v29 = vsel %vm1922_vm1, %v14947_v20, %v9225_v11  ;;  %v4931_v49 = vsel %vm1822_vm12, %v4923_v12, %v18658_v13  ;;  %v5943_v13 = vld [vmem:[%s18438_s3 + $0x3f8] sm:$0xff] }
 0x500   : > { %v15329_v47 = vmax.f32 %v4441_v2, 0.0  ;;  %v4260_v50 = vpop.permute.xlu1 %4259  ;;  %6420 = vmatprep.mubr.f32.mxu1 %v4930_v37  ;;  %v15339_v39 = vsel %vm19229_vm9, %v4585_v28, %v15317_v41  ;;  %6478 = vmatpush1.msra.mxu1 %v5890_v19  ;;  %v4915_v60 = vsel %vm1922_vm1, %v14943_v32, %v9226_v4  ;;  %v4588_v19 = vrot.slane %v14984_v48, 1  ;;  %v5885_v4 = vld [vmem:[%s18438_s3 + $0x228] sm:$0xff] }
 0x501   : > { %v4391_v5 = vld [vmem:[#allocation2 + $0x88] ss:$2 sm:$0xf]  ;;  %v4423_v17 = vld [vmem:[#allocation2 + $0x89] ss:$2 sm:$0xf]  ;;  %v4293_v40 = vsel %vm1847_vm13, %v4258_v18, %v4260_v50  ;;  %6421 = vmatmul.mubr.f32.gmra.mxu1 %v4914_v29  ;;  %v15353_v44 = vpack.i.bf16 %v15339_v39, %v15335_v15  ;;  %6479 = vmatprep.subr.mxu1 %v5889_v53  ;;  %v15382_v2 = vsel %vm1468_vm6, %v4864_v54, %v4865_v3 }
 0x502   : > { %v4443_v57 = vmax.f32 %v4391_v5, %v4423_v17  ;;  %v4341_v26 = vmax.f32 %v14970_v7, %v4293_v40  ;;  %v4270_v11 = vpop.permute.xlu0 %4269  ;;  %6426 = vmatprep.mubr.f32.mxu1 %v4931_v49  ;;  %v5992_v7 = vld [vmem:[%s18438_s3 + $0x580] sm:$0xff]  ;;  %v15375_v58 = vrot.slane %v15329_v47, 1  ;;  %6480 = vmatpush1.msra.mxu1 %v5888_v55  ;;  %v15385_v18 = vsel %vm1468_vm6, %v4867_v23, %v4868_v63  ;;  %v5883_v29 = vld [vmem:[%s18438_s3 + $0x218] sm:$0xff] }
 0x503   : > { %9293 = vrot.lane.b32.xlu1 %v15353_v44, %s9982_s18  ;;  %9288 = vrot.lane.b32.xlu0 %v15353_v44, %s9983_s21  ;;  %v4591_v37 = vrot.slane %v14981_v1, 1  ;;  %v5884_v63 = vld [vmem:[%s18438_s3 + $0x220] sm:$0xff]  ;;  %v4732_v54 = vrot.slane %v14984_v48, 2  ;;  %v4735_v23 = vrot.slane %v14981_v1, 2 }
 0x504   : > { %v15368_v10 = vmax.f32 %v4443_v57, 0.0  ;;  %4365 = vst.msk [vmem:[#allocation2 + $0xa0] sm:$0xff] %vm1697_vm7, %v4341_v26  ;;  %v4272_v33 = vpop.permute.xlu1 %4271  ;;  %6481 = vmatprep.subr.mxu1 %v5887_v21  ;;  %6617 = vmatpush2.msra.mxu0 %v5992_v7  ;;  %v15415_v5 = vsel %vm19230_vm11, %v4588_v19, %v15375_v58  ;;  %v5882_v26 = vld [vmem:[%s18438_s3 + $0x210] sm:$0xff]  ;;  %v5881_v21 = vld [vmem:[%s18438_s3 + $0x208] sm:$0xff]  ;;  %v5880_v7 = vld [vmem:[%s18438_s3 + $0x200] sm:$0xff] }
 0x505   : > { %v4296_v36 = vsel %vm1847_vm13, %v4270_v11, %v4272_v33  ;;  %6427 = vmatmul.mubr.f32.gmra.mxu1 %v4915_v60  ;;  %vm19231_vm13 = vmmov %vm19226_vm0  ;;  %v4873_v33 = vrot.slane %v14943_v32, 3  ;;  %v4876_v60 = vrot.slane %v14984_v48, 3 }
 0x506   : > { %v4344_v12 = vmax.f32 %v14979_v62, %v4296_v36  ;;  %v15391_v28 = vpop.permute.xlu0 %9238  ;;  %v15395_v53 = vrot.slane %v15368_v10, 1  ;;  %v5991_v62 = vld [vmem:[%s18438_s3 + $0x578] sm:$0xff]  ;;  %6482 = vmatpush1.msra.mxu1 %v5886_v35 }
 0x507   : > { %9298 = vrot.lane.b32.xlu0 %v14991_v22, %s9981_s17  ;;  %v9240_v55 = vunpack.i.l.bf16 %v15391_v28  ;;  %6483 = vmatprep.subr.mxu1 %v5885_v4  ;;  %v4870_v22 = vrot.slane %v14947_v20, 3  ;;  %v9241_v36 = vunpack.i.h.bf16 %v15391_v28 }
 0x508   : > { %4368 = vst.msk [vmem:[#allocation2 + $0xb8] sm:$0xff] %vm1697_vm7, %v4344_v12  ;;  %v9244_v59 = vpop.permute.xlu1 %9243  ;;  %v15419_v17 = vsel %vm19231_vm13, %v4591_v37, %v15395_v53  ;;  %6484 = vmatpush1.msra.mxu1 %v5884_v63  ;;  %6618 = vmatprep.subr.mxu0 %v5991_v62  ;;  %v4879_v62 = vrot.slane %v14981_v1, 3  ;;  %vm19232_vm7 = vcmask 1045504  }
 0x509   : > { %v9246_v40 = vunpack.i.h.bf16 %v9244_v59  ;;  %v9245_v49 = vunpack.i.l.bf16 %v9244_v59  ;;  %v15424_v57 = vpack.i.bf16 %v15419_v17, %v15415_v5  ;;  %6485 = vmatprep.subr.mxu1 %v5883_v29  ;;  %v4736_v59 = vrot.slane %v15368_v10, 2  ;;  %vm19233_vm15 = vmmov %vm19232_vm7 }
 0x50a   : > { %v15429_v11 = vpop.permute.xlu0 %9248  ;;  %6486 = vmatpush1.msra.mxu1 %v5882_v26  ;;  %vm19237_vm4 = vmmov %vm19232_vm7 }
 0x50b   : > { %v4395_v19 = vld [vmem:[#allocation2 + $0xa0] ss:$2 sm:$0xf]  ;;  %v4427_v35 = vld [vmem:[#allocation2 + $0xa1] ss:$2 sm:$0xf]  ;;  %v18659_v4 = vunpack.i.l.bf16 %v15429_v11  ;;  %9308 = vrot.lane.b32.xlu0 %v15424_v57, %s9982_s18  ;;  %9303 = vrot.lane.b32.xlu1 %v15424_v57, %s9983_s21  ;;  %v4924_v12 = vsel %vm1872_vm14, %v9240_v55, %v9245_v49  ;;  %v18663_v63 = vunpack.i.h.bf16 %v15429_v11  ;;  %v4925_v29 = vsel %vm1872_vm14, %v9241_v36, %v9246_v40  ;;  %vm19238_vm9 = vmmov %vm19237_vm4 }
 0x50c   : > { %v4445_v37 = vmax.f32 %v4395_v19, %v4427_v35  ;;  %6487 = vmatprep.subr.mxu1 %v5881_v21  ;;  %v5942_v49 = vld [vmem:[%s18438_s3 + $0x3f0] sm:$0xff]  ;;  %v4733_v19 = vrot.slane %v15329_v47, 2  ;;  %v5941_v40 = vld [vmem:[%s18438_s3 + $0x3e8] sm:$0xff]  ;;  %v4871_v21 = vrot.slane %v15255_v16, 3  ;;  %v4874_v35 = vrot.slane %v15296_v27, 3  ;;  %vm19239_vm11 = vmmov %vm19237_vm4 }
 0x50d   : > { %v4932_v28 = vsel %vm1822_vm12, %v4924_v12, %v18659_v4  ;;  %6488 = vmatpush1.msra.mxu1 %v5880_v7  ;;  %v5990_v12 = vld [vmem:[%s18438_s3 + $0x570] sm:$0xff]  ;;  %v4916_v7 = vsel %vm1922_vm1, %v14984_v48, %v9240_v55  ;;  %v4737_v30 = vsel %vm19232_vm7, %v4735_v23, %v4736_v59  ;;  %v4877_v55 = vrot.slane %v15329_v47, 3  ;;  %vm19240_vm13 = vmmov %vm19237_vm4 }
 0x50e   : > { %v15461_v26 = vmax.f32 %v4445_v37, 0.0  ;;  %6432 = vmatprep.mubr.f32.mxu1 %v4932_v28  ;;  %v4933_v28 = vsel %vm1822_vm12, %v4925_v29, %v18663_v63  ;;  %6489 = vmatprep.subr.mxu1 %v5943_v13  ;;  %v15484_v3 = vsel %vm1468_vm6, %v4870_v22, %v4871_v21  ;;  %v15487_v50 = vsel %vm1468_vm6, %v4873_v33, %v4874_v35  ;;  %v5940_v22 = vld [vmem:[%s18438_s3 + $0x3e0] sm:$0xff]  ;;  %v5939_v21 = vld [vmem:[%s18438_s3 + $0x3d8] sm:$0xff]  ;;  %vm19241_vm7 = vmmov %vm19237_vm4 }
 0x50f   : > { %v4399_v4 = vld [vmem:[#allocation2 + $0xb8] ss:$2 sm:$0xf]  ;;  %v4431_v0 = vld [vmem:[#allocation2 + $0xb9] ss:$2 sm:$0xf]  ;;  %9318 = vrot.lane.b32.xlu0 %v15276_v6, %s9984_s9  ;;  %9313 = vrot.lane.b32.xlu1 %v15276_v6, %s9985_s23  ;;  %v4917_v59 = vsel %vm1922_vm1, %v14981_v1, %v9241_v36 }
 0x510   : > { %v4447_v37 = vmax.f32 %v4399_v4, %v4431_v0  ;;  %6433 = vmatmul.mubr.f32.gmra.mxu1 %v4916_v7  ;;  %v5989_v0 = vld [vmem:[%s18438_s3 + $0x568] sm:$0xff]  ;;  %v15496_v13 = vrot.slane %v15461_v26, 1  ;;  %v4597_v23 = vrot.slane %v15122_v52, 1  ;;  %6619 = vmatpush2.msra.mxu0 %v5990_v12  ;;  %v5988_v29 = vld [vmem:[%s18438_s3 + $0x560] sm:$0xff]  ;;  %v4880_v35 = vrot.slane %v15368_v10, 3 }
 0x511   : > { %6438 = vmatprep.mubr.f32.mxu1 %v4933_v28  ;;  %6490 = vmatpush2.msra.mxu1 %v5942_v49  ;;  %v4724_v49 = vrot.slane %v15221_v51, 2  ;;  %v4721_v12 = vrot.slane %v15195_v61, 2  ;;  %v4741_v7 = vrot.slane %v15122_v52, 2  ;;  %v15541_v28 = vsel %vm1468_vm6, %v4876_v60, %v4877_v55 }
 0x512   : > { %v15493_v4 = vmax.f32 %v4447_v37, 0.0  ;;  %6491 = vmatprep.subr.mxu1 %v5941_v40  ;;  %v4734_v40 = vsel %vm19233_vm15, %v4732_v54, %v4733_v19  ;;  %v5938_v54 = vld [vmem:[%s18438_s3 + $0x3d0] sm:$0xff]  ;;  %6620 = vmatprep.subr.mxu0 %v5989_v0  ;;  %v5937_v37 = vld [vmem:[%s18438_s3 + $0x3c8] sm:$0xff]  ;;  %v15550_v0 = vsel %vm19226_vm0, %v4594_v45, %v15496_v13  ;;  %v4738_v45 = vrot.slane %v15120_v31, 2  ;;  %vm19242_vm15 = vmmov %vm19237_vm4 }
 0x513   : > { %9328 = vrot.lane.b32.xlu0 %v15136_v34, %s9981_s17  ;;  %9323 = vrot.lane.b32.xlu1 %v15276_v6, %s9986_s20  ;;  %v5987_v34 = vld [vmem:[%s18438_s3 + $0x558] sm:$0xff]  ;;  %v15531_v19 = vpack.i.bf16 %v4737_v30, %v4734_v40  ;;  %v15546_v30 = vsel %vm1468_vm6, %v4879_v62, %v4880_v35  ;;  %v4720_v62 = vrot.slane %v14875_v43, 2  ;;  %v19236_v40 = vrot.slane %v14859_v46, 2  ;;  %s18670_s17 = smov 118  }
 0x514   : > { %6439 = vmatmul.mubr.f32.gmra.mxu1 %v4917_v59  ;;  %v15525_v6 = vrot.slane %v15493_v4, 1  ;;  %v4742_v36 = vrot.slane %v15493_v4, 2  ;;  %6621 = vmatpush2.msra.mxu0 %v5988_v29  ;;  %v4739_v29 = vrot.slane %v15461_v26, 2  ;;  %v5986_v59 = vld [vmem:[%s18438_s3 + $0x550] sm:$0xff]  ;;  %v5935_v35 = vld [vmem:[%s18438_s3 + $0x3b8] sm:$0xff]  ;;  %v4883_v63 = vrot.slane %v15461_v26, 3 }
 0x515   : > { %6492 = vmatpush2.msra.mxu1 %v5940_v22  ;;  %6622 = vmatprep.subr.mxu0 %v5987_v34  ;;  %v4886_v60 = vrot.slane %v15493_v4, 3  ;;  %v4885_v33 = vrot.slane %v15122_v52, 3  ;;  %vm7378_vm0 = vcmask 1044484  }
 0x516   : > { %19234 = vst [vmem:[#allocation45_spill] sm:$0xff] %v15525_v6  ;;  %v15554_v22 = vsel %vm19235_vm2, %v4597_v23, %v15525_v6  ;;  %6493 = vmatprep.subr.mxu1 %v5939_v21  ;;  %v5936_v23 = vld [vmem:[%s18438_s3 + $0x3c0] sm:$0xff]  ;;  %v4725_v21 = vsel %vm19237_vm4, %v19236_v40, %v4724_v49  ;;  %v4743_v34 = vsel %vm19238_vm9, %v4741_v7, %v4742_v36  ;;  %v5934_v49 = vld [vmem:[%s18438_s3 + $0x3b0] sm:$0xff]  ;;  %v4882_v40 = vrot.slane %v15120_v31, 3  ;;  %v5933_v6 = vld [vmem:[%s18438_s3 + $0x3a8] sm:$0xff] }
 0x517   : > { %v15561_v55 = vpack.i.bf16 %v15554_v22, %v15550_v0  ;;  %6494 = vmatpush2.msra.mxu1 %v5938_v54  ;;  %v5985_v54 = vld [vmem:[%s18438_s3 + $0x548] sm:$0xff]  ;;  %v5984_v36 = vld [vmem:[%s18438_s3 + $0x540] sm:$0xff]  ;;  %v4722_v7 = vsel %vm19239_vm11, %v4720_v62, %v4721_v12  ;;  %6623 = vmatpush2.msra.mxu0 %v5986_v59  ;;  %v5983_v12 = vld [vmem:[%s18438_s3 + $0x538] sm:$0xff]  ;;  %v15617_v59 = vsel %vm1468_vm6, %v4885_v33, %v4886_v60  ;;  %vm7381_vm2 = vcmask 1045509  }
 0x518   : > { %6495 = vmatprep.subr.mxu1 %v5937_v37  ;;  %v4740_v37 = vsel %vm19240_vm13, %v4738_v45, %v4739_v29  ;;  %v15597_v42 = vpack.i.bf16 %v4725_v21, %v4722_v7  ;;  %6624 = vmatprep.subr.mxu0 %v5985_v54  ;;  %v5932_v29 = vld [vmem:[%s18438_s3 + $0x3a0] sm:$0xff]  ;;  %v5982_v45 = vld [vmem:[%s18438_s3 + $0x530] sm:$0xff]  ;;  %v5931_v21 = vld [vmem:[%s18438_s3 + $0x398] sm:$0xff]  ;;  %vm7384_vm4 = vcmask 1046534   ;;  %vm7387_vm9 = vcmask 1047559  }
 0x519   : > { %9338 = vrot.lane.b32.xlu0 %v15561_v55, %s9982_s18  ;;  %9333 = vrot.lane.b32.xlu1 %v15561_v55, %s9983_s21  ;;  %v15605_v62 = vpack.i.bf16 %v4743_v34, %v4740_v37  ;;  %v5930_v60 = vld [vmem:[%s18438_s3 + $0x390] sm:$0xff]  ;;  %v5980_v34 = vld [vmem:[%s18438_s3 + $0x520] sm:$0xff]  ;;  %v4730_v37 = vrot.slane %v15296_v27, 2  ;;  %s9993_s18 = smov 2   ;;  %s19244_s21 = smov 60  }
 0x51a   : > { %6496 = vmatpush2.msra.mxu1 %v5936_v23  ;;  %6625 = vmatpush2.msra.mxu0 %v5984_v36  ;;  %v15614_v23 = vsel %vm1468_vm6, %v4882_v40, %v4883_v63  ;;  %v5981_v63 = vld [vmem:[%s18438_s3 + $0x528] sm:$0xff]  ;;  %v5928_v54 = vld [vmem:[%s18438_s3 + $0x380] sm:$0xff]  ;;  %v5927_v36 = vld [vmem:[%s18438_s3 + $0x378] sm:$0xff] }
 0x51b   : > { %6497 = vmatprep.subr.mxu1 %v5935_v35  ;;  %v9637_v33 = vpack.i.bf16 %v15617_v59, %v15614_v23  ;;  %6626 = vmatprep.subr.mxu0 %v5983_v12  ;;  %v5929_v35 = vld [vmem:[%s18438_s3 + $0x388] sm:$0xff]  ;;  %v5926_v40 = vld [vmem:[%s18438_s3 + $0x370] sm:$0xff]  ;;  %v5976_v12 = vld [vmem:[%s18438_s3 + $0x500] sm:$0xff] }
 0x51c   : > { %6498 = vmatpush2.msra.mxu1 %v5934_v49  ;;  %6627 = vmatpush2.msra.mxu0 %v5982_v45  ;;  %v5978_v49 = vld [vmem:[%s18438_s3 + $0x510] sm:$0xff]  ;;  %v5977_v7 = vld [vmem:[%s18438_s3 + $0x508] sm:$0xff]  ;;  %v6103_v45 = vld [vmem:[%s18438_s3 + $0x8f8] sm:$0xff] }
 0x51d   : > { %9348 = vrot.lane.b32.xlu0 %v15597_v42, %s9987_s8  ;;  %9343 = vrot.lane.b32.xlu1 %v15597_v42, %s18669_s16  ;;  %v6070_v23 = vld [vmem:[%s18438_s3 + $0x7f0] sm:$0xff]  ;;  %v6092_v59 = vld [vmem:[%s18438_s3 + $0x8a0] sm:$0xff] }
 0x51e   : > { %6499 = vmatprep.subr.mxu1 %v5933_v6  ;;  %6628 = vmatprep.subr.mxu0 %v5981_v63  ;;  %v5979_v6 = vld [vmem:[%s18438_s3 + $0x518] sm:$0xff]  ;;  %v4729_v63 = vrot.slane %v14943_v32, 2 }
 0x51f   : > { %6500 = vmatpush2.msra.mxu1 %v5932_v29  ;;  %6629 = vmatpush2.msra.mxu0 %v5980_v34  ;;  %v5925_v29 = vld [vmem:[%s18438_s3 + $0x368] sm:$0xff] }
 0x520   : > { %6501 = vmatprep.subr.mxu1 %v5931_v21  ;;  %6630 = vmatprep.subr.mxu0 %v5979_v6  ;;  %v4727_v21 = vrot.slane %v15255_v16, 2  ;;  %v4731_v34 = vsel %vm19241_vm7, %v4729_v63, %v4730_v37  ;;  %v5922_v6 = vld [vmem:[%s18438_s3 + $0x350] sm:$0xff]  ;;  %v5919_v37 = vld [vmem:[%s18438_s3 + $0x338] sm:$0xff]  ;;  %v5912_v63 = vld [vmem:[%s18438_s3 + $0x300] sm:$0xff] }
 0x521   : > { %9358 = vrot.lane.b32.xlu0 %v15353_v44, %s9985_s23  ;;  %9353 = vrot.lane.b32.xlu1 %v15597_v42, %s9989_s14 }
 0x522   : > { %6502 = vmatpush2.msra.mxu1 %v5930_v60  ;;  %6631 = vmatpush2.msra.mxu0 %v5978_v49  ;;  %v5924_v60 = vld [vmem:[%s18438_s3 + $0x360] sm:$0xff] }
 0x523   : > { %6503 = vmatprep.subr.mxu1 %v5929_v35  ;;  %6632 = vmatprep.subr.mxu0 %v5977_v7  ;;  %v5923_v35 = vld [vmem:[%s18438_s3 + $0x358] sm:$0xff]  ;;  %v5920_v7 = vld [vmem:[%s18438_s3 + $0x340] sm:$0xff] }
 0x524   : > { %6504 = vmatpush2.msra.mxu1 %v5928_v54  ;;  %6633 = vmatpush2.msra.mxu0 %v5976_v12  ;;  %v5917_v12 = vld [vmem:[%s18438_s3 + $0x328] sm:$0xff] }
 0x525   : > { %9368 = vrot.lane.b32.xlu0 %v15353_v44, %s9986_s20  ;;  %9363 = vrot.lane.b32.xlu1 %v15353_v44, %s9984_s9  ;;  %v4726_v44 = vrot.slane %v14947_v20, 2 }
 0x526   : > { %6505 = vmatprep.subr.mxu1 %v5927_v36  ;;  %6796 = vmatprep.subr.mxu0 %v6103_v45  ;;  %v5921_v36 = vld [vmem:[%s18438_s3 + $0x348] sm:$0xff]  ;;  %v5914_v45 = vld [vmem:[%s18438_s3 + $0x310] sm:$0xff] }
 0x527   : > { %6506 = vmatpush2.msra.mxu1 %v5926_v40  ;;  %v4728_v54 = vsel %vm19242_vm15, %v4726_v44, %v4727_v21  ;;  %v5918_v40 = vld [vmem:[%s18438_s3 + $0x330] sm:$0xff]  ;;  %v5913_v21 = vld [vmem:[%s18438_s3 + $0x308] sm:$0xff]  ;;  %v9467_v44 = vpack.i.bf16 %v15195_v61, %v14875_v43  ;;  %v9507_v43 = vpack.i.bf16 %v15255_v16, %v14947_v20 }
 0x528   : > { %6507 = vmatprep.subr.mxu1 %v5925_v29  ;;  %v15694_v49 = vpack.i.bf16 %v4731_v34, %v4728_v54  ;;  %v5915_v29 = vld [vmem:[%s18438_s3 + $0x318] sm:$0xff] }
 0x529   : > { %9378 = vrot.lane.b32.xlu0 %v15424_v57, %s9984_s9  ;;  %9373 = vrot.lane.b32.xlu1 %v15424_v57, %s9985_s23 }
 0x52a   : > { %6508 = vmatpush2.msra.mxu1 %v5924_v60  ;;  %v6039_v60 = vld [vmem:[%s18438_s3 + $0x6f8] sm:$0xff] }
 0x52b   : > { %6509 = vmatprep.subr.mxu1 %v5923_v35 }
 0x52c   : > { %6510 = vmatpush2.msra.mxu1 %v5922_v6 }
 0x52d   : > { %9388 = vrot.lane.b32.xlu0 %v15694_v49, %s18669_s16  ;;  %9383 = vrot.lane.b32.xlu1 %v15424_v57, %s9986_s20  ;;  %v5916_v57 = vld [vmem:[%s18438_s3 + $0x320] sm:$0xff] }
 0x52e   : > { %6511 = vmatprep.subr.mxu1 %v5921_v36  ;;  %v19245_v36 = vpack.i.bf16 %v15487_v50, %v15484_v3 }
 0x52f   : > { %6512 = vmatpush2.msra.mxu1 %v5920_v7 }
 0x530   : > { %6513 = vmatprep.subr.mxu1 %v5919_v37 }
 0x531   : > { %9398 = vrot.lane.b32.xlu0 %v15694_v49, %s9989_s14  ;;  %9393 = vrot.lane.b32.xlu1 %v15694_v49, %s9987_s8 }
 0x532   : > { %6514 = vmatpush2.msra.mxu1 %v5918_v40 }
 0x533   : > { %6515 = vmatprep.subr.mxu1 %v5917_v12  ;;  %v9537_v12 = vpack.i.bf16 %v15296_v27, %v14943_v32 }
 0x534   : > { %6516 = vmatpush2.msra.mxu1 %v5916_v57 }
 0x535   : > { %9408 = vrot.lane.b32.xlu0 %v15561_v55, %s9984_s9  ;;  %9403 = vrot.lane.b32.xlu1 %v15561_v55, %s9985_s23  ;;  %s9990_s9 = smov 56   ;;  %s9991_s23 = smov 114  }
 0x536   : > { %6517 = vmatprep.subr.mxu1 %v5915_v29 }
 0x537   : > { %6518 = vmatpush2.msra.mxu1 %v5914_v45 }
 0x538   : > { %6519 = vmatprep.subr.mxu1 %v5913_v21 }
 0x539   : > { %9418 = vrot.lane.b32.xlu0 %v15531_v19, %s18669_s16  ;;  %9413 = vrot.lane.b32.xlu1 %v15561_v55, %s9986_s20  ;;  %s9992_s20 = smov 48   ;;  %v19243_v55 = vpack.i.bf16 %v15385_v18, %v15382_v2 }
 0x53a   : > { %6520 = vmatpush2.msra.mxu1 %v5912_v63 }
 0x53b   : > { %6683 = vmatprep.subr.mxu1 %v6039_v60  ;;  %v9557_v60 = vpack.i.bf16 %v15329_v47, %v14984_v48  ;;  %v19246_v48 = vunpack.i.l.bf16 %v15099_v14 }
 0x53d   : > { %9428 = vrot.lane.b32.xlu0 %v15531_v19, %s9989_s14  ;;  %9423 = vrot.lane.b32.xlu1 %v15531_v19, %s9987_s8 }
 0x541   : > { %9438 = vrot.lane.b32.xlu0 %v15597_v42, %s9990_s9  ;;  %9433 = vrot.lane.b32.xlu1 %v15597_v42, %s9991_s23  ;;  %v9487_v42 = vpack.i.bf16 %v15221_v51, %v14859_v46 }
 0x545   : > { %9448 = vrot.lane.b32.xlu0 %v15605_v62, %s18669_s16  ;;  %9443 = vrot.lane.b32.xlu1 %v19243_v55, %s9992_s20  ;;  %s9997_s16 = smov 6  }
 0x549   : > { %9458 = vrot.lane.b32.xlu0 %v15605_v62, %s9989_s14  ;;  %9453 = vrot.lane.b32.xlu1 %v15605_v62, %s9987_s8  ;;  %s9998_s14 = smov 88  }
 0x54d   : > { %9468 = vrot.lane.b32.xlu0 %v9467_v44, %s9993_s18  ;;  %9463 = vrot.lane.b32.xlu1 %v9467_v44, %s19244_s21 }
 0x551   : > { %9478 = vrot.lane.b32.xlu0 %v9467_v44, %s18670_s17  ;;  %9473 = vrot.lane.b32.xlu1 %v9467_v44, %s9995_s19 }
 0x555   : > { %9488 = vrot.lane.b32.xlu0 %v9487_v42, %s9993_s18  ;;  %9483 = vrot.lane.b32.xlu1 %v9487_v42, %s19244_s21 }
 0x559   : > { %9498 = vrot.lane.b32.xlu0 %v9487_v42, %s18670_s17  ;;  %9493 = vrot.lane.b32.xlu1 %v9487_v42, %s9995_s19 }
 0x55c   : > { %v9254_v61 = vpop.permute.xlu1 %9253  ;;  %v9259_v2 = vpop.permute.xlu0 %9258 }
 0x55d   : > { %9508 = vrot.lane.b32.xlu0 %v9507_v43, %s9993_s18  ;;  %9503 = vrot.lane.b32.xlu1 %v9507_v43, %s19244_s21  ;;  %v9255_v18 = vunpack.i.l.bf16 %v9254_v61  ;;  %v9260_v34 = vunpack.i.l.bf16 %v9259_v2  ;;  %v9256_v51 = vunpack.i.h.bf16 %v9254_v61  ;;  %v9261_v35 = vunpack.i.h.bf16 %v9259_v2  ;;  %v6038_v61 = vld [vmem:[%s18438_s3 + $0x6f0] sm:$0xff]  ;;  %v6037_v2 = vld [vmem:[%s18438_s3 + $0x6e8] sm:$0xff] }
 0x55f   : > { %v4926_v16 = vsel %vm1872_vm14, %v9255_v18, %v9260_v34  ;;  %v4918_v7 = vsel %vm1922_vm1, %v15120_v31, %v9255_v18  ;;  %v4927_v37 = vsel %vm1872_vm14, %v9256_v51, %v9261_v35  ;;  %v4919_v3 = vsel %vm1922_vm1, %v15122_v52, %v9256_v51  ;;  %v6036_v34 = vld [vmem:[%s18438_s3 + $0x6e0] sm:$0xff]  ;;  %v6035_v51 = vld [vmem:[%s18438_s3 + $0x6d8] sm:$0xff] }
 0x560   : > { %v15779_v46 = vpop.permute.xlu1 %9263  ;;  %v9269_v57 = vpop.permute.xlu0 %9268 }
 0x561   : > { %v9265_v6 = vunpack.i.l.bf16 %v15779_v46  ;;  %9518 = vrot.lane.b32.xlu0 %v15694_v49, %s9991_s23  ;;  %9513 = vrot.lane.b32.xlu1 %v9507_v43, %s9995_s19  ;;  %v9266_v20 = vunpack.i.h.bf16 %v15779_v46  ;;  %v9271_v50 = vunpack.i.h.bf16 %v9269_v57  ;;  %v9270_v45 = vunpack.i.l.bf16 %v9269_v57  ;;  %v6088_v46 = vld [vmem:[%s18438_s3 + $0x880] sm:$0xff] }
 0x563   : > { %v4934_v54 = vsel %vm1822_vm12, %v4926_v16, %v9265_v6  ;;  %v4935_v40 = vsel %vm1822_vm12, %v4927_v37, %v9266_v20  ;;  %v4936_v47 = vsel %vm1772_vm10, %v19246_v48, %v9270_v45  ;;  %v6029_v48 = vld [vmem:[%s18438_s3 + $0x6a8] sm:$0xff] }
 0x564   : > { %6444 = vmatprep.mubr.f32.mxu1 %v4934_v54  ;;  %v19247_v54 = vunpack.i.h.bf16 %v15099_v14 }
 0x565   : > { %9528 = vrot.lane.b32.xlu0 %v19245_v36, %s9992_s20  ;;  %9523 = vrot.lane.b32.xlu1 %v15694_v49, %s9990_s9 }
 0x566   : > { %6445 = vmatmul.mubr.f32.gmra.mxu1 %v4918_v7  ;;  %v4937_v36 = vsel %vm1772_vm10, %v19247_v54, %v9271_v50  ;;  %v6034_v7 = vld [vmem:[%s18438_s3 + $0x6d0] sm:$0xff] }
 0x567   : > { %6450 = vmatprep.mubr.f32.mxu1 %v4935_v40 }
 0x569   : > { %9538 = vrot.lane.b32.xlu0 %v9537_v12, %s19244_s21  ;;  %9533 = vrot.lane.b32.xlu1 %v9507_v43, %s18670_s17 }
 0x56a   : > { %6451 = vmatmul.mubr.f32.gmra.mxu1 %v4919_v3  ;;  %v6033_v3 = vld [vmem:[%s18438_s3 + $0x6c8] sm:$0xff] }
 0x56d   : > { %v9274_v49 = vpop.permute.xlu1 %9273  ;;  %9548 = vrot.lane.b32.xlu0 %v9537_v12, %s9995_s19  ;;  %9543 = vrot.lane.b32.xlu1 %v9537_v12, %s9993_s18  ;;  %v15810_v29 = vpop.permute.xlu0 %9278 }
 0x56e   : > { %v9276_v21 = vunpack.i.h.bf16 %v9274_v49  ;;  %v9275_v32 = vunpack.i.l.bf16 %v9274_v49  ;;  %v9280_v27 = vunpack.i.l.bf16 %v15810_v29  ;;  %v9281_v63 = vunpack.i.h.bf16 %v15810_v29 }
 0x570   : > { %v4944_v55 = vsel %vm1722_vm8, %v9270_v45, %v9275_v32  ;;  %v4945_v44 = vsel %vm1722_vm8, %v9271_v50, %v9276_v21  ;;  %v6032_v50 = vld [vmem:[%s18438_s3 + $0x6c0] sm:$0xff]  ;;  %v6031_v21 = vld [vmem:[%s18438_s3 + $0x6b8] sm:$0xff] }
 0x571   : > { %v15818_v42 = vpop.permute.xlu1 %9283  ;;  %9558 = vrot.lane.b32.xlu0 %v9557_v60, %s19244_s21  ;;  %9553 = vrot.lane.b32.xlu1 %v9537_v12, %s18670_s17  ;;  %v4952_v43 = vsel %vm1672_vm5, %v4944_v55, %v9280_v27  ;;  %v4953_v18 = vsel %vm1672_vm5, %v4945_v44, %v9281_v63 }
 0x572   : > { %6521 = vmatprep.mubr.f32.mxu1 %v4952_v43  ;;  %v9285_v37 = vunpack.i.l.bf16 %v15818_v42  ;;  %v9286_v14 = vunpack.i.h.bf16 %v15818_v42  ;;  %v6030_v42 = vld [vmem:[%s18438_s3 + $0x6b0] sm:$0xff]  ;;  %v19248_v43 = vunpack.i.l.bf16 %v15299_v25 }
 0x573   : > { %6522 = vmatmul.mubr.f32.vlgmr.msra.gmra.mxu1 %v4936_v47  ;;  %v6028_v47 = vld [vmem:[%s18438_s3 + $0x6a0] sm:$0xff] }
 0x574   : > { %6684 = vmatpush1.msra.mxu1 %v6038_v61  ;;  %6527 = vmatprep.mubr.f32.mxu1 %v4953_v18  ;;  %v4938_v61 = vsel %vm1772_vm10, %v19248_v43, %v9285_v37 }
 0x575   : > { %6685 = vmatprep.subr.mxu1 %v6037_v2  ;;  %v15843_v35 = vpop.permute.xlu1 %9293  ;;  %9568 = vrot.lane.b32.xlu0 %v9557_v60, %s9995_s19  ;;  %v9289_v16 = vpop.permute.xlu0 %9288 }
 0x576   : > { %v9295_v40 = vunpack.i.l.bf16 %v15843_v35  ;;  %9563 = vrot.lane.b32.xlu1 %v9557_v60, %s9993_s18  ;;  %v9291_v12 = vunpack.i.h.bf16 %v9289_v16  ;;  %v9290_v57 = vunpack.i.l.bf16 %v9289_v16  ;;  %6686 = vmatpush1.msra.mxu1 %v6036_v34  ;;  %v9296_v49 = vunpack.i.h.bf16 %v15843_v35  ;;  %v6027_v34 = vld [vmem:[%s18438_s3 + $0x698] sm:$0xff] }
 0x577   : > { %6687 = vmatprep.subr.mxu1 %v6035_v51  ;;  %6528 = vmatmul.mubr.f32.gmra.mxu1 %v4937_v36 }
 0x578   : > { %6688 = vmatpush1.msra.mxu1 %v6034_v7  ;;  %v4946_v45 = vsel %vm1722_vm8, %v9285_v37, %v9290_v57  ;;  %v4947_v44 = vsel %vm1722_vm8, %v9286_v14, %v9291_v12  ;;  %v6026_v7 = vld [vmem:[%s18438_s3 + $0x690] sm:$0xff]  ;;  %v19249_v37 = vpack.i.bf16 %v15546_v30, %v15541_v28  ;;  %v19250_v12 = vunpack.i.h.bf16 %v15299_v25  ;;  %v6024_v28 = vld [vmem:[%s18438_s3 + $0x680] sm:$0xff] }
 0x579   : > { %6689 = vmatprep.subr.mxu1 %v6033_v3  ;;  %9578 = vrot.lane.b32.xlu0 %v15531_v19, %s9990_s9  ;;  %v15869_v32 = vpop.permute.xlu0 %9298  ;;  %v4954_v55 = vsel %vm1672_vm5, %v4946_v45, %v9295_v40 }
 0x57a   : > { %9573 = vrot.lane.b32.xlu1 %v15531_v19, %s9991_s23  ;;  %6690 = vmatpush1.msra.mxu1 %v6032_v50  ;;  %v4955_v19 = vsel %vm1672_vm5, %v4947_v44, %v9296_v49  ;;  %v9300_v51 = vunpack.i.l.bf16 %v15869_v32  ;;  %v4939_v57 = vsel %vm1772_vm10, %v19250_v12, %v9286_v14  ;;  %v9301_v3 = vunpack.i.h.bf16 %v15869_v32  ;;  %v6022_v44 = vld [vmem:[%s18438_s3 + $0x670] sm:$0xff] }
 0x57b   : > { %6533 = vmatprep.mubr.f32.mxu1 %v4954_v55  ;;  %6691 = vmatprep.subr.mxu1 %v6031_v21  ;;  %v9597_v50 = vpack.i.bf16 %v15368_v10, %v14981_v1  ;;  %v6023_v1 = vld [vmem:[%s18438_s3 + $0x678] sm:$0xff]  ;;  %v19252_v12 = vunpack.i.h.bf16 %v15429_v11 }
 0x57c   : > { %6534 = vmatmul.mubr.f32.gmra.mxu1 %v4938_v61  ;;  %v6021_v61 = vld [vmem:[%s18438_s3 + $0x668] sm:$0xff] }
 0x57d   : > { %6692 = vmatpush1.msra.mxu1 %v6030_v42  ;;  %6539 = vmatprep.mubr.f32.mxu1 %v4955_v19  ;;  %v9304_v2 = vpop.permute.xlu1 %9303  ;;  %v15892_v18 = vpop.permute.xlu0 %9308  ;;  %v19251_v42 = vunpack.i.l.bf16 %v15429_v11  ;;  %v6016_v11 = vld [vmem:[%s18438_s3 + $0x640] sm:$0xff] }
 0x57e   : > { %6693 = vmatprep.subr.mxu1 %v6029_v48  ;;  %v9306_v16 = vunpack.i.h.bf16 %v9304_v2  ;;  %v9305_v54 = vunpack.i.l.bf16 %v9304_v2  ;;  %9588 = vrot.lane.b32.xlu0 %v9557_v60, %s18670_s17  ;;  %v9310_v36 = vunpack.i.l.bf16 %v15892_v18  ;;  %v6025_v60 = vld [vmem:[%s18438_s3 + $0x688] sm:$0xff]  ;;  %v9311_v25 = vunpack.i.h.bf16 %v15892_v18  ;;  %v6020_v2 = vld [vmem:[%s18438_s3 + $0x660] sm:$0xff] }
 0x57f   : > { %9583 = vrot.lane.b32.xlu1 %v19249_v37, %s9992_s20  ;;  %6694 = vmatpush1.msra.mxu1 %v6028_v47  ;;  %v4940_v43 = vsel %vm1772_vm10, %v19251_v42, %v9300_v51  ;;  %v6013_v42 = vld [vmem:[%s18438_s3 + $0x628] sm:$0xff] }
 0x580   : > { %6695 = vmatprep.subr.mxu1 %v6027_v34  ;;  %6540 = vmatmul.mubr.f32.gmra.mxu1 %v4939_v57  ;;  %v4948_v30 = vsel %vm1722_vm8, %v9300_v51, %v9305_v54  ;;  %v4949_v55 = vsel %vm1722_vm8, %v9301_v3, %v9306_v16  ;;  %v6019_v51 = vld [vmem:[%s18438_s3 + $0x658] sm:$0xff]  ;;  %v6018_v54 = vld [vmem:[%s18438_s3 + $0x650] sm:$0xff]  ;;  %v4941_v57 = vsel %vm1772_vm10, %v19252_v12, %v9301_v3  ;;  %v6097_v12 = vld [vmem:[%s18438_s3 + $0x8c8] sm:$0xff] }
 0x581   : > { %6696 = vmatpush1.msra.mxu1 %v6026_v7  ;;  %v9314_v14 = vpop.permute.xlu1 %9313  ;;  %v15921_v45 = vpop.permute.xlu0 %9318  ;;  %v4956_v21 = vsel %vm1672_vm5, %v4948_v30, %v9310_v36  ;;  %v4957_v19 = vsel %vm1672_vm5, %v4949_v55, %v9311_v25  ;;  %v15973_v30 = vpack.i.bf16 %v15461_v26, %v15120_v31  ;;  %v6102_v3 = vld [vmem:[%s18438_s3 + $0x8f0] sm:$0xff]  ;;  %v6101_v31 = vld [vmem:[%s18438_s3 + $0x8e8] sm:$0xff] }
 0x582   : > { %6697 = vmatprep.subr.mxu1 %v6025_v60  ;;  %v9315_v10 = vunpack.i.l.bf16 %v9314_v14  ;;  %9598 = vrot.lane.b32.xlu0 %v9597_v50, %s9993_s18  ;;  %v9320_v32 = vunpack.i.l.bf16 %v15921_v45  ;;  %v9316_v7 = vunpack.i.h.bf16 %v9314_v14  ;;  %v9321_v37 = vunpack.i.h.bf16 %v15921_v45  ;;  %v6017_v60 = vld [vmem:[%s18438_s3 + $0x648] sm:$0xff]  ;;  %v6163_v45 = vld [vmem:[%s18438_s3 + $0xad8] sm:$0xff] }
 0x583   : > { %9593 = vrot.lane.b32.xlu1 %v9597_v50, %s19244_s21  ;;  %6698 = vmatpush1.msra.mxu1 %v6024_v28  ;;  %v6133_v18 = vld [vmem:[%s18438_s3 + $0x9e8] sm:$0xff] }
 0x584   : > { %6545 = vmatprep.mubr.f32.mxu1 %v4956_v21  ;;  %6699 = vmatprep.subr.mxu1 %v6023_v1  ;;  %v4968_v48 = vsel %vm1922_vm1, %v9315_v10, %v9320_v32  ;;  %v4969_v14 = vsel %vm1922_vm1, %v9316_v7, %v9321_v37  ;;  %v6014_v1 = vld [vmem:[%s18438_s3 + $0x630] sm:$0xff]  ;;  %v6100_v10 = vld [vmem:[%s18438_s3 + $0x8e0] sm:$0xff] }
 0x585   : > { %6546 = vmatmul.mubr.f32.gmra.mxu1 %v4940_v43  ;;  %v9324_v47 = vpop.permute.xlu1 %9323  ;;  %6634 = vmatprep.mubr.f32.mxu0 %v4968_v48  ;;  %v15955_v16 = vpop.permute.xlu0 %9328  ;;  %v6099_v43 = vld [vmem:[%s18438_s3 + $0x8d8] sm:$0xff]  ;;  %v6012_v48 = vld [vmem:[%s18438_s3 + $0x620] sm:$0xff] }
 0x586   : > { %6700 = vmatpush1.msra.mxu1 %v6022_v44  ;;  %6551 = vmatprep.mubr.f32.mxu1 %v4957_v19  ;;  %v9325_v34 = vunpack.i.l.bf16 %v9324_v47  ;;  %v9326_v55 = vunpack.i.h.bf16 %v9324_v47  ;;  %v9330_v44 = vunpack.i.l.bf16 %v15955_v16 }
 0x587   : > { %6701 = vmatprep.subr.mxu1 %v6021_v61  ;;  %9608 = vrot.lane.b32.xlu0 %v9597_v50, %s18670_s17  ;;  %s272_s17 = sand.u32 1, %s9942_s25  }
 0x588   : > { %9603 = vrot.lane.b32.xlu1 %v9597_v50, %s9995_s19  ;;  %6702 = vmatpush1.msra.mxu1 %v6020_v2  ;;  %v4960_v28 = vsel %vm1622_vm3, %v9280_v27, %v9325_v34  ;;  %v6015_v27 = vld [vmem:[%s18438_s3 + $0x638] sm:$0xff]  ;;  %v6098_v34 = vld [vmem:[%s18438_s3 + $0x8d0] sm:$0xff]  ;;  %v4961_v7 = vsel %vm1622_vm3, %v9281_v63, %v9326_v55  ;;  %v9331_v63 = vunpack.i.h.bf16 %v15955_v16 }
 0x589   : > { %6703 = vmatprep.subr.mxu1 %v6019_v51  ;;  %6552 = vmatmul.mubr.f32.gmra.mxu1 %v4941_v57  ;;  %v6011_v51 = vld [vmem:[%s18438_s3 + $0x618] sm:$0xff]  ;;  %v6010_v57 = vld [vmem:[%s18438_s3 + $0x610] sm:$0xff] }
 0x58a   : > { %6704 = vmatpush1.msra.mxu1 %v6018_v54  ;;  %6635 = vmatmul.mubr.f32.vlgmr.msra.gmra.mxu0 %v4960_v28  ;;  %v6009_v28 = vld [vmem:[%s18438_s3 + $0x608] sm:$0xff]  ;;  %v6094_v16 = vld [vmem:[%s18438_s3 + $0x8b0] sm:$0xff] }
 0x58b   : > { %6705 = vmatprep.subr.mxu1 %v6017_v60  ;;  %9618 = vrot.lane.b32.xlu0 %v15973_v30, %s9993_s18  ;;  %v9334_v26 = vpop.permute.xlu1 %9333  ;;  %v15989_v50 = vpop.permute.xlu0 %9338  ;;  %v6096_v60 = vld [vmem:[%s18438_s3 + $0x8c0] sm:$0xff] }
 0x58c   : > { %9613 = vrot.lane.b32.xlu1 %v15973_v30, %s19244_s21  ;;  %6706 = vmatpush1.msra.mxu1 %v6016_v11  ;;  %v9335_v21 = vunpack.i.l.bf16 %v9334_v26  ;;  %v9340_v61 = vunpack.i.l.bf16 %v15989_v50  ;;  %v9336_v54 = vunpack.i.h.bf16 %v9334_v26  ;;  %v6095_v11 = vld [vmem:[%s18438_s3 + $0x8b8] sm:$0xff] }
 0x58d   : > { %6797 = vmatpush1.msra.mxu0 %v6102_v3  ;;  %6640 = vmatprep.mubr.f32.mxu0 %v4969_v14  ;;  %v6008_v14 = vld [vmem:[%s18438_s3 + $0x600] sm:$0xff] }
 0x58e   : > { %6707 = vmatprep.subr.mxu1 %v6015_v27  ;;  %6798 = vmatprep.subr.mxu0 %v6101_v31  ;;  %v4950_v2 = vsel %vm1722_vm8, %v9330_v44, %v9335_v21  ;;  %v9341_v31 = vunpack.i.h.bf16 %v15989_v50  ;;  %v4951_v26 = vsel %vm1722_vm8, %v9331_v63, %v9336_v54  ;;  %v4942_v21 = vsel %vm1772_vm10, %v9265_v6, %v9330_v44  ;;  %v6069_v6 = vld [vmem:[%s18438_s3 + $0x7e8] sm:$0xff]  ;;  %v6091_v44 = vld [vmem:[%s18438_s3 + $0x898] sm:$0xff]  ;;  %v6068_v54 = vld [vmem:[%s18438_s3 + $0x7e0] sm:$0xff] }
 0x58f   : > { %6708 = vmatpush1.msra.mxu1 %v6014_v1  ;;  %6799 = vmatpush1.msra.mxu0 %v6100_v10  ;;  %v16013_v19 = vpop.permute.xlu1 %9343  ;;  %v16015_v47 = vpop.permute.xlu0 %9348  ;;  %v4958_v29 = vsel %vm1672_vm5, %v4950_v2, %v9340_v61  ;;  %v6071_v1 = vld [vmem:[%s18438_s3 + $0x7f8] sm:$0xff]  ;;  %v6093_v10 = vld [vmem:[%s18438_s3 + $0x8a8] sm:$0xff]  ;;  %v6090_v2 = vld [vmem:[%s18438_s3 + $0x890] sm:$0xff] }
 0x590   : > { %6709 = vmatprep.subr.mxu1 %v6013_v42  ;;  %6800 = vmatprep.subr.mxu0 %v6099_v43  ;;  %v9350_v43 = vunpack.i.l.bf16 %v16015_v47 }
 0x591   : > { %9628 = vrot.lane.b32.xlu0 %v15605_v62, %s9991_s23  ;;  %9623 = vrot.lane.b32.xlu1 %v15973_v30, %s9995_s19  ;;  %s19254_s23 = smov 76  }
 0x592   : > { %6641 = vmatmul.mubr.f32.gmra.mxu0 %v4961_v7  ;;  %6710 = vmatpush1.msra.mxu1 %v6012_v48  ;;  %v16100_v48 = vpack.i.bf16 %v15493_v4, %v15122_v52  ;;  %v6089_v7 = vld [vmem:[%s18438_s3 + $0x888] sm:$0xff]  ;;  %v4943_v52 = vsel %vm1772_vm10, %v9266_v20, %v9331_v63  ;;  %v6067_v4 = vld [vmem:[%s18438_s3 + $0x7d8] sm:$0xff] }
 0x593   : > { %6801 = vmatpush1.msra.mxu0 %v6098_v34  ;;  %6711 = vmatprep.subr.mxu1 %v6011_v51  ;;  %v16050_v3 = vpop.permute.xlu1 %9353  ;;  %v16052_v27 = vpop.permute.xlu0 %9358 }
 0x594   : > { %6802 = vmatprep.subr.mxu0 %v6097_v12  ;;  %6712 = vmatpush1.msra.mxu1 %v6010_v57  ;;  %v6065_v57 = vld [vmem:[%s18438_s3 + $0x7c8] sm:$0xff] }
 0x595   : > { %6803 = vmatpush1.msra.mxu0 %v6096_v60  ;;  %6557 = vmatprep.mubr.f32.mxu1 %v4958_v29  ;;  %v6087_v60 = vld [vmem:[%s18438_s3 + $0x878] sm:$0xff] }
 0x596   : > { %6713 = vmatprep.subr.mxu1 %v6009_v28  ;;  %6804 = vmatprep.subr.mxu0 %v6095_v11  ;;  %v9360_v28 = vunpack.i.l.bf16 %v16052_v27 }
 0x597   : > { %9638 = vrot.lane.b32.xlu0 %v9637_v33, %s9992_s20  ;;  %9633 = vrot.lane.b32.xlu1 %v15605_v62, %s9990_s9  ;;  %v16077_v55 = vpop.permute.xlu1 %9363  ;;  %v16079_v42 = vpop.permute.xlu0 %9368  ;;  %v4959_v62 = vsel %vm1672_vm5, %v4951_v26, %v9341_v31  ;;  %v9355_v33 = vunpack.i.l.bf16 %v16050_v3  ;;  %v6086_v26 = vld [vmem:[%s18438_s3 + $0x870] sm:$0xff] }
 0x598   : > { %6558 = vmatmul.mubr.f32.gmra.mxu1 %v4942_v21  ;;  %6805 = vmatpush1.msra.mxu0 %v6094_v16  ;;  %v9365_v20 = vunpack.i.l.bf16 %v16077_v55  ;;  %v9370_v11 = vunpack.i.l.bf16 %v16079_v42  ;;  %v6064_v16 = vld [vmem:[%s18438_s3 + $0x7c0] sm:$0xff]  ;;  %v6085_v21 = vld [vmem:[%s18438_s3 + $0x868] sm:$0xff] }
 0x599   : > { %6714 = vmatpush1.msra.mxu1 %v6008_v14  ;;  %6563 = vmatprep.mubr.f32.mxu1 %v4959_v62  ;;  %v4992_v12 = vsel %vm1772_vm10, %v9350_v43, %v9355_v33  ;;  %v6063_v14 = vld [vmem:[%s18438_s3 + $0x7b8] sm:$0xff] }
 0x59a   : > { %6715 = vmatprep.subr.mxu1 %v6071_v1  ;;  %6806 = vmatprep.subr.mxu0 %v6093_v10  ;;  %v4970_v1 = vsel %vm1922_vm1, %v9360_v28, %v9365_v20  ;;  %v6062_v10 = vld [vmem:[%s18438_s3 + $0x7b0] sm:$0xff] }
 0x59b   : > { %6716 = vmatpush2.msra.mxu1 %v6070_v23  ;;  %6807 = vmatpush1.msra.mxu0 %v6092_v59  ;;  %v16105_v34 = vpop.permute.xlu1 %9373  ;;  %v16107_v51 = vpop.permute.xlu0 %9378  ;;  %v6084_v59 = vld [vmem:[%s18438_s3 + $0x860] sm:$0xff]  ;;  %v6058_v28 = vld [vmem:[%s18438_s3 + $0x790] sm:$0xff] }
 0x59c   : > { %6717 = vmatprep.subr.mxu1 %v6069_v6  ;;  %6808 = vmatprep.subr.mxu0 %v6091_v44  ;;  %v6061_v6 = vld [vmem:[%s18438_s3 + $0x7a8] sm:$0xff]  ;;  %v9366_v44 = vunpack.i.h.bf16 %v16077_v55 }
 0x59d   : > { %9648 = vrot.lane.b32.xlu0 %v16100_v48, %s19244_s21  ;;  %9643 = vrot.lane.b32.xlu1 %v15973_v30, %s19253_s13  ;;  %v6066_v30 = vld [vmem:[%s18438_s3 + $0x7d0] sm:$0xff] }
 0x59e   : > { %6564 = vmatmul.mubr.f32.gmra.mxu1 %v4943_v52  ;;  %6809 = vmatpush1.msra.mxu0 %v6090_v2  ;;  %v4962_v2 = vsel %vm1622_vm3, %v9295_v40, %v9370_v11  ;;  %v16191_v52 = vpack.i.bf16 %v15225_v8, %v15262_v24  ;;  %v9375_v11 = vunpack.i.l.bf16 %v16105_v34 }
 0x59f   : > { %6718 = vmatpush2.msra.mxu1 %v6068_v54  ;;  %6810 = vmatprep.subr.mxu0 %v6089_v7  ;;  %v16143_v29 = vpop.permute.xlu1 %9383  ;;  %v16145_v63 = vpop.permute.xlu0 %9388  ;;  %v6083_v54 = vld [vmem:[%s18438_s3 + $0x858] sm:$0xff]  ;;  %v9361_v7 = vunpack.i.h.bf16 %v16052_v27  ;;  %v6082_v27 = vld [vmem:[%s18438_s3 + $0x850] sm:$0xff] }
 0x5a0   : > { %6719 = vmatprep.subr.mxu1 %v6067_v4  ;;  %6747 = vmatprep.mubr.f32.mxu1 %v4992_v12  ;;  %v6060_v4 = vld [vmem:[%s18438_s3 + $0x7a0] sm:$0xff] }
 0x5a1   : > { %6720 = vmatpush2.msra.mxu1 %v6066_v30  ;;  %6811 = vmatpush1.msra.mxu0 %v6088_v46  ;;  %v6059_v30 = vld [vmem:[%s18438_s3 + $0x798] sm:$0xff]  ;;  %v9371_v46 = vunpack.i.h.bf16 %v16079_v42  ;;  %v6080_v42 = vld [vmem:[%s18438_s3 + $0x840] sm:$0xff] }
 0x5a2   : > { %6721 = vmatprep.subr.mxu1 %v6065_v57  ;;  %6812 = vmatprep.subr.mxu0 %v6087_v60  ;;  %v4971_v57 = vsel %vm1922_vm1, %v9361_v7, %v9366_v44  ;;  %v6081_v60 = vld [vmem:[%s18438_s3 + $0x848] sm:$0xff] }
 0x5a3   : > { %9658 = vrot.lane.b32.xlu0 %v16100_v48, %s9995_s19  ;;  %9653 = vrot.lane.b32.xlu1 %v16100_v48, %s9993_s18  ;;  %v16171_v62 = vpop.permute.xlu1 %9393  ;;  %v16173_v23 = vpop.permute.xlu0 %9398  ;;  %s19326_s18 = smov 32  }
 0x5a4   : > { %6722 = vmatpush2.msra.mxu1 %v6064_v16  ;;  %6813 = vmatpush1.msra.mxu0 %v6086_v26  ;;  %v9380_v16 = vunpack.i.l.bf16 %v16107_v51  ;;  %v6079_v26 = vld [vmem:[%s18438_s3 + $0x838] sm:$0xff]  ;;  %v18676_v50 = vunpack.i.l.bf16 %v16173_v23 }
 0x5a5   : > { %6723 = vmatprep.subr.mxu1 %v6063_v14  ;;  %6814 = vmatprep.subr.mxu0 %v6085_v21 }
 0x5a6   : > { %6646 = vmatprep.mubr.f32.mxu0 %v4970_v1  ;;  %6724 = vmatpush2.msra.mxu1 %v6062_v10  ;;  %v9385_v1 = vunpack.i.l.bf16 %v16143_v29  ;;  %v4963_v10 = vsel %vm1622_vm3, %v9296_v49, %v9371_v46  ;;  %v4972_v35 = vsel %vm1922_vm1, %v9375_v11, %v9380_v16  ;;  %v6077_v49 = vld [vmem:[%s18438_s3 + $0x828] sm:$0xff]  ;;  %v9376_v46 = vunpack.i.h.bf16 %v16105_v34  ;;  %v6052_v34 = vld [vmem:[%s18438_s3 + $0x760] sm:$0xff] }
 0x5a7   : > { %6815 = vmatpush1.msra.mxu0 %v6084_v59  ;;  %6725 = vmatprep.subr.mxu1 %v6061_v6  ;;  %v16196_v12 = vpop.permute.xlu1 %9403  ;;  %v16198_v40 = vpop.permute.xlu0 %9408  ;;  %v6056_v59 = vld [vmem:[%s18438_s3 + $0x780] sm:$0xff]  ;;  %v6078_v6 = vld [vmem:[%s18438_s3 + $0x830] sm:$0xff] }
 0x5a8   : > { %6647 = vmatmul.mubr.f32.gmra.mxu0 %v4962_v2  ;;  %6816 = vmatprep.subr.mxu0 %v6083_v54  ;;  %v6055_v2 = vld [vmem:[%s18438_s3 + $0x778] sm:$0xff]  ;;  %v6054_v54 = vld [vmem:[%s18438_s3 + $0x770] sm:$0xff] }
 0x5a9   : > { %9668 = vrot.lane.b32.xlu0 %v16191_v52, %s9996_s22  ;;  %9663 = vrot.lane.b32.xlu1 %v16100_v48, %s19253_s13  ;;  %v6057_v48 = vld [vmem:[%s18438_s3 + $0x788] sm:$0xff] }
 0x5aa   : > { %6652 = vmatprep.mubr.f32.mxu0 %v4971_v57  ;;  %6726 = vmatpush2.msra.mxu1 %v6060_v4  ;;  %v9381_v57 = vunpack.i.h.bf16 %v16107_v51 }
 0x5ab   : > { %6817 = vmatpush1.msra.mxu0 %v6082_v27  ;;  %6727 = vmatprep.subr.mxu1 %v6059_v30  ;;  %v16231_v14 = vpop.permute.xlu1 %9413  ;;  %v16233_v21 = vpop.permute.xlu0 %9418  ;;  %v6076_v27 = vld [vmem:[%s18438_s3 + $0x820] sm:$0xff]  ;;  %v6053_v30 = vld [vmem:[%s18438_s3 + $0x768] sm:$0xff] }
 0x5ac   : > { %6818 = vmatprep.subr.mxu0 %v6081_v60  ;;  %6728 = vmatpush2.msra.mxu1 %v6058_v28  ;;  %v4964_v60 = vsel %vm1622_vm3, %v9310_v36, %v9385_v1  ;;  %v6075_v28 = vld [vmem:[%s18438_s3 + $0x818] sm:$0xff]  ;;  %v6074_v36 = vld [vmem:[%s18438_s3 + $0x810] sm:$0xff]  ;;  %v9386_v1 = vunpack.i.h.bf16 %v16143_v29  ;;  %v6072_v29 = vld [vmem:[%s18438_s3 + $0x800] sm:$0xff] }
 0x5ad   : > { %6819 = vmatpush1.msra.mxu0 %v6080_v42  ;;  %6729 = vmatprep.subr.mxu1 %v6057_v48  ;;  %v16281_v42 = vpack.i.bf16 %v15240_v38, %v15266_v9 }
 0x5ae   : > { %6653 = vmatmul.mubr.f32.gmra.mxu0 %v4963_v10  ;;  %6820 = vmatprep.subr.mxu0 %v6079_v26  ;;  %v6051_v26 = vld [vmem:[%s18438_s3 + $0x758] sm:$0xff]  ;;  %v4973_v10 = vsel %vm1922_vm1, %v9376_v46, %v9381_v57  ;;  %v4965_v46 = vsel %vm1622_vm3, %v9311_v25, %v9386_v1 }
 0x5af   : > { %9678 = vrot.lane.b32.xlu0 %v16191_v52, %s19254_s23  ;;  %9673 = vrot.lane.b32.xlu1 %v16191_v52, %s9997_s16  ;;  %v16261_v7 = vpop.permute.xlu1 %9423  ;;  %v16263_v4 = vpop.permute.xlu0 %9428 }
 0x5b0   : > { %6658 = vmatprep.mubr.f32.mxu0 %v4972_v35  ;;  %6730 = vmatpush2.msra.mxu1 %v6056_v59  ;;  %v6073_v59 = vld [vmem:[%s18438_s3 + $0x808] sm:$0xff]  ;;  %v9405_v35 = vunpack.i.l.bf16 %v16196_v12 }
 0x5b1   : > { %6821 = vmatpush1.msra.mxu0 %v6078_v6  ;;  %6731 = vmatprep.subr.mxu1 %v6055_v2  ;;  %v6050_v6 = vld [vmem:[%s18438_s3 + $0x750] sm:$0xff]  ;;  %v6049_v2 = vld [vmem:[%s18438_s3 + $0x748] sm:$0xff] }
 0x5b2   : > { %6822 = vmatprep.subr.mxu0 %v6077_v49  ;;  %6732 = vmatpush2.msra.mxu1 %v6054_v54  ;;  %v9410_v49 = vunpack.i.l.bf16 %v16198_v40  ;;  %v6135_v54 = vld [vmem:[%s18438_s3 + $0x9f8] sm:$0xff] }
 0x5b3   : > { %6823 = vmatpush1.msra.mxu0 %v6076_v27  ;;  %6733 = vmatprep.subr.mxu1 %v6053_v30  ;;  %v16286_v48 = vpop.permute.xlu1 %9433  ;;  %v16288_v11 = vpop.permute.xlu0 %9438 }
 0x5b4   : > { %6659 = vmatmul.mubr.f32.gmra.mxu0 %v4964_v60  ;;  %6824 = vmatprep.subr.mxu0 %v6075_v28  ;;  %v6048_v60 = vld [vmem:[%s18438_s3 + $0x740] sm:$0xff]  ;;  %v6134_v28 = vld [vmem:[%s18438_s3 + $0x9f0] sm:$0xff]  ;;  %v4974_v25 = vsel %vm1922_vm1, %v9405_v35, %v9410_v49 }
 0x5b5   : > { %9688 = vrot.lane.b32.xlu0 %v16281_v42, %s9997_s16  ;;  %9683 = vrot.lane.b32.xlu1 %v16281_v42, %s9996_s22 }
 0x5b6   : > { %6664 = vmatprep.mubr.f32.mxu0 %v4973_v10  ;;  %6734 = vmatpush2.msra.mxu1 %v6052_v34  ;;  %v6047_v34 = vld [vmem:[%s18438_s3 + $0x738] sm:$0xff]  ;;  %v6045_v10 = vld [vmem:[%s18438_s3 + $0x728] sm:$0xff] }
 0x5b7   : > { %6825 = vmatpush1.msra.mxu0 %v6074_v36  ;;  %6735 = vmatprep.subr.mxu1 %v6051_v26  ;;  %v16321_v27 = vpop.permute.xlu1 %9443  ;;  %v16323_v30 = vpop.permute.xlu0 %9448  ;;  %v6046_v36 = vld [vmem:[%s18438_s3 + $0x730] sm:$0xff] }
 0x5b8   : > { %6826 = vmatprep.subr.mxu0 %v6073_v59  ;;  %6736 = vmatpush2.msra.mxu1 %v6050_v6  ;;  %v6131_v59 = vld [vmem:[%s18438_s3 + $0x9d8] sm:$0xff]  ;;  %v6044_v6 = vld [vmem:[%s18438_s3 + $0x720] sm:$0xff] }
 0x5b9   : > { %6827 = vmatpush1.msra.mxu0 %v6072_v29  ;;  %6737 = vmatprep.subr.mxu1 %v6049_v2  ;;  %v6130_v29 = vld [vmem:[%s18438_s3 + $0x9d0] sm:$0xff]  ;;  %v6043_v2 = vld [vmem:[%s18438_s3 + $0x718] sm:$0xff] }
 0x5ba   : > { %6665 = vmatmul.mubr.f32.gmra.mxu0 %v4965_v46  ;;  %6828 = vmatprep.subr.mxu0 %v6135_v54  ;;  %v9345_v46 = vunpack.i.l.bf16 %v16013_v19 }
 0x5bb   : > { %5408 = vrot.lane.b32.xlu0 %v15262_v24, %s9998_s14  ;;  %9693 = vrot.lane.b32.xlu1 %v16191_v52, %s9999_s15  ;;  %v16350_v26 = vpop.permute.xlu1 %9453  ;;  %v16352_v1 = vpop.permute.xlu0 %9458  ;;  %v9415_v24 = vunpack.i.l.bf16 %v16231_v14  ;;  %v6132_v52 = vld [vmem:[%s18438_s3 + $0x9e0] sm:$0xff] }
 0x5bc   : > { %6738 = vmatpush2.msra.mxu1 %v6048_v60  ;;  %6829 = vmatpush2.msra.mxu0 %v6134_v28  ;;  %v9406_v60 = vunpack.i.h.bf16 %v16196_v12  ;;  %v9411_v28 = vunpack.i.h.bf16 %v16198_v40  ;;  %v6042_v12 = vld [vmem:[%s18438_s3 + $0x710] sm:$0xff]  ;;  %v6136_v40 = vld [vmem:[%s18438_s3 + $0xa00] sm:$0xff] }
 0x5bd   : > { %6739 = vmatprep.subr.mxu1 %v6047_v34  ;;  %6830 = vmatprep.subr.mxu0 %v6133_v18  ;;  %v6129_v34 = vld [vmem:[%s18438_s3 + $0x9c8] sm:$0xff]  ;;  %v4966_v18 = vsel %vm1622_vm3, %v9340_v61, %v9415_v24 }
 0x5be   : > { %6670 = vmatprep.mubr.f32.mxu0 %v4974_v25  ;;  %6740 = vmatpush2.msra.mxu1 %v6046_v36  ;;  %v6128_v25 = vld [vmem:[%s18438_s3 + $0x9c0] sm:$0xff]  ;;  %v6041_v36 = vld [vmem:[%s18438_s3 + $0x708] sm:$0xff] }
 0x5bf   : > { %6831 = vmatpush2.msra.mxu0 %v6132_v52  ;;  %6741 = vmatprep.subr.mxu1 %v6045_v10  ;;  %v16373_v35 = vpop.permute.xlu1 %9463  ;;  %v16375_v54 = vpop.permute.xlu0 %9468  ;;  %v4975_v52 = vsel %vm1922_vm1, %v9406_v60, %v9411_v28  ;;  %v16411_v10 = vpack.i.bf16 %v15303_v56, %v15335_v15  ;;  %v6126_v60 = vld [vmem:[%s18438_s3 + $0x9b0] sm:$0xff] }
 0x5c0   : > { %6832 = vmatprep.subr.mxu0 %v6131_v59  ;;  %9698 = vrot.lane.b32.xlu0 %v16281_v42, %s19254_s23  ;;  %v6040_v59 = vld [vmem:[%s18438_s3 + $0x700] sm:$0xff] }
 0x5c1   : > { %5410 = vrot.lane.b32.xlu1 %v15225_v8, %s9998_s14  ;;  %6742 = vmatpush2.msra.mxu1 %v6044_v6  ;;  %v6127_v8 = vld [vmem:[%s18438_s3 + $0x9b8] sm:$0xff]  ;;  %v4976_v6 = vsel %vm1872_vm14, %v9320_v32, %v9345_v46  ;;  %v9351_v46 = vunpack.i.h.bf16 %v16015_v47 }
 0x5c2   : > { %6833 = vmatpush2.msra.mxu0 %v6130_v29  ;;  %6743 = vmatprep.subr.mxu1 %v6043_v2  ;;  %v9356_v29 = vunpack.i.h.bf16 %v16050_v3  ;;  %v9416_v2 = vunpack.i.h.bf16 %v16231_v14  ;;  %v6167_v32 = vld [vmem:[%s18438_s3 + $0xaf8] sm:$0xff]  ;;  %v9346_v14 = vunpack.i.h.bf16 %v16013_v19  ;;  %v6124_v19 = vld [vmem:[%s18438_s3 + $0x9a0] sm:$0xff] }
 0x5c3   : > { %6834 = vmatprep.subr.mxu0 %v6129_v34  ;;  %6671 = vmatmul.mubr.f32.gmra.mxu0 %v4966_v18  ;;  %v16402_v61 = vpop.permute.xlu1 %9473  ;;  %v16404_v24 = vpop.permute.xlu0 %9478  ;;  %v6125_v34 = vld [vmem:[%s18438_s3 + $0x9a8] sm:$0xff]  ;;  %v4984_v18 = vsel %vm1822_vm12, %v4976_v6, %v9350_v43  ;;  %v6164_v6 = vld [vmem:[%s18438_s3 + $0xae0] sm:$0xff]  ;;  %v6143_v3 = vld [vmem:[%s18438_s3 + $0xa38] sm:$0xff] }
 0x5c4   : > { %19255 = vst [vmem:[#allocation59_spill] sm:$0xff] %v16402_v61  ;;  %6744 = vmatpush2.msra.mxu1 %v6042_v12  ;;  %6835 = vmatpush2.msra.mxu0 %v6128_v25  ;;  %v4967_v47 = vsel %vm1622_vm3, %v9341_v31, %v9416_v2  ;;  %v4993_v43 = vsel %vm1772_vm10, %v9351_v46, %v9356_v29  ;;  %v6122_v31 = vld [vmem:[%s18438_s3 + $0x990] sm:$0xff] }
 0x5c5   : > { %6676 = vmatprep.mubr.f32.mxu0 %v4975_v52  ;;  %6745 = vmatprep.subr.mxu1 %v6041_v36  ;;  %v6166_v36 = vld [vmem:[%s18438_s3 + $0xaf0] sm:$0xff]  ;;  %v6165_v52 = vld [vmem:[%s18438_s3 + $0xae8] sm:$0xff]  ;;  %v4977_v2 = vsel %vm1872_vm14, %v9321_v37, %v9346_v14  ;;  %v6120_v14 = vld [vmem:[%s18438_s3 + $0x980] sm:$0xff] }
 0x5c6   : > { %6836 = vmatprep.subr.mxu0 %v6127_v8  ;;  %9708 = vrot.lane.b32.xlu0 %v16411_v10, %s9997_s16  ;;  %v6123_v8 = vld [vmem:[%s18438_s3 + $0x998] sm:$0xff]  ;;  %v4985_v37 = vsel %vm1822_vm12, %v4977_v2, %v9351_v46  ;;  %v9440_v2 = vunpack.i.l.bf16 %v16288_v11 }
 0x5c7   : > { %9703 = vrot.lane.b32.xlu1 %v16411_v10, %s9996_s22  ;;  %6746 = vmatpush2.msra.mxu1 %v6040_v59  ;;  %v16439_v12 = vpop.permute.xlu1 %9483  ;;  %v16441_v25 = vpop.permute.xlu0 %9488  ;;  %v9395_v59 = vunpack.i.l.bf16 %v16171_v62  ;;  %v6119_v46 = vld [vmem:[%s18438_s3 + $0x978] sm:$0xff] }
 0x5c8   : > { %6837 = vmatpush2.msra.mxu0 %v6126_v60  ;;  %6748 = vmatmul.mubr.f32.vlgmr.msra.gmra.mxu1 %v4984_v18  ;;  %v6162_v18 = vld [vmem:[%s18438_s3 + $0xad0] sm:$0xff] }
 0x5c9   : > { %6838 = vmatprep.subr.mxu0 %v6125_v34  ;;  %6909 = vmatprep.subr.mxu1 %v6167_v32  ;;  %v6121_v32 = vld [vmem:[%s18438_s3 + $0x988] sm:$0xff] }
 0x5ca   : > { %6677 = vmatmul.mubr.f32.gmra.mxu0 %v4967_v47  ;;  %6753 = vmatprep.mubr.f32.mxu1 %v4993_v43  ;;  %v9445_v43 = vunpack.i.l.bf16 %v16321_v27 }
 0x5cb   : > { %6839 = vmatpush2.msra.mxu0 %v6124_v19  ;;  %6910 = vmatpush1.msra.mxu1 %v6166_v36  ;;  %v16472_v60 = vpop.permute.xlu1 %9493  ;;  %v16474_v34 = vpop.permute.xlu0 %9498  ;;  %v6161_v19 = vld [vmem:[%s18438_s3 + $0xac8] sm:$0xff] }
 0x5cc   : > { %19256 = vst [vmem:[#allocation73_spill] sm:$0xff] %v16472_v60  ;;  %6840 = vmatprep.subr.mxu0 %v6123_v8  ;;  %6911 = vmatprep.subr.mxu1 %v6165_v52  ;;  %v9396_v8 = vunpack.i.h.bf16 %v16171_v62  ;;  %v18674_v52 = vunpack.i.h.bf16 %v16173_v23  ;;  %v6117_v62 = vld [vmem:[%s18438_s3 + $0x968] sm:$0xff] }
 0x5cd   : > { %9713 = vrot.lane.b32.xlu1 %v16281_v42, %s9999_s15  ;;  %5412 = vrot.lane.b32.xlu0 %v15266_v9, %s9998_s14  ;;  %v9390_v42 = vunpack.i.l.bf16 %v16145_v63  ;;  %v4994_v9 = vsel %vm1772_vm10, %v9395_v59, %v18676_v50 }
 0x5ce   : > { %6841 = vmatpush2.msra.mxu0 %v6122_v31  ;;  %6912 = vmatpush1.msra.mxu1 %v6164_v6  ;;  %v6118_v31 = vld [vmem:[%s18438_s3 + $0x970] sm:$0xff]  ;;  %v6160_v6 = vld [vmem:[%s18438_s3 + $0xac0] sm:$0xff] }
 0x5cf   : > { %6754 = vmatmul.mubr.f32.gmra.mxu1 %v4985_v37  ;;  %6842 = vmatprep.subr.mxu0 %v6121_v32  ;;  %v16503_v36 = vpop.permute.xlu1 %9503  ;;  %v16505_v47 = vpop.permute.xlu0 %9508  ;;  %v4978_v32 = vsel %vm1872_vm14, %v9365_v20, %v9390_v42  ;;  %v5016_v20 = vsel %vm1622_vm3, %v9440_v2, %v9445_v43  ;;  %v4995_v42 = vsel %vm1772_vm10, %v9396_v8, %v18674_v52 }
 0x5d0   : > { %6913 = vmatprep.subr.mxu1 %v6163_v45  ;;  %6759 = vmatprep.mubr.f32.mxu1 %v4994_v9  ;;  %v6159_v45 = vld [vmem:[%s18438_s3 + $0xab8] sm:$0xff]  ;;  %v6158_v9 = vld [vmem:[%s18438_s3 + $0xab0] sm:$0xff]  ;;  %v16556_v43 = vpack.i.bf16 %v15317_v41, %v15339_v39 }
 0x5d1   : > { %6843 = vmatpush2.msra.mxu0 %v6120_v14  ;;  %6914 = vmatpush1.msra.mxu1 %v6162_v18  ;;  %v4986_v18 = vsel %vm1822_vm12, %v4978_v32, %v9395_v59  ;;  %v6115_v59 = vld [vmem:[%s18438_s3 + $0x958] sm:$0xff]  ;;  %v18673_v32 = vunpack.i.l.bf16 %v16263_v4 }
 0x5d2   : > { %6844 = vmatprep.subr.mxu0 %v6119_v46  ;;  %6915 = vmatprep.subr.mxu1 %v6161_v19  ;;  %v9391_v46 = vunpack.i.h.bf16 %v16145_v63  ;;  %v6157_v19 = vld [vmem:[%s18438_s3 + $0xaa8] sm:$0xff]  ;;  %v9425_v63 = vunpack.i.l.bf16 %v16261_v7 }
 0x5d3   : > { %5414 = vrot.lane.b32.xlu1 %v15240_v38, %s9998_s14  ;;  %9718 = vrot.lane.b32.xlu0 %v16411_v10, %s19254_s23  ;;  %v16530_v37 = vpop.permute.xlu1 %9513  ;;  %v16532_v14 = vpop.permute.xlu0 %9518  ;;  %v6116_v38 = vld [vmem:[%s18438_s3 + $0x960] sm:$0xff] }
 0x5d4   : > { %19257 = vst [vmem:[#allocation7_spill] sm:$0xff] %v16530_v37  ;;  %6845 = vmatpush2.msra.mxu0 %v6118_v31  ;;  %6916 = vmatpush1.msra.mxu1 %v6160_v6  ;;  %v6114_v31 = vld [vmem:[%s18438_s3 + $0x950] sm:$0xff] }
 0x5d5   : > { %6760 = vmatmul.mubr.f32.gmra.mxu1 %v4986_v18  ;;  %6846 = vmatprep.subr.mxu0 %v6117_v62  ;;  %v6113_v18 = vld [vmem:[%s18438_s3 + $0x948] sm:$0xff] }
 0x5d6   : > { %6917 = vmatprep.subr.mxu1 %v6159_v45  ;;  %6765 = vmatprep.mubr.f32.mxu1 %v4995_v42  ;;  %v6156_v45 = vld [vmem:[%s18438_s3 + $0xaa0] sm:$0xff] }
 0x5d7   : > { %6847 = vmatpush2.msra.mxu0 %v6116_v38  ;;  %6860 = vmatprep.mubr.f32.mxu0 %v5016_v20  ;;  %v16561_v6 = vpop.permute.xlu1 %9523  ;;  %v16563_v62 = vpop.permute.xlu0 %9528  ;;  %v6155_v38 = vld [vmem:[%s18438_s3 + $0xa98] sm:$0xff]  ;;  %v4979_v20 = vsel %vm1872_vm14, %v9366_v44, %v9391_v46  ;;  %v6112_v42 = vld [vmem:[%s18438_s3 + $0x940] sm:$0xff]  ;;  %v9420_v44 = vunpack.i.l.bf16 %v16233_v21  ;;  %v6153_v46 = vld [vmem:[%s18438_s3 + $0xa88] sm:$0xff] }
 0x5d8   : > { %6918 = vmatpush1.msra.mxu1 %v6158_v9  ;;  %6848 = vmatprep.subr.mxu0 %v6115_v59  ;;  %v4987_v9 = vsel %vm1822_vm12, %v4979_v20, %v9396_v8  ;;  %v6154_v59 = vld [vmem:[%s18438_s3 + $0xa90] sm:$0xff]  ;;  %v4996_v8 = vsel %vm1772_vm10, %v9425_v63, %v18673_v32  ;;  %v18672_v20 = vunpack.i.h.bf16 %v16263_v4  ;;  %v18677_v32 = vunpack.i.l.bf16 %v16402_v61 }
 0x5d9   : > { %6919 = vmatprep.subr.mxu1 %v6157_v19  ;;  %9723 = vrot.lane.b32.xlu1 %v16556_v43, %s9996_s22  ;;  %v6111_v19 = vld [vmem:[%s18438_s3 + $0x938] sm:$0xff] }
 0x5da   : > { %9728 = vrot.lane.b32.xlu0 %v16556_v43, %s9997_s16  ;;  %6849 = vmatpush2.msra.mxu0 %v6114_v31 }
 0x5db   : > { %6920 = vmatpush1.msra.mxu1 %v6156_v45  ;;  %6850 = vmatprep.subr.mxu0 %v6113_v18  ;;  %v16593_v31 = vpop.permute.xlu1 %9533  ;;  %v16595_v55 = vpop.permute.xlu0 %9538  ;;  %v6110_v45 = vld [vmem:[%s18438_s3 + $0x930] sm:$0xff]  ;;  %v9426_v18 = vunpack.i.h.bf16 %v16261_v7  ;;  %v6151_v7 = vld [vmem:[%s18438_s3 + $0xa78] sm:$0xff] }
 0x5dc   : > { %6766 = vmatmul.mubr.f32.gmra.mxu1 %v4987_v9  ;;  %6921 = vmatprep.subr.mxu1 %v6155_v38  ;;  %v6152_v38 = vld [vmem:[%s18438_s3 + $0xa80] sm:$0xff]  ;;  %v6109_v9 = vld [vmem:[%s18438_s3 + $0x928] sm:$0xff] }
 0x5dd   : > { %6771 = vmatprep.mubr.f32.mxu1 %v4996_v8  ;;  %6851 = vmatpush2.msra.mxu0 %v6112_v42  ;;  %v4980_v8 = vsel %vm1872_vm14, %v9380_v16, %v9420_v44  ;;  %v4997_v16 = vsel %vm1772_vm10, %v9426_v18, %v18672_v20  ;;  %v6106_v44 = vld [vmem:[%s18438_s3 + $0x910] sm:$0xff] }
 0x5de   : > { %6922 = vmatpush1.msra.mxu1 %v6154_v59  ;;  %6852 = vmatprep.subr.mxu0 %v6111_v19  ;;  %v9421_v19 = vunpack.i.h.bf16 %v16233_v21  ;;  %v6150_v21 = vld [vmem:[%s18438_s3 + $0xa70] sm:$0xff] }
 0x5df   : > { %6923 = vmatprep.subr.mxu1 %v6153_v46  ;;  %9733 = vrot.lane.b32.xlu1 %v16411_v10, %s9999_s15  ;;  %v16620_v42 = vpop.permute.xlu1 %9543  ;;  %v16622_v59 = vpop.permute.xlu0 %9548  ;;  %v6108_v10 = vld [vmem:[%s18438_s3 + $0x920] sm:$0xff]  ;;  %v4988_v46 = vsel %vm1822_vm12, %v4980_v8, %v9425_v63  ;;  %v6149_v63 = vld [vmem:[%s18438_s3 + $0xa68] sm:$0xff]  ;;  %v18675_v8 = vunpack.i.l.bf16 %v16352_v1 }
 0x5e0   : > { %5416 = vrot.lane.b32.xlu0 %v15335_v15, %s9998_s14  ;;  %6853 = vmatpush2.msra.mxu0 %v6110_v45  ;;  %v6107_v15 = vld [vmem:[%s18438_s3 + $0x918] sm:$0xff]  ;;  %v9435_v45 = vunpack.i.l.bf16 %v16286_v48 }
 0x5e1   : > { %6924 = vmatpush1.msra.mxu1 %v6152_v38  ;;  %6854 = vmatprep.subr.mxu0 %v6109_v9 }
 0x5e2   : > { %6772 = vmatmul.mubr.f32.gmra.mxu1 %v4988_v46  ;;  %6925 = vmatprep.subr.mxu1 %v6151_v7  ;;  %v9455_v7 = vunpack.i.l.bf16 %v16350_v26  ;;  %v6148_v46 = vld [vmem:[%s18438_s3 + $0xa60] sm:$0xff]  ;;  %v5000_v51 = vsel %vm1722_vm8, %v9355_v33, %v9435_v45  ;;  %v9470_v33 = vunpack.i.l.bf16 %v16375_v54 }
 0x5e3   : > { %6777 = vmatprep.mubr.f32.mxu1 %v4997_v16  ;;  %6855 = vmatpush2.msra.mxu0 %v6108_v10  ;;  %v16650_v38 = vpop.permute.xlu1 %9553  ;;  %v16652_v9 = vpop.permute.xlu0 %9558  ;;  %v4981_v10 = vsel %vm1872_vm14, %v9381_v57, %v9421_v19  ;;  %v6105_v16 = vld [vmem:[%s18438_s3 + $0x908] sm:$0xff]  ;;  %v9441_v57 = vunpack.i.h.bf16 %v16288_v11  ;;  %v9446_v19 = vunpack.i.h.bf16 %v16321_v27  ;;  %v6146_v27 = vld [vmem:[%s18438_s3 + $0xa50] sm:$0xff]  ;;  %v5008_v52 = vsel %vm1672_vm5, %v5000_v51, %v9440_v2  ;;  %v6144_v11 = vld [vmem:[%s18438_s3 + $0xa40] sm:$0xff] }
 0x5e4   : > { %6926 = vmatpush1.msra.mxu1 %v6150_v21  ;;  %6856 = vmatprep.subr.mxu0 %v6107_v15  ;;  %v4989_v20 = vsel %vm1822_vm12, %v4981_v10, %v9426_v18  ;;  %v6147_v21 = vld [vmem:[%s18438_s3 + $0xa58] sm:$0xff]  ;;  %v9436_v15 = vunpack.i.h.bf16 %v16286_v48  ;;  %v9466_v18 = vunpack.i.h.bf16 %v16373_v35  ;;  %v9465_v48 = vunpack.i.l.bf16 %v16373_v35 }
 0x5e5   : > { %6927 = vmatprep.subr.mxu1 %v6149_v63  ;;  %5418 = vrot.lane.b32.xlu1 %v15303_v56, %s9998_s14  ;;  %v6104_v56 = vld [vmem:[%s18438_s3 + $0x900] sm:$0xff]  ;;  %v9471_v63 = vunpack.i.h.bf16 %v16375_v54  ;;  %v18678_v10 = vunpack.i.h.bf16 %v16402_v61  ;;  %v4998_v54 = vsel %vm1772_vm10, %v9455_v7, %v18675_v8  ;;  %v18681_v8 = vunpack.i.h.bf16 %v16352_v1  ;;  %v6231_v51 = vld [vmem:[%s18438_s3 + $0xcf8] sm:$0xff] }
 0x5e6   : > { %9738 = vrot.lane.b32.xlu0 %v16556_v43, %s19254_s23  ;;  %6857 = vmatpush2.msra.mxu0 %v6106_v44  ;;  %v9450_v44 = vunpack.i.l.bf16 %v16323_v30  ;;  %v5017_v50 = vsel %vm1622_vm3, %v9441_v57, %v9446_v19  ;;  %v5001_v2 = vsel %vm1722_vm8, %v9356_v29, %v9436_v15  ;;  %v9525_v29 = vunpack.i.l.bf16 %v16561_v6 }
 0x5e7   : > { %6928 = vmatpush1.msra.mxu1 %v6148_v46  ;;  %6858 = vmatprep.subr.mxu0 %v6105_v16  ;;  %v16689_v45 = vpop.permute.xlu0 %9568  ;;  %v6145_v46 = vld [vmem:[%s18438_s3 + $0xa48] sm:$0xff]  ;;  %v9530_v15 = vunpack.i.l.bf16 %v16563_v62 }
 0x5e8   : > { %6778 = vmatmul.mubr.f32.gmra.mxu1 %v4989_v20  ;;  %6929 = vmatprep.subr.mxu1 %v6147_v21  ;;  %v16702_v16 = vpop.permute.xlu1 %9563  ;;  %v16709_v20 = vpack.i.bf16 %v15375_v58, %v15415_v5  ;;  %v9456_v21 = vunpack.i.h.bf16 %v16350_v26 }
 0x5e9   : > { %6783 = vmatprep.mubr.f32.mxu1 %v4998_v54  ;;  %6859 = vmatpush2.msra.mxu0 %v6104_v56  ;;  %v5457_v56 = vsel %vm1872_vm14, %v9466_v18, %v9471_v63  ;;  %v4982_v63 = vsel %vm1872_vm14, %v9410_v49, %v9450_v44  ;;  %v6141_v44 = vld [vmem:[%s18438_s3 + $0xa28] sm:$0xff] }
 0x5ea   : > { %6930 = vmatpush1.msra.mxu1 %v6146_v27  ;;  %6861 = vmatmul.mubr.f32.vlgmr.msra.gmra.mxu0 %v5008_v52  ;;  %v5456_v52 = vsel %vm1872_vm14, %v9465_v48, %v9470_v33  ;;  %v6142_v33 = vld [vmem:[%s18438_s3 + $0xa30] sm:$0xff]  ;;  %v5473_v54 = vsel %vm1822_vm12, %v5457_v56, %v18678_v10  ;;  %v4990_v49 = vsel %vm1822_vm12, %v4982_v63, %v9455_v7 }
 0x5eb   : > { %6931 = vmatprep.subr.mxu1 %v6145_v46  ;;  %9743 = vrot.lane.b32.xlu1 %v16709_v20, %s9996_s22  ;;  %v16736_v19 = vpop.permute.xlu0 %9578  ;;  %v5472_v27 = vsel %vm1822_vm12, %v5456_v52, %v18677_v32  ;;  %v4999_v56 = vsel %vm1772_vm10, %v9456_v21, %v18681_v8  ;;  %v5009_v52 = vsel %vm1672_vm5, %v5001_v2, %v9441_v57  ;;  %v5636_v7 = vrot.slane %v5473_v54, 3  ;;  %v6138_v2 = vld [vmem:[%s18438_s3 + $0xa10] sm:$0xff]  ;;  %v6169_v8 = vld [vmem:[%s18438_s3 + $0xb08] sm:$0xff] }
 0x5ec   : > { %9748 = vrot.lane.b32.xlu0 %v16709_v20, %s9997_s16  ;;  %6866 = vmatprep.mubr.f32.mxu0 %v5017_v50  ;;  %v16752_v46 = vpop.permute.xlu1 %9573  ;;  %v9451_v50 = vunpack.i.h.bf16 %v16323_v30  ;;  %v6140_v30 = vld [vmem:[%s18438_s3 + $0xa20] sm:$0xff]  ;;  %v5635_v26 = vrot.slane %v5472_v27, 3  ;;  %v9531_v27 = vunpack.i.h.bf16 %v16563_v62  ;;  %v19258_v54 = vunpack.i.l.bf16 %v16173_v23 }
 0x5ed   : > { %6932 = vmatpush1.msra.mxu1 %v6144_v11  ;;  %7022 = vmatprep.subr.mxu0 %v6231_v51  ;;  %v9520_v11 = vunpack.i.l.bf16 %v16532_v14  ;;  %v5018_v51 = vsel %vm1622_vm3, %v9525_v29, %v9530_v15 }
 0x5ee   : > { %6784 = vmatmul.mubr.f32.gmra.mxu1 %v4990_v49  ;;  %6933 = vmatprep.subr.mxu1 %v6143_v3  ;;  %v6139_v3 = vld [vmem:[%s18438_s3 + $0xa18] sm:$0xff]  ;;  %v4983_v57 = vsel %vm1872_vm14, %v9411_v28, %v9451_v50  ;;  %v9526_v28 = vunpack.i.h.bf16 %v16561_v6  ;;  %v6198_v6 = vld [vmem:[%s18438_s3 + $0xbf0] sm:$0xff] }
 0x5ef   : > { %6789 = vmatprep.mubr.f32.mxu1 %v4999_v56  ;;  %6934 = vmatpush1.msra.mxu1 %v6142_v33  ;;  %v4991_v33 = vsel %vm1822_vm12, %v4983_v57, %v9456_v21  ;;  %v5002_v21 = vsel %vm1722_vm8, %v19258_v54, %v9520_v11  ;;  %v6199_v50 = vld [vmem:[%s18438_s3 + $0xbf8] sm:$0xff]  ;;  %v16820_v56 = vpack.i.bf16 %v15395_v53, %v15419_v17  ;;  %v6229_v11 = vld [vmem:[%s18438_s3 + $0xce8] sm:$0xff]  ;;  %v19259_v54 = vunpack.i.h.bf16 %v16173_v23 }
 0x5f0   : > { %6867 = vmatmul.mubr.f32.gmra.mxu0 %v5009_v52  ;;  %6935 = vmatprep.subr.mxu1 %v6141_v44  ;;  %v16773_v63 = vpop.permute.xlu0 %9588  ;;  %v5010_v49 = vsel %vm1672_vm5, %v5002_v21, %v9525_v29  ;;  %v6197_v29 = vld [vmem:[%s18438_s3 + $0xbe8] sm:$0xff]  ;;  %v5019_v52 = vsel %vm1622_vm3, %v9526_v28, %v9531_v27  ;;  %v6187_v23 = vld [vmem:[%s18438_s3 + $0xb98] sm:$0xff] }
 0x5f1   : > { %9753 = vrot.lane.b32.xlu1 %v16556_v43, %s9999_s15  ;;  %5420 = vrot.lane.b32.xlu0 %v15339_v39, %s9998_s14  ;;  %v16785_v15 = vpop.permute.xlu1 %9583  ;;  %v6137_v43 = vld [vmem:[%s18438_s3 + $0xa08] sm:$0xff]  ;;  %v5637_v39 = vsel %vm1468_vm6, %v5635_v26, %v5636_v7  ;;  %v6230_v26 = vld [vmem:[%s18438_s3 + $0xcf0] sm:$0xff] }
 0x5f2   : > { %6936 = vmatpush1.msra.mxu1 %v6140_v30  ;;  %6872 = vmatprep.mubr.f32.mxu0 %v5018_v51  ;;  %v6195_v30 = vld [vmem:[%s18438_s3 + $0xbd8] sm:$0xff]  ;;  %v6194_v7 = vld [vmem:[%s18438_s3 + $0xbd0] sm:$0xff]  ;;  %v6193_v57 = vld [vmem:[%s18438_s3 + $0xbc8] sm:$0xff] }
 0x5f3   : > { %6790 = vmatmul.mubr.f32.gmra.mxu1 %v4991_v33  ;;  %6937 = vmatprep.subr.mxu1 %v6139_v3  ;;  %v9521_v3 = vunpack.i.h.bf16 %v16532_v14  ;;  %v6192_v33 = vld [vmem:[%s18438_s3 + $0xbc0] sm:$0xff]  ;;  %v6191_v14 = vld [vmem:[%s18438_s3 + $0xbb8] sm:$0xff]  ;;  %v6189_v27 = vld [vmem:[%s18438_s3 + $0xba8] sm:$0xff] }
 0x5f4   : > { %6938 = vmatpush1.msra.mxu1 %v6138_v2  ;;  %6973 = vmatprep.mubr.f32.mxu1 %v5637_v39  ;;  %v16804_v44 = vpop.permute.xlu0 %9598  ;;  %v6228_v39 = vld [vmem:[%s18438_s3 + $0xce0] sm:$0xff] }
 0x5f5   : > { %6939 = vmatprep.subr.mxu1 %v6137_v43  ;;  %5422 = vrot.lane.b32.xlu1 %v15317_v41, %s9998_s14  ;;  %v16811_v62 = vpop.permute.xlu1 %9593  ;;  %v6196_v41 = vld [vmem:[%s18438_s3 + $0xbe0] sm:$0xff]  ;;  %v16853_v43 = vpop.f32.mrf.mxu1  ;;  %v5003_v21 = vsel %vm1722_vm8, %v19259_v54, %v9521_v3  ;;  %v6225_v3 = vld [vmem:[%s18438_s3 + $0xcc8] sm:$0xff] }
 0x5f6   : > { %9758 = vrot.lane.b32.xlu0 %v16709_v20, %s19254_s23  ;;  %6940 = vmatpush1.msra.mxu1 %v6136_v40  ;;  %v6190_v40 = vld [vmem:[%s18438_s3 + $0xbb0] sm:$0xff]  ;;  %v6180_v54 = vld [vmem:[%s18438_s3 + $0xb60] sm:$0xff] }
 0x5f7   : > { %6941 = vmatprep.subr.mxu1 %v6199_v50  ;;  %6873 = vmatmul.mubr.f32.gmra.mxu0 %v5010_v49 }
 0x5f8   : > { %6942 = vmatpush2.msra.mxu1 %v6198_v6  ;;  %6878 = vmatprep.mubr.f32.mxu0 %v5019_v52  ;;  %v16882_v6 = vpop.f32.mrf.mxu1  ;;  %v6185_v52 = vld [vmem:[%s18438_s3 + $0xb88] sm:$0xff] }
 0x5f9   : > { %6943 = vmatprep.subr.mxu1 %v6197_v29  ;;  %9763 = vrot.lane.b32.xlu1 %v16820_v56, %s9996_s22  ;;  %v16840_v51 = vpop.permute.xlu0 %9608  ;;  %v6227_v29 = vld [vmem:[%s18438_s3 + $0xcd8] sm:$0xff] }
 0x5fa   : > { %9768 = vrot.lane.b32.xlu0 %v16820_v56, %s9997_s16  ;;  %6944 = vmatpush2.msra.mxu1 %v6196_v41  ;;  %v16848_v2 = vpop.permute.xlu1 %9603  ;;  %v6226_v41 = vld [vmem:[%s18438_s3 + $0xcd0] sm:$0xff] }
 0x5fb   : > { %6945 = vmatprep.subr.mxu1 %v6195_v30  ;;  %7023 = vmatpush1.msra.mxu0 %v6230_v26  ;;  %v6184_v30 = vld [vmem:[%s18438_s3 + $0xb80] sm:$0xff] }
 0x5fc   : > { %6946 = vmatpush2.msra.mxu1 %v6194_v7  ;;  %7024 = vmatprep.subr.mxu0 %v6229_v11  ;;  %v16912_v7 = vpop.f32.mrf.mxu1  ;;  %v6183_v11 = vld [vmem:[%s18438_s3 + $0xb78] sm:$0xff] }
 0x5fd   : > { %6947 = vmatprep.subr.mxu1 %v6193_v57  ;;  %9773 = vrot.lane.b32.xlu1 %v16709_v20, %s9999_s15  ;;  %v16876_v49 = vpop.permute.xlu0 %9618  ;;  %v6188_v20 = vld [vmem:[%s18438_s3 + $0xba0] sm:$0xff] }
 0x5fe   : > { %5424 = vrot.lane.b32.xlu0 %v15415_v5, %s9998_s14  ;;  %6948 = vmatpush2.msra.mxu1 %v6192_v33  ;;  %v16874_v50 = vpop.permute.xlu1 %9613  ;;  %v5011_v5 = vsel %vm1672_vm5, %v5003_v21, %v9526_v28  ;;  %v6186_v28 = vld [vmem:[%s18438_s3 + $0xb90] sm:$0xff] }
 0x5ff   : > { %6949 = vmatprep.subr.mxu1 %v6191_v14  ;;  %7025 = vmatpush1.msra.mxu0 %v6228_v39  ;;  %v6182_v33 = vld [vmem:[%s18438_s3 + $0xb70] sm:$0xff]  ;;  %v6224_v14 = vld [vmem:[%s18438_s3 + $0xcc0] sm:$0xff]  ;;  %v6181_v39 = vld [vmem:[%s18438_s3 + $0xb68] sm:$0xff] }
 0x600   : > { %6950 = vmatpush2.msra.mxu1 %v6190_v40  ;;  %6879 = vmatmul.mubr.f32.gmra.mxu0 %v5011_v5  ;;  %v6223_v40 = vld [vmem:[%s18438_s3 + $0xcb8] sm:$0xff]  ;;  %v6222_v21 = vld [vmem:[%s18438_s3 + $0xcb0] sm:$0xff] }
 0x601   : > { %6951 = vmatprep.subr.mxu1 %v6189_v27  ;;  %5426 = vrot.lane.b32.xlu1 %v15375_v58, %s9998_s14  ;;  %v16905_v58 = vpack.i.bf16 %v15496_v13, %v15550_v0  ;;  %v16938_v27 = vpop.f32.mrf.mxu1  ;;  %v6179_v5 = vld [vmem:[%s18438_s3 + $0xb58] sm:$0xff] }
 0x602   : > { %9778 = vrot.lane.b32.xlu0 %v16820_v56, %s19254_s23  ;;  %6952 = vmatpush2.msra.mxu1 %v6188_v20  ;;  %v9481_v20 = vunpack.i.h.bf16 %v16404_v24 }
 0x603   : > { %6953 = vmatprep.subr.mxu1 %v6187_v23  ;;  %7026 = vmatprep.subr.mxu0 %v6227_v29  ;;  %v16910_v26 = vpop.permute.xlu1 %9623  ;;  %v16920_v57 = vpop.permute.xlu0 %9628  ;;  %v6221_v23 = vld [vmem:[%s18438_s3 + $0xca8] sm:$0xff] }
 0x604   : > { %6954 = vmatpush2.msra.mxu1 %v6186_v28  ;;  %7027 = vmatpush1.msra.mxu0 %v6226_v41  ;;  %v16955_v28 = vpop.f32.mrf.mxu1  ;;  %v9486_v41 = vunpack.i.h.bf16 %v16439_v12  ;;  %v16993_v32 = vsel %vm1922_vm1, %v9481_v20, %v9466_v18  ;;  %v6174_v20 = vld [vmem:[%s18438_s3 + $0xb30] sm:$0xff] }
 0x605   : > { %6955 = vmatprep.subr.mxu1 %v6185_v52  ;;  %9783 = vrot.lane.b32.xlu1 %v16905_v58, %s9996_s22  ;;  %v9485_v52 = vunpack.i.l.bf16 %v16439_v12  ;;  %v9480_v12 = vunpack.i.l.bf16 %v16404_v24  ;;  %v9501_v24 = vunpack.i.h.bf16 %v16474_v34 }
 0x606   : > { %9788 = vrot.lane.b32.xlu0 %v16905_v58, %s9997_s16  ;;  %6956 = vmatpush2.msra.mxu1 %v6184_v30  ;;  %v9491_v30 = vunpack.i.h.bf16 %v16441_v25  ;;  %v16995_v10 = vpop.f32.mrf.mxu1 }
 0x607   : > { %6957 = vmatprep.subr.mxu1 %v6183_v11  ;;  %7028 = vmatprep.subr.mxu0 %v6225_v3  ;;  %v9490_v11 = vunpack.i.l.bf16 %v16441_v25  ;;  %v6178_v3 = vld [vmem:[%s18438_s3 + $0xb50] sm:$0xff]  ;;  %v18679_v25 = vunpack.i.h.bf16 %v16472_v60  ;;  %19260 = vst [vmem:[#allocation6_spill] sm:$0xff] %v16995_v10  ;;  %v5440_v18 = vsel %vm1922_vm1, %v9480_v12, %v9465_v48  ;;  %v9545_v10 = vunpack.i.l.bf16 %v16620_v42 }
 0x608   : > { %6958 = vmatpush2.msra.mxu1 %v6182_v33  ;;  %7029 = vmatpush1.msra.mxu0 %v6224_v14  ;;  %v6220_v33 = vld [vmem:[%s18438_s3 + $0xca0] sm:$0xff] }
 0x609   : > { %6959 = vmatprep.subr.mxu1 %v6181_v39  ;;  %7030 = vmatprep.subr.mxu0 %v6223_v40  ;;  %v16953_v29 = vpop.permute.xlu1 %9633  ;;  %v16971_v14 = vpop.permute.xlu0 %9638  ;;  %v18680_v39 = vunpack.i.l.bf16 %v16472_v60  ;;  %v9500_v40 = vunpack.i.l.bf16 %v16474_v34  ;;  %v5458_v34 = vsel %vm1872_vm14, %v9485_v52, %v9490_v11  ;;  %v6173_v11 = vld [vmem:[%s18438_s3 + $0xb28] sm:$0xff]  ;;  %v19264_v60 = vunpack.i.l.bf16 %v16503_v36 }
 0x60a   : > { %9793 = vrot.lane.b32.xlu1 %v16820_v56, %s9999_s15  ;;  %5428 = vrot.lane.b32.xlu0 %v15419_v17, %s9998_s14  ;;  %v6177_v17 = vld [vmem:[%s18438_s3 + $0xb48] sm:$0xff]  ;;  %v6219_v56 = vld [vmem:[%s18438_s3 + $0xc98] sm:$0xff] }
 0x60b   : > { %6960 = vmatpush2.msra.mxu1 %v6180_v54  ;;  %7031 = vmatpush1.msra.mxu0 %v6222_v21  ;;  %v6176_v54 = vld [vmem:[%s18438_s3 + $0xb40] sm:$0xff]  ;;  %v6218_v21 = vld [vmem:[%s18438_s3 + $0xc90] sm:$0xff]  ;;  %v5474_v35 = vsel %vm1822_vm12, %v5458_v34, %v18680_v39  ;;  %v5442_v12 = vsel %vm1922_vm1, %v9500_v40, %v9485_v52  ;;  %v5632_v34 = vrot.slane %v5440_v18, 3 }
 0x60c   : > { %6961 = vmatprep.subr.mxu1 %v6179_v5  ;;  %7032 = vmatprep.subr.mxu0 %v6221_v23  ;;  %v5459_v5 = vsel %vm1872_vm14, %v9486_v41, %v9491_v30  ;;  %v6175_v23 = vld [vmem:[%s18438_s3 + $0xb38] sm:$0xff]  ;;  %v6216_v30 = vld [vmem:[%s18438_s3 + $0xc80] sm:$0xff]  ;;  %v6214_v40 = vld [vmem:[%s18438_s3 + $0xc70] sm:$0xff]  ;;  %v5650_v18 = vrot.slane %v5442_v12, 3 }
 0x60d   : > { %6962 = vmatpush2.msra.mxu1 %v6178_v3  ;;  %7033 = vmatpush1.msra.mxu0 %v6220_v33  ;;  %v6217_v3 = vld [vmem:[%s18438_s3 + $0xc88] sm:$0xff]  ;;  %v5475_v48 = vsel %vm1822_vm12, %v5459_v5, %v18679_v25  ;;  %v6215_v33 = vld [vmem:[%s18438_s3 + $0xc78] sm:$0xff]  ;;  %v17041_v25 = vpop.f32.mrf.mxu1  ;;  %v6172_v52 = vld [vmem:[%s18438_s3 + $0xb20] sm:$0xff] }
 0x60e   : > { %6963 = vmatprep.subr.mxu1 %v6177_v17  ;;  %7034 = vmatprep.subr.mxu0 %v6219_v56  ;;  %v19261_v56 = vld [vmem:[#allocation45_spill] sm:$0xff]  ;;  %19262 = vst [vmem:[#allocation108_spill] sm:$0xff] %v17041_v25  ;;  %v9546_v25 = vunpack.i.h.bf16 %v16620_v42  ;;  %v19267_v42 = vunpack.i.l.bf16 %v16530_v37 }
 0x60f   : > { %5430 = vrot.lane.b32.xlu1 %v15395_v53, %s9998_s14  ;;  %9798 = vrot.lane.b32.xlu0 %v16905_v58, %s19254_s23  ;;  %v17024_v53 = vpop.permute.xlu1 %9643  ;;  %v17033_v17 = vpop.permute.xlu0 %9648  ;;  %v17037_v5 = vpack.i.bf16 %v19261_v56, %v15554_v22 }
 0x610   : > { %6964 = vmatpush2.msra.mxu1 %v6176_v54  ;;  %7035 = vmatpush1.msra.mxu0 %v6218_v21  ;;  %v5443_v54 = vsel %vm1922_vm1, %v9501_v24, %v9486_v41  ;;  %v5633_v21 = vrot.slane %v16993_v32, 3  ;;  %v9510_v41 = vunpack.i.l.bf16 %v16505_v47  ;;  %v6171_v32 = vld [vmem:[%s18438_s3 + $0xb18] sm:$0xff]  ;;  %v6213_v24 = vld [vmem:[%s18438_s3 + $0xc68] sm:$0xff]  ;;  %v17080_v39 = vpop.f32.mrf.mxu1 }
 0x611   : > { %6965 = vmatprep.subr.mxu1 %v6175_v23  ;;  %7036 = vmatprep.subr.mxu0 %v6217_v3  ;;  %v5653_v23 = vrot.slane %v5474_v35, 3  ;;  %v5654_v3 = vrot.slane %v5475_v48, 3  ;;  %v6170_v48 = vld [vmem:[%s18438_s3 + $0xb10] sm:$0xff]  ;;  %v6211_v35 = vld [vmem:[%s18438_s3 + $0xc58] sm:$0xff]  ;;  %19263 = vst [vmem:[#allocation46_spill] sm:$0xff] %v17080_v39  ;;  %v9580_v39 = vunpack.i.l.bf16 %v16736_v19 }
 0x612   : > { %6966 = vmatpush2.msra.mxu1 %v6174_v20  ;;  %7037 = vmatpush1.msra.mxu0 %v6216_v30  ;;  %v9511_v30 = vunpack.i.h.bf16 %v16505_v47  ;;  %v9585_v47 = vunpack.i.l.bf16 %v16785_v15  ;;  %v5460_v61 = vsel %vm1872_vm14, %v19264_v60, %v9510_v41 }
 0x613   : > { %6967 = vmatprep.subr.mxu1 %v6173_v11  ;;  %7038 = vmatprep.subr.mxu0 %v6215_v33  ;;  %v6212_v11 = vld [vmem:[%s18438_s3 + $0xc60] sm:$0xff]  ;;  %v5651_v33 = vrot.slane %v5443_v54, 3  ;;  %v9575_v54 = vunpack.i.l.bf16 %v16752_v46  ;;  %v17107_v41 = vsel %vm1822_vm12, %v5460_v61, %v19267_v42  ;;  %v9540_v61 = vunpack.i.l.bf16 %v16595_v55 }
 0x614   : > { %9803 = vrot.lane.b32.xlu1 %v17037_v5, %s9996_s22  ;;  %9808 = vrot.lane.b32.xlu0 %v17037_v5, %s9997_s16  ;;  %s7712_s22 = sshll.u32 %s272_s17, 3 }
 0x615   : > { %6968 = vmatpush2.msra.mxu1 %v6172_v52  ;;  %7039 = vmatpush1.msra.mxu0 %v6214_v40  ;;  %v17078_v20 = vpop.permute.xlu1 %9653  ;;  %v5634_v52 = vsel %vm1468_vm6, %v5632_v34, %v5633_v21  ;;  %v5655_v40 = vsel %vm1468_vm6, %v5653_v23, %v5654_v3  ;;  %v17085_v12 = vpop.permute.xlu0 %9658  ;;  %v6168_v21 = vld [vmem:[%s18438_s3 + $0xb00] sm:$0xff]  ;;  %v6210_v34 = vld [vmem:[%s18438_s3 + $0xc50] sm:$0xff]  ;;  %v19265_v23 = vunpack.i.h.bf16 %v16503_v36  ;;  %v5462_v42 = vsel %vm1872_vm14, %v9540_v61, %v9545_v10  ;;  %s274_s9 = scalar_lea.vmem [#allocation3], %s7712_s22 }
 0x616   : > { %6969 = vmatprep.subr.mxu1 %v6171_v32  ;;  %7040 = vmatprep.subr.mxu0 %v6213_v24  ;;  %v17102_v3 = vpop.f32.mrf.mxu1  ;;  %v9535_v32 = vunpack.i.l.bf16 %v16593_v31  ;;  %v6209_v24 = vld [vmem:[%s18438_s3 + $0xc48] sm:$0xff]  ;;  %s7649_s8 = sshll.u32 %s274_s9, 4  ;;  %s7650_s8 = int_to_ptr.vmem [resolvable:$true] %s7649_s8 }
 0x617   : > { %6970 = vmatpush2.msra.mxu1 %v6170_v48  ;;  %7041 = vmatpush1.msra.mxu0 %v6212_v11  ;;  %v5461_v60 = vsel %vm1872_vm14, %v19265_v23, %v9511_v30  ;;  %19266 = vst [vmem:[#allocation12_spill] sm:$0xff] %v17102_v3  ;;  %v17114_v48 = vsel %vm1468_vm6, %v5650_v18, %v5651_v33  ;;  %v19268_v30 = vunpack.i.h.bf16 %v16530_v37  ;;  %v9541_v23 = vunpack.i.h.bf16 %v16595_v55  ;;  %v6208_v55 = vld [vmem:[%s18438_s3 + $0xc40] sm:$0xff] }
 0x618   : > { %6971 = vmatprep.subr.mxu1 %v6169_v8  ;;  %7042 = vmatprep.subr.mxu0 %v6211_v35  ;;  %v6295_v8 = vld [vmem:[%s18438_s3 + $0xef8] sm:$0xff]  ;;  %v5020_v18 = vsel %vm1622_vm3, %v9580_v39, %v9585_v47  ;;  %v9536_v35 = vunpack.i.h.bf16 %v16593_v31  ;;  %v9556_v31 = vunpack.i.h.bf16 %v16650_v38  ;;  %v17149_v33 = vpop.f32.mrf.mxu1 }
 0x619   : > { %v17119_v11 = vsel %vm1822_vm12, %v5461_v60, %v19268_v30  ;;  %9813 = vrot.lane.b32.xlu1 %v16905_v58, %s9999_s15  ;;  %5432 = vrot.lane.b32.xlu0 %v15550_v0, %s9998_s14  ;;  %v19269_v0 = vunpack.i.l.bf16 %v16263_v4  ;;  %v5463_v47 = vsel %vm1872_vm14, %v9541_v23, %v9546_v25  ;;  %v9555_v30 = vunpack.i.l.bf16 %v16650_v38  ;;  %19270 = vst [vmem:[#allocation47_spill] sm:$0xff] %v17149_v33  ;;  %v6207_v38 = vld [vmem:[%s18438_s3 + $0xc38] sm:$0xff] }
 0x61a   : > { %6972 = vmatpush2.msra.mxu1 %v6168_v21  ;;  %7043 = vmatpush1.msra.mxu0 %v6210_v34  ;;  %v6294_v21 = vld [vmem:[%s18438_s3 + $0xef0] sm:$0xff]  ;;  %v9586_v25 = vunpack.i.h.bf16 %v16785_v15  ;;  %v9565_v15 = vunpack.i.l.bf16 %v16702_v16  ;;  %v19274_v33 = vunpack.i.h.bf16 %v16622_v59 }
 0x61b   : > { %v5004_v58 = vsel %vm1722_vm8, %v19269_v0, %v9575_v54  ;;  %6974 = vmatmul.mubr.f32.vlgmr.msra.gmra.mxu1 %v5634_v52  ;;  %7044 = vmatprep.subr.mxu0 %v6209_v24  ;;  %v17147_v34 = vpop.permute.xlu1 %9663  ;;  %v19271_v54 = vunpack.i.l.bf16 %v16503_v36  ;;  %v6293_v52 = vld [vmem:[%s18438_s3 + $0xee8] sm:$0xff]  ;;  %v5671_v24 = vrot.slane %v17107_v41, 3  ;;  %v5672_v0 = vrot.slane %v17119_v11, 3  ;;  %v17165_v60 = vpop.permute.xlu0 %9668 }
 0x61c   : > { %7135 = vmatprep.subr.mxu1 %v6295_v8  ;;  %6884 = vmatprep.mubr.f32.mxu0 %v5020_v18  ;;  %v9576_v8 = vunpack.i.h.bf16 %v16752_v46  ;;  %v5012_v18 = vsel %vm1672_vm5, %v5004_v58, %v9580_v39  ;;  %v19273_v41 = vunpack.i.l.bf16 %v16622_v59  ;;  %v5479_v3 = vsel %vm1822_vm12, %v5463_v47, %v19274_v33  ;;  %v6206_v46 = vld [vmem:[%s18438_s3 + $0xc30] sm:$0xff]  ;;  %v6205_v33 = vld [vmem:[%s18438_s3 + $0xc28] sm:$0xff] }
 0x61d   : > { %v17154_v10 = vsel %vm1922_vm1, %v9535_v32, %v19271_v54  ;;  %v9566_v32 = vunpack.i.h.bf16 %v16702_v16  ;;  %6979 = vmatprep.mubr.f32.mxu1 %v5655_v40  ;;  %7045 = vmatpush1.msra.mxu0 %v6208_v55  ;;  %v19272_v54 = vunpack.i.h.bf16 %v16503_v36  ;;  %v9581_v16 = vunpack.i.h.bf16 %v16736_v19  ;;  %v6292_v19 = vld [vmem:[%s18438_s3 + $0xee0] sm:$0xff]  ;;  %v17194_v55 = vpop.f32.mrf.mxu1 }
 0x61e   : > { %v5478_v11 = vsel %vm1822_vm12, %v5462_v42, %v19273_v41  ;;  %7136 = vmatpush1.msra.mxu1 %v6294_v21  ;;  %6885 = vmatmul.mubr.f32.gmra.mxu0 %v5012_v18  ;;  %v5446_v36 = vsel %vm1922_vm1, %v9555_v30, %v9540_v61  ;;  %v5447_v39 = vsel %vm1922_vm1, %v9556_v31, %v9541_v23  ;;  %v9561_v40 = vunpack.i.h.bf16 %v16652_v9  ;;  %v6291_v42 = vld [vmem:[%s18438_s3 + $0xed8] sm:$0xff]  ;;  %v6316_v31 = vld [vmem:[%s18439_s4] sm:$0x3] }
 0x61f   : > { %v5445_v37 = vsel %vm1922_vm1, %v9536_v35, %v19272_v54  ;;  %v9560_v35 = vunpack.i.l.bf16 %v16652_v9  ;;  %7046 = vmatprep.subr.mxu0 %v6207_v38  ;;  %7137 = vmatprep.subr.mxu1 %v6293_v52  ;;  %v18688_v61 = vunpack.i.h.bf16 %v16689_v45  ;;  %v18695_v23 = vunpack.i.l.bf16 %v16689_v45  ;;  %v6204_v21 = vld [vmem:[%s18438_s3 + $0xc20] sm:$0xff] }
 0x620   : > { %5434 = vrot.lane.b32.xlu1 %v15496_v13, %s9998_s14  ;;  %9818 = vrot.lane.b32.xlu0 %v17037_v5, %s19254_s23  ;;  %v5021_v58 = vsel %vm1622_vm3, %v9581_v16, %v9586_v25  ;;  %v5668_v47 = vrot.slane %v17154_v10, 3  ;;  %v5465_v13 = vsel %vm1872_vm14, %v9561_v40, %v9566_v32  ;;  %v19275_v10 = vunpack.i.h.bf16 %v16263_v4 }
 0x621   : > { %v5464_v30 = vsel %vm1872_vm14, %v9560_v35, %v9565_v15  ;;  %6890 = vmatprep.mubr.f32.mxu0 %v5021_v58  ;;  %7047 = vmatpush1.msra.mxu0 %v6206_v46  ;;  %v5669_v38 = vrot.slane %v5445_v37, 3  ;;  %v17222_v52 = vpop.permute.xlu1 %9673  ;;  %v6290_v15 = vld [vmem:[%s18438_s3 + $0xed0] sm:$0xff]  ;;  %v5689_v32 = vrot.slane %v5478_v11, 3  ;;  %v5690_v18 = vrot.slane %v5479_v3, 3  ;;  %v17227_v46 = vpop.permute.xlu0 %9678  ;;  %v6203_v37 = vld [vmem:[%s18438_s3 + $0xc18] sm:$0xff] }
 0x622   : > { %v5005_v25 = vsel %vm1722_vm8, %v19275_v10, %v9576_v8  ;;  %7138 = vmatpush1.msra.mxu1 %v6292_v19  ;;  %7048 = vmatprep.subr.mxu0 %v6205_v33  ;;  %v5686_v54 = vrot.slane %v5446_v36, 3  ;;  %v5687_v41 = vrot.slane %v5447_v39, 3  ;;  %v5673_v4 = vsel %vm1468_vm6, %v5671_v24, %v5672_v0  ;;  %v6289_v8 = vld [vmem:[%s18438_s3 + $0xec8] sm:$0xff]  ;;  %v17237_v19 = vpop.f32.mrf.mxu1  ;;  %v19276_v0 = vld [vmem:[#allocation74_spill] sm:$0xff] }
 0x623   : > { %6980 = vmatmul.mubr.f32.gmra.mxu1 %v17114_v48  ;;  %7139 = vmatprep.subr.mxu1 %v6291_v42  ;;  %v5480_v3 = vsel %vm1822_vm12, %v5464_v30, %v18695_v23  ;;  %v5481_v48 = vsel %vm1822_vm12, %v5465_v13, %v18688_v61  ;;  %v5013_v24 = vsel %vm1672_vm5, %v5005_v25, %v9581_v16  ;;  %v19277_v11 = vsub.s32 0, %v19276_v0  ;;  %v6202_v58 = vld [vmem:[%s18438_s3 + $0xc10] sm:$0xff]  ;;  %v6288_v42 = vld [vmem:[%s18438_s3 + $0xec0] sm:$0xff]  ;;  %v6201_v30 = vld [vmem:[%s18438_s3 + $0xc08] sm:$0xff] }
 0x624   : > { %6985 = vmatprep.mubr.f32.mxu1 %v5673_v4  ;;  %7049 = vmatpush1.msra.mxu0 %v6204_v21  ;;  %v19278_v39 = vsub.s32 1, %v19276_v0  ;;  %v5670_v16 = vsel %vm1468_vm6, %v5668_v47, %v5669_v38  ;;  %v17266_v13 = vsel %vm1468_vm6, %v5686_v54, %v5687_v41  ;;  %v9591_v10 = vunpack.i.h.bf16 %v16773_v63  ;;  %v6287_v47 = vld [vmem:[%s18438_s3 + $0xeb8] sm:$0xff] }
 0x625   : > { %v17248_v36 = vrot.slane %v6316_v31, %v19277_v11  ;;  %7140 = vmatpush1.msra.mxu1 %v6290_v15  ;;  %6891 = vmatmul.mubr.f32.gmra.mxu0 %v5013_v24  ;;  %v9590_v25 = vunpack.i.l.bf16 %v16773_v63  ;;  %v5707_v38 = vrot.slane %v5480_v3, 3  ;;  %v5708_v15 = vrot.slane %v5481_v48, 3  ;;  %v6263_v3 = vld [vmem:[%s18438_s3 + $0xdf8] sm:$0xff]  ;;  %v6285_v48 = vld [vmem:[%s18438_s3 + $0xea8] sm:$0xff] }
 0x626   : > { %v17252_v33 = vrot.slane %v6316_v31, %v19278_v39  ;;  %7050 = vmatprep.subr.mxu0 %v6203_v37  ;;  %7141 = vmatprep.subr.mxu1 %v6289_v8  ;;  %v5691_v31 = vsel %vm1468_vm6, %v5689_v32, %v5690_v18  ;;  %v17268_v21 = vpop.f32.mrf.mxu1  ;;  %v9596_v18 = vunpack.i.h.bf16 %v16811_v62  ;;  %v9595_v54 = vunpack.i.l.bf16 %v16811_v62 }
 0x627   : > { %9823 = vrot.lane.b32.xlu1 %v17037_v5, %s9999_s15  ;;  %5436 = vrot.lane.b32.xlu0 %v15554_v22, %s9998_s14  ;;  %v17279_v32 = vpop.permute.xlu1 %9683  ;;  %v9601_v63 = vunpack.i.h.bf16 %v16804_v44  ;;  %v9600_v41 = vunpack.i.l.bf16 %v16804_v44  ;;  %v6200_v22 = vld [vmem:[%s18438_s3 + $0xc00] sm:$0xff]  ;;  %v6286_v5 = vld [vmem:[%s18438_s3 + $0xeb0] sm:$0xff]  ;;  %v17291_v4 = vpop.permute.xlu0 %9688  ;;  %v18693_v37 = vunpack.i.h.bf16 %v16848_v2  ;;  %v18694_v62 = vunpack.i.l.bf16 %v16848_v2  ;;  %s7751_s15 = sshll.u32 %s10064_s28, 7  ;;  %s10002_s28 = smov [#allocation3]  }
 0x628   : > { %7051 = vmatpush1.msra.mxu0 %v6202_v58  ;;  %7142 = vmatpush1.msra.mxu1 %v6288_v42  ;;  %v9611_v8 = vunpack.i.h.bf16 %v16840_v51  ;;  %v9610_v44 = vunpack.i.l.bf16 %v16840_v51  ;;  %v17303_v24 = vpop.f32.mrf.mxu1  ;;  %v9616_v0 = vunpack.i.h.bf16 %v16874_v50  ;;  %v9615_v11 = vunpack.i.l.bf16 %v16874_v50  ;;  %v6262_v58 = vld [vmem:[%s18438_s3 + $0xdf0] sm:$0xff]  ;;  %v6251_v50 = vld [vmem:[%s18438_s3 + $0xd98] sm:$0xff]  ;;  %s9894_s21 = sshll.u32 %s10002_s28, 4  ;;  %s9895_s21 = int_to_ptr.vmem [resolvable:$false] %s9894_s21 }
 0x629   : > { %6986 = vmatmul.mubr.f32.gmra.mxu1 %v5670_v16  ;;  %7052 = vmatprep.subr.mxu0 %v6201_v30  ;;  %v9621_v39 = vunpack.i.h.bf16 %v16876_v49  ;;  %v9620_v51 = vunpack.i.l.bf16 %v16876_v49  ;;  %v5448_v42 = vsel %vm1922_vm1, %v9590_v25, %v9560_v35  ;;  %v6284_v16 = vld [vmem:[%s18438_s3 + $0xea0] sm:$0xff]  ;;  %v6261_v30 = vld [vmem:[%s18438_s3 + $0xde8] sm:$0xff]  ;;  %v18689_v49 = vunpack.i.h.bf16 %v16910_v26  ;;  %s9896_s23 = scalar_lea.vmem %s9895_s21, 256  ;;  %p9897_p0 = scmp.lt.s32.totalorder %s7650_s8, %s9895_s21 }
 0x62a   : > { %7143 = vmatprep.subr.mxu1 %v6287_v47  ;;  %6991 = vmatprep.mubr.f32.mxu1 %v5691_v31  ;;  %v18690_v31 = vunpack.i.l.bf16 %v16910_v26  ;;  %v5709_v47 = vsel %vm1468_vm6, %v5707_v38, %v5708_v15  ;;  %v5449_v35 = vsel %vm1922_vm1, %v9591_v10, %v9561_v40  ;;  %v5467_v25 = vsel %vm1872_vm14, %v9596_v18, %v9601_v63  ;;  %v6260_v10 = vld [vmem:[%s18438_s3 + $0xde0] sm:$0xff]  ;;  %v17348_v15 = vpop.f32.mrf.mxu1 }
 0x62b   : > { %7053 = vmatpush1.msra.mxu0 %v6200_v22  ;;  %7144 = vmatpush1.msra.mxu1 %v6286_v5  ;;  %v5466_v22 = vsel %vm1872_vm14, %v9595_v54, %v9600_v41  ;;  %v6283_v5 = vld [vmem:[%s18438_s3 + $0xe98] sm:$0xff]  ;;  %v5483_v9 = vsel %vm1822_vm12, %v5467_v25, %v18693_v37  ;;  %v17339_v40 = vsel %vm1922_vm1, %v9611_v8, %v9596_v18 }
 0x62c   : > { %7054 = vmatprep.subr.mxu0 %v6263_v3  ;;  %7145 = vmatprep.subr.mxu1 %v6285_v48  ;;  %v5482_v61 = vsel %vm1822_vm12, %v5466_v22, %v18694_v62  ;;  %v5450_v63 = vsel %vm1922_vm1, %v9610_v44, %v9595_v54  ;;  %v5469_v41 = vsel %vm1872_vm14, %v9616_v0, %v9621_v39  ;;  %v6259_v8 = vld [vmem:[%s18438_s3 + $0xdd8] sm:$0xff]  ;;  %v6281_v48 = vld [vmem:[%s18438_s3 + $0xe88] sm:$0xff]  ;;  %v6258_v39 = vld [vmem:[%s18438_s3 + $0xdd0] sm:$0xff]  ;;  %v5726_v25 = vrot.slane %v5483_v9, 3 }
 0x62d   : > { %5438 = vrot.lane.b32.xlu1 %v19261_v56, %s9998_s14  ;;  %7055 = vmatpush2.msra.mxu0 %v6262_v58  ;;  %v17346_v38 = vpop.permute.xlu1 %9693  ;;  %v5468_v18 = vsel %vm1872_vm14, %v9615_v11, %v9620_v51  ;;  %v6282_v56 = vld [vmem:[%s18438_s3 + $0xe90] sm:$0xff]  ;;  %v17363_v3 = vpop.permute.xlu0 %5408  ;;  %v5485_v44 = vsel %vm1822_vm12, %v5469_v41, %v18689_v49  ;;  %v5704_v51 = vrot.slane %v5448_v42, 3  ;;  %v5705_v58 = vrot.slane %v5449_v35, 3  ;;  %v6279_v42 = vld [vmem:[%s18438_s3 + $0xe78] sm:$0xff]  ;;  %v6256_v9 = vld [vmem:[%s18438_s3 + $0xdc0] sm:$0xff]  ;;  %s19327_s14 = smov 112  }
 0x62e   : > { %7146 = vmatpush1.msra.mxu1 %v6284_v16  ;;  %7056 = vmatprep.subr.mxu0 %v6261_v30  ;;  %v5484_v54 = vsel %vm1822_vm12, %v5468_v18, %v18690_v31  ;;  %v6257_v16 = vld [vmem:[%s18438_s3 + $0xdc8] sm:$0xff]  ;;  %v5725_v30 = vrot.slane %v5482_v61, 3  ;;  %v9630_v22 = vunpack.i.l.bf16 %v16920_v57  ;;  %v5723_v35 = vrot.slane %v17339_v40, 3 }
 0x62f   : > { %6992 = vmatmul.mubr.f32.gmra.mxu1 %v17266_v13  ;;  %7147 = vmatprep.subr.mxu1 %v6283_v5  ;;  %v6280_v13 = vld [vmem:[%s18438_s3 + $0xe80] sm:$0xff]  ;;  %v17389_v5 = vpop.f32.mrf.mxu1  ;;  %v6413_v61 = vadd.f32 %v16882_v6, %v17252_v33  ;;  %v5743_v41 = vrot.slane %v5484_v54, 3  ;;  %v5744_v18 = vrot.slane %v5485_v44, 3  ;;  %v5706_v40 = vsel %vm1468_vm6, %v5704_v51, %v5705_v58  ;;  %v6278_v6 = vld [vmem:[%s18438_s3 + $0xe70] sm:$0xff] }
 0x630   : > { %6997 = vmatprep.mubr.f32.mxu1 %v5709_v47  ;;  %7057 = vmatpush2.msra.mxu0 %v6260_v10  ;;  %v5722_v47 = vrot.slane %v5450_v63, 3  ;;  %v6411_v10 = vadd.f32 %v16853_v43, %v17248_v36  ;;  %v6417_v63 = vadd.f32 %v16912_v7, %v17248_v36  ;;  %v9635_v43 = vunpack.i.l.bf16 %v16953_v29 }
 0x631   : > { %7148 = vmatpush1.msra.mxu1 %v6282_v56  ;;  %7058 = vmatprep.subr.mxu0 %v6259_v8  ;;  %v9640_v56 = vunpack.i.l.bf16 %v16971_v14  ;;  %v6255_v8 = vld [vmem:[%s18438_s3 + $0xdb8] sm:$0xff]  ;;  %v5727_v7 = vsel %vm1468_vm6, %v5725_v30, %v5726_v25  ;;  %v9646_v51 = vunpack.i.h.bf16 %v17024_v53  ;;  %v9645_v58 = vunpack.i.l.bf16 %v17024_v53  ;;  %v6276_v30 = vld [vmem:[%s18438_s3 + $0xe60] sm:$0xff] }
 0x632   : > { %7149 = vmatprep.subr.mxu1 %v6281_v48  ;;  %7059 = vmatpush2.msra.mxu0 %v6258_v39  ;;  %v6277_v48 = vld [vmem:[%s18438_s3 + $0xe68] sm:$0xff]  ;;  %v6254_v39 = vld [vmem:[%s18438_s3 + $0xdb0] sm:$0xff]  ;;  %v5724_v25 = vsel %vm1468_vm6, %v5722_v47, %v5723_v35  ;;  %v19279_v53 = vunpack.i.l.bf16 %v16352_v1  ;;  %v5745_v47 = vsel %vm1468_vm6, %v5743_v41, %v5744_v18  ;;  %v9656_v35 = vunpack.i.h.bf16 %v17078_v20 }
 0x633   : > { %7150 = vmatpush1.msra.mxu1 %v6280_v13  ;;  %7060 = vmatprep.subr.mxu0 %v6257_v16  ;;  %v17409_v54 = vpop.permute.xlu1 %5410  ;;  %v6523_v44 = vpop.f32.mrf.mxu1  ;;  %v9641_v31 = vunpack.i.h.bf16 %v16971_v14  ;;  %v5452_v41 = vsel %vm1922_vm1, %v9645_v58, %v9615_v11  ;;  %v6252_v14 = vld [vmem:[%s18438_s3 + $0xda0] sm:$0xff] }
 0x634   : > { %6998 = vmatmul.mubr.f32.gmra.mxu1 %v5706_v40  ;;  %7151 = vmatprep.subr.mxu1 %v6279_v42  ;;  %v17420_v13 = vpop.permute.xlu0 %9698  ;;  %v17422_v16 = vadd.f32 %v6523_v44, %v6411_v10  ;;  %v6419_v42 = vadd.f32 %v16938_v27, %v17252_v33  ;;  %v6253_v40 = vld [vmem:[%s18438_s3 + $0xda8] sm:$0xff]  ;;  %v5006_v10 = vsel %vm1722_vm8, %v19279_v53, %v9630_v22  ;;  %v9655_v44 = vunpack.i.l.bf16 %v17078_v20 }
 0x635   : > { %7003 = vmatprep.mubr.f32.mxu1 %v5727_v7  ;;  %7061 = vmatpush2.msra.mxu0 %v6256_v9  ;;  %v6525_v49 = vpop.f32.mrf.mxu1  ;;  %v9636_v27 = vunpack.i.h.bf16 %v16953_v29  ;;  %v6275_v9 = vld [vmem:[%s18438_s3 + $0xe58] sm:$0xff]  ;;  %v9651_v22 = vunpack.i.h.bf16 %v17033_v17  ;;  %v9650_v53 = vunpack.i.l.bf16 %v17033_v17  ;;  %v5453_v20 = vsel %vm1922_vm1, %v9646_v51, %v9616_v0  ;;  %v6268_v29 = vld [vmem:[%s18438_s3 + $0xe20] sm:$0xff]  ;;  %v6266_v17 = vld [vmem:[%s18438_s3 + $0xe10] sm:$0xff] }
 0x636   : > { %7152 = vmatpush1.msra.mxu1 %v6278_v6  ;;  %7062 = vmatprep.subr.mxu0 %v6255_v8  ;;  %v17443_v7 = vadd.f32 %v6525_v49, %v6413_v61  ;;  %v5022_v6 = vsel %vm1622_vm3, %v9635_v43, %v9640_v56  ;;  %v6274_v49 = vld [vmem:[%s18438_s3 + $0xe50] sm:$0xff]  ;;  %v18692_v61 = vunpack.i.l.bf16 %v17085_v12  ;;  %v5014_v11 = vsel %vm1672_vm5, %v5006_v10, %v9635_v43  ;;  %v6273_v43 = vld [vmem:[%s18438_s3 + $0xe48] sm:$0xff] }
 0x637   : > { %7153 = vmatprep.subr.mxu1 %v6277_v48  ;;  %7063 = vmatpush2.msra.mxu0 %v6254_v39  ;;  %v6529_v8 = vpop.f32.mrf.mxu1  ;;  %v5470_v0 = vsel %vm1872_vm14, %v9650_v53, %v9655_v44  ;;  %v18691_v56 = vunpack.i.h.bf16 %v17085_v12  ;;  %v5471_v51 = vsel %vm1872_vm14, %v9651_v22, %v9656_v35  ;;  %v5740_v10 = vrot.slane %v5452_v41, 3 }
 0x638   : > { %7154 = vmatpush1.msra.mxu1 %v6276_v30  ;;  %7064 = vmatprep.subr.mxu0 %v6253_v40  ;;  %v17462_v18 = vadd.f32 %v6529_v8, %v6417_v63  ;;  %v9631_v63 = vunpack.i.h.bf16 %v16920_v57  ;;  %v17481_v58 = vpop.permute.xlu0 %9708  ;;  %v6250_v57 = vld [vmem:[%s18438_s3 + $0xd90] sm:$0xff]  ;;  %v6272_v40 = vld [vmem:[%s18438_s3 + $0xe40] sm:$0xff]  ;;  %v5741_v44 = vrot.slane %v5453_v20, 3  ;;  %v9665_v35 = vunpack.i.l.bf16 %v17147_v34 }
 0x639   : > { %7004 = vmatmul.mubr.f32.gmra.mxu1 %v5724_v25  ;;  %7155 = vmatprep.subr.mxu1 %v6275_v9  ;;  %v17472_v48 = vpop.permute.xlu1 %9703  ;;  %v6531_v39 = vpop.f32.mrf.mxu1  ;;  %v6423_v25 = vadd.f32 %v16955_v28, %v17248_v36  ;;  %v6249_v28 = vld [vmem:[%s18438_s3 + $0xd88] sm:$0xff]  ;;  %v6271_v9 = vld [vmem:[%s18438_s3 + $0xe38] sm:$0xff]  ;;  %v19280_v8 = vld [vmem:[#allocation6_spill] sm:$0xff] }
 0x63a   : > { %6896 = vmatprep.mubr.f32.mxu0 %v5022_v6  ;;  %7009 = vmatprep.mubr.f32.mxu1 %v5745_v47  ;;  %v17483_v30 = vadd.f32 %v6531_v39, %v6419_v42  ;;  %v5023_v42 = vsel %vm1622_vm3, %v9636_v27, %v9641_v31  ;;  %v17505_v47 = vsel %vm1822_vm12, %v5470_v0, %v18692_v61  ;;  %v6248_v20 = vld [vmem:[%s18438_s3 + $0xd80] sm:$0xff]  ;;  %v19282_v39 = vld [vmem:[#allocation46_spill] sm:$0xff]  ;;  %v18696_v61 = vunpack.i.l.bf16 %v17420_v13 }
 0x63b   : > { %7065 = vmatpush2.msra.mxu0 %v6252_v14  ;;  %7156 = vmatpush1.msra.mxu1 %v6274_v49  ;;  %v6425_v41 = vadd.f32 %v19280_v8, %v17252_v33  ;;  %v5487_v31 = vsel %vm1822_vm12, %v5471_v51, %v18691_v56  ;;  %v6270_v14 = vld [vmem:[%s18438_s3 + $0xe30] sm:$0xff]  ;;  %v9666_v49 = vunpack.i.h.bf16 %v17147_v34  ;;  %v19283_v51 = vunpack.i.h.bf16 %v16352_v1  ;;  %v6247_v8 = vld [vmem:[%s18438_s3 + $0xd78] sm:$0xff] }
 0x63c   : > { %6897 = vmatmul.mubr.f32.gmra.mxu0 %v5014_v11  ;;  %7066 = vmatprep.subr.mxu0 %v6251_v50  ;;  %v6535_v6 = vpop.f32.mrf.mxu1  ;;  %v19281_v50 = vld [vmem:[#allocation108_spill] sm:$0xff]  ;;  %v9675_v34 = vunpack.i.l.bf16 %v17222_v52  ;;  %v6246_v1 = vld [vmem:[%s18438_s3 + $0xd70] sm:$0xff]  ;;  %v6239_v56 = vld [vmem:[%s18438_s3 + $0xd38] sm:$0xff]  ;;  %v9705_v62 = vunpack.i.l.bf16 %v17472_v48 }
 0x63d   : > { %7157 = vmatprep.subr.mxu1 %v6273_v43  ;;  %6902 = vmatprep.mubr.f32.mxu0 %v5023_v42  ;;  %v17520_v11 = vadd.f32 %v6535_v6, %v6423_v25  ;;  %v6429_v0 = vadd.f32 %v19281_v50, %v17248_v36  ;;  %v6431_v43 = vadd.f32 %v19282_v39, %v17252_v33 }
 0x63e   : > { %7067 = vmatpush2.msra.mxu0 %v6250_v57  ;;  %7158 = vmatpush1.msra.mxu1 %v6272_v40  ;;  %v5007_v42 = vsel %vm1722_vm8, %v19283_v51, %v9631_v63  ;;  %v6537_v25 = vpop.f32.mrf.mxu1  ;;  %v6269_v57 = vld [vmem:[%s18438_s3 + $0xe28] sm:$0xff]  ;;  %v5742_v63 = vsel %vm1468_vm6, %v5740_v10, %v5741_v44  ;;  %v5761_v40 = vrot.slane %v17505_v47, 3  ;;  %v17557_v10 = vsel %vm1922_vm1, %v9665_v35, %v9650_v53 }
 0x63f   : > { %7068 = vmatprep.subr.mxu0 %v6249_v28  ;;  %7159 = vmatprep.subr.mxu1 %v6271_v9  ;;  %v5015_v6 = vsel %vm1672_vm5, %v5007_v42, %v9636_v27  ;;  %v17544_v50 = vpop.permute.xlu1 %9713  ;;  %v17546_v28 = vadd.f32 %v6537_v25, %v6425_v41  ;;  %v6245_v27 = vld [vmem:[%s18438_s3 + $0xd68] sm:$0xff]  ;;  %v9671_v44 = vunpack.i.h.bf16 %v17165_v60  ;;  %v9670_v9 = vunpack.i.l.bf16 %v17165_v60  ;;  %v17561_v41 = vpop.permute.xlu0 %5412  ;;  %v19284_v60 = vld [vmem:[#allocation12_spill] sm:$0xff]  ;;  %v6243_v25 = vld [vmem:[%s18438_s3 + $0xd58] sm:$0xff] }
 0x640   : > { %7069 = vmatpush2.msra.mxu0 %v6248_v20  ;;  %7160 = vmatpush1.msra.mxu1 %v6270_v14  ;;  %v5762_v47 = vrot.slane %v5487_v31, 3  ;;  %v6541_v20 = vpop.f32.mrf.mxu1  ;;  %v6267_v14 = vld [vmem:[%s18438_s3 + $0xe18] sm:$0xff]  ;;  %v5455_v39 = vsel %vm1922_vm1, %v9666_v49, %v9651_v22  ;;  %v9676_v53 = vunpack.i.h.bf16 %v17222_v52  ;;  %v9680_v35 = vunpack.i.l.bf16 %v17227_v46  ;;  %v6244_v42 = vld [vmem:[%s18438_s3 + $0xd60] sm:$0xff] }
 0x641   : > { %6903 = vmatmul.mubr.f32.gmra.mxu0 %v5015_v6  ;;  %7070 = vmatprep.subr.mxu0 %v6247_v8  ;;  %v17571_v51 = vadd.f32 %v6541_v20, %v6429_v0  ;;  %v6435_v31 = vadd.f32 %v19284_v60, %v17248_v36  ;;  %v5504_v22 = vsel %vm1722_vm8, %v9670_v9, %v9675_v34  ;;  %v19285_v49 = vld [vmem:[#allocation47_spill] sm:$0xff]  ;;  %v6265_v6 = vld [vmem:[%s18438_s3 + $0xe08] sm:$0xff]  ;;  %v6242_v34 = vld [vmem:[%s18438_s3 + $0xd50] sm:$0xff]  ;;  %v5759_v20 = vrot.slane %v5455_v39, 3 }
 0x642   : > { %7161 = vmatprep.subr.mxu1 %v6269_v57  ;;  %7071 = vmatpush2.msra.mxu0 %v6246_v1  ;;  %v6543_v52 = vpop.f32.mrf.mxu1  ;;  %v6437_v0 = vadd.f32 %v19285_v49, %v17252_v33  ;;  %v17586_v8 = vadd.f32 %v17194_v55, %v17248_v36  ;;  %v6264_v55 = vld [vmem:[%s18438_s3 + $0xe00] sm:$0xff]  ;;  %v18698_v1 = vunpack.i.h.bf16 %v17227_v46  ;;  %v19286_v60 = vld [vmem:[#allocation59_spill] sm:$0xff]  ;;  %v9691_v49 = vunpack.i.h.bf16 %v17291_v4 }
 0x643   : > { %7162 = vmatpush1.msra.mxu1 %v6268_v29  ;;  %7072 = vmatprep.subr.mxu0 %v6245_v27  ;;  %v17594_v57 = vadd.f32 %v6543_v52, %v6431_v43  ;;  %v5763_v29 = vsel %vm1468_vm6, %v5761_v40, %v5762_v47  ;;  %v5758_v27 = vrot.slane %v17557_v10, 3  ;;  %v19287_v43 = vunpack.i.h.bf16 %v19286_v60  ;;  %v6315_v52 = vld [vmem:[%s18438_s3 + $0xf98] sm:$0xff]  ;;  %v6240_v39 = vld [vmem:[%s18438_s3 + $0xd40] sm:$0xff] }
 0x644   : > { %7010 = vmatmul.mubr.f32.gmra.mxu1 %v5742_v63  ;;  %7163 = vmatprep.subr.mxu1 %v6267_v14  ;;  %v6241_v14 = vld [vmem:[%s18438_s3 + $0xd48] sm:$0xff]  ;;  %v5505_v40 = vsel %vm1722_vm8, %v9671_v44, %v9676_v53  ;;  %v17620_v10 = vsel %vm1672_vm5, %v5504_v22, %v9680_v35 }
 0x645   : > { %v17608_v63 = vsel %vm1772_vm10, %v19287_v43, %v9671_v44  ;;  %7073 = vmatpush2.msra.mxu0 %v6244_v42  ;;  %7164 = vmatpush1.msra.mxu1 %v6266_v17  ;;  %v17622_v47 = vpop.permute.xlu1 %5414  ;;  %v9686_v42 = vunpack.i.h.bf16 %v17279_v32  ;;  %v9685_v17 = vunpack.i.l.bf16 %v17279_v32  ;;  %v9690_v44 = vunpack.i.l.bf16 %v17291_v4  ;;  %v17631_v53 = vpop.permute.xlu0 %9718  ;;  %v6306_v32 = vld [vmem:[%s18438_s3 + $0xf50] sm:$0xff] }
 0x646   : > { %7074 = vmatprep.subr.mxu0 %v6243_v25  ;;  %7165 = vmatprep.subr.mxu1 %v6265_v6  ;;  %v6547_v22 = vpop.f32.mrf.mxu1  ;;  %v19288_v43 = vunpack.i.l.bf16 %v19286_v60  ;;  %v6314_v6 = vld [vmem:[%s18438_s3 + $0xf90] sm:$0xff]  ;;  %v18697_v4 = vunpack.i.h.bf16 %v17420_v13  ;;  %v5760_v60 = vsel %vm1468_vm6, %v5758_v27, %v5759_v20  ;;  %v9710_v27 = vunpack.i.l.bf16 %v17481_v58 }
 0x647   : > { %7075 = vmatpush2.msra.mxu0 %v6242_v34  ;;  %7166 = vmatpush1.msra.mxu1 %v6264_v55  ;;  %v17646_v37 = vadd.f32 %v6547_v22, %v6435_v31  ;;  %v6313_v34 = vld [vmem:[%s18438_s3 + $0xf88] sm:$0xff]  ;;  %v6238_v55 = vld [vmem:[%s18438_s3 + $0xd30] sm:$0xff]  ;;  %v5641_v31 = vrot.slane %v17620_v10, 3  ;;  %v5507_v10 = vsel %vm1722_vm8, %v9686_v42, %v9691_v49  ;;  %v5639_v23 = vrot.slane %v17608_v63, 3  ;;  %v6308_v63 = vld [vmem:[%s18438_s3 + $0xf60] sm:$0xff] }
 0x648   : > { %v17636_v25 = vsel %vm1772_vm10, %v19288_v43, %v9670_v9  ;;  %7076 = vmatprep.subr.mxu0 %v6241_v14  ;;  %7179 = vmatprep.subr.mxu1 %v6315_v52  ;;  %v17651_v9 = vsel %vm1672_vm5, %v5505_v40, %v18698_v1  ;;  %v9711_v14 = vunpack.i.h.bf16 %v17481_v58  ;;  %v6549_v52 = vpop.f32.mrf.mxu1  ;;  %v6312_v40 = vld [vmem:[%s18438_s3 + $0xf80] sm:$0xff]  ;;  %v6237_v22 = vld [vmem:[%s18438_s3 + $0xd28] sm:$0xff]  ;;  %v9706_v43 = vunpack.i.h.bf16 %v17472_v48 }
 0x649   : > { %7015 = vmatprep.mubr.f32.mxu1 %v5763_v29  ;;  %7077 = vmatpush2.msra.mxu0 %v6240_v39  ;;  %v17671_v20 = vadd.f32 %v6549_v52, %v6437_v0  ;;  %v6311_v29 = vld [vmem:[%s18438_s3 + $0xf78] sm:$0xff]  ;;  %v5506_v39 = vsel %vm1722_vm8, %v9685_v17, %v9690_v44  ;;  %v18699_v48 = vunpack.i.h.bf16 %v17631_v53  ;;  %v9720_v58 = vunpack.i.l.bf16 %v17631_v53 }
 0x64a   : > { %7180 = vmatpush2.msra.mxu1 %v6314_v6  ;;  %7078 = vmatprep.subr.mxu0 %v6239_v56  ;;  %v6553_v0 = vpop.f32.mrf.mxu1  ;;  %v6236_v56 = vld [vmem:[%s18438_s3 + $0xd20] sm:$0xff]  ;;  %v6310_v6 = vld [vmem:[%s18438_s3 + $0xf70] sm:$0xff]  ;;  %v5642_v49 = vrot.slane %v17651_v9, 3  ;;  %v5522_v44 = vsel %vm1672_vm5, %v5506_v39, %v18696_v61  ;;  %v5523_v52 = vsel %vm1672_vm5, %v5507_v10, %v18697_v4  ;;  %v6235_v9 = vld [vmem:[%s18438_s3 + $0xd18] sm:$0xff]  ;;  %v5648_v61 = vrot.slane %v17409_v54, 3 }
 0x64b   : > { %7181 = vmatprep.subr.mxu1 %v6313_v34  ;;  %7079 = vmatpush2.msra.mxu0 %v6238_v55  ;;  %v17697_v34 = vpop.permute.xlu1 %9723  ;;  %v17700_v55 = vadd.f32 %v6553_v0, %v17586_v8  ;;  %v6309_v39 = vld [vmem:[%s18438_s3 + $0xf68] sm:$0xff]  ;;  %v5638_v4 = vrot.slane %v17636_v25, 3  ;;  %v6234_v8 = vld [vmem:[%s18438_s3 + $0xd10] sm:$0xff]  ;;  %v5508_v54 = vsel %vm1722_vm8, %v9705_v62, %v9710_v27  ;;  %v5660_v0 = vrot.slane %v5523_v52, 3 }
 0x64c   : > { %7182 = vmatpush2.msra.mxu1 %v6312_v40  ;;  %7080 = vmatprep.subr.mxu0 %v6237_v22  ;;  %v17710_v10 = vpop.permute.xlu0 %9728  ;;  %v5647_v40 = vrot.slane %v17363_v3, 3  ;;  %v5509_v22 = vsel %vm1722_vm8, %v9706_v43, %v9711_v14  ;;  %v6233_v25 = vld [vmem:[%s18438_s3 + $0xd08] sm:$0xff]  ;;  %v5524_v3 = vsel %vm1672_vm5, %v5508_v54, %v9720_v58  ;;  %v9695_v52 = vunpack.i.l.bf16 %v17346_v38 }
 0x64d   : > { %7016 = vmatmul.mubr.f32.gmra.mxu1 %v5760_v60  ;;  %7183 = vmatprep.subr.mxu1 %v6311_v29  ;;  %v6307_v60 = vld [vmem:[%s18438_s3 + $0xf58] sm:$0xff]  ;;  %v5659_v29 = vrot.slane %v5522_v44, 3  ;;  %v5525_v14 = vsel %vm1672_vm5, %v5509_v22, %v18699_v48  ;;  %v19289_v27 = vld [vmem:[#allocation73_spill] sm:$0xff]  ;;  %v6232_v22 = vld [vmem:[%s18438_s3 + $0xd00] sm:$0xff]  ;;  %v5643_v54 = vsel %vm1468_vm6, %v5641_v31, %v5642_v49  ;;  %v9716_v31 = vunpack.i.h.bf16 %v17544_v50 }
 0x64e   : > { %7081 = vmatpush2.msra.mxu0 %v6236_v56  ;;  %7184 = vmatpush2.msra.mxu1 %v6310_v6  ;;  %v19290_v56 = vunpack.i.l.bf16 %v19289_v27  ;;  %v19291_v1 = vunpack.i.h.bf16 %v19289_v27  ;;  %v19292_v27 = vld [vmem:[#allocation7_spill] sm:$0xff]  ;;  %v9715_v49 = vunpack.i.l.bf16 %v17544_v50  ;;  %v17777_v50 = vsel %vm1622_vm3, %v9680_v35, %v9695_v52  ;;  %v6302_v35 = vld [vmem:[%s18438_s3 + $0xf30] sm:$0xff] }
 0x64f   : > { %7082 = vmatprep.subr.mxu0 %v6235_v9  ;;  %7185 = vmatprep.subr.mxu1 %v6309_v39  ;;  %v19294_v9 = vunpack.i.h.bf16 %v19292_v27  ;;  %v19296_v52 = vunpack.i.l.bf16 %v17420_v13 }
 0x650   : > { %v5490_v6 = vsel %vm1772_vm10, %v19290_v56, %v9685_v17  ;;  %v5491_v44 = vsel %vm1772_vm10, %v19291_v1, %v9686_v42  ;;  %7083 = vmatpush2.msra.mxu0 %v6234_v8  ;;  %7186 = vmatpush2.msra.mxu1 %v6308_v63  ;;  %v9696_v17 = vunpack.i.h.bf16 %v17346_v38  ;;  %v19293_v1 = vunpack.i.l.bf16 %v19292_v27  ;;  %v6305_v38 = vld [vmem:[%s18438_s3 + $0xf48] sm:$0xff] }
 0x651   : > { %v5493_v39 = vsel %vm1772_vm10, %v19294_v9, %v9706_v43  ;;  %v5649_v56 = vsel %vm1468_vm6, %v5647_v40, %v5648_v61  ;;  %7084 = vmatprep.subr.mxu0 %v6233_v25  ;;  %7187 = vmatprep.subr.mxu1 %v6307_v60  ;;  %v5677_v8 = vrot.slane %v5524_v3, 3  ;;  %v5678_v63 = vrot.slane %v5525_v14, 3  ;;  %v17765_v48 = vpop.permute.xlu1 %9733  ;;  %v6304_v43 = vld [vmem:[%s18438_s3 + $0xf40] sm:$0xff]  ;;  %v6303_v60 = vld [vmem:[%s18438_s3 + $0xf38] sm:$0xff]  ;;  %v17818_v9 = vpop.f32.mrf.mxu1 }
 0x652   : > { %v5492_v42 = vsel %vm1772_vm10, %v19293_v1, %v9705_v62  ;;  %v5656_v62 = vrot.slane %v5490_v6, 3  ;;  %v5657_v27 = vrot.slane %v5491_v44, 3  ;;  %7085 = vmatpush2.msra.mxu0 %v6232_v22  ;;  %7086 = vmatprep.mubr.f32.mxu0 %v5643_v54  ;;  %v5640_v61 = vsel %vm1468_vm6, %v5638_v4, %v5639_v23  ;;  %v17772_v25 = vpop.permute.xlu0 %5416 }
 0x653   : > { %v5661_v40 = vsel %vm1468_vm6, %v5659_v29, %v5660_v0  ;;  %7188 = vmatpush2.msra.mxu1 %v6306_v32  ;;  %7087 = vmatmul.mubr.f32.vlgmr.msra.gmra.mxu0 %v5640_v61  ;;  %v5674_v23 = vrot.slane %v5492_v42, 3  ;;  %v5675_v4 = vrot.slane %v5493_v39, 3  ;;  %v9725_v3 = vunpack.i.l.bf16 %v17697_v34  ;;  %v6299_v39 = vld [vmem:[%s18438_s3 + $0xf18] sm:$0xff] }
 0x654   : > { %v19295_v14 = vunpack.i.h.bf16 %v17227_v46  ;;  %7189 = vmatprep.subr.mxu1 %v6305_v38  ;;  %7740 = vmatprep.mubr.msk.f32.mxu1 %vm1922_vm1, %v5649_v56  ;;  %v6447_v0 = vadd.f32 %v17268_v21, %v17248_v36  ;;  %v6449_v6 = vadd.f32 %v17303_v24, %v17252_v33  ;;  %v9726_v44 = vunpack.i.h.bf16 %v17697_v34  ;;  %v6301_v46 = vld [vmem:[%s18438_s3 + $0xf28] sm:$0xff] }
 0x655   : > { %7190 = vmatpush2.msra.mxu1 %v6304_v43  ;;  %7092 = vmatprep.mubr.f32.mxu0 %v5661_v40  ;;  %v17803_v22 = vsel %vm1622_vm3, %v19296_v52, %v9715_v49  ;;  %v19297_v54 = vunpack.i.h.bf16 %v17420_v13  ;;  %v5679_v24 = vsel %vm1468_vm6, %v5677_v8, %v5678_v63  ;;  %v5644_v34 = vrot.slane %v17777_v50, 3  ;;  %v6297_v50 = vld [vmem:[%s18438_s3 + $0xf08] sm:$0xff] }
 0x656   : > { %v17786_v29 = vsel %vm1622_vm3, %v19295_v14, %v9696_v17  ;;  %7191 = vmatprep.subr.mxu1 %v6303_v60  ;;  %v6300_v17 = vld [vmem:[%s18438_s3 + $0xf20] sm:$0xff]  ;;  %v5658_v32 = vsel %vm1468_vm6, %v5656_v62, %v5657_v27  ;;  %v9731_v1 = vunpack.i.h.bf16 %v17710_v10  ;;  %v9730_v42 = vunpack.i.l.bf16 %v17710_v10  ;;  %v6298_v10 = vld [vmem:[%s18438_s3 + $0xf10] sm:$0xff] }
 0x657   : > { %v17808_v21 = vsel %vm1622_vm3, %v19297_v54, %v9716_v31  ;;  %v5645_v13 = vrot.slane %v17786_v29, 3  ;;  %7192 = vmatpush2.msra.mxu1 %v6302_v35  ;;  %v5665_v56 = vrot.slane %v17561_v41, 3  ;;  %7093 = vmatmul.mubr.f32.gmra.mxu0 %v5658_v32  ;;  %v19298_v38 = vunpack.i.l.bf16 %v16622_v59  ;;  %v5419_v8 = vpop.permute.xlu1 %5418  ;;  %v6296_v14 = vld [vmem:[%s18438_s3 + $0xf00] sm:$0xff] }
 0x658   : > { %v5676_v49 = vsel %vm1468_vm6, %v5674_v23, %v5675_v4  ;;  %7193 = vmatprep.subr.mxu1 %v6301_v46  ;;  %v5662_v63 = vrot.slane %v17803_v22, 3  ;;  %v5663_v62 = vrot.slane %v17808_v21, 3  ;;  %v5666_v27 = vrot.slane %v17622_v47, 3  ;;  %7098 = vmatprep.mubr.f32.mxu0 %v5679_v24  ;;  %v17838_v43 = vpop.permute.xlu0 %9738  ;;  %v6559_v40 = vpop.f32.mrf.mxu1 }
 0x659   : > { %v5494_v31 = vsel %vm1772_vm10, %v19298_v38, %v9725_v3  ;;  %v19299_v41 = vunpack.i.h.bf16 %v16622_v59  ;;  %7194 = vmatpush2.msra.mxu1 %v6300_v17  ;;  %v9735_v60 = vunpack.i.l.bf16 %v17765_v48  ;;  %v9741_v23 = vunpack.i.h.bf16 %v17838_v43  ;;  %v17846_v47 = vpop.f32.mrf.mxu0 }
 0x65a   : > { %v9740_v4 = vunpack.i.l.bf16 %v17838_v43  ;;  %v17848_v59 = vadd.f32 %v6559_v40, %v6447_v0  ;;  %7195 = vmatprep.subr.mxu1 %v6299_v39  ;;  %v5692_v29 = vrot.slane %v5494_v31, 3  ;;  %v5511_v35 = vsel %vm1722_vm8, %v9726_v44, %v9731_v1  ;;  %v6561_v22 = vpop.f32.mrf.mxu1 }
 0x65b   : > { %v5495_v61 = vsel %vm1772_vm10, %v19299_v41, %v9726_v44  ;;  %v5510_v46 = vsel %vm1722_vm8, %v9725_v3, %v9730_v42  ;;  %v9736_v52 = vunpack.i.h.bf16 %v17765_v48  ;;  %7196 = vmatpush2.msra.mxu1 %v6298_v10  ;;  %7099 = vmatmul.mubr.f32.gmra.mxu0 %v5676_v49  ;;  %v5527_v21 = vsel %vm1672_vm5, %v5511_v35, %v9741_v23  ;;  %v17872_v38 = vpop.f32.mrf.mxu0 }
 0x65c   : > { %v5693_v54 = vrot.slane %v5495_v61, 3  ;;  %v5526_v0 = vsel %vm1672_vm5, %v5510_v46, %v9740_v4  ;;  %v17862_v24 = vadd.f32 %v6561_v22, %v6449_v6  ;;  %7197 = vmatprep.subr.mxu1 %v6297_v50  ;;  %v5667_v44 = vsel %vm1468_vm6, %v5665_v56, %v5666_v27 }
 0x65d   : > { %v5684_v3 = vrot.slane %v5419_v8, 3  ;;  %v5695_v17 = vrot.slane %v5526_v0, 3  ;;  %v5696_v48 = vrot.slane %v5527_v21, 3  ;;  %7198 = vmatpush2.msra.mxu1 %v6296_v14  ;;  %v5646_v32 = vsel %vm1468_vm6, %v5644_v34, %v5645_v13  ;;  %v9744_v6 = vpop.permute.xlu1 %9743  ;;  %v17892_v35 = vpop.f32.mrf.mxu0 }
 0x65e   : > { %v6453_v1 = vadd.f32 %v17348_v15, %v17248_v36  ;;  %v5540_v42 = vsel %vm1622_vm3, %v9720_v58, %v9735_v60  ;;  %v5683_v39 = vrot.slane %v17772_v25, 3  ;;  %7200 = vmatmul.mubr.f32.vlgmr.msra.gmra.mxu1 %v5646_v32  ;;  %v19300_v56 = vunpack.i.h.bf16 %v17631_v53  ;;  %v9749_v34 = vpop.permute.xlu0 %9748  ;;  %v6565_v36 = vpop.f32.mrf.mxu1 }
 0x65f   : > { %v9746_v49 = vunpack.i.h.bf16 %v9744_v6  ;;  %v9745_v8 = vunpack.i.l.bf16 %v9744_v6  ;;  %v5697_v13 = vsel %vm1468_vm6, %v5695_v17, %v5696_v48  ;;  %v6455_v15 = vadd.f32 %v17389_v5, %v17252_v33  ;;  %7741 = vmatprep.mubr.msk.f32.mxu1 %vm1922_vm1, %v5667_v44  ;;  %v17905_v17 = vpop.f32.mrf.mxu0 }
 0x660   : > { %v5541_v31 = vsel %vm1622_vm3, %v19300_v56, %v9736_v52  ;;  %7104 = vmatprep.mubr.f32.mxu0 %v5697_v13  ;;  %v5694_v58 = vsel %vm1468_vm6, %v5692_v29, %v5693_v54  ;;  %v17882_v25 = vadd.f32 %v6565_v36, %v6453_v1  ;;  %v5664_v53 = vsel %vm1468_vm6, %v5662_v63, %v5663_v62  ;;  %v6567_v5 = vpop.f32.mrf.mxu1 }
 0x661   : > { %v19301_v10 = vunpack.i.l.bf16 %v16689_v45  ;;  %v19302_v41 = vunpack.i.h.bf16 %v16689_v45  ;;  %v5685_v40 = vsel %vm1468_vm6, %v5683_v39, %v5684_v3  ;;  %7105 = vmatmul.mubr.f32.gmra.mxu0 %v5694_v58  ;;  %v5680_v50 = vrot.slane %v5540_v42, 3 }
 0x662   : > { %v5681_v60 = vrot.slane %v5541_v31, 3  ;;  %7206 = vmatmul.mubr.f32.gmra.mxu1 %v5664_v53  ;;  %v17894_v63 = vadd.f32 %v6567_v5, %v6455_v15  ;;  %v9751_v0 = vunpack.i.h.bf16 %v9749_v34  ;;  %v9750_v21 = vunpack.i.l.bf16 %v9749_v34 }
 0x663   : > { %v5496_v27 = vsel %vm1772_vm10, %v19301_v10, %v9745_v8  ;;  %v5497_v61 = vsel %vm1772_vm10, %v19302_v41, %v9746_v49  ;;  %7742 = vmatprep.mubr.msk.f32.mxu1 %vm1922_vm1, %v5685_v40  ;;  %v9754_v62 = vpop.permute.xlu1 %9753  ;;  %v5421_v46 = vpop.permute.xlu0 %5420 }
 0x664   : > { %v5710_v14 = vrot.slane %v5496_v27, 3  ;;  %v5711_v29 = vrot.slane %v5497_v61, 3  ;;  %v9756_v52 = vunpack.i.h.bf16 %v9754_v62  ;;  %v9755_v22 = vunpack.i.l.bf16 %v9754_v62 }
 0x665   : > { %v5682_v54 = vsel %vm1468_vm6, %v5680_v50, %v5681_v60  ;;  %v5701_v42 = vrot.slane %v5421_v46, 3  ;;  %v5513_v13 = vsel %vm1722_vm8, %v9746_v49, %v9751_v0  ;;  %v19303_v46 = vunpack.i.l.bf16 %v16848_v2 }
 0x666   : > { %v5712_v45 = vsel %vm1468_vm6, %v5710_v14, %v5711_v29  ;;  %7212 = vmatmul.mubr.f32.gmra.mxu1 %v5682_v54  ;;  %v5542_v44 = vsel %vm1622_vm3, %v9740_v4, %v9755_v22  ;;  %v5543_v3 = vsel %vm1622_vm3, %v9741_v23, %v9756_v52  ;;  %v5512_v4 = vsel %vm1722_vm8, %v9745_v8, %v9750_v21 }
 0x667   : > { %v5698_v48 = vrot.slane %v5542_v44, 3  ;;  %v5699_v32 = vrot.slane %v5543_v3, 3  ;;  %v5423_v1 = vpop.permute.xlu1 %5422  ;;  %v19304_v21 = vunpack.i.h.bf16 %v16848_v2 }
 0x668   : > { %v5702_v39 = vrot.slane %v5423_v1, 3  ;;  %v9759_v6 = vpop.permute.xlu0 %9758  ;;  %v17907_v56 = vpop.f32.mrf.mxu0 }
 0x669   : > { %v9761_v31 = vunpack.i.h.bf16 %v9759_v6  ;;  %v9760_v34 = vunpack.i.l.bf16 %v9759_v6  ;;  %v5700_v53 = vsel %vm1468_vm6, %v5698_v48, %v5699_v32 }
 0x66a   : > { %v5703_v43 = vsel %vm1468_vm6, %v5701_v42, %v5702_v39  ;;  %v17912_v36 = vpop.f32.mrf.mxu0 }
 0x66b   : > { %v5528_v23 = vsel %vm1672_vm5, %v5512_v4, %v9760_v34  ;;  %v5529_v15 = vsel %vm1672_vm5, %v5513_v13, %v9761_v31  ;;  %v9764_v58 = vpop.permute.xlu1 %9763  ;;  %7743 = vmatprep.mubr.msk.f32.mxu1 %vm1922_vm1, %v5703_v43 }
 0x66c   : > { %v9769_v10 = vpop.permute.xlu0 %9768  ;;  %7218 = vmatmul.mubr.f32.gmra.mxu1 %v5700_v53  ;;  %v5713_v27 = vrot.slane %v5528_v23, 3  ;;  %v5714_v41 = vrot.slane %v5529_v15, 3  ;;  %v9765_v49 = vunpack.i.l.bf16 %v9764_v58  ;;  %v9766_v40 = vunpack.i.h.bf16 %v9764_v58 }
 0x66d   : > { %v9771_v62 = vunpack.i.h.bf16 %v9769_v10  ;;  %v9770_v22 = vunpack.i.l.bf16 %v9769_v10 }
 0x66e   : > { %v5715_v8 = vsel %vm1468_vm6, %v5713_v27, %v5714_v41  ;;  %v17919_v61 = vpop.f32.mrf.mxu0  ;;  %v5498_v52 = vsel %vm1772_vm10, %v19303_v46, %v9765_v49  ;;  %v5499_v44 = vsel %vm1772_vm10, %v19304_v21, %v9766_v40 }
 0x66f   : > { %7110 = vmatprep.mubr.f32.mxu0 %v5715_v8  ;;  %v9774_v5 = vpop.permute.xlu1 %9773  ;;  %v5728_v6 = vrot.slane %v5498_v52, 3  ;;  %v5514_v2 = vsel %vm1722_vm8, %v9765_v49, %v9770_v22  ;;  %v6443_v49 = vadd.f32 %v17237_v19, %v17252_v33 }
 0x670   : > { %v9776_v50 = vunpack.i.h.bf16 %v9774_v5  ;;  %v9775_v60 = vunpack.i.l.bf16 %v9774_v5  ;;  %v5425_v14 = vpop.permute.xlu0 %5424  ;;  %7111 = vmatmul.mubr.f32.gmra.mxu0 %v5712_v45  ;;  %v17921_v29 = vpop.f32.mrf.mxu0 }
 0x671   : > { %v5719_v45 = vrot.slane %v5425_v14, 3  ;;  %v6556_v14 = vadd.f32 %v17818_v9, %v6443_v49  ;;  %v19305_v9 = vunpack.i.l.bf16 %v16910_v26 }
 0x672   : > { %v5544_v54 = vsel %vm1622_vm3, %v9760_v34, %v9775_v60  ;;  %v5545_v0 = vsel %vm1622_vm3, %v9761_v31, %v9776_v50  ;;  %v5729_v34 = vrot.slane %v5499_v44, 3  ;;  %v5515_v31 = vsel %vm1722_vm8, %v9766_v40, %v9771_v62 }
 0x673   : > { %v5716_v3 = vrot.slane %v5544_v54, 3  ;;  %v5717_v48 = vrot.slane %v5545_v0, 3  ;;  %v5427_v32 = vpop.permute.xlu1 %5426 }
 0x674   : > { %v5720_v1 = vrot.slane %v5427_v32, 3  ;;  %v9779_v42 = vpop.permute.xlu0 %9778  ;;  %v6660_v39 = vpop.f32.mrf.mxu0  ;;  %v5730_v60 = vsel %vm1468_vm6, %v5728_v6, %v5729_v34 }
 0x675   : > { %v9781_v13 = vunpack.i.h.bf16 %v9779_v42  ;;  %v9780_v4 = vunpack.i.l.bf16 %v9779_v42  ;;  %v17932_v43 = vadd.f32 %v6660_v39, %v17646_v37  ;;  %v5718_v27 = vsel %vm1468_vm6, %v5716_v3, %v5717_v48 }
 0x676   : > { %v5721_v23 = vsel %vm1468_vm6, %v5719_v45, %v5720_v1  ;;  %v6662_v15 = vpop.f32.mrf.mxu0  ;;  %v19306_v45 = vunpack.i.h.bf16 %v16910_v26 }
 0x677   : > { %v5530_v58 = vsel %vm1672_vm5, %v5514_v2, %v9780_v4  ;;  %v5531_v53 = vsel %vm1672_vm5, %v5515_v31, %v9781_v13  ;;  %v9784_v10 = vpop.permute.xlu1 %9783  ;;  %7744 = vmatprep.mubr.msk.f32.mxu1 %vm1922_vm1, %v5721_v23  ;;  %v17942_v37 = vadd.f32 %v6662_v15, %v17671_v20 }
 0x678   : > { %v9789_v41 = vpop.permute.xlu0 %9788  ;;  %7224 = vmatmul.mubr.f32.gmra.mxu1 %v5718_v27  ;;  %v5731_v8 = vrot.slane %v5530_v58, 3  ;;  %v5732_v40 = vrot.slane %v5531_v53, 3  ;;  %v9785_v62 = vunpack.i.l.bf16 %v9784_v10  ;;  %v9786_v22 = vunpack.i.h.bf16 %v9784_v10 }
 0x679   : > { %v9791_v33 = vunpack.i.h.bf16 %v9789_v41  ;;  %v9790_v44 = vunpack.i.l.bf16 %v9789_v41 }
 0x67a   : > { %v5733_v5 = vsel %vm1468_vm6, %v5731_v8, %v5732_v40  ;;  %v6666_v50 = vpop.f32.mrf.mxu0  ;;  %v5500_v32 = vsel %vm1772_vm10, %v19305_v9, %v9785_v62 }
 0x67b   : > { %7116 = vmatprep.mubr.f32.mxu0 %v5733_v5  ;;  %v17950_v20 = vadd.f32 %v6666_v50, %v17700_v55  ;;  %v5501_v55 = vsel %vm1772_vm10, %v19306_v45, %v9786_v22  ;;  %v5746_v15 = vrot.slane %v5500_v32, 3 }
 0x67c   : > { %v9794_v46 = vpop.permute.xlu1 %9793  ;;  %v5429_v52 = vpop.permute.xlu0 %5428  ;;  %7117 = vmatmul.mubr.f32.gmra.mxu0 %v5730_v60  ;;  %v5747_v41 = vrot.slane %v5501_v55, 3 }
 0x67d   : > { %v9796_v54 = vunpack.i.h.bf16 %v9794_v46  ;;  %v9795_v0 = vunpack.i.l.bf16 %v9794_v46  ;;  %v6668_v21 = vpop.f32.mrf.mxu0  ;;  %v5737_v34 = vrot.slane %v5429_v52, 3 }
 0x67e   : > { %v17952_v19 = vadd.f32 %v6668_v21, %v6556_v14 }
 0x67f   : > { %v5546_v3 = vsel %vm1622_vm3, %v9780_v4, %v9795_v0  ;;  %v5547_v48 = vsel %vm1622_vm3, %v9781_v13, %v9796_v54  ;;  %v5517_v4 = vsel %vm1722_vm8, %v9786_v22, %v9791_v33  ;;  %v5516_v13 = vsel %vm1722_vm8, %v9785_v62, %v9790_v44 }
 0x680   : > { %v5734_v1 = vrot.slane %v5546_v3, 3  ;;  %v5735_v42 = vrot.slane %v5547_v48, 3 }
 0x681   : > { %v5431_v39 = vpop.permute.xlu1 %5430  ;;  %v9799_v6 = vpop.permute.xlu0 %9798 }
 0x682   : > { %v5738_v31 = vrot.slane %v5431_v39, 3  ;;  %v9801_v2 = vunpack.i.h.bf16 %v9799_v6  ;;  %v9800_v23 = vunpack.i.l.bf16 %v9799_v6  ;;  %v5736_v8 = vsel %vm1468_vm6, %v5734_v1, %v5735_v42 }
 0x683   : > { %v6672_v58 = vpop.f32.mrf.mxu0  ;;  %v19307_v42 = vunpack.i.l.bf16 %v17085_v12 }
 0x684   : > { %v5532_v53 = vsel %vm1672_vm5, %v5516_v13, %v9800_v23  ;;  %v5533_v26 = vsel %vm1672_vm5, %v5517_v4, %v9801_v2  ;;  %v5739_v10 = vsel %vm1468_vm6, %v5737_v34, %v5738_v31  ;;  %v17968_v27 = vadd.f32 %v6672_v58, %v17848_v59 }
 0x685   : > { %7745 = vmatprep.mubr.msk.f32.mxu1 %vm1922_vm1, %v5739_v10  ;;  %v5749_v40 = vrot.slane %v5532_v53, 3  ;;  %v5750_v49 = vrot.slane %v5533_v26, 3  ;;  %v6674_v5 = vpop.f32.mrf.mxu0  ;;  %v5748_v59 = vsel %vm1468_vm6, %v5746_v15, %v5747_v41  ;;  %v19308_v34 = vunpack.i.h.bf16 %v17085_v12 }
 0x686   : > { %v9804_v50 = vpop.permute.xlu1 %9803  ;;  %v9809_v60 = vpop.permute.xlu0 %9808  ;;  %7230 = vmatmul.mubr.f32.gmra.mxu1 %v5736_v8  ;;  %v17973_v14 = vadd.f32 %v6674_v5, %v17862_v24 }
 0x687   : > { %v5751_v62 = vsel %vm1468_vm6, %v5749_v40, %v5750_v49  ;;  %v9805_v3 = vunpack.i.l.bf16 %v9804_v50  ;;  %v9806_v9 = vunpack.i.h.bf16 %v9804_v50  ;;  %v9811_v1 = vunpack.i.h.bf16 %v9809_v60 }
 0x688   : > { %v17976_v46 = vpop.f32.mrf.mxu1  ;;  %7122 = vmatprep.mubr.f32.mxu0 %v5751_v62 }
 0x689   : > { %7123 = vmatmul.mubr.f32.gmra.mxu0 %v5748_v59  ;;  %v5502_v39 = vsel %vm1772_vm10, %v19307_v42, %v9805_v3  ;;  %v5519_v10 = vsel %vm1722_vm8, %v9806_v9, %v9811_v1 }
 0x68a   : > { %v6678_v52 = vpop.f32.mrf.mxu0  ;;  %v17982_v0 = vpop.f32.mrf.mxu1  ;;  %v5764_v26 = vrot.slane %v5502_v39, 3 }
 0x68b   : > { %v9814_v22 = vpop.permute.xlu1 %9813  ;;  %v17980_v54 = vadd.f32 %v6678_v52, %v17882_v25  ;;  %v5433_v44 = vpop.permute.xlu0 %5432  ;;  %v9810_v25 = vunpack.i.l.bf16 %v9809_v60 }
 0x68c   : > { %v9816_v21 = vunpack.i.h.bf16 %v9814_v22  ;;  %v9815_v33 = vunpack.i.l.bf16 %v9814_v22  ;;  %v6680_v24 = vpop.f32.mrf.mxu0  ;;  %v5755_v13 = vrot.slane %v5433_v44, 3 }
 0x68d   : > { %v17985_v48 = vadd.f32 %v6680_v24, %v17894_v63  ;;  %v5503_v63 = vsel %vm1772_vm10, %v19308_v34, %v9806_v9  ;;  %v5518_v41 = vsel %vm1722_vm8, %v9805_v3, %v9810_v25  ;;  %vm7375_vm8 = vcmask 1043459  }
 0x68e   : > { %v5548_v32 = vsel %vm1622_vm3, %v9800_v23, %v9815_v33  ;;  %v5549_v45 = vsel %vm1622_vm3, %v9801_v2, %v9816_v21  ;;  %v5765_v8 = vrot.slane %v5503_v63, 3 }
 0x68f   : > { %v17989_v55 = vpop.f32.mrf.mxu1  ;;  %v5752_v31 = vrot.slane %v5548_v32, 3  ;;  %v5753_v15 = vrot.slane %v5549_v45, 3 }
 0x690   : > { %v5766_v21 = vsel %vm1468_vm6, %v5764_v26, %v5765_v8 }
 0x691   : > { %v17994_v6 = vpop.f32.mrf.mxu1  ;;  %v5754_v50 = vsel %vm1468_vm6, %v5752_v31, %v5753_v15 }
 0x692   : > { %v5435_v4 = vpop.permute.xlu1 %5434  ;;  %v9819_v23 = vpop.permute.xlu0 %9818 }
 0x693   : > { %v5756_v2 = vrot.slane %v5435_v4, 3  ;;  %v9821_v58 = vunpack.i.h.bf16 %v9819_v23  ;;  %v9820_v53 = vunpack.i.l.bf16 %v9819_v23 }
 0x695   : > { %v5534_v40 = vsel %vm1672_vm5, %v5518_v41, %v9820_v53  ;;  %v5535_v12 = vsel %vm1672_vm5, %v5519_v10, %v9821_v58  ;;  %v5757_v49 = vsel %vm1468_vm6, %v5755_v13, %v5756_v2  ;;  %v18004_v5 = vpop.f32.mrf.mxu1  ;;  %vm7369_vm5 = vcmask 1041409  }
 0x696   : > { %7746 = vmatprep.mubr.msk.f32.mxu1 %vm1922_vm1, %v5757_v49  ;;  %v5767_v60 = vrot.slane %v5534_v40, 3  ;;  %v5768_v62 = vrot.slane %v5535_v12, 3 }
 0x697   : > { %7236 = vmatmul.mubr.f32.gmra.mxu1 %v5754_v50  ;;  %v18009_v52 = vpop.f32.mrf.mxu1 }
 0x698   : > { %v5769_v59 = vsel %vm1468_vm6, %v5767_v60, %v5768_v62 }
 0x699   : > { %v9824_v22 = vpop.permute.xlu1 %9823  ;;  %7128 = vmatprep.mubr.f32.mxu0 %v5769_v59  ;;  %v5437_v32 = vpop.permute.xlu0 %5436 }
 0x69a   : > { %v9826_v33 = vunpack.i.h.bf16 %v9824_v22  ;;  %v9825_v44 = vunpack.i.l.bf16 %v9824_v22  ;;  %7129 = vmatmul.mubr.f32.gmra.mxu0 %v5766_v21  ;;  %v5773_v39 = vrot.slane %v5437_v32, 3 }
 0x69c   : > { %v5550_v24 = vsel %vm1622_vm3, %v9820_v53, %v9825_v44  ;;  %v5551_v3 = vsel %vm1622_vm3, %v9821_v58, %v9826_v33  ;;  %v18014_v9 = vpop.f32.mrf.mxu1 }
 0x69d   : > { %v5770_v1 = vrot.slane %v5550_v24, 3  ;;  %v5771_v25 = vrot.slane %v5551_v3, 3 }
 0x69e   : > { %v18016_v45 = vpop.f32.mrf.mxu1 }
 0x69f   : > { %v5439_v42 = vpop.permute.xlu1 %5438  ;;  %v5772_v15 = vsel %vm1468_vm6, %v5770_v1, %v5771_v25 }
 0x6a0   : > { %v5774_v34 = vrot.slane %v5439_v42, 3 }
 0x6a2   : > { %v5775_v63 = vsel %vm1468_vm6, %v5773_v39, %v5774_v34  ;;  %v6773_v31 = vpop.f32.mrf.mxu1  ;;  %vm7372_vm6 = vcmask 1042434  }
 0x6a3   : > { %7747 = vmatprep.mubr.msk.f32.mxu1 %vm1922_vm1, %v5775_v63  ;;  %v18022_v4 = vadd.f32 %v6773_v31, %v17932_v43 }
 0x6a4   : > { %7242 = vmatmul.mubr.f32.gmra.mxu1 %v5772_v15  ;;  %v6775_v23 = vpop.f32.mrf.mxu1 }
 0x6a5   : > { %v18025_v13 = vadd.f32 %v6775_v23, %v17942_v37 }
 0x6a8   : > { %v6779_v2 = vpop.f32.mrf.mxu1 }
 0x6a9   : > { %v18028_v58 = vadd.f32 %v6779_v2, %v17950_v20 }
 0x6aa   : > { %v6781_v53 = vpop.f32.mrf.mxu1  ;;  %v6862_v20 = vpop.f32.mrf.mxu0 }
 0x6ab   : > { %v18031_v26 = vadd.f32 %v6781_v53, %v17952_v19 }
 0x6ac   : > { %v6864_v50 = vpop.f32.mrf.mxu0 }
 0x6ad   : > { %19309 = vst [vmem:[#allocation107_spill] sm:$0xff] %v18031_v26 }
 0x6ae   : > { %v6785_v10 = vpop.f32.mrf.mxu1 }
 0x6af   : > { %v18034_v41 = vadd.f32 %v6785_v10, %v17968_v27 }
 0x6b0   : > { %v6787_v8 = vpop.f32.mrf.mxu1  ;;  %v6868_v60 = vpop.f32.mrf.mxu0 }
 0x6b1   : > { %19310 = vst [vmem:[#allocation9_spill] sm:$0xff] %v18034_v41  ;;  %v18037_v43 = vadd.f32 %v6787_v8, %v17973_v14 }
 0x6b2   : > { %v6870_v19 = vpop.f32.mrf.mxu0 }
 0x6b3   : > { %19311 = vst [vmem:[#allocation48_spill] sm:$0xff] %v18037_v43  ;;  %v6791_v40 = vpop.f32.mrf.mxu1 }
 0x6b4   : > { %v6792_v37 = vadd.f32 %v6791_v40, %v17980_v54 }
 0x6b5   : > { %v6793_v12 = vpop.f32.mrf.mxu1 }
 0x6b6   : > { %v6794_v49 = vadd.f32 %v6793_v12, %v17985_v48 }
 0x6b7   : > { %v6874_v22 = vpop.f32.mrf.mxu0 }
 0x6b9   : > { %v18041_v27 = vpop.f32.mrf.mxu0 }
 0x6c0   : > { %v18043_v44 = vpop.f32.mrf.mxu0 }
 0x6c2   : > { %v18045_v24 = vpop.f32.mrf.mxu0 }
 0x6db   : > { %v6975_v62 = vpop.f32.mrf.mxu1 }
 0x6dd   : > { %v6977_v59 = vpop.f32.mrf.mxu1 }
 0x6de   : > { %v18049_v3 = vpop.f32.mrf.mxu0 }
 0x6e0   : > { %v18053_v32 = vpop.f32.mrf.mxu0 }
 0x6e3   : > { %v6981_v21 = vpop.f32.mrf.mxu1 }
 0x6e5   : > { %v6983_v33 = vpop.f32.mrf.mxu1  ;;  %v18057_v25 = vpop.f32.mrf.mxu0 }
 0x6e7   : > { %v18061_v39 = vpop.f32.mrf.mxu0 }
 0x6e8   : > { %19312 = vst [vmem:[#allocation49_spill] sm:$0xff] %v18061_v39 }
 0x6e9   : > { %v6987_v14 = vpop.f32.mrf.mxu1 }
 0x6eb   : > { %v18047_v54 = vpop.f32.mrf.mxu1 }
 0x6ef   : > { %v18051_v48 = vpop.f32.mrf.mxu1 }
 0x6f1   : > { %v18055_v1 = vpop.f32.mrf.mxu1 }
 0x6f4   : > { %v18059_v42 = vpop.f32.mrf.mxu1 }
 0x6f6   : > { %v18065_v63 = vpop.f32.mrf.mxu1 }
 0x6f9   : > { %v18069_v15 = vpop.f32.mrf.mxu1 }
 0x6fb   : > { %v18071_v8 = vpop.f32.mrf.mxu1 }
 0x6fc   : > { %v18063_v34 = vpop.f32.mrf.mxu0 }
 0x6fd   : > { %19313 = vst [vmem:[#allocation62_spill] sm:$0xff] %v18063_v34 }
 0x6fe   : > { %v18067_v31 = vpop.f32.mrf.mxu0 }
 0x6ff   : > { %19314 = vst [vmem:[#allocation102_spill] sm:$0xff] %v18067_v31  ;;  %v6637_v31 = vadd.f32 %v17846_v47, %v17422_v16 }
 0x701   : > { %v6904_v23 = vpop.f32.mrf.mxu0 }
 0x702   : > { %v6905_v2 = vadd.f32 %v6904_v23, %v6792_v37  ;;  %v6639_v37 = vadd.f32 %v17872_v38, %v17443_v7  ;;  %v6649_v7 = vadd.f32 %v17907_v56, %v17520_v11 }
 0x703   : > { %v6906_v53 = vpop.f32.mrf.mxu0 }
 0x704   : > { %v6907_v10 = vadd.f32 %v6906_v53, %v6794_v49  ;;  %v18073_v40 = vpop.f32.mrf.mxu1  ;;  %v6750_v49 = vadd.f32 %v17976_v46, %v6637_v31  ;;  %v6643_v53 = vadd.f32 %v17892_v35, %v17462_v18  ;;  %v6651_v18 = vadd.f32 %v17912_v36, %v17546_v28 }
 0x705   : > { %v6762_v35 = vadd.f32 %v18004_v5, %v6649_v7  ;;  %v6655_v28 = vadd.f32 %v17919_v61, %v17571_v51 }
 0x706   : > { %v18075_v12 = vpop.f32.mrf.mxu1 }
 0x707   : > { %19315 = vst [vmem:[#allocation61_spill] sm:$0xff] %v18075_v12  ;;  %v6752_v12 = vadd.f32 %v17982_v0, %v6639_v37 }
 0x70d   : > { %v7017_v43 = vpop.f32.mrf.mxu1 }
 0x70e   : > { %v18077_v41 = vadd.f32 %v7017_v43, %v6905_v2  ;;  %v6863_v43 = vadd.f32 %v6862_v20, %v6750_v49 }
 0x70f   : > { %v7019_v34 = vpop.f32.mrf.mxu1 }
 0x710   : > { %v18079_v39 = vadd.f32 %v7019_v34, %v6907_v10  ;;  %v6645_v34 = vadd.f32 %v17905_v17, %v17483_v30  ;;  %v6756_v10 = vadd.f32 %v17989_v55, %v6643_v53  ;;  %v6976_v16 = vadd.f32 %v6975_v62, %v6863_v43 }
 0x711   : > { %v6764_v62 = vadd.f32 %v18009_v52, %v6651_v18 }
 0x712   : > { %19316 = vst [vmem:[#allocation103_spill] sm:$0xff] %v18079_v39  ;;  %v6865_v39 = vadd.f32 %v6864_v50, %v6752_v12  ;;  %v6758_v47 = vadd.f32 %v17994_v6, %v6645_v34  ;;  %v6869_v38 = vadd.f32 %v6868_v60, %v6756_v10  ;;  %v6875_v6 = vadd.f32 %v6874_v22, %v6762_v35 }
 0x713   : > { %v7088_v26 = vpop.f32.mrf.mxu0  ;;  %v6877_v5 = vadd.f32 %v18041_v27, %v6764_v62  ;;  %v6657_v22 = vadd.f32 %v17921_v29, %v17594_v57  ;;  %v6768_v12 = vadd.f32 %v18014_v9, %v6655_v28  ;;  %v19320_v28 = vld [vmem:[#allocation62_spill] sm:$0xff] }
 0x714   : > { %v6978_v46 = vadd.f32 %v6977_v59, %v6865_v39  ;;  %v7089_v31 = vadd.f32 %v7088_v26, %v6976_v16  ;;  %v6871_v30 = vadd.f32 %v6870_v19, %v6758_v47  ;;  %v6982_v17 = vadd.f32 %v6981_v21, %v6869_v38 }
 0x715   : > { %v7090_v23 = vpop.f32.mrf.mxu0  ;;  %v6988_v19 = vadd.f32 %v6987_v14, %v6875_v6  ;;  %v6990_v37 = vadd.f32 %v18047_v54, %v6877_v5  ;;  %v6770_v14 = vadd.f32 %v18016_v45, %v6657_v22  ;;  %v19322_v5 = vld [vmem:[#allocation102_spill] sm:$0xff]  ;;  %v19323_v22 = vld [vmem:[#allocation61_spill] sm:$0xff] }
 0x716   : > { %v7091_v55 = vadd.f32 %v7090_v23, %v6978_v46  ;;  %v6984_v60 = vadd.f32 %v6983_v33, %v6871_v30  ;;  %v6881_v23 = vadd.f32 %v18043_v44, %v6768_v12 }
 0x717   : > { %v7094_v2 = vpop.f32.mrf.mxu0  ;;  %v6883_v9 = vadd.f32 %v18045_v24, %v6770_v14 }
 0x718   : > { %v7095_v59 = vadd.f32 %v7094_v2, %v6982_v17  ;;  %v6994_v54 = vadd.f32 %v18051_v48, %v6881_v23  ;;  %v6887_v48 = vadd.f32 %v18049_v3, %v18022_v4  ;;  %v19317_v3 = vld [vmem:[#allocation107_spill] sm:$0xff] }
 0x719   : > { %v7096_v20 = vpop.f32.mrf.mxu0  ;;  %v6996_v34 = vadd.f32 %v18055_v1, %v6883_v9  ;;  %v6889_v1 = vadd.f32 %v18053_v32, %v18025_v13  ;;  %v6893_v13 = vadd.f32 %v18057_v25, %v18028_v58  ;;  %v19318_v32 = vld [vmem:[#allocation49_spill] sm:$0xff] }
 0x71a   : > { %v7097_v21 = vadd.f32 %v7096_v20, %v6984_v60  ;;  %v7000_v38 = vadd.f32 %v18059_v42, %v6887_v48  ;;  %v6895_v42 = vadd.f32 %v19318_v32, %v19317_v3  ;;  %v19319_v25 = vld [vmem:[#allocation9_spill] sm:$0xff]  ;;  %v7455_v48 = vld [vmem:[%s18440_s5 + $0x58] sm:$0xff]  ;;  %v7464_v32 = vld [vmem:[%s18440_s5 + $0xa0] sm:$0xff] }
 0x71b   : > { %v7100_v56 = vpop.f32.mrf.mxu0  ;;  %v7449_v3 = vld [vmem:[%s18440_s5 + $0x28] sm:$0xff] }
 0x71c   : > { %v7101_v51 = vadd.f32 %v7100_v56, %v6988_v19  ;;  %v7008_v62 = vadd.f32 %v18071_v8, %v6895_v42  ;;  %v7448_v42 = vld [vmem:[%s18440_s5 + $0x20] sm:$0xff] }
 0x71d   : > { %v7102_v39 = vpop.f32.mrf.mxu0 }
 0x71e   : > { %v7201_v0 = vpop.f32.mrf.mxu1  ;;  %v7103_v53 = vadd.f32 %v7102_v39, %v6990_v37 }
 0x71f   : > { %v18098_v50 = vadd.f32 %v7201_v0, %v7089_v31  ;;  %v7002_v31 = vadd.f32 %v18065_v63, %v6889_v1  ;;  %v7006_v63 = vadd.f32 %v18069_v15, %v6893_v13  ;;  %v19321_v15 = vld [vmem:[#allocation48_spill] sm:$0xff]  ;;  %v7470_v1 = vld [vmem:[%s18440_s5 + $0xd0] sm:$0xff]  ;;  %v7465_v13 = vld [vmem:[%s18440_s5 + $0xa8] sm:$0xff] }
 0x720   : > { %v7203_v11 = vpop.f32.mrf.mxu1  ;;  %v6901_v19 = vadd.f32 %v19322_v5, %v19321_v15 }
 0x721   : > { %v7204_v26 = vadd.f32 %v7203_v11, %v7091_v55  ;;  %7264 = vrot.lane.b32.xlu0 %v18098_v50, %s9992_s20  ;;  %v7106_v27 = vpop.f32.mrf.mxu0 }
 0x722   : > { %v7207_v36 = vpop.f32.mrf.mxu1  ;;  %v7107_v45 = vadd.f32 %v7106_v27, %v6994_v54 }
 0x723   : > { %7266 = vrot.lane.b32.xlu1 %v7204_v26, %s9992_s20  ;;  %v18107_v52 = vadd.f32 %v7207_v36, %v7095_v59  ;;  %v7108_v2 = vpop.f32.mrf.mxu0  ;;  %v6899_v36 = vadd.f32 %v19320_v28, %v19319_v25 }
 0x724   : > { %v7209_v33 = vpop.f32.mrf.mxu1  ;;  %v7109_v10 = vadd.f32 %v7108_v2, %v6996_v34  ;;  %v7475_v2 = vld [vmem:[%s18440_s5 + $0xf8] sm:$0xff]  ;;  %v7474_v34 = vld [vmem:[%s18440_s5 + $0xf0] sm:$0xff] }
 0x725   : > { %v7210_v49 = vadd.f32 %v7209_v33, %v7097_v21  ;;  %7268 = vrot.lane.b32.xlu0 %v18107_v52, %s9992_s20  ;;  %v7012_v8 = vadd.f32 %v18073_v40, %v6899_v36  ;;  %v7014_v33 = vadd.f32 %v19323_v22, %v6901_v19  ;;  %7755 = vmatprep.subr.mxu0 %v7475_v2 }
 0x726   : > { %v7213_v61 = vpop.f32.mrf.mxu1 }
 0x727   : > { %7270 = vrot.lane.b32.xlu1 %v7210_v49, %s9992_s20  ;;  %v18118_v57 = vadd.f32 %v7213_v61, %v7101_v51 }
 0x728   : > { %v7215_v29 = vpop.f32.mrf.mxu1 }
 0x729   : > { %v7216_v43 = vadd.f32 %v7215_v29, %v7103_v53  ;;  %7272 = vrot.lane.b32.xlu0 %v18118_v57, %s9992_s20  ;;  %v19324_v53 = vld [vmem:[#allocation103_spill] sm:$0xff] }
 0x72b   : > { %7274 = vrot.lane.b32.xlu1 %v7216_v43, %s9992_s20 }
 0x72c   : > { %v7219_v44 = vpop.f32.mrf.mxu1 }
 0x72d   : > { %v18126_v16 = vadd.f32 %v7219_v44, %v7107_v45  ;;  %v7458_v45 = vld [vmem:[%s18440_s5 + $0x70] sm:$0xff]  ;;  %v7473_v44 = vld [vmem:[%s18440_s5 + $0xe8] sm:$0xff] }
 0x72e   : > { %v7221_v7 = vpop.f32.mrf.mxu1 }
 0x72f   : > { %v7222_v47 = vadd.f32 %v7221_v7, %v7109_v10  ;;  %7276 = vrot.lane.b32.xlu0 %v18126_v16, %s9992_s20  ;;  %v7457_v10 = vld [vmem:[%s18440_s5 + $0x68] sm:$0xff]  ;;  %v7472_v7 = vld [vmem:[%s18440_s5 + $0xe0] sm:$0xff] }
 0x730   : > { %v7112_v24 = vpop.f32.mrf.mxu0 }
 0x731   : > { %7278 = vrot.lane.b32.xlu1 %v7222_v47, %s9992_s20  ;;  %v7113_v18 = vadd.f32 %v7112_v24, %v7000_v38  ;;  %v7456_v47 = vld [vmem:[%s18440_s5 + $0x60] sm:$0xff]  ;;  %v7471_v24 = vld [vmem:[%s18440_s5 + $0xd8] sm:$0xff]  ;;  %v7454_v38 = vld [vmem:[%s18440_s5 + $0x50] sm:$0xff] }
 0x732   : > { %v7114_v46 = vpop.f32.mrf.mxu0 }
 0x733   : > { %v7115_v0 = vadd.f32 %v7114_v46, %v7002_v31  ;;  %v7469_v46 = vld [vmem:[%s18440_s5 + $0xc8] sm:$0xff] }
 0x734   : > { %v7453_v31 = vld [vmem:[%s18440_s5 + $0x48] sm:$0xff] }
 0x738   : > { %v7225_v35 = vpop.f32.mrf.mxu1 }
 0x739   : > { %v18137_v20 = vadd.f32 %v7225_v35, %v7113_v18  ;;  %v7468_v18 = vld [vmem:[%s18440_s5 + $0xc0] sm:$0xff] }
 0x73a   : > { %v7227_v30 = vpop.f32.mrf.mxu1  ;;  %v7452_v35 = vld [vmem:[%s18440_s5 + $0x40] sm:$0xff] }
 0x73b   : > { %v7228_v17 = vadd.f32 %v7227_v30, %v7115_v0  ;;  %7280 = vrot.lane.b32.xlu0 %v18137_v20, %s9992_s20  ;;  %v7467_v0 = vld [vmem:[%s18440_s5 + $0xb8] sm:$0xff] }
 0x73c   : > { %v7118_v4 = vpop.f32.mrf.mxu0  ;;  %v7451_v30 = vld [vmem:[%s18440_s5 + $0x38] sm:$0xff] }
 0x73d   : > { %7282 = vrot.lane.b32.xlu1 %v7228_v17, %s9992_s20  ;;  %v7119_v11 = vadd.f32 %v7118_v4, %v7006_v63  ;;  %v7466_v17 = vld [vmem:[%s18440_s5 + $0xb0] sm:$0xff]  ;;  %v7463_v63 = vld [vmem:[%s18440_s5 + $0x98] sm:$0xff] }
 0x73e   : > { %v7120_v55 = vpop.f32.mrf.mxu0  ;;  %v7450_v4 = vld [vmem:[%s18440_s5 + $0x30] sm:$0xff] }
 0x73f   : > { %v7121_v6 = vadd.f32 %v7120_v55, %v7008_v62  ;;  %v7447_v55 = vld [vmem:[%s18440_s5 + $0x18] sm:$0xff]  ;;  %v7462_v62 = vld [vmem:[%s18440_s5 + $0x90] sm:$0xff] }
 0x746   : > { %v7231_v56 = vpop.f32.mrf.mxu1 }
 0x747   : > { %v18148_v60 = vadd.f32 %v7231_v56, %v7119_v11 }
 0x748   : > { %v7233_v59 = vpop.f32.mrf.mxu1 }
 0x749   : > { %v7234_v26 = vadd.f32 %v7233_v59, %v7121_v6  ;;  %7284 = vrot.lane.b32.xlu0 %v18148_v60, %s9992_s20  ;;  %v7124_v58 = vpop.f32.mrf.mxu0 }
 0x74a   : > { %v7125_v39 = vadd.f32 %v7124_v58, %v7012_v8 }
 0x74b   : > { %7286 = vrot.lane.b32.xlu1 %v7234_v26, %s9992_s20  ;;  %v7126_v21 = vpop.f32.mrf.mxu0 }
 0x74c   : > { %v7127_v37 = vadd.f32 %v7126_v21, %v7014_v33 }
 0x757   : > { %v7237_v12 = vpop.f32.mrf.mxu1 }
 0x758   : > { %v18159_v49 = vadd.f32 %v7237_v12, %v7125_v39 }
 0x759   : > { %v7239_v51 = vpop.f32.mrf.mxu1 }
 0x75a   : > { %v7240_v61 = vadd.f32 %v7239_v51, %v7127_v37  ;;  %7288 = vrot.lane.b32.xlu0 %v18159_v49, %s9992_s20  ;;  %v7130_v27 = vpop.f32.mrf.mxu0 }
 0x75b   : > { %v7131_v23 = vadd.f32 %v7130_v27, %v18077_v41  ;;  %v7459_v41 = vld [vmem:[%s18440_s5 + $0x78] sm:$0xff] }
 0x75c   : > { %7290 = vrot.lane.b32.xlu1 %v7240_v61, %s9992_s20  ;;  %v7132_v14 = vpop.f32.mrf.mxu0  ;;  %7756 = vmatpush3.msra.mxu0 %v7459_v41 }
 0x75d   : > { %v7133_v29 = vadd.f32 %v7132_v14, %v19324_v53  ;;  %7757 = vmatprep.subr.mxu0 %v7474_v34 }
 0x75e   : > { %7758 = vmatpush3.msra.mxu0 %v7458_v45 }
 0x75f   : > { %7759 = vmatprep.subr.mxu0 %v7473_v44 }
 0x760   : > { %7760 = vmatpush3.msra.mxu0 %v7457_v10 }
 0x761   : > { %7761 = vmatprep.subr.mxu0 %v7472_v7 }
 0x762   : > { %7762 = vmatpush3.msra.mxu0 %v7456_v47 }
 0x763   : > { %7763 = vmatprep.subr.mxu0 %v7471_v24 }
 0x764   : > { %v7243_v40 = vpop.f32.mrf.mxu1  ;;  %7764 = vmatpush3.msra.mxu0 %v7455_v48 }
 0x765   : > { %v18166_v9 = vadd.f32 %v7243_v40, %v7131_v23  ;;  %7765 = vmatprep.subr.mxu0 %v7470_v1 }
 0x766   : > { %v7245_v54 = vpop.f32.mrf.mxu1  ;;  %7766 = vmatpush3.msra.mxu0 %v7454_v38 }
 0x767   : > { %v7246_v43 = vadd.f32 %v7245_v54, %v7133_v29  ;;  %7292 = vrot.lane.b32.xlu0 %v18166_v9, %s9992_s20  ;;  %7767 = vmatprep.subr.mxu0 %v7469_v46 }
 0x768   : > { %7768 = vmatpush3.msra.mxu0 %v7453_v31 }
 0x769   : > { %7294 = vrot.lane.b32.xlu1 %v7246_v43, %s9992_s20  ;;  %7769 = vmatprep.subr.mxu0 %v7468_v18  ;;  %s10000_s20 = smov 80  }
 0x76a   : > { %7770 = vmatpush3.msra.mxu0 %v7452_v35 }
 0x76b   : > { %7771 = vmatprep.subr.mxu0 %v7467_v0 }
 0x76c   : > { %7772 = vmatpush3.msra.mxu0 %v7451_v30 }
 0x76d   : > { %7773 = vmatprep.subr.mxu0 %v7466_v17 }
 0x76e   : > { %7774 = vmatpush3.msra.mxu0 %v7450_v4 }
 0x76f   : > { %7775 = vmatprep.subr.mxu0 %v7465_v13 }
 0x770   : > { %7776 = vmatpush3.msra.mxu0 %v7449_v3 }
 0x771   : > { %7777 = vmatprep.subr.mxu0 %v7464_v32 }
 0x772   : > { %7778 = vmatpush3.msra.mxu0 %v7448_v42 }
 0x773   : > { %7779 = vmatprep.subr.mxu0 %v7463_v63 }
 0x774   : > { %7780 = vmatpush3.msra.mxu0 %v7447_v55 }
 0x775   : > { %7781 = vmatprep.subr.mxu0 %v7462_v62 }
 0x793   : > { %v7265_v11 = vpop.permute.xlu0 %7264 }
 0x795   : > { %v7267_v56 = vpop.permute.xlu1 %7266 }
 0x796   : > { %v7296_v6 = vsel %vm1622_vm3, %v7265_v11, %v7267_v56 }
 0x797   : > { %v7312_v59 = vmax.f32 %v18098_v50, %v7296_v6  ;;  %v7269_v26 = vpop.permute.xlu0 %7268  ;;  %v7446_v6 = vld [vmem:[%s18440_s5 + $0x10] sm:$0xff] }
 0x798   : > { %7782 = vmatpush3.msra.mxu0 %v7446_v6  ;;  %v7479_v6 = vld [vmem:[%s18440_s5 + $0x118] sm:$0xff] }
 0x799   : > { %v7271_v58 = vpop.permute.xlu1 %7270  ;;  %v7328_v36 = vrot.slane %v7312_v59, 1 }
 0x79a   : > { %v7297_v25 = vsel %vm1622_vm3, %v7269_v26, %v7271_v58 }
 0x79b   : > { %v7313_v28 = vmax.f32 %v18107_v52, %v7297_v25  ;;  %v7273_v5 = vpop.permute.xlu0 %7272  ;;  %v7344_v22 = vmax.f32 %v7312_v59, %v7328_v36  ;;  %v7445_v59 = vld [vmem:[%s18440_s5 + $0x8] sm:$0xff] }
 0x79d   : > { %v7329_v15 = vrot.slane %v7313_v28, 1  ;;  %v7275_v19 = vpop.permute.xlu1 %7274  ;;  %v18261_v61 = vmax.f32 %v7344_v22, 0.0  ;;  %v7444_v22 = vld [vmem:[%s18440_s5] sm:$0xff] }
 0x79e   : > { %v7298_v8 = vsel %vm1622_vm3, %v7273_v5, %v7275_v19 }
 0x79f   : > { %v7345_v21 = vmax.f32 %v7313_v28, %v7329_v15  ;;  %v7314_v33 = vmax.f32 %v18118_v57, %v7298_v8  ;;  %v7460_v28 = vld [vmem:[%s18440_s5 + $0x80] sm:$0xff]  ;;  %v7390_v36 = vrot.slane %v18261_v61, 2  ;;  %v7407_v19 = vrot.slane %v18261_v61, 4 }
 0x7a0   : > { %v7424_v8 = vrot.slane %v18261_v61, 6 }
 0x7a1   : > { %v18258_v39 = vmax.f32 %v7345_v21, 0.0  ;;  %v7330_v12 = vrot.slane %v7314_v33, 1  ;;  %v7277_v37 = vpop.permute.xlu0 %7276 }
 0x7a3   : > { %v7368_v50 = vrot.slane %v18258_v39, 7  ;;  %v7279_v51 = vpop.permute.xlu1 %7278  ;;  %v7346_v52 = vmax.f32 %v7314_v33, %v7330_v12  ;;  %v7391_v62 = vrot.slane %v18258_v39, 1  ;;  %v7408_v26 = vrot.slane %v18258_v39, 3 }
 0x7a4   : > { %v7299_v27 = vsel %vm1622_vm3, %v7277_v37, %v7279_v51  ;;  %v7425_v58 = vrot.slane %v18258_v39, 5 }
 0x7a5   : > { %v7315_v14 = vmax.f32 %v18126_v16, %v7299_v27  ;;  %v18265_v23 = vmax.f32 %v7346_v52, 0.0  ;;  %v7370_v57 = vsel %vm7369_vm5, %v7368_v50, %v18261_v61  ;;  %v7392_v33 = vsel %vm7369_vm5, %v7391_v62, %v7390_v36  ;;  %v7748_v36 = vld [vmem:[%s18441_s6] ss:$0 sm:$0xff] }
 0x7a6   : > { %v7409_v37 = vsel %vm7369_vm5, %v7408_v26, %v7407_v19  ;;  %v7426_v61 = vsel %vm7369_vm5, %v7425_v58, %v7424_v8  ;;  %v7476_v26 = vld [vmem:[%s18440_s5 + $0x100] sm:$0xff] }
 0x7a7   : > { %v7331_v40 = vrot.slane %v7315_v14, 1  ;;  %v7371_v53 = vrot.slane %v18265_v23, 6  ;;  %v7410_v15 = vrot.slane %v18265_v23, 2  ;;  %v7427_v39 = vrot.slane %v18265_v23, 4 }
 0x7a8   : > { %v7393_v52 = vsel %vm7372_vm6, %v18265_v23, %v7392_v33 }
 0x7a9   : > { %v7347_v29 = vmax.f32 %v7315_v14, %v7331_v40  ;;  %v7373_v54 = vsel %vm7372_vm6, %v7371_v53, %v7370_v57  ;;  %v7411_v14 = vsel %vm7372_vm6, %v7410_v15, %v7409_v37  ;;  %v19325_v40 = vmov 0.0  }
 0x7ab   : > { %v18271_v43 = vmax.f32 %v7347_v29, 0.0 }
 0x7ad   : > { %v7374_v2 = vrot.slane %v18271_v43, 5  ;;  %v7281_v41 = vpop.permute.xlu0 %7280  ;;  %v7412_v21 = vrot.slane %v18271_v43, 1  ;;  %v7394_v12 = vrot.slane %v18271_v43, 7  ;;  %v7429_v53 = vrot.slane %v18271_v43, 3 }
 0x7af   : > { %v7283_v34 = vpop.permute.xlu1 %7282  ;;  %v7376_v16 = vsel %vm7375_vm8, %v7374_v2, %v7373_v54  ;;  %v7413_v29 = vsel %vm7375_vm8, %v7412_v21, %v7411_v14  ;;  %v7395_v23 = vsel %vm7375_vm8, %v7394_v12, %v7393_v52 }
 0x7b0   : > { %v7300_v45 = vsel %vm1622_vm3, %v7281_v41, %v7283_v34 }
 0x7b1   : > { %v7316_v44 = vmax.f32 %v18137_v20, %v7300_v45 }
 0x7b3   : > { %v7332_v10 = vrot.slane %v7316_v44, 1 }
 0x7b5   : > { %v7348_v7 = vmax.f32 %v7316_v44, %v7332_v10 }
 0x7b7   : > { %v18277_v47 = vmax.f32 %v7348_v7, 0.0 }
 0x7b9   : > { %v7377_v24 = vrot.slane %v18277_v47, 4  ;;  %v7396_v50 = vrot.slane %v18277_v47, 6  ;;  %v7414_v34 = vsel %vm7378_vm0, %v18277_v47, %v7413_v29  ;;  %v7431_v45 = vrot.slane %v18277_v47, 2 }
 0x7bb   : > { %v7379_v48 = vsel %vm7378_vm0, %v7377_v24, %v7376_v16  ;;  %v7285_v1 = vpop.permute.xlu0 %7284  ;;  %v7428_v16 = vsel %vm7372_vm6, %v7427_v39, %v7426_v61  ;;  %v7397_v43 = vsel %vm7378_vm0, %v7396_v50, %v7395_v23 }
 0x7bd   : > { %v7287_v38 = vpop.permute.xlu1 %7286 }
 0x7be   : > { %v7301_v46 = vsel %vm1622_vm3, %v7285_v1, %v7287_v38 }
 0x7bf   : > { %v7317_v31 = vmax.f32 %v18148_v60, %v7301_v46 }
 0x7c1   : > { %v7333_v18 = vrot.slane %v7317_v31, 1 }
 0x7c3   : > { %v7349_v35 = vmax.f32 %v7317_v31, %v7333_v18  ;;  %v7430_v31 = vsel %vm7375_vm8, %v7429_v53, %v7428_v16 }
 0x7c5   : > { %v18283_v0 = vmax.f32 %v7349_v35, 0.0 }
 0x7c7   : > { %v7380_v20 = vrot.slane %v18283_v0, 3  ;;  %v7415_v51 = vrot.slane %v18283_v0, 7  ;;  %v7398_v57 = vrot.slane %v18283_v0, 5  ;;  %v7433_v10 = vrot.slane %v18283_v0, 1 }
 0x7c8   : > { %v7432_v0 = vsel %vm7378_vm0, %v7431_v45, %v7430_v31 }
 0x7c9   : > { %v7382_v30 = vsel %vm7381_vm2, %v7380_v20, %v7379_v48  ;;  %v7416_v44 = vsel %vm7381_vm2, %v7415_v51, %v7414_v34  ;;  %v7399_v24 = vsel %vm7381_vm2, %v7398_v57, %v7397_v43 }
 0x7cc   : > { %v7289_v17 = vpop.permute.xlu0 %7288 }
 0x7ce   : > { %v7291_v4 = vpop.permute.xlu1 %7290 }
 0x7cf   : > { %v7302_v13 = vsel %vm1622_vm3, %v7289_v17, %v7291_v4 }
 0x7d0   : > { %v7318_v3 = vmax.f32 %v18159_v49, %v7302_v13  ;;  %v7461_v49 = vld [vmem:[%s18440_s5 + $0x88] sm:$0xff] }
 0x7d1   : > { %7783 = vmatprep.subr.mxu0 %v7461_v49  ;;  %v7478_v49 = vld [vmem:[%s18440_s5 + $0x110] sm:$0xff] }
 0x7d2   : > { %v7334_v32 = vrot.slane %v7318_v3, 1  ;;  %7784 = vmatpush3.msra.mxu0 %v7445_v59  ;;  %v7477_v59 = vld [vmem:[%s18440_s5 + $0x108] sm:$0xff] }
 0x7d3   : > { %7785 = vmatprep.subr.mxu0 %v7460_v28 }
 0x7d4   : > { %v7350_v42 = vmax.f32 %v7318_v3, %v7334_v32  ;;  %7786 = vmatpush3.msra.mxu0 %v7444_v22 }
 0x7d5   : > { %7799 = vmatprep.subr.mxu0 %v19325_v40 }
 0x7d6   : > { %v18289_v63 = vmax.f32 %v7350_v42, 0.0 }
 0x7d8   : > { %v7383_v60 = vrot.slane %v18289_v63, 2  ;;  %v7417_v54 = vrot.slane %v18289_v63, 6  ;;  %v7400_v2 = vrot.slane %v18289_v63, 4 }
 0x7d9   : > { %v7293_v11 = vpop.permute.xlu0 %7292 }
 0x7da   : > { %v7385_v55 = vsel %vm7384_vm4, %v7383_v60, %v7382_v30  ;;  %v7418_v38 = vsel %vm7384_vm4, %v7417_v54, %v7416_v44  ;;  %v7401_v46 = vsel %vm7384_vm4, %v7400_v2, %v7399_v24  ;;  %v7434_v30 = vsel %vm7381_vm2, %v7433_v10, %v7432_v0 }
 0x7db   : > { %v7295_v56 = vpop.permute.xlu1 %7294  ;;  %v7435_v17 = vsel %vm7384_vm4, %v18289_v63, %v7434_v30  ;;  %v7482_v63 = vld [vmem:[%s18440_s5 + $0x130] sm:$0xff] }
 0x7dc   : > { %v7303_v25 = vsel %vm1622_vm3, %v7293_v11, %v7295_v56  ;;  %vm10001_vm3 = vmmov 0   ;;  %v7481_v11 = vld [vmem:[%s18440_s5 + $0x128] sm:$0xff]  ;;  %v7480_v56 = vld [vmem:[%s18440_s5 + $0x120] sm:$0xff] }
 0x7dd   : > { %v7319_v5 = vmax.f32 %v18166_v9, %v7303_v25 }
 0x7df   : > { %v7335_v9 = vrot.slane %v7319_v5, 1 }
 0x7e1   : > { %v7351_v27 = vmax.f32 %v7319_v5, %v7335_v9 }
 0x7e3   : > { %v7359_v41 = vmax.f32 %v7351_v27, 0.0 }
 0x7e5   : > { %v7419_v7 = vrot.slane %v7359_v41, 5  ;;  %v7402_v48 = vrot.slane %v7359_v41, 3  ;;  %v7386_v1 = vrot.slane %v7359_v41, 1  ;;  %v7436_v35 = vrot.slane %v7359_v41, 7 }
 0x7e7   : > { %v7420_v18 = vsel %vm7387_vm9, %v7419_v7, %v7418_v38  ;;  %v7403_v47 = vsel %vm7387_vm9, %v7402_v48, %v7401_v46  ;;  %v7388_v20 = vsel %vm7387_vm9, %v7386_v1, %v7385_v55  ;;  %v7437_v4 = vsel %vm7387_vm9, %v7436_v35, %v7435_v17  ;;  %v7483_v55 = vld [vmem:[%s18440_s5 + $0x138] sm:$0xff] }
 0x7e8   : > { %7421 = vrot.lane.b32.xlu1 %v7420_v18, %s19326_s18  ;;  %7404 = vrot.lane.b32.xlu0 %v7403_v47, %s10000_s20  ;;  %s18400_s18 = scalar_lea.hbm %s18442_s7, %s7751_s15  ;;  %s7636_s20 = scalar_lea.sflag [#allocation4], %s272_s17 }
 0x7ec   : > { %7438 = vrot.lane.b32.xlu0 %v7437_v4, %s19327_s14  ;;  %s9890_s14 = scalar_lea.vmem %s7650_s8, 128 }
 0x7ed   : > { %p9891_p11 = scmp.ne.s32.totalorder %s7650_s8, %s9890_s14  ;;  %p9898_p1 = scmp.lt.s32.totalorder %s9896_s23, %s9890_s14 }
 0x7ef   : > { %p9892_p12 = pnand %p9891_p11, %p10081_p5  ;;  %p9899_p2 = por %p9898_p1, %p9897_p0 }
 0x7f1   : > { %p9893_p13 = pneg %p9892_p12 }
 0x7f3   : > { %p9900_p3 = pnand %p9899_p2, %p9893_p13 }
 0x85a   : > { %v7405_v13 = vpop.permute.xlu0 %7404  ;;  %v7422_v3 = vpop.permute.xlu1 %7421 }
 0x85b   : > { %v7442_v32 = vsel %vm1872_vm14, %v7405_v13, %v7422_v3  ;;  %v7441_v62 = vsel %vm1922_vm1, %v7388_v20, %v7405_v13  ;;  %vm7633_vm1 = vcmask 80896  }
 0x85e   : > { %v7439_v42 = vpop.permute.xlu0 %7438 }
 0x85f   : > { %v7443_v60 = vsel %vm1822_vm12, %v7442_v32, %v7439_v42 }
 0x860   : > { %7557 = vmatprep.mubr.f32.mxu0 %v7443_v60 }
 0x861   : > { %7558 = vmatmul.mubr.f32.vlgmr.msra.gmra.mxu0 %v7441_v62 }
 0x862   : > { %7800 = vmatpush3.msra.mxu0 %v7483_v55  ;;  %7815 = vmatprep.mubr.msk.f32.mxu0 %vm10001_vm3, %v19325_v40 }
 0x863   : > { %7801 = vmatprep.subr.mxu0 %v19325_v40 }
 0x864   : > { %7802 = vmatpush3.msra.mxu0 %v7482_v63 }
 0x865   : > { %7803 = vmatprep.subr.mxu0 %v19325_v40 }
 0x866   : > { %7804 = vmatpush3.msra.mxu0 %v7481_v11 }
 0x867   : > { %7805 = vmatprep.subr.mxu0 %v19325_v40 }
 0x868   : > { %7806 = vmatpush3.msra.mxu0 %v7480_v56 }
 0x869   : > { %7807 = vmatprep.subr.mxu0 %v19325_v40 }
 0x86a   : > { %7808 = vmatpush3.msra.mxu0 %v7479_v6 }
 0x86b   : > { %7809 = vmatprep.subr.mxu0 %v19325_v40 }
 0x86c   : > { %7810 = vmatpush3.msra.mxu0 %v7478_v49 }
 0x86d   : > { %7811 = vmatprep.subr.mxu0 %v19325_v40 }
 0x86e   : > { %7812 = vmatpush3.msra.mxu0 %v7477_v59 }
 0x86f   : > { %7813 = vmatprep.subr.mxu0 %v19325_v40 }
 0x870   : > { %7814 = vmatpush3.msra.mxu0 %v7476_v26 }
 0x871   : > { %7816 = vmatmul.mubr.msk.f32.vlgmr.msra.gmra.mxu0 %vm1772_vm10, %v7439_v42 }
 0x921   : > { %v7787_v58 = vpop.f32.mrf.mxu0 }
 0x923   : > { %v7788_v25 = vpop.f32.mrf.mxu0 }
 0x924   : > { %v7789_v28 = vadd.f32 %v7788_v25, %v7787_v58 }
 0x926   : > { %v7560_v15 = vadd.f32 %v7789_v28, %v7748_v36 }
 0x931   : > { %v7629_v5 = vpop.f32.mrf.mxu0 }
 0x932   : > { %v7630_v19 = vadd.f32 %v7629_v5, %v7560_v15 }
 0x933   : > { %v7817_v8 = vpop.f32.mrf.mxu0 }
 0x934   : > { %7634 = vst.msk [vmem:[%s274_s9] sm:$0xff] %vm7633_vm1, %v7630_v19 }
 0x935   : > { %9903 = shalt.err (!%p9900_p3)
}
 0x936   : > { %s9904_s22 = scalar_lea.hbm %s18400_s18, 128  ;;  %s9908_s13 = scalar_lea.hbm %s18442_s7, 256 }
 0x937   : > { %p9905_p4 = scmp.ne.s32.totalorder %s18400_s18, %s9904_s22  ;;  %p9909_p9 = scmp.lt.s32.totalorder %s18400_s18, %s18442_s7 }
 0x938   : > { %p9910_p10 = scmp.lt.s32.totalorder %s9908_s13, %s9904_s22 }
 0x939   : > { %p9906_p7 = pnand %p9905_p4, %p10081_p5 }
 0x93a   : > { %p9911_p11 = por %p9910_p10, %p9909_p9 }
 0x93b   : > { %p9907_p8 = pneg %p9906_p7 }
 0x93d   : > { %p9912_p12 = pnand %p9911_p11, %p9907_p8 }
 0x93f   : > { %9915 = shalt.err (!%p9912_p12)
}
 0x940   : > { %7818 = dma.vmem_to_hbm [thread:$0]  (%p10081_p5), %s7650_s8, 128, %s18400_s18, %s7636_s20  }
 0x941 PF: > { %p7824_p13 = scmp.ge.s32.totalorder %s9950_s27, 2  ;;  %s7661_s29 = sand.u32 1, %s9938_s24  }
 0x942   : > { %s7662_s19 = scalar_lea.sflag [#allocation4], %s7661_s29 }
 0x943   : > { %p7821_p0 = pnand %p7824_p13, %p10085_p6 }
 0x945   : > { %p7822_p1 = pneg %p7821_p0 }
 0x947   : > { %9933 = dma.done.wait (%p7822_p1), %s7662_s19, 128  }
 0x948   : > { %9935 = vsyncadd (%p7822_p1), %s7662_s19, 4294967168  ;;  %p17_p2 = scmp.ge.s32.totalorder %s10068_s30, 4   ;;  %s19328_s24 = smov %s9942_s25 }
 0x949   : > { %s19329_s25 = smov %s9946_s26  ;;  %s19330_s26 = smov %s10079_s10 }
 0x94a   : > { %s19331_s27 = smov %s10068_s30  ;;  %19 = sbr.rel (!%p17_p2) target bundleno = 3 (0x3), region = 114 }
 0x94f   :  { %7667 = vsyncpa [#allocation4], 1 }
 0x950   :  { %7669 = vsyncpa [#allocation4 + $0x1], 1 }

</bundles_post_ra>
